<compile_context>
chip_gen: v7x
topology: tpu7x:2x2x1
jax: 0.10.0
libtpu: 0.0.40
codegen_flags: <defaults>
</compile_context>

<pallas_src>
import functools

import jax
import jax.numpy as jnp
from jax import lax
from jax.experimental import pallas as pl
from jax.experimental.pallas import tpu as pltpu

FT = 1000            # backbone feature dim per image
KIN = 2 * FT         # classifier input dim (2000)
HID = 4000           # classifier hidden dim
HID_PAD = 4096       # hidden dim padded to a multiple of 128 for lane tiling
NCORES = 2           # leading "parallel" grid axis (v7x megacore split)
TN = 1024            # hidden tile width per step
JSTEPS = HID_PAD // (NCORES * TN)   # pipelined steps per core (= 2)
NCLS = 2             # output classes


# ---------------------------------------------------------------------------
# Fused kernel: l2-normalize both feature vectors (once per core, at j == 0),
# then (ft @ W1 + b1) -> ReLU -> partial (@ W2) accumulated over the hidden
# tiles owned by this core.  W1 is streamed as int8 and dequantized in-kernel.
# ---------------------------------------------------------------------------
def _disc_kernel(x1_ref, x2_ref, w1a_ref, w1b_ref, w1s_ref, b1_ref, w2t_ref,
                 o_ref, ft1_ref, ft2_ref, acc_ref):
    c = pl.program_id(0)   # core / hidden-half index ("parallel")
    j = pl.program_id(1)   # hidden tile within this half ("arbitrary")

    @pl.when(j == 0)
    def _():
        acc_ref[...] = jnp.zeros_like(acc_ref)
        x1 = x1_ref[...]
        x2 = x2_ref[...]
        n1 = jnp.sqrt(jnp.sum(x1 * x1, axis=-1, keepdims=True))
        n2 = jnp.sqrt(jnp.sum(x2 * x2, axis=-1, keepdims=True))
        ft1_ref[...] = (x1 / jnp.maximum(n1, 1e-12)).astype(ft1_ref.dtype)
        ft2_ref[...] = (x2 / jnp.maximum(n2, 1e-12)).astype(ft2_ref.dtype)

    # First linear layer, split over the (virtual) concat axis:
    #   h = concat(ft1, ft2) @ W1  ==  ft1 @ W1[:1000] + ft2 @ W1[1000:]
    # W1 tiles arrive as int8; dequantize to bf16 (exact: |q| <= 127) for the
    # MXU, accumulate in f32, then apply the per-output-column scale.
    w1a = w1a_ref[...].astype(jnp.bfloat16)
    w1b = w1b_ref[...].astype(jnp.bfloat16)
    h = jnp.dot(ft1_ref[...], w1a, preferred_element_type=jnp.float32)
    h = h + jnp.dot(ft2_ref[...], w1b, preferred_element_type=jnp.float32)
    h = jnp.maximum(h * w1s_ref[...] + b1_ref[...], 0.0)

    # Second linear layer: W2^T is resident and lane-dense; slice the current
    # hidden tile along the lane axis and contract hidden dims (nt matmul).
    col0 = pl.multiple_of((c * JSTEPS + j) * TN, TN)
    w2t_tile = w2t_ref[:, pl.ds(col0, TN)]                     # (NCLS, TN)
    acc_ref[...] += lax.dot_general(
        h, w2t_tile, (((1,), (1,)), ((), ())),
        preferred_element_type=jnp.float32)

    @pl.when(j == pl.num_programs(1) - 1)
    def _():
        # Per-core partial sum; b2 and the cross-core reduce happen in the
        # wrapper (16 bytes of work).
        o_ref[0, :, :] = acc_ref[...].astype(o_ref.dtype)


def discriminator_head(x1, x2, w1a_q, w1b_q, w1s, b1p, w2t, b2):
    B = x1.shape[0]
    flops = 2 * B * KIN * HID_PAD + 2 * B * HID_PAD * NCLS
    bytes_accessed = (
        x1.size * 4 + x2.size * 4                    # features (f32)
        + w1a_q.size * 1 + w1b_q.size * 1            # W1 stream (int8)
        + w1s.size * 4 + b1p.size * 4 + w2t.size * 4
        + NCORES * B * NCLS * 4)                     # partial outputs

    hidden_col = lambda c, j: (0, c * JSTEPS + j)

    partials = pl.pallas_call(
        _disc_kernel,
        out_shape=jax.ShapeDtypeStruct((NCORES, B, NCLS), jnp.float32),
        grid_spec=pltpu.PrefetchScalarGridSpec(
            num_scalar_prefetch=0,
            grid=(NCORES, JSTEPS),
            in_specs=[
                pl.BlockSpec((B, FT), lambda c, j: (0, 0)),           # x1 (resident)
                pl.BlockSpec((B, FT), lambda c, j: (0, 0)),           # x2 (resident)
                pl.BlockSpec((FT, TN), hidden_col),                   # W1[:1000] int8 tile
                pl.BlockSpec((FT, TN), hidden_col),                   # W1[1000:] int8 tile
                pl.BlockSpec((1, TN), hidden_col),                    # dequant scale tile
                pl.BlockSpec((1, TN), hidden_col),                    # b1 tile
                pl.BlockSpec((NCLS, HID_PAD), lambda c, j: (0, 0)),   # W2^T (resident)
            ],
            out_specs=pl.BlockSpec((1, B, NCLS), lambda c, j: (c, 0, 0)),
            scratch_shapes=[
                pltpu.VMEM((B, FT), jnp.bfloat16),    # normalized ft1
                pltpu.VMEM((B, FT), jnp.bfloat16),    # normalized ft2
                pltpu.VMEM((B, NCLS), jnp.float32),   # per-core accumulator
            ],
        ),
        compiler_params=pltpu.CompilerParams(
            dimension_semantics=("parallel", "arbitrary"),
            vmem_limit_bytes=32 * 1024 * 1024,
        ),
        cost_estimate=pl.CostEstimate(
            flops=flops, transcendentals=0, bytes_accessed=bytes_accessed),
    )(x1, x2, w1a_q, w1b_q, w1s, b1p, w2t)

    # Reduce the two hidden-half partial sums and add the output bias.
    return partials[0] + partials[1] + b2


# ---------------------------------------------------------------------------
# Parameter construction (deterministic) + full forward.
# ---------------------------------------------------------------------------
def init_params(key):
    k1, k2, k3, k4 = jax.random.split(key, 4)
    # Stored as (in, out) so that y = x @ W + b.
    w1 = jax.random.normal(k1, (KIN, HID), jnp.float32) * 0.02
    b1 = jax.random.normal(k2, (HID,), jnp.float32) * 0.02
    w2 = jax.random.normal(k3, (HID, NCLS), jnp.float32) * 0.02
    b2 = jax.random.normal(k4, (NCLS,), jnp.float32) * 0.02

    # Symmetric int8 quantization of W1 with one scale per output column:
    #   w[:, n] ~= w_q[:, n] * s[n]   =>   (x @ w)[n] ~= (x @ w_q)[n] * s[n]
    s = jnp.maximum(jnp.max(jnp.abs(w1), axis=0) / 127.0, 1e-8)      # (HID,)
    w1_q = jnp.clip(jnp.round(w1 / s), -127.0, 127.0).astype(jnp.int8)

    pad = HID_PAD - HID
    w1_qp = jnp.pad(w1_q, ((0, 0), (0, pad)))       # zero-padded hidden cols
    w1a_q = w1_qp[:FT, :]                           # rows for ft1 (int8)
    w1b_q = w1_qp[FT:, :]                           # rows for ft2 (int8)
    w1s = jnp.pad(s, (0, pad), constant_values=1.0).reshape(1, HID_PAD)
    b1p = jnp.pad(b1, (0, pad)).reshape(1, HID_PAD)
    w2t = jnp.pad(w2, ((0, pad), (0, 0))).T         # (NCLS, HID_PAD), lane-dense
    b2r = b2.reshape(1, NCLS)
    return dict(w1a_q=w1a_q, w1b_q=w1b_q, w1s=w1s, b1p=b1p, w2t=w2t, b2=b2r,
                w1=w1, b1=b1, w2=w2, b2_raw=b2)


@functools.partial(jax.jit, static_argnames=())
def discriminator_forward(x1, x2, w1a_q, w1b_q, w1s, b1p, w2t, b2):
    return discriminator_head(x1, x2, w1a_q, w1b_q, w1s, b1p, w2t, b2)


def reference_forward(x1, x2, p):
    def norm(x):
        n = jnp.sqrt(jnp.sum(x * x, axis=1, keepdims=True))
        return x / jnp.maximum(n, 1e-12)
    ft = jnp.concatenate([norm(x1), norm(x2)], axis=1)
    h = jnp.maximum(ft @ p["w1"] + p["b1"], 0.0)
    return h @ p["w2"] + p["b2_raw"]


if __name__ == "__main__":
    key = jax.random.PRNGKey(0)
    kx1, kx2, kp = jax.random.split(key, 3)

    B = 2
    x1 = jax.random.normal(kx1, (B, FT), jnp.float32)   # backbone features, img 1
    x2 = jax.random.normal(kx2, (B, FT), jnp.float32)   # backbone features, img 2

    params = init_params(kp)

    pred = discriminator_forward(x1, x2, params["w1a_q"], params["w1b_q"],
                                 params["w1s"], params["b1p"], params["w2t"],
                                 params["b2"])
    pred = jax.block_until_ready(pred)

    ref = reference_forward(x1, x2, params)
    assert pred.shape == (B, NCLS)
    # W1 is streamed as per-column-scaled int8 and activations as bf16 (f32
    # accumulation), so tolerances are relaxed vs. the all-f32 reference;
    # observed error is ~1e-3 relative, well inside these bounds.
    assert jnp.allclose(pred, ref, rtol=3e-2, atol=3e-3), (pred, ref)

    print("KERNEL_OK")
</pallas_src>

<mosaic_0001>
module attributes {stable_mosaic.version = 11 : i64} {
  func.func @_disc_kernel(%arg0: i32, %arg1: i32, %arg2: memref<2x1000xf32, #tpu.memory_space<vmem>>, %arg3: memref<2x1000xf32, #tpu.memory_space<vmem>>, %arg4: memref<1000x1024xi8, #tpu.memory_space<vmem>>, %arg5: memref<1000x1024xi8, #tpu.memory_space<vmem>>, %arg6: memref<1x1024xf32, #tpu.memory_space<vmem>>, %arg7: memref<1x1024xf32, #tpu.memory_space<vmem>>, %arg8: memref<2x4096xf32, #tpu.memory_space<vmem>>, %arg9: memref<1x2x2xf32, #tpu.memory_space<vmem>>, %arg10: memref<2x1000xbf16, #tpu.memory_space<vmem>>, %arg11: memref<2x1000xbf16, #tpu.memory_space<vmem>>, %arg12: memref<2x2xf32, #tpu.memory_space<vmem>>) attributes {dimension_semantics = [#tpu.dimension_semantics<parallel>, #tpu.dimension_semantics<arbitrary>], iteration_bounds = array<i64: 2, 2>, scalar_prefetch = 0 : i64, scratch_operands = 3 : i64, tpu.core_type = #tpu.core_type<tc>, window_params = [{pipeline_mode = #tpu.pipeline_mode<synchronous>, transform_indices = @transform_0, window_bounds = array<i64: 2, 1000>}, {pipeline_mode = #tpu.pipeline_mode<synchronous>, transform_indices = @transform_1, window_bounds = array<i64: 2, 1000>}, {transform_indices = @transform_2, window_bounds = array<i64: 1000, 1024>}, {transform_indices = @transform_3, window_bounds = array<i64: 1000, 1024>}, {transform_indices = @transform_4, window_bounds = array<i64: 1, 1024>}, {transform_indices = @transform_5, window_bounds = array<i64: 1, 1024>}, {pipeline_mode = #tpu.pipeline_mode<synchronous>, transform_indices = @transform_6, window_bounds = array<i64: 2, 4096>}, {transform_indices = @transform_7, window_bounds = array<i64: 1, 2, 2>}]} {
    %c0_i32 = arith.constant 0 : i32
    %0 = arith.cmpi eq, %arg1, %c0_i32 : i32
    %1 = arith.extui %0 : i1 to i32
    %c0_i32_0 = arith.constant 0 : i32
    %2 = arith.cmpi ne, %1, %c0_i32_0 : i32
    scf.if %2 {
      %cst_21 = arith.constant 0.000000e+00 : f32
      %33 = vector.broadcast %cst_21 : f32 to vector<2x2xf32>
      %c0_22 = arith.constant 0 : index
      %c0_23 = arith.constant 0 : index
      %34 = vector.load %arg12[%c0_22, %c0_23] : memref<2x2xf32, #tpu.memory_space<vmem>>, vector<2x2xf32>
      tpu.vector_store %arg12[%c0_22, %c0_23], %33 {strides = array<i32>} : memref<2x2xf32, #tpu.memory_space<vmem>>, vector<2x2xf32>,
      %c0_24 = arith.constant 0 : index
      %c0_25 = arith.constant 0 : index
      %35 = vector.load %arg2[%c0_24, %c0_25] : memref<2x1000xf32, #tpu.memory_space<vmem>>, vector<2x1000xf32>
      %c0_26 = arith.constant 0 : index
      %c0_27 = arith.constant 0 : index
      %36 = vector.load %arg3[%c0_26, %c0_27] : memref<2x1000xf32, #tpu.memory_space<vmem>>, vector<2x1000xf32>
      %37 = arith.mulf %35, %35 : vector<2x1000xf32>
      %cst_28 = arith.constant dense<0.000000e+00> : vector<2xf32>
      %38 = vector.multi_reduction <add>, %37, %cst_28 [1] : vector<2x1000xf32> to vector<2xf32>
      %39 = vector.shape_cast %38 : vector<2xf32> to vector<2x1xf32>
      %40 = math.sqrt %39 : vector<2x1xf32>
      %41 = arith.mulf %36, %36 : vector<2x1000xf32>
      %cst_29 = arith.constant dense<0.000000e+00> : vector<2xf32>
      %42 = vector.multi_reduction <add>, %41, %cst_29 [1] : vector<2x1000xf32> to vector<2xf32>
      %43 = vector.shape_cast %42 : vector<2xf32> to vector<2x1xf32>
      %44 = math.sqrt %43 : vector<2x1xf32>
      %cst_30 = arith.constant 9.99999996E-13 : f32
      %45 = vector.broadcast %cst_30 : f32 to vector<2x1xf32>
      %46 = arith.maximumf %40, %45 : vector<2x1xf32>
      %47 = vector.broadcast %46 : vector<2x1xf32> to vector<2x1000xf32>
      %48 = arith.divf %35, %47 : vector<2x1000xf32>
      %49 = arith.truncf %48 : vector<2x1000xf32> to vector<2x1000xbf16>
      %c0_31 = arith.constant 0 : index
      %c0_32 = arith.constant 0 : index
      %50 = vector.load %arg10[%c0_31, %c0_32] : memref<2x1000xbf16, #tpu.memory_space<vmem>>, vector<2x1000xbf16>
      tpu.vector_store %arg10[%c0_31, %c0_32], %49 {strides = array<i32>} : memref<2x1000xbf16, #tpu.memory_space<vmem>>, vector<2x1000xbf16>,
      %cst_33 = arith.constant 9.99999996E-13 : f32
      %51 = vector.broadcast %cst_33 : f32 to vector<2x1xf32>
      %52 = arith.maximumf %44, %51 : vector<2x1xf32>
      %53 = vector.broadcast %52 : vector<2x1xf32> to vector<2x1000xf32>
      %54 = arith.divf %36, %53 : vector<2x1000xf32>
      %55 = arith.truncf %54 : vector<2x1000xf32> to vector<2x1000xbf16>
      %c0_34 = arith.constant 0 : index
      %c0_35 = arith.constant 0 : index
      %56 = vector.load %arg11[%c0_34, %c0_35] : memref<2x1000xbf16, #tpu.memory_space<vmem>>, vector<2x1000xbf16>
      tpu.vector_store %arg11[%c0_34, %c0_35], %55 {strides = array<i32>} : memref<2x1000xbf16, #tpu.memory_space<vmem>>, vector<2x1000xbf16>,
    } else {
    }
    %c0 = arith.constant 0 : index
    %c0_1 = arith.constant 0 : index
    %3 = vector.load %arg4[%c0, %c0_1] : memref<1000x1024xi8, #tpu.memory_space<vmem>>, vector<1000x1024xi8>
    %4 = arith.sitofp %3 : vector<1000x1024xi8> to vector<1000x1024xbf16>
    %c0_2 = arith.constant 0 : index
    %c0_3 = arith.constant 0 : index
    %5 = vector.load %arg5[%c0_2, %c0_3] : memref<1000x1024xi8, #tpu.memory_space<vmem>>, vector<1000x1024xi8>
    %6 = arith.sitofp %5 : vector<1000x1024xi8> to vector<1000x1024xbf16>
    %c0_4 = arith.constant 0 : index
    %c0_5 = arith.constant 0 : index
    %7 = vector.load %arg10[%c0_4, %c0_5] : memref<2x1000xbf16, #tpu.memory_space<vmem>>, vector<2x1000xbf16>
    %cst = arith.constant dense<0.000000e+00> : vector<2x1024xf32>
    %8 = tpu.matmul %7, %4, %cst {dimension_numbers = #tpu.dot_dimension_numbers<[1], [0], [0], [1], [0, 0, 1, 1], [], []>} : vector<2x1000xbf16>, vector<1000x1024xbf16>, vector<2x1024xf32> -> vector<2x1024xf32>
    %c0_6 = arith.constant 0 : index
    %c0_7 = arith.constant 0 : index
    %9 = vector.load %arg11[%c0_6, %c0_7] : memref<2x1000xbf16, #tpu.memory_space<vmem>>, vector<2x1000xbf16>
    %cst_8 = arith.constant dense<0.000000e+00> : vector<2x1024xf32>
    %10 = tpu.matmul %9, %6, %cst_8 {dimension_numbers = #tpu.dot_dimension_numbers<[1], [0], [0], [1], [0, 0, 1, 1], [], []>} : vector<2x1000xbf16>, vector<1000x1024xbf16>, vector<2x1024xf32> -> vector<2x1024xf32>
    %11 = arith.addf %8, %10 : vector<2x1024xf32>
    %c0_9 = arith.constant 0 : index
    %c0_10 = arith.constant 0 : index
    %12 = vector.load %arg6[%c0_9, %c0_10] : memref<1x1024xf32, #tpu.memory_space<vmem>>, vector<1x1024xf32>
    %13 = vector.broadcast %12 : vector<1x1024xf32> to vector<2x1024xf32>
    %14 = arith.mulf %11, %13 : vector<2x1024xf32>
    %c0_11 = arith.constant 0 : index
    %c0_12 = arith.constant 0 : index
    %15 = vector.load %arg7[%c0_11, %c0_12] : memref<1x1024xf32, #tpu.memory_space<vmem>>, vector<1x1024xf32>
    %16 = vector.broadcast %15 : vector<1x1024xf32> to vector<2x1024xf32>
    %17 = arith.addf %14, %16 : vector<2x1024xf32>
    %cst_13 = arith.constant 0.000000e+00 : f32
    %18 = vector.broadcast %cst_13 : f32 to vector<2x1024xf32>
    %19 = arith.maximumf %17, %18 : vector<2x1024xf32>
    %c2_i32 = arith.constant 2 : i32
    %20 = arith.muli %arg0, %c2_i32 : i32
    %21 = arith.addi %20, %arg1 : i32
    %c1024_i32 = arith.constant 1024 : i32
    %22 = arith.muli %21, %c1024_i32 : i32
    %23 = tpu.assume_multiple %22, 1024 : i32
    %c0_14 = arith.constant 0 : index
    %24 = arith.index_cast %23 : i32 to index
    %25 = vector.load %arg8[%c0_14, %24] : memref<2x4096xf32, #tpu.memory_space<vmem>>, vector<2x1024xf32>
    %c0_15 = arith.constant 0 : index
    %c0_16 = arith.constant 0 : index
    %26 = vector.load %arg12[%c0_15, %c0_16] : memref<2x2xf32, #tpu.memory_space<vmem>>, vector<2x2xf32>
    %cst_17 = arith.constant dense<0.000000e+00> : vector<2x2xf32>
    %27 = tpu.matmul %19, %25, %cst_17 {dimension_numbers = #tpu.dot_dimension_numbers<[1], [1], [0], [0], [0, 0, 1, 0], [], []>} : vector<2x1024xf32>, vector<2x1024xf32>, vector<2x2xf32> -> vector<2x2xf32>
    %28 = arith.addf %26, %27 : vector<2x2xf32>
    %c0_18 = arith.constant 0 : index
    %c0_19 = arith.constant 0 : index
    %29 = vector.load %arg12[%c0_18, %c0_19] : memref<2x2xf32, #tpu.memory_space<vmem>>, vector<2x2xf32>
    tpu.vector_store %arg12[%c0_18, %c0_19], %28 {strides = array<i32>} : memref<2x2xf32, #tpu.memory_space<vmem>>, vector<2x2xf32>,
    %c1_i32 = arith.constant 1 : i32
    %30 = arith.cmpi eq, %arg1, %c1_i32 : i32
    %31 = arith.extui %30 : i1 to i32
    %c0_i32_20 = arith.constant 0 : i32
    %32 = arith.cmpi ne, %31, %c0_i32_20 : i32
    scf.if %32 {
      %c0_21 = arith.constant 0 : index
      %c0_22 = arith.constant 0 : index
      %33 = vector.load %arg12[%c0_21, %c0_22] : memref<2x2xf32, #tpu.memory_space<vmem>>, vector<2x2xf32>
      %c0_23 = arith.constant 0 : index
      %c0_24 = arith.constant 0 : index
      %c0_25 = arith.constant 0 : index
      %34 = vector.load %arg9[%c0_23, %c0_24, %c0_25] : memref<1x2x2xf32, #tpu.memory_space<vmem>>, vector<1x2x2xf32>
      %35 = vector.shape_cast %34 : vector<1x2x2xf32> to vector<2x2xf32>
      %36 = vector.shape_cast %33 : vector<2x2xf32> to vector<1x2x2xf32>
      tpu.vector_store %arg9[%c0_23, %c0_24, %c0_25], %36 {strides = array<i32>} : memref<1x2x2xf32, #tpu.memory_space<vmem>>, vector<1x2x2xf32>,
    } else {
    }
    return
  }
  func.func @transform_0(%arg0: i32, %arg1: i32) -> (i32, i32) {
    %c0_i32 = arith.constant 0 : i32
    %c0_i32_0 = arith.constant 0 : i32
    %c0_i32_1 = arith.constant 0 : i32
    return %c0_i32, %c0_i32_0 : i32, i32
  }
  func.func @transform_1(%arg0: i32, %arg1: i32) -> (i32, i32) {
    %c0_i32 = arith.constant 0 : i32
    %c0_i32_0 = arith.constant 0 : i32
    %c0_i32_1 = arith.constant 0 : i32
    return %c0_i32, %c0_i32_0 : i32, i32
  }
  func.func @transform_2(%arg0: i32, %arg1: i32) -> (i32, i32) {
    %c2_i32 = arith.constant 2 : i32
    %0 = arith.muli %arg0, %c2_i32 : i32
    %1 = arith.addi %0, %arg1 : i32
    %c0_i32 = arith.constant 0 : i32
    %c0_i32_0 = arith.constant 0 : i32
    return %c0_i32, %1 : i32, i32
  }
  func.func @transform_3(%arg0: i32, %arg1: i32) -> (i32, i32) {
    %c2_i32 = arith.constant 2 : i32
    %0 = arith.muli %arg0, %c2_i32 : i32
    %1 = arith.addi %0, %arg1 : i32
    %c0_i32 = arith.constant 0 : i32
    %c0_i32_0 = arith.constant 0 : i32
    return %c0_i32, %1 : i32, i32
  }
  func.func @transform_4(%arg0: i32, %arg1: i32) -> (i32, i32) {
    %c2_i32 = arith.constant 2 : i32
    %0 = arith.muli %arg0, %c2_i32 : i32
    %1 = arith.addi %0, %arg1 : i32
    %c0_i32 = arith.constant 0 : i32
    %c0_i32_0 = arith.constant 0 : i32
    return %c0_i32, %1 : i32, i32
  }
  func.func @transform_5(%arg0: i32, %arg1: i32) -> (i32, i32) {
    %c2_i32 = arith.constant 2 : i32
    %0 = arith.muli %arg0, %c2_i32 : i32
    %1 = arith.addi %0, %arg1 : i32
    %c0_i32 = arith.constant 0 : i32
    %c0_i32_0 = arith.constant 0 : i32
    return %c0_i32, %1 : i32, i32
  }
  func.func @transform_6(%arg0: i32, %arg1: i32) -> (i32, i32) {
    %c0_i32 = arith.constant 0 : i32
    %c0_i32_0 = arith.constant 0 : i32
    %c0_i32_1 = arith.constant 0 : i32
    return %c0_i32, %c0_i32_0 : i32, i32
  }
  func.func @transform_7(%arg0: i32, %arg1: i32) -> (i32, i32, i32) {
    %c0_i32 = arith.constant 0 : i32
    %c0_i32_0 = arith.constant 0 : i32
    %c0_i32_1 = arith.constant 0 : i32
    return %arg0, %c0_i32, %c0_i32_0 : i32, i32, i32
  }
}

</mosaic_0001>

<bundles_post_ra>
// kernel: discriminator_forward.1
= control target key start
LH: loop header
LB: loop body
LE: loop exit
PB: predicated region body
PF: predicated region fallthrough
CT: control target
= control target key end

     0   :  { %s12357_s0 = inlined_call_operand.hbm [shape: f32[2,1000], index: 0, kind: input, shape index: {}]   ;;  %s12358_s1 = inlined_call_operand.hbm [shape: f32[2,1000], index: 1, kind: input, shape index: {}]   ;;  %s12359_s2 = inlined_call_operand.hbm [shape: s8[1000,4096], index: 2, kind: input, shape index: {}]   ;;  %s12360_s3 = inlined_call_operand.hbm [shape: s8[1000,4096], index: 3, kind: input, shape index: {}]   ;;  %s12361_s4 = inlined_call_operand.hbm [shape: f32[1,4096], index: 4, kind: input, shape index: {}]   ;;  %s12362_s5 = inlined_call_operand.hbm [shape: f32[1,4096], index: 5, kind: input, shape index: {}]   ;;  %s12363_s6 = inlined_call_operand.hbm [shape: f32[2,4096], index: 6, kind: input, shape index: {}]   ;;  %s12364_s7 = inlined_call_operand.vmem [shape: f32[2,2,2], index: 7, kind: output, shape index: {}]  }
   0x1   :  { %12388 = sst [smem:[#allocation26_spill]] %s12357_s0 }
   0x2   :  { %12389 = sst [smem:[#allocation27_spill]] %s12359_s2 }
   0x3   :  { %12390 = sst [smem:[#allocation28_spill]] %s12364_s7 }
   0x4   :  { %12 = vsyncpa [#allocation6], 0 }
   0x5   :  { %13 = vsyncpa [#allocation8], 0  ;;  %s11184_s24 = smov 0   ;;  %s11186_s25 = smov 0  }
   0x6   :  { %s11188_s26 = smov 0   ;;  %s11190_s27 = smov 0  }
   0x7   :  { %s11192_s28 = smov 0   ;;  %s11194_s29 = smov 0  }
   0x8   :  { %s11196_s30 = smov 0   ;;  %s11198_s8 = smov 0  }
   0x9 LB: > { %12391 = sst [smem:[#allocation18_spill]] %s11102_s25  ;;  %s12370_s9 = sadd.s32 4294967295, %s11126_s8   ;;  %s11126_s8 = sphi %s11198_s8, %s19_s8   ;;  %s11122_s30 = sphi %s11196_s30, %s12437_s30   ;;  %s11118_s29 = sphi %s11194_s29, %s12436_s29   ;;  %s11114_s28 = sphi %s11192_s28, %s12435_s28   ;;  %s11110_s27 = sphi %s11190_s27, %s12434_s27   ;;  %s11106_s26 = sphi %s11188_s26, %s12439_s26   ;;  %s11102_s25 = sphi %s11186_s25, %s12438_s25   ;;  %s11098_s24 = sphi %s11184_s24, %s12433_s24  }
   0xa   : > { %12392 = sst [smem:[#allocation19_spill]] %s11110_s27  ;;  %p91_p0 = scmp.ne.s32.totalorder %s11106_s26, %s11102_s25 }
   0xb   : > { %12393 = sst [smem:[#allocation20_spill]] %s11114_s28  ;;  %p92_p1 = scmp.eq.s32.totalorder %s11126_s8, 0 }
   0xc   : > { %12394 = sst [smem:[#allocation21_spill]] %s11118_s29  ;;  %p97_p2 = scmp.ne.s32.totalorder %s11102_s25, %s11098_s24 }
   0xd   : > { %12395 = sst [smem:[#allocation22_spill]] %s11122_s30  ;;  %p11230_p3 = scmp.eq.s32.totalorder %s12370_s9, 0 }
   0xe   : > { %p93_p4 = por %p92_p1, %p91_p0  ;;  %p9522_p5 = scmp.ge.s32.totalorder %s11126_s8, 1 }
   0xf   : > { %s12396_s11 = scalar_select %p11230_p3, 1, 0 }
  0x10   : > { %p11237_p6 = por %p11230_p3, %p97_p2  ;;  %p245_p7 = scmp.lt.s32.totalorder %s11126_s8, 5 }
  0x11   : > { %s11128_s14 = smov [#allocation5]   ;;  %p10752_p10 = scmp.lt.s32.totalorder %s11126_s8, 4 }
  0x12   : > { %s12397_s12 = scalar_select %p11237_p6, 1, 0 }
  0x13   : > { %p11242_p8 = pnand %p9522_p5, %p245_p7  ;;  %s258_s15 = sshll.u32 %s11128_s14, 4  ;;  %s259_s15 = int_to_ptr.vmem [resolvable:$true] %s258_s15 }
  0x14   : > { %12398 = sst [smem:[#allocation23_spill]] %s12397_s12  ;;  %p11255_p12 = pnand %p10752_p10, %p93_p4 }
  0x15   : > { %s12399_s13 = scalar_select %p11242_p8, 1, 0 }
  0x16   : > { %p10726_p9 = pneg %p11242_p8  ;;  %s12402_s0 = sld [smem:[#allocation26_spill]] }
  0x17   : > { %s12401_s17 = scalar_select %p11255_p12, 1, 0 }
  0x18   : > { %p11251_p11 = pnand %p10726_p9, %p11230_p3 }
  0x1a   : > { %s12400_s16 = scalar_select %p11251_p11, 1, 0 }
  0x1b   : > { %p11267_p0 = pneg %p11251_p11 }
  0x1c   : > { %s10844_s20 = scalar_lea.hbm %s12402_s0, 256 }
  0x1d   : > { %p10845_p13 = scmp.ne.s32.totalorder %s12402_s0, %s10844_s20  ;;  %p10851_p4 = scmp.lt.u32.totalorder %s10844_s20, %s12402_s0 }
  0x1e   : > { %s12403_s23 = scalar_select %p11267_p0, 1, 0 }
  0x1f   : > { %p10847_p1 = pnand %p11267_p0, %p10845_p13 }
  0x21   : > { %p10848_p2 = pneg %p10847_p1 }
  0x23   : > { %p10853_p5 = pnand %p10851_p4, %p10848_p2 }
  0x25   : > { %10856 = shalt.err (!%p10853_p5)
}
  0x26   : > { %s10857_s18 = scalar_lea.vmem %s259_s15, 256  ;;  %p10865_p6 = scmp.lt.s32.totalorder %s259_s15, %s259_s15 }
  0x27   : > { %p10858_p7 = scmp.ne.s32.totalorder %s259_s15, %s10857_s18  ;;  %p10866_p3 = scmp.lt.s32.totalorder %s10857_s18, %s10857_s18 }
  0x29   : > { %p10860_p9 = pnand %p10858_p7, %p11267_p0  ;;  %p10867_p8 = por %p10866_p3, %p10865_p6 }
  0x2b   : > { %p10861_p10 = pneg %p10860_p9 }
  0x2d   : > { %p10868_p12 = pnand %p10867_p8, %p10861_p10 }
  0x2f   : > { %10871 = shalt.err (!%p10868_p12)
}
  0x30   : > { %10729 = dma.hbm_to_vmem [thread:$0]  (!%p11251_p11), %s12402_s0, 256, %s259_s15, [#allocation6]  }
  0x31   : > { %s28_s20 = sadd.s32 1, %s11118_s29  ;;  %s31_s22 = sadd.s32 1, %s11122_s30 }
  0x32   : > { %p29_p13 = scmp.ge.s32.totalorder %s28_s20, 2  ;;  %s9514_s24 = sshll.u32 %s11122_s30, 1 }
  0x33   : > { %s11287_s14 = sadd.s32 %s11118_s29, %s9514_s24  ;;  %s291_s18 = sand.u32 1, %s11126_s8  }
  0x34   : > { %s12441_s20 = smov (%p29_p13, %s28_s20), 0  ;;  %s12443_s22 = smov (!%p29_p13, %s31_s22), %s11122_s30 }
  0x35   : > { %12404 = sst [smem:[#allocation24_spill]] %s12441_s20  ;;  %s12373_s19 = sand.u32 1, %s11106_s26  }
  0x36   : > { %p33_p3 = scmp.ge.s32.totalorder %s12443_s22, 2  ;;  %s11296_s21 = smul.u32 2000, %s12373_s19 }
  0x37   : > { %s12376_s15 = sshll.u32 %s11287_s14, 8  ;;  %s12406_s2 = sld [smem:[#allocation27_spill]] }
  0x38   : > { %s12445_s22 = smov (%p33_p3, %s12443_s22), 0  ;;  %s295_s30 = scalar_lea.vmem [#allocation9], %s11296_s21 }
  0x39   : > { %12405 = sst [smem:[#allocation25_spill]] %s12445_s22  ;;  %s9515_s0 = sshll.u32 %s12445_s22, 1 }
  0x3a   : > { %s304_s29 = sshll.u32 %s295_s30, 4  ;;  %s80_s19 = sadd.s32 %s9515_s0, %s12441_s20  ;;  %s11311_s29 = int_to_ptr.vmem [resolvable:$true] %s304_s29 }
  0x3b   : > { %s81_s27 = ssub.s32 %s11287_s14, %s80_s19  ;;  %s11318_s28 = scalar_lea.sflag [#allocation6], %s291_s18 }
  0x3c   : > { %p11314_p6 = scmp.eq.s32.totalorder %s81_s27, 0  ;;  %p12408_p12 = scmp.ne.s32.totalorder %s12401_s17, 0 }
  0x3d   : > { %s11306_s10 = scalar_lea.hbm %s12406_s2, %s12376_s15  ;;  %s10877_s27 = scalar_lea.hbm %s12406_s2, 128000 }
  0x3e   : > { %s12407_s7 = scalar_select %p11314_p6, 1, 0 }
  0x3f   : > { %s10872_s9 = scalar_lea.hbm %s11306_s10, 32000  ;;  %p11324_p1 = pneg %p12408_p12 }
  0x40   : > { %p10873_p8 = scmp.ne.s32.totalorder %s11306_s10, %s10872_s9  ;;  %p10878_p5 = scmp.lt.u32.totalorder %s11306_s10, %s12406_s2 }
  0x41   : > { %p10879_p7 = scmp.lt.u32.totalorder %s10877_s27, %s10872_s9  ;;  %p10881_p10 = scmp.lt.u32.totalorder %s10872_s9, %s11306_s10 }
  0x42   : > { %p10875_p2 = pnand %p11324_p1, %p10873_p8 }
  0x43   : > { %p10880_p9 = por %p10879_p7, %p10878_p5 }
  0x44   : > { %p10876_p4 = pneg %p10875_p2 }
  0x45   : > { %p10882_p13 = por %p10881_p10, %p10880_p9 }
  0x47   : > { %p10883_p3 = pnand %p10882_p13, %p10876_p4 }
  0x49   : > { %10886 = shalt.err (!%p10883_p3)
}
  0x4a   : > { %s10887_s18 = scalar_lea.vmem %s11311_s29, 32000  ;;  %s11129_s0 = smov [#allocation9]  }
  0x4b   : > { %p10888_p8 = scmp.ne.s32.totalorder %s11311_s29, %s10887_s18  ;;  %s10892_s30 = sshll.u32 %s11129_s0, 4  ;;  %s10893_s30 = int_to_ptr.vmem [resolvable:$false] %s10892_s30 }
  0x4c   : > { %s10894_s15 = scalar_lea.vmem %s10893_s30, 64000  ;;  %p10895_p0 = scmp.lt.s32.totalorder %s11311_s29, %s10893_s30 }
  0x4d   : > { %p10890_p2 = pnand %p10888_p8, %p11324_p1  ;;  %p10896_p6 = scmp.lt.s32.totalorder %s10894_s15, %s10887_s18 }
  0x4f   : > { %p10891_p11 = pneg %p10890_p2  ;;  %p10897_p5 = por %p10896_p6, %p10895_p0 }
  0x51   : > { %p10898_p7 = pnand %p10897_p5, %p10891_p11 }
  0x53   : > { %10901 = shalt.err (!%p10898_p7)
}
  0x54   : > { %s11130_s9 = smov 1024   ;;  %s11131_s27 = smov 256  }
  0x55   : > { %s11132_s19 = smov 16   ;;  %s12410_s18 = sadd.s32 1, %s11106_s26 }
  0x56   : > { %10739 = dma.hbm_to_vmem [thread:$0]  (!%p12408_p12), %s11306_s10, 32000, %s11311_s29, %s11318_s28, %s11130_s9, %s11131_s27, %s11132_s19  }
  0x57   : > { %p12411_p11 = scmp.ne.s32.totalorder %s12407_s7, 0  ;;  %s12412_s30 = sshll.u32 %s11287_s14, 8 }
  0x58   : > { %s11363_s22 = scalar_lea.hbm %s12360_s3, %s12412_s30  ;;  %s318_s20 = scalar_lea.vmem [#allocation10], %s11296_s21 }
  0x59   : > { %s11356_s0 = scalar_select %p12411_p11, %s11106_s26, %s12410_s18  }
  0x5a   : > { %s327_s12 = sshll.u32 %s318_s20, 4  ;;  %s11133_s25 = smov [#allocation7]   ;;  %s11366_s12 = int_to_ptr.vmem [resolvable:$true] %s327_s12 }
  0x5b   : > { %s11368_s29 = sshll.u32 %s11133_s25, 4  ;;  %s10902_s7 = scalar_lea.hbm %s11363_s22, 32000  ;;  %s270_s29 = int_to_ptr.vmem [resolvable:$true] %s11368_s29 }
  0x5c   : > { %p10903_p0 = scmp.ne.s32.totalorder %s11363_s22, %s10902_s7  ;;  %s10907_s18 = scalar_lea.hbm %s12360_s3, 128000 }
  0x5d   : > { %p10908_p9 = scmp.lt.u32.totalorder %s11363_s22, %s12360_s3  ;;  %p10909_p10 = scmp.lt.u32.totalorder %s10907_s18, %s10902_s7 }
  0x5e   : > { %p10905_p6 = pnand %p10903_p0, %p11324_p1  ;;  %p10911_p3 = scmp.lt.u32.totalorder %s10902_s7, %s11363_s22 }
  0x5f   : > { %p10910_p13 = por %p10909_p10, %p10908_p9 }
  0x60   : > { %p10906_p4 = pneg %p10905_p6 }
  0x61   : > { %p10912_p8 = por %p10911_p3, %p10910_p13 }
  0x63   : > { %p10913_p2 = pnand %p10912_p8, %p10906_p4 }
  0x65   : > { %10916 = shalt.err (!%p10913_p2)
}
  0x66   : > { %s10917_s25 = scalar_lea.vmem %s11366_s12, 32000  ;;  %s11134_s20 = smov [#allocation10]  }
  0x67   : > { %p10918_p5 = scmp.ne.s32.totalorder %s11366_s12, %s10917_s25  ;;  %s10922_s21 = sshll.u32 %s11134_s20, 4  ;;  %s10923_s21 = int_to_ptr.vmem [resolvable:$false] %s10922_s21 }
  0x68   : > { %s10924_s10 = scalar_lea.vmem %s10923_s21, 64000  ;;  %p10925_p0 = scmp.lt.s32.totalorder %s11366_s12, %s10923_s21 }
  0x69   : > { %p10920_p7 = pnand %p10918_p5, %p11324_p1  ;;  %p10926_p6 = scmp.lt.s32.totalorder %s10924_s10, %s10917_s25 }
  0x6b   : > { %p10921_p11 = pneg %p10920_p7  ;;  %p10927_p9 = por %p10926_p6, %p10925_p0 }
  0x6d   : > { %p10928_p10 = pnand %p10927_p9, %p10921_p11 }
  0x6f   : > { %10931 = shalt.err (!%p10928_p10)
}
  0x70   : > { %10742 = dma.hbm_to_vmem [thread:$0]  (!%p12408_p12), %s11363_s22, 32000, %s11366_s12, %s11318_s28, %s11130_s9, %s11131_s27, %s11132_s19  }
  0x71   : > { %s12413_s7 = sand.u32 1, %s11106_s26   ;;  %s10932_s15 = scalar_lea.hbm %s12358_s1, 256 }
  0x72   : > { %s11398_s2 = sshll.u32 %s12413_s7, 3  ;;  %p10933_p4 = scmp.ne.s32.totalorder %s12358_s1, %s10932_s15 }
  0x73   : > { %p12414_p13 = scmp.ne.s32.totalorder %s12403_s23, 0  ;;  %p10939_p2 = scmp.lt.u32.totalorder %s10932_s15, %s12358_s1 }
  0x75   : > { %p10935_p3 = pnand %p10933_p4, %p12414_p13 }
  0x77   : > { %p10936_p8 = pneg %p10935_p3 }
  0x79   : > { %p10941_p5 = pnand %p10939_p2, %p10936_p8 }
  0x7b   : > { %10944 = shalt.err (!%p10941_p5)
}
  0x7c   : > { %s10945_s12 = scalar_lea.vmem %s270_s29, 256  ;;  %p10953_p6 = scmp.lt.s32.totalorder %s270_s29, %s270_s29 }
  0x7d   : > { %p10946_p7 = scmp.ne.s32.totalorder %s270_s29, %s10945_s12  ;;  %p10954_p9 = scmp.lt.s32.totalorder %s10945_s12, %s10945_s12 }
  0x7f   : > { %p10948_p11 = pnand %p10946_p7, %p12414_p13  ;;  %p10955_p10 = por %p10954_p9, %p10953_p6 }
  0x81   : > { %p10949_p0 = pneg %p10948_p11 }
  0x83   : > { %p10956_p12 = pnand %p10955_p10, %p10949_p0 }
  0x85   : > { %10959 = shalt.err (!%p10956_p12)
}
  0x86   : > { %p12415_p4 = scmp.ne.s32.totalorder %s12400_s16, 0  ;;  %s10589_s27 = sshll.u32 %s11287_s14, 7 }
  0x87   : > { %s11424_s18 = scalar_lea.hbm %s12361_s4, %s10589_s27  ;;  %s341_s30 = scalar_lea.vmem [#allocation11], %s11398_s2 }
  0x88   : > { %10732 = dma.hbm_to_vmem [thread:$0]  (!%p12415_p4), %s12358_s1, 256, %s270_s29, [#allocation8]  }
  0x89   : > { %s351_s15 = sshll.u32 %s341_s30, 4  ;;  %s10960_s25 = scalar_lea.hbm %s11424_s18, 128  ;;  %s352_s15 = int_to_ptr.vmem [resolvable:$true] %s351_s15 }
  0x8a   : > { %p10961_p12 = scmp.ne.s32.totalorder %s11424_s18, %s10960_s25  ;;  %s10965_s21 = scalar_lea.hbm %s12361_s4, 512 }
  0x8b   : > { %p10966_p2 = scmp.lt.u32.totalorder %s11424_s18, %s12361_s4  ;;  %p10967_p5 = scmp.lt.u32.totalorder %s10965_s21, %s10960_s25 }
  0x8c   : > { %p10963_p3 = pnand %p10961_p12, %p11324_p1  ;;  %p10969_p11 = scmp.lt.u32.totalorder %s10960_s25, %s11424_s18 }
  0x8d   : > { %p10968_p7 = por %p10967_p5, %p10966_p2 }
  0x8e   : > { %p10964_p8 = pneg %p10963_p3 }
  0x8f   : > { %p10970_p0 = por %p10969_p11, %p10968_p7 }
  0x91   : > { %p10971_p6 = pnand %p10970_p0, %p10964_p8 }
  0x93   : > { %10974 = shalt.err (!%p10971_p6)
}
  0x94   : > { %s10975_s22 = scalar_lea.vmem %s352_s15, 128  ;;  %s11135_s9 = smov [#allocation11]  }
  0x95   : > { %p10976_p9 = scmp.ne.s32.totalorder %s352_s15, %s10975_s22  ;;  %s10980_s19 = sshll.u32 %s11135_s9, 4  ;;  %s10981_s19 = int_to_ptr.vmem [resolvable:$false] %s10980_s19 }
  0x96   : > { %s10982_s7 = scalar_lea.vmem %s10981_s19, 256  ;;  %p10983_p3 = scmp.lt.s32.totalorder %s352_s15, %s10981_s19 }
  0x97   : > { %p10978_p10 = pnand %p10976_p9, %p11324_p1  ;;  %p10984_p4 = scmp.lt.s32.totalorder %s10982_s7, %s10975_s22 }
  0x99   : > { %p10979_p12 = pneg %p10978_p10  ;;  %p10985_p13 = por %p10984_p4, %p10983_p3 }
  0x9b   : > { %p10986_p2 = pnand %p10985_p13, %p10979_p12 }
  0x9d   : > { %10989 = shalt.err (!%p10986_p2)
}
  0x9e   : > { %p12416_p5 = scmp.ne.s32.totalorder %s12401_s17, 0  ;;  %s11136_s30 = smov [#allocation13]  }
  0x9f   : > { %s280_s25 = sshll.u32 %s11136_s30, 4  ;;  %s11450_s21 = scalar_lea.hbm %s12362_s5, %s10589_s27  ;;  %s281_s25 = int_to_ptr.vmem [resolvable:$true] %s280_s25 }
  0xa0   : > { %10745 = dma.hbm_to_vmem [thread:$0]  (!%p12416_p5), %s11424_s18, 128, %s352_s15, %s11318_s28  }
  0xa1   : > { %s10990_s22 = scalar_lea.hbm %s12363_s6, 1024  ;;  %p12417_p4 = scmp.ne.s32.totalorder %s12403_s23, 0 }
  0xa2   : > { %p10991_p13 = scmp.ne.s32.totalorder %s12363_s6, %s10990_s22  ;;  %p10997_p11 = scmp.lt.u32.totalorder %s10990_s22, %s12363_s6 }
  0xa4   : > { %p10993_p8 = pnand %p10991_p13, %p12417_p4 }
  0xa6   : > { %p10994_p7 = pneg %p10993_p8 }
  0xa8   : > { %p10999_p0 = pnand %p10997_p11, %p10994_p7 }
  0xaa   : > { %11002 = shalt.err (!%p10999_p0)
}
  0xab   : > { %s11003_s14 = scalar_lea.vmem %s281_s25, 1024  ;;  %p11011_p12 = scmp.lt.s32.totalorder %s281_s25, %s281_s25 }
  0xac   : > { %p11004_p6 = scmp.ne.s32.totalorder %s281_s25, %s11003_s14  ;;  %p11012_p3 = scmp.lt.s32.totalorder %s11003_s14, %s11003_s14 }
  0xae   : > { %p11006_p9 = pnand %p11004_p6, %p12417_p4  ;;  %p11013_p2 = por %p11012_p3, %p11011_p12 }
  0xb0   : > { %p11007_p10 = pneg %p11006_p9 }
  0xb2   : > { %p11014_p5 = pnand %p11013_p2, %p11007_p10 }
  0xb4   : > { %11017 = shalt.err (!%p11014_p5)
}
  0xb5   : > { %p12418_p13 = scmp.ne.s32.totalorder %s12400_s16, 0  ;;  %s362_s23 = scalar_lea.vmem [#allocation12], %s11398_s2 }
  0xb6   : > { %s372_s30 = sshll.u32 %s362_s23, 4  ;;  %s11018_s29 = scalar_lea.hbm %s11450_s21, 128  ;;  %s373_s30 = int_to_ptr.vmem [resolvable:$true] %s372_s30 }
  0xb7   : > { %10735 = dma.hbm_to_vmem [thread:$0]  (!%p12418_p13), %s12363_s6, 1024, %s281_s25, [#allocation8]  }
  0xb8   : > { %p11019_p4 = scmp.ne.s32.totalorder %s11450_s21, %s11018_s29  ;;  %s11023_s10 = scalar_lea.hbm %s12362_s5, 512 }
  0xb9   : > { %p11024_p7 = scmp.lt.u32.totalorder %s11450_s21, %s12362_s5  ;;  %p11025_p11 = scmp.lt.u32.totalorder %s11023_s10, %s11018_s29 }
  0xba   : > { %p11021_p8 = pnand %p11019_p4, %p11324_p1  ;;  %p11027_p6 = scmp.lt.u32.totalorder %s11018_s29, %s11450_s21 }
  0xbb   : > { %p11026_p0 = por %p11025_p11, %p11024_p7 }
  0xbc   : > { %p11022_p5 = pneg %p11021_p8 }
  0xbd   : > { %p11028_p9 = por %p11027_p6, %p11026_p0 }
  0xbf   : > { %p11029_p10 = pnand %p11028_p9, %p11022_p5 }
  0xc1   : > { %11032 = shalt.err (!%p11029_p10)
}
  0xc2   : > { %s11033_s2 = scalar_lea.vmem %s373_s30, 128  ;;  %s11137_s25 = smov [#allocation12]  }
  0xc3   : > { %p11034_p12 = scmp.ne.s32.totalorder %s373_s30, %s11033_s2  ;;  %s11038_s9 = sshll.u32 %s11137_s25, 4  ;;  %s11039_s9 = int_to_ptr.vmem [resolvable:$false] %s11038_s9 }
  0xc4   : > { %s11040_s19 = scalar_lea.vmem %s11039_s9, 256  ;;  %p11041_p13 = scmp.lt.s32.totalorder %s373_s30, %s11039_s9 }
  0xc5   : > { %p11036_p3 = pnand %p11034_p12, %p11324_p1  ;;  %p11042_p4 = scmp.lt.s32.totalorder %s11040_s19, %s11033_s2 }
  0xc7   : > { %p11037_p2 = pneg %p11036_p3  ;;  %p11043_p8 = por %p11042_p4, %p11041_p13 }
  0xc9   : > { %p11044_p7 = pnand %p11043_p8, %p11037_p2 }
  0xcb   : > { %11047 = shalt.err (!%p11044_p7)
}
  0xcc   : > { %p12419_p11 = scmp.ne.s32.totalorder %s12401_s17, 0  ;;  %p12420_p5 = scmp.ne.s32.totalorder %s12399_s13, 0 }
  0xcd   : > { %p12421_p1 = scmp.ne.s32.totalorder (!%p12420_p5), %s12396_s11, 0 }
  0xce   : > { %10748 = dma.hbm_to_vmem [thread:$0]  (!%p12419_p11), %s11450_s21, 128, %s373_s30, %s11318_s28  }
  0xcf   : > { %381 = sbr.rel (%p12420_p5) target bundleno = 1921 (0x781), region = 48 }
  0xd6   : > { %11081 = dma.done.wait (%p12421_p1), [#allocation6], 256  }
  0xd7   : > { %11083 = vsyncadd (%p12421_p1), [#allocation6], 4294967040 }
  0xd8   : > { %11085 = dma.done.wait (%p12421_p1), [#allocation8], 256  }
  0xd9   : > { %11087 = vsyncadd (%p12421_p1), [#allocation8], 4294967040  ;;  %s12422_s17 = sadd.s32 4294967295, %s11126_s8   ;;  %s12423_s24 = sld [smem:[#allocation18_spill]] }
  0xda   : > { %s12424_s18 = sld [smem:[#allocation23_spill]]  ;;  %s391_s28 = sand.u32 1, %s12422_s17  }
  0xdb   : > { %s392_s15 = scalar_lea.sflag [#allocation6], %s391_s28 }
  0xdf   : > { %s393_s21 = sand.u32 1, %s12423_s24  }
  0xe0   : > { %s10705_s13 = smul.u32 2000, %s393_s21  ;;  %p12425_p0 = scmp.ne.s32.totalorder %s12424_s18, 0 }
  0xe2   : > { %s11502_s14 = scalar_lea.vmem [#allocation9], %s10705_s13 }
  0xe3   : > { %11089 = dma.done.wait (%p12425_p0), %s392_s15, 64256  }
  0xe4   : > { %11091 = vsyncadd (%p12425_p0), %s392_s15, 4294903040  ;;  %s11508_s27 = sshll.u32 %s393_s21, 3  ;;  %s11510_s7 = scalar_lea.vmem [#allocation10], %s10705_s13 }
  0xe5   : > { %s413_s23 = scalar_lea.vmem [#allocation11], %s11508_s27  ;;  %s422_s30 = scalar_lea.vmem [#allocation12], %s11508_s27 }
  0xe6   : > { %11093 = dma.done.wait (%p12421_p1), [#allocation8], 1024  }
  0xe7   : > { %11095 = vsyncadd (%p12421_p1), [#allocation8], 4294966272  ;;  %s12426_s29 = sld [smem:[#allocation20_spill]]  ;;  %s12427_s12 = sld [smem:[#allocation28_spill]] }
  0xe8   : > { %s12428_s2 = sld [smem:[#allocation19_spill]] }
  0xed   : > { %p483_p6 = scmp.lt.s32.totalorder %s12426_s29, 1 }
  0xee   : > { %p9548_p9 = scmp.ne.s32.totalorder %s12428_s2, 0 }
  0xef   : > { %s12447_s29 = smov (!%p483_p6, %s12426_s29), 1  ;;  %v11526_v0 = vld [vmem:[#allocation5] sm:$0xff] (!%p9548_p9)  ;;  %v506_v1 = vlaneseq (!%p9548_p9)  ;;  %v11138_v3 = vmov (!%p9548_p9), 1983009808   ;;  %v11530_v5 = vld [vmem:[#allocation7] sm:$0xff] (!%p9548_p9)  ;;  %v11532_v6 = vld [vmem:[#allocation5 + $0x8] sm:$0xff] (!%p9548_p9) }
  0xf0   : > { %s9547_s20 = sshll.u32 %s12447_s29, 1  ;;  %491 = sbr.rel (%p9548_p9) target bundleno = 461 (0x1cd), region = 80  ;;  %v498_v2 = vmul.f32 (!%p9548_p9), %v11526_v0, %v11526_v0  ;;  %v504_v4 = vunpack.c.l.s4 (!%p9548_p9), %v11138_v3  ;;  %v570_v8 = vmul.f32 (!%p9548_p9), %v11530_v5, %v11530_v5  ;;  %v499_v12 = vmul.f32 (!%p9548_p9), %v11532_v6, %v11532_v6  ;;  %v11543_v14 = vld [vmem:[#allocation7 + $0x8] sm:$0xff] (!%p9548_p9) }
  0xf1   : > { %s11523_s22 = scalar_lea.vmem %s12427_s12, %s9547_s20  ;;  %v11534_v7 = vshrl.u32 (!%p9548_p9), %v506_v1, 7  ;;  %vm544_vm0 = vcmask (!%p9548_p9), 1041408   ;;  %v571_v17 = vmul.f32 (!%p9548_p9), %v11543_v14, %v11543_v14  ;;  %vm558_vm1 = vcmask (!%p9548_p9), 844800  }
  0xf2   : > { %v502_v9 = vcombine.high (!%p9548_p9), %v498_v2, %v498_v2  ;;  %v505_v10 = vunpack.c.0.s8 (!%p9548_p9), %v504_v4  ;;  %v574_v11 = vcombine.high (!%p9548_p9), %v570_v8, %v570_v8  ;;  %v519_v22 = vcombine.high (!%p9548_p9), %v499_v12, %v499_v12 }
  0xf3   : > { %v591_v27 = vcombine.high (!%p9548_p9), %v571_v17, %v571_v17  ;;  %vm492_vm2 = vcmask (!%p9548_p9), 9216   ;;  %v11139_v1 = vmov (!%p9548_p9), 0.0   ;;  %v11140_v4 = vmov (!%p9548_p9), 269488144  }
  0xf4   : > { %v11541_v13 = vsub.s32 (!%p9548_p9), %v505_v10, %v11534_v7  ;;  %493 = vst.msk [vmem:[#allocation4] sm:$0x3] (!%p9548_p9), %vm492_vm2, %v11139_v1  ;;  %vm763_vm7 = vcmask (!%p9548_p9), 1040384   ;;  %vm764_vm8 = vcmask (!%p9548_p9), 1041409   ;;  %vm766_vm10 = vcmask (!%p9548_p9), 1042434  }
  0xf5   : > { %vm765_vm9 = vmor (!%p9548_p9), %vm764_vm8, %vm763_vm7  ;;  %vm768_vm12 = vcmask (!%p9548_p9), 1043459   ;;  %vm770_vm14 = vcmask (!%p9548_p9), 1044484   ;;  %vm772_vm15 = vcmask (!%p9548_p9), 1045509  }
  0xf6   : > { %v509_v15 = vrot.slane (!%p9548_p9), %v498_v2, %v11541_v13  ;;  %v516_v16 = vrot.slane (!%p9548_p9), %v502_v9, %v11541_v13  ;;  %v581_v18 = vrot.slane (!%p9548_p9), %v570_v8, %v11541_v13  ;;  %v588_v19 = vrot.slane (!%p9548_p9), %v574_v11, %v11541_v13  ;;  %vm767_vm11 = vmor (!%p9548_p9), %vm766_vm10, %vm765_vm9 }
  0xf7   : > { %v526_v23 = vrot.slane %v499_v12, %v11541_v13  ;;  %v598_v31 = vrot.slane %v571_v17, %v11541_v13  ;;  %v533_v32 = vrot.slane %v519_v22, %v11541_v13  ;;  %v605_v42 = vrot.slane %v591_v27, %v11541_v13  ;;  %vm769_vm13 = vmor %vm768_vm12, %vm767_vm11 }
  0xf8   : > { %v517_v20 = vcombine.high %v509_v15, %v509_v15  ;;  %v518_v21 = vcombine.high %v516_v16, %v516_v16  ;;  %v545_v24 = vsel %vm544_vm0, %v509_v15, 0.0  ;;  %v548_v26 = vsel %vm544_vm0, %v516_v16, 0.0 }
  0xf9   : > { %v589_v29 = vcombine.high %v581_v18, %v581_v18  ;;  %v590_v30 = vcombine.high %v588_v19, %v588_v19  ;;  %v534_v33 = vcombine.high %v526_v23, %v526_v23  ;;  %v616_v35 = vsel %vm544_vm0, %v581_v18, 0.0 }
  0xfa   : > { %v546_v25 = vsel %vm544_vm0, %v517_v20, 0.0  ;;  %v550_v34 = vsel %vm544_vm0, %v518_v21, 0.0  ;;  %v619_v38 = vsel %vm544_vm0, %v588_v19, 0.0  ;;  %v552_v39 = vsel %vm544_vm0, %v526_v23, 0.0 }
  0xfb   : > { %v547_v28 = vadd.f32 %v546_v25, %v545_v24  ;;  %v617_v37 = vsel %vm544_vm0, %v589_v29, 0.0  ;;  %v606_v43 = vcombine.high %v598_v31, %v598_v31  ;;  %v621_v44 = vsel %vm544_vm0, %v590_v30, 0.0 }
  0xfc   : > { %v618_v40 = vadd.f32 %v617_v37, %v616_v35  ;;  %v535_v45 = vcombine.high %v533_v32, %v533_v32  ;;  %v554_v46 = vsel %vm544_vm0, %v534_v33, 0.0  ;;  %v623_v49 = vsel %vm544_vm0, %v598_v31, 0.0 }
  0xfd   : > { %v549_v36 = vadd.f32 %v548_v26, %v547_v28  ;;  %v556_v50 = vsel %vm544_vm0, %v533_v32, 0.0  ;;  %v607_v53 = vcombine.high %v605_v42, %v605_v42  ;;  %v625_v54 = vsel %vm544_vm0, %v606_v43, 0.0 }
  0xfe   : > { %v620_v47 = vadd.f32 %v619_v38, %v618_v40  ;;  %v559_v55 = vsel %vm558_vm1, %v535_v45, 0.0  ;;  %v627_v58 = vsel %vm544_vm0, %v605_v42, 0.0  ;;  %v643_v8 = vunpack.c.l.s4 %v11140_v4  ;;  %vm771_vm0 = vmor %vm770_vm14, %vm769_vm13 }
  0xff   : > { %v551_v41 = vadd.f32 %v550_v34, %v549_v36  ;;  %v629_v61 = vsel %vm558_vm1, %v607_v53, 0.0  ;;  %v11141_v27 = vmov 1966171168   ;;  %vm774_vm1 = vcmask 1046534   ;;  %vm11582_vm2 = vmor %vm772_vm15, %vm771_vm0 }
 0x100   : > { %v622_v51 = vadd.f32 %v621_v44, %v620_v47  ;;  %v644_v9 = vunpack.c.0.s8 %v643_v8  ;;  %v718_v28 = vunpack.c.l.s4 %v11141_v27 }
 0x101   : > { %v553_v48 = vadd.f32 %v552_v39, %v551_v41 }
 0x102   : > { %v624_v56 = vadd.f32 %v623_v49, %v622_v51  ;;  %v647_v16 = vsub.s32 %v644_v9, %v11534_v7  ;;  %v719_v32 = vunpack.c.0.s8 %v718_v28 }
 0x103   : > { %v555_v52 = vadd.f32 %v554_v46, %v553_v48 }
 0x104   : > { %v626_v59 = vadd.f32 %v625_v54, %v624_v56 }
 0x105   : > { %v557_v57 = vadd.f32 %v556_v50, %v555_v52 }
 0x106   : > { %v628_v62 = vadd.f32 %v627_v58, %v626_v59 }
 0x107   : > { %v560_v60 = vadd.f32 %v559_v55, %v557_v57 }
 0x108   : > { %v630_v63 = vadd.f32 %v629_v61, %v628_v62 }
 0x109   : > { %561 = vadd.xlane.f32.xlu0 %v560_v60 }
 0x10d   : > { %631 = vadd.xlane.f32.xlu0 %v630_v63 }
 0x196   : > { %v562_v2 = vpop.xlane.xlu0 %561 }
 0x197   : > { %10832 = vrsqrt.f32 %v562_v2  ;;  %vm565_vm3 = vcmp.eq.f32.partialorder %v562_v2, inf  ;;  %v568_v12 = vand.u32 2147483648, %v562_v2  ;;  %vm567_vm4 = vcmp.eq.f32.partialorder %v562_v2, 0.0 }
 0x19a   : > { %v632_v3 = vpop.xlane.xlu0 %631 }
 0x19b   : > { %10834 = vrsqrt.f32 %v632_v3  ;;  %vm635_vm5 = vcmp.eq.f32.partialorder %v632_v3, inf  ;;  %v638_v21 = vand.u32 2147483648, %v632_v3  ;;  %vm637_vm6 = vcmp.eq.f32.partialorder %v632_v3, 0.0 }
 0x1a1   : > { %v10833_v10 = vpop.eup %10832 }
 0x1a2   : > { %v564_v11 = vmul.f32 %v10833_v10, %v562_v2 }
 0x1a4   : > { %v566_v15 = vsel %vm565_vm3, %v562_v2, %v564_v11  ;;  %vm775_vm3 = vmor %vm774_vm1, %vm11582_vm2 }
 0x1a5   : > { %v10835_v17 = vpop.eup %10834  ;;  %v569_v18 = vsel %vm567_vm4, %v568_v12, %v566_v15  ;;  %vm776_vm4 = vcmask 850951  }
 0x1a6   : > { %v640_v19 = vmax.f32 %v569_v18, 1e-12  ;;  %v634_v20 = vmul.f32 %v10835_v17, %v632_v3 }
 0x1a8   : > { %v648_v22 = vrot.slane %v640_v19, %v647_v16  ;;  %v636_v23 = vsel %vm635_vm5, %v632_v3, %v634_v20  ;;  %vm777_vm5 = vmor %vm776_vm4, %vm775_vm3 }
 0x1a9   : > { %v639_v24 = vsel %vm637_vm6, %v638_v21, %v636_v23 }
 0x1aa   : > { %10836 = vrcp.f32 %v648_v22  ;;  %v779_v25 = vmax.f32 %v639_v24, 1e-12 }
 0x1ac   : > { %v787_v26 = vrot.slane %v779_v25, %v647_v16 }
 0x1ae   : > { %10838 = vrcp.f32 %v787_v26 }
 0x1b4   : > { %v10837_v29 = vpop.eup %10836 }
 0x1b5   : > { %v651_v30 = vmul.f32 %v10837_v29, %v11526_v0  ;;  %v652_v31 = vmul.f32 %v10837_v29, %v11532_v6  ;;  %v722_v6 = vsub.s32 %v719_v32, %v11534_v7 }
 0x1b7   : > { %v655_v33 = vcombine.high %v651_v30, %v651_v30  ;;  %v662_v34 = vrot.slane %v651_v30, %v11541_v13  ;;  %v672_v35 = vcombine.high %v652_v31, %v652_v31  ;;  %v679_v36 = vrot.slane %v652_v31, %v11541_v13 }
 0x1b8   : > { %v10839_v37 = vpop.eup %10838 }
 0x1b9   : > { %v669_v38 = vrot.slane %v655_v33, %v11541_v13  ;;  %v670_v39 = vcombine.high %v662_v34, %v662_v34  ;;  %v686_v40 = vrot.slane %v672_v35, %v11541_v13  ;;  %v687_v0 = vcombine.high %v679_v36, %v679_v36 }
 0x1ba   : > { %v790_v41 = vmul.f32 %v10839_v37, %v11530_v5  ;;  %v791_v42 = vmul.f32 %v10839_v37, %v11543_v14 }
 0x1bb   : > { %v671_v43 = vcombine.high %v669_v38, %v669_v38  ;;  %v688_v44 = vcombine.high %v686_v40, %v686_v40  ;;  %v9549_v45 = vpack.c.bf16 %v670_v39, %v662_v34  ;;  %v9551_v46 = vpack.c.bf16 %v687_v0, %v679_v36 }
 0x1bc   : > { %v794_v47 = vcombine.high %v790_v41, %v790_v41  ;;  %v801_v48 = vrot.slane %v790_v41, %v11541_v13  ;;  %v811_v49 = vcombine.high %v791_v42, %v791_v42  ;;  %v818_v50 = vrot.slane %v791_v42, %v11541_v13 }
 0x1bd   : > { %v9550_v51 = vpack.c.bf16 %v671_v43, %v669_v38  ;;  %v9552_v52 = vpack.c.bf16 %v688_v44, %v686_v40  ;;  %v723_v55 = vrot.slane %v9549_v45, %v722_v6  ;;  %v737_v57 = vrot.slane %v9551_v46, %v722_v6 }
 0x1be   : > { %v808_v5 = vrot.slane %v794_v47, %v11541_v13  ;;  %v809_v14 = vcombine.high %v801_v48, %v801_v48  ;;  %v825_v53 = vrot.slane %v811_v49, %v11541_v13  ;;  %v826_v54 = vcombine.high %v818_v50, %v818_v50 }
 0x1bf   : > { %v730_v56 = vrot.slane %v9550_v51, %v722_v6  ;;  %v744_v58 = vrot.slane %v9552_v52, %v722_v6 }
 0x1c0   : > { %v810_v59 = vcombine.high %v808_v5, %v808_v5  ;;  %v827_v60 = vcombine.high %v825_v53, %v825_v53  ;;  %v9553_v61 = vpack.c.bf16 %v809_v14, %v801_v48  ;;  %v9555_v62 = vpack.c.bf16 %v826_v54, %v818_v50 }
 0x1c1   : > { %v745_v63 = vcombine.low %v723_v55, %v730_v56  ;;  %v746_v1 = vcombine.low %v737_v57, %v744_v58 }
 0x1c2   : > { %v9554_v2 = vpack.c.bf16 %v810_v59, %v808_v5  ;;  %v9556_v3 = vpack.c.bf16 %v827_v60, %v825_v53  ;;  %v862_v8 = vrot.slane %v9553_v61, %v722_v6  ;;  %v876_v10 = vrot.slane %v9555_v62, %v722_v6 }
 0x1c3   : > { %v753_v4 = vrot.slane %v745_v63, %v722_v6  ;;  %v760_v13 = vrot.slane %v746_v1, %v722_v6 }
 0x1c4   : > { %v869_v9 = vrot.slane %v9554_v2, %v722_v6  ;;  %v883_v11 = vrot.slane %v9556_v3, %v722_v6 }
 0x1c5   : > { %v761_v12 = vcombine.low %v753_v4, %v760_v13 }
 0x1c6   : > { %v884_v15 = vcombine.low %v862_v8, %v869_v9  ;;  %v885_v16 = vcombine.low %v876_v10, %v883_v11 }
 0x1c7   : > { %778 = vst.msk [vmem:[#allocation2] sm:$0xff] %vm777_vm5, %v761_v12 }
 0x1c8   : > { %v892_v17 = vrot.slane %v884_v15, %v722_v6  ;;  %v899_v18 = vrot.slane %v885_v16, %v722_v6 }
 0x1ca   : > { %v900_v19 = vcombine.low %v892_v17, %v899_v18 }
 0x1cc   : > { %902 = vst.msk [vmem:[#allocation3] sm:$0xff] %vm777_vm5, %v900_v19 }
 0x1cd PF: > { %v1653_v20 = vld [vmem:[%s11510_s7] sm:$0xff]  ;;  %v1655_v21 = vld [vmem:[%s11510_s7 + $0x10] sm:$0xff]  ;;  %vm4962_vm6 = vcmask 850944   ;;  %vm4966_vm7 = vcmask 1043456   ;;  %s12431_s11 = sld [smem:[#allocation20_spill]]  ;;  %s12432_s25 = sld [smem:[#allocation19_spill]] }
 0x1ce   : > { %v1657_v22 = vld [vmem:[%s11510_s7 + $0x20] sm:$0xff]  ;;  %v1903_v23 = vunpack.c.l.s8.bf16 %v1653_v20  ;;  %v1907_v24 = vunpack.c.l.s8.bf16 %v1655_v21  ;;  %v1904_v25 = vunpack.c.h.s8.bf16 %v1653_v20  ;;  %v1908_v26 = vunpack.c.h.s8.bf16 %v1655_v21  ;;  %v1659_v27 = vld [vmem:[%s11510_s7 + $0x30] sm:$0xff] }
 0x1cf   : > { %v1911_v28 = vunpack.c.l.s8.bf16 %v1657_v22  ;;  %v1915_v29 = vunpack.c.l.s8.bf16 %v1659_v27  ;;  %v1912_v30 = vunpack.c.h.s8.bf16 %v1657_v22  ;;  %v1916_v31 = vunpack.c.h.s8.bf16 %v1659_v27  ;;  %v1661_v32 = vld [vmem:[%s11510_s7 + $0x40] sm:$0xff]  ;;  %v1663_v33 = vld [vmem:[%s11510_s7 + $0x50] sm:$0xff] }
 0x1d0   : > { %v9558_v34 = vcombine.high %v1903_v23, %v1907_v24  ;;  %v9560_v35 = vcombine.high %v1904_v25, %v1908_v26  ;;  %v9557_v36 = vcombine.low %v1903_v23, %v1907_v24  ;;  %v9559_v37 = vcombine.low %v1904_v25, %v1908_v26  ;;  %v1665_v38 = vld [vmem:[%s11510_s7 + $0x60] sm:$0xff]  ;;  %v1667_v39 = vld [vmem:[%s11510_s7 + $0x70] sm:$0xff] }
 0x1d1   : > { %v9566_v40 = vcombine.high %v1911_v28, %v1915_v29  ;;  %v9568_v0 = vcombine.high %v1912_v30, %v1916_v31  ;;  %v1919_v6 = vunpack.c.l.s8.bf16 %v1661_v32  ;;  %v1923_v41 = vunpack.c.l.s8.bf16 %v1663_v33  ;;  %v1669_v52 = vld [vmem:[%s11510_s7 + $0x80] sm:$0xff]  ;;  %v1671_v7 = vld [vmem:[%s11510_s7 + $0x90] sm:$0xff] }
 0x1d2   : > { %4991 = vmatprep.subr.bf16.mxu0 %v9558_v34  ;;  %5155 = vmatprep.subr.bf16.mxu1 %v9560_v35  ;;  %v1920_v42 = vunpack.c.h.s8.bf16 %v1661_v32  ;;  %v1924_v43 = vunpack.c.h.s8.bf16 %v1663_v33  ;;  %v9565_v44 = vcombine.low %v1911_v28, %v1915_v29  ;;  %v9567_v45 = vcombine.low %v1912_v30, %v1916_v31  ;;  %v1673_v59 = vld [vmem:[%s11510_s7 + $0xa0] sm:$0xff]  ;;  %v1675_v60 = vld [vmem:[%s11510_s7 + $0xb0] sm:$0xff] }
 0x1d3   : > { %4992 = vmatpush1.bf16.msra.mxu0 %v9557_v36  ;;  %5156 = vmatpush1.bf16.msra.mxu1 %v9559_v37  ;;  %v1927_v46 = vunpack.c.l.s8.bf16 %v1665_v38  ;;  %v1931_v47 = vunpack.c.l.s8.bf16 %v1667_v39  ;;  %v9574_v48 = vcombine.high %v1919_v6, %v1923_v41  ;;  %v1928_v50 = vunpack.c.h.s8.bf16 %v1665_v38  ;;  %v1677_v8 = vld [vmem:[%s11510_s7 + $0xc0] sm:$0xff]  ;;  %v1679_v9 = vld [vmem:[%s11510_s7 + $0xd0] sm:$0xff]  ;;  %s10581_s9 = sshll.u32 %s12431_s11, 1  ;;  %p10584_p10 = scmp.ne.s32.totalorder %s12432_s25, 1 }
 0x1d4   : > { %4993 = vmatprep.subr.bf16.mxu0 %v9566_v40  ;;  %5157 = vmatprep.subr.bf16.mxu1 %v9568_v0  ;;  %v9576_v49 = vcombine.high %v1920_v42, %v1924_v43  ;;  %v1932_v51 = vunpack.c.h.s8.bf16 %v1667_v39  ;;  %v9573_v5 = vcombine.low %v1919_v6, %v1923_v41  ;;  %v9575_v14 = vcombine.low %v1920_v42, %v1924_v43  ;;  %v1681_v20 = vld [vmem:[%s11510_s7 + $0xe0] sm:$0xff]  ;;  %v1683_v21 = vld [vmem:[%s11510_s7 + $0xf0] sm:$0xff]  ;;  %s12271_s19 = sadd.s32 %s12432_s25, %s10581_s9 }
 0x1d5   : > { %v9582_v53 = vcombine.high %v1927_v46, %v1931_v47  ;;  %v1935_v54 = vunpack.c.l.s8.bf16 %v1669_v52  ;;  %v1939_v56 = vunpack.c.l.s8.bf16 %v1671_v7  ;;  %v1936_v57 = vunpack.c.h.s8.bf16 %v1669_v52  ;;  %v1685_v30 = vld [vmem:[%s11510_s7 + $0x100] sm:$0xff]  ;;  %v1687_v31 = vld [vmem:[%s11510_s7 + $0x110] sm:$0xff]  ;;  %s10582_s17 = sshll.u32 %s12271_s19, 10 }
 0x1d6   : > { %v9584_v55 = vcombine.high %v1928_v50, %v1932_v51  ;;  %v1940_v58 = vunpack.c.h.s8.bf16 %v1671_v7  ;;  %v9581_v61 = vcombine.low %v1927_v46, %v1931_v47  ;;  %v9583_v62 = vcombine.low %v1928_v50, %v1932_v51  ;;  %v1689_v40 = vld [vmem:[%s11510_s7 + $0x120] sm:$0xff]  ;;  %v1691_v0 = vld [vmem:[%s11510_s7 + $0x130] sm:$0xff]  ;;  %s12278_s24 = sshra.s32 %s10582_s17, 7 }
 0x1d7   : > { %4994 = vmatpush1.bf16.msra.mxu0 %v9565_v44  ;;  %5158 = vmatpush1.bf16.msra.mxu1 %v9567_v45  ;;  %v1943_v63 = vunpack.c.l.s8.bf16 %v1673_v59  ;;  %v1947_v1 = vunpack.c.l.s8.bf16 %v1675_v60  ;;  %v9590_v2 = vcombine.high %v1935_v54, %v1939_v56  ;;  %v1944_v4 = vunpack.c.h.s8.bf16 %v1673_v59  ;;  %v1695_v52 = vld [vmem:[%s11510_s7 + $0x150] sm:$0xff]  ;;  %s10583_s18 = sshll.u32 %s12278_s24, 1 }
 0x1d8   : > { %4995 = vmatprep.subr.bf16.mxu0 %v9574_v48  ;;  %5159 = vmatprep.subr.bf16.mxu1 %v9576_v49  ;;  %v9592_v3 = vcombine.high %v1936_v57, %v1940_v58  ;;  %v1948_v13 = vunpack.c.h.s8.bf16 %v1675_v60  ;;  %v9589_v10 = vcombine.low %v1935_v54, %v1939_v56  ;;  %v9591_v11 = vcombine.low %v1936_v57, %v1940_v58  ;;  %v1693_v49 = vld [vmem:[%s11510_s7 + $0x140] sm:$0xff]  ;;  %s12286_s28 = scalar_lea.vmem [#allocation13], %s10583_s18 }
 0x1d9   : > { %v9598_v12 = vcombine.high %v1943_v63, %v1947_v1  ;;  %v1951_v15 = vunpack.c.l.s8.bf16 %v1677_v8  ;;  %v1955_v17 = vunpack.c.l.s8.bf16 %v1679_v9  ;;  %v1952_v18 = vunpack.c.h.s8.bf16 %v1677_v8  ;;  %v11615_v57 = vld [vmem:[#allocation3] sm:$0xff] }
 0x1da   : > { %v9600_v16 = vcombine.high %v1944_v4, %v1948_v13  ;;  %v1956_v19 = vunpack.c.h.s8.bf16 %v1679_v9  ;;  %v9597_v22 = vcombine.low %v1943_v63, %v1947_v1  ;;  %v9599_v23 = vcombine.low %v1944_v4, %v1948_v13 }
 0x1db   : > { %4996 = vmatpush1.bf16.msra.mxu0 %v9573_v5  ;;  %5160 = vmatpush1.bf16.msra.mxu1 %v9575_v14  ;;  %v1959_v24 = vunpack.c.l.s8.bf16 %v1681_v20  ;;  %v1963_v25 = vunpack.c.l.s8.bf16 %v1683_v21  ;;  %v9606_v26 = vcombine.high %v1951_v15, %v1955_v17  ;;  %v1960_v28 = vunpack.c.h.s8.bf16 %v1681_v20 }
 0x1dc   : > { %4997 = vmatprep.subr.bf16.mxu0 %v9582_v53  ;;  %5161 = vmatprep.subr.bf16.mxu1 %v9584_v55  ;;  %v9608_v27 = vcombine.high %v1952_v18, %v1956_v19  ;;  %v1964_v29 = vunpack.c.h.s8.bf16 %v1683_v21  ;;  %v9605_v32 = vcombine.low %v1951_v15, %v1955_v17  ;;  %v9607_v33 = vcombine.low %v1952_v18, %v1956_v19 }
 0x1dd   : > { %v9614_v34 = vcombine.high %v1959_v24, %v1963_v25  ;;  %v1967_v35 = vunpack.c.l.s8.bf16 %v1685_v30  ;;  %v1971_v37 = vunpack.c.l.s8.bf16 %v1687_v31  ;;  %v1968_v38 = vunpack.c.h.s8.bf16 %v1685_v30 }
 0x1de   : > { %v9616_v36 = vcombine.high %v1960_v28, %v1964_v29  ;;  %v1972_v39 = vunpack.c.h.s8.bf16 %v1687_v31  ;;  %v9613_v6 = vcombine.low %v1959_v24, %v1963_v25  ;;  %v9615_v41 = vcombine.low %v1960_v28, %v1964_v29 }
 0x1df   : > { %4998 = vmatpush1.bf16.msra.mxu0 %v9581_v61  ;;  %5162 = vmatpush1.bf16.msra.mxu1 %v9583_v62  ;;  %v2410_v42 = vlaneseq  ;;  %v1975_v43 = vunpack.c.l.s8.bf16 %v1689_v40  ;;  %v1979_v44 = vunpack.c.l.s8.bf16 %v1691_v0  ;;  %v1976_v45 = vunpack.c.h.s8.bf16 %v1689_v40  ;;  %v1697_v61 = vld [vmem:[%s11510_s7 + $0x160] sm:$0xff]  ;;  %v1699_v62 = vld [vmem:[%s11510_s7 + $0x170] sm:$0xff] }
 0x1e0   : > { %4999 = vmatprep.subr.bf16.mxu0 %v9590_v2  ;;  %5163 = vmatprep.subr.bf16.mxu1 %v9592_v3  ;;  %v1980_v46 = vunpack.c.h.s8.bf16 %v1691_v0  ;;  %v9622_v47 = vcombine.high %v1967_v35, %v1971_v37  ;;  %v9624_v48 = vcombine.high %v1968_v38, %v1972_v39  ;;  %v11142_v50 = vmov 1966171168  }
 0x1e1   : > { %v2408_v51 = vunpack.c.l.s4 %v11142_v50  ;;  %v9621_v7 = vcombine.low %v1967_v35, %v1971_v37  ;;  %v11613_v14 = vshrl.u32 %v2410_v42, 7  ;;  %v9623_v53 = vcombine.low %v1968_v38, %v1972_v39  ;;  %v1711_v37 = vld [vmem:[%s11510_s7 + $0x1d0] sm:$0xff] }
 0x1e2   : > { %v9630_v54 = vcombine.high %v1975_v43, %v1979_v44  ;;  %v9632_v55 = vcombine.high %v1976_v45, %v1980_v46  ;;  %v1983_v56 = vunpack.c.l.s8.bf16 %v1693_v49  ;;  %v1987_v58 = vunpack.c.l.s8.bf16 %v1695_v52 }
 0x1e3   : > { %5000 = vmatpush1.bf16.msra.mxu0 %v9589_v10  ;;  %5164 = vmatpush1.bf16.msra.mxu1 %v9591_v11  ;;  %v2409_v5 = vunpack.c.0.s8 %v2408_v51  ;;  %v1984_v59 = vunpack.c.h.s8.bf16 %v1693_v49  ;;  %v1988_v60 = vunpack.c.h.s8.bf16 %v1695_v52  ;;  %v9629_v1 = vcombine.low %v1975_v43, %v1979_v44  ;;  %v1713_v44 = vld [vmem:[%s11510_s7 + $0x1e0] sm:$0xff] }
 0x1e4   : > { %5001 = vmatprep.subr.bf16.mxu0 %v9598_v12  ;;  %5165 = vmatprep.subr.bf16.mxu1 %v9600_v16  ;;  %v9631_v3 = vcombine.low %v1976_v45, %v1980_v46  ;;  %v1991_v4 = vunpack.c.l.s8.bf16 %v1697_v61  ;;  %v1995_v13 = vunpack.c.l.s8.bf16 %v1699_v62  ;;  %v1992_v8 = vunpack.c.h.s8.bf16 %v1697_v61  ;;  %v1701_v12 = vld [vmem:[%s11510_s7 + $0x180] sm:$0xff]  ;;  %v1703_v16 = vld [vmem:[%s11510_s7 + $0x190] sm:$0xff] }
 0x1e5   : > { %v11620_v63 = vsub.s32 %v2409_v5, %v11613_v14  ;;  %v9638_v9 = vcombine.high %v1983_v56, %v1987_v58  ;;  %v9640_v10 = vcombine.high %v1984_v59, %v1988_v60  ;;  %v1996_v11 = vunpack.c.h.s8.bf16 %v1699_v62  ;;  %v1715_v45 = vld [vmem:[%s11510_s7 + $0x1f0] sm:$0xff]  ;;  %v1717_v5 = vld [vmem:[%s11510_s7 + $0x200] sm:$0xff] }
 0x1e6   : > { %v9637_v18 = vcombine.low %v1983_v56, %v1987_v58  ;;  %v9639_v19 = vcombine.low %v1984_v59, %v1988_v60  ;;  %v9646_v20 = vcombine.high %v1991_v4, %v1995_v13  ;;  %v1999_v21 = vunpack.c.l.s8.bf16 %v1701_v12 }
 0x1e7   : > { %5002 = vmatpush1.bf16.msra.mxu0 %v9597_v22  ;;  %5166 = vmatpush1.bf16.msra.mxu1 %v9599_v23  ;;  %v11624_v2 = vrot.slane %v11615_v57, %v11620_v63  ;;  %v9648_v22 = vcombine.high %v1992_v8, %v1996_v11  ;;  %v2003_v23 = vunpack.c.l.s8.bf16 %v1703_v16  ;;  %v2000_v24 = vunpack.c.h.s8.bf16 %v1701_v12 }
 0x1e8   : > { %5003 = vmatprep.subr.bf16.mxu0 %v9606_v26  ;;  %5167 = vmatprep.subr.bf16.mxu1 %v9608_v27  ;;  %v2004_v25 = vunpack.c.h.s8.bf16 %v1703_v16  ;;  %v1705_v26 = vld [vmem:[%s11510_s7 + $0x1a0] sm:$0xff]  ;;  %v1707_v27 = vld [vmem:[%s11510_s7 + $0x1b0] sm:$0xff]  ;;  %v9645_v28 = vcombine.low %v1991_v4, %v1995_v13  ;;  %v9647_v29 = vcombine.low %v1992_v8, %v1996_v11  ;;  %v2020_v43 = vunpack.c.h.s8.bf16 %v1711_v37 }
 0x1e9   : > { %v2421_v15 = vcombine.high %v11624_v2, %v11624_v2  ;;  %v2007_v30 = vunpack.c.l.s8.bf16 %v1705_v26  ;;  %v2011_v31 = vunpack.c.l.s8.bf16 %v1707_v27  ;;  %v2012_v35 = vunpack.c.h.s8.bf16 %v1707_v27  ;;  %v1725_v16 = vld [vmem:[%s11510_s7 + $0x240] sm:$0xff] }
 0x1ea   : > { %v9653_v38 = vcombine.low %v1999_v21, %v2003_v23  ;;  %v9655_v39 = vcombine.low %v2000_v24, %v2004_v25  ;;  %v2027_v49 = vunpack.c.l.s8.bf16 %v1715_v45  ;;  %v2024_v50 = vunpack.c.h.s8.bf16 %v1713_v44 }
 0x1eb   : > { %5004 = vmatpush1.bf16.msra.mxu0 %v9605_v32  ;;  %5168 = vmatpush1.bf16.msra.mxu1 %v9607_v33  ;;  %v11631_v17 = vrot.slane %v2421_v15, %v11620_v63  ;;  %v9654_v32 = vcombine.high %v1999_v21, %v2003_v23  ;;  %v9656_v33 = vcombine.high %v2000_v24, %v2004_v25  ;;  %v2028_v51 = vunpack.c.h.s8.bf16 %v1715_v45 }
 0x1ec   : > { %5005 = vmatprep.subr.bf16.mxu0 %v9614_v34  ;;  %5169 = vmatprep.subr.bf16.mxu1 %v9616_v36  ;;  %v2008_v34 = vunpack.c.h.s8.bf16 %v1705_v26  ;;  %v1709_v36 = vld [vmem:[%s11510_s7 + $0x1c0] sm:$0xff]  ;;  %v9662_v40 = vcombine.high %v2007_v30, %v2011_v31  ;;  %v9661_v46 = vcombine.low %v2007_v30, %v2011_v31  ;;  %v2031_v59 = vunpack.c.l.s8.bf16 %v1717_v5 }
 0x1ed   : > { %5023 = vmatprep.mubr.bf16.mxu0 %v11631_v17  ;;  %5187 = vmatprep.mubr.bf16.mxu1 %v11631_v17  ;;  %v2015_v0 = vunpack.c.l.s8.bf16 %v1709_v36  ;;  %v2016_v42 = vunpack.c.h.s8.bf16 %v1709_v36  ;;  %v9680_v58 = vcombine.high %v2024_v50, %v2028_v51  ;;  %v2032_v61 = vunpack.c.h.s8.bf16 %v1717_v5 }
 0x1ee   : > { %v9679_v13 = vcombine.low %v2024_v50, %v2028_v51  ;;  %v2047_v24 = vunpack.c.l.s8.bf16 %v1725_v16  ;;  %v2048_v26 = vunpack.c.h.s8.bf16 %v1725_v16  ;;  %v11655_v30 = vcombine.high %v11631_v17, %v11631_v17 }
 0x1ef   : > { %5006 = vmatpush1.bf16.msra.mxu0 %v9613_v6  ;;  %5170 = vmatpush1.bf16.msra.mxu1 %v9615_v41  ;;  %v9664_v6 = vcombine.high %v2008_v34, %v2012_v35  ;;  %v2019_v41 = vunpack.c.l.s8.bf16 %v1711_v37  ;;  %vm9330_vm8 = vcmask 9216  }
 0x1f0   : > { %5007 = vmatprep.subr.bf16.mxu0 %v9622_v47  ;;  %5171 = vmatprep.subr.bf16.mxu1 %v9624_v48  ;;  %v9663_v47 = vcombine.low %v2008_v34, %v2012_v35  ;;  %v2023_v48 = vunpack.c.l.s8.bf16 %v1713_v44 }
 0x1f1   : > { %v9670_v52 = vcombine.high %v2015_v0, %v2019_v41 }
 0x1f2   : > { %v9678_v56 = vcombine.high %v2023_v48, %v2027_v49  ;;  %v9677_v4 = vcombine.low %v2023_v48, %v2027_v49 }
 0x1f3   : > { %5008 = vmatpush1.bf16.msra.mxu0 %v9621_v7  ;;  %5172 = vmatpush1.bf16.msra.mxu1 %v9623_v53  ;;  %v9672_v7 = vcombine.high %v2016_v42, %v2020_v43  ;;  %v1719_v53 = vld [vmem:[%s11510_s7 + $0x210] sm:$0xff] }
 0x1f4   : > { %5009 = vmatprep.subr.bf16.mxu0 %v9630_v54  ;;  %5173 = vmatprep.subr.bf16.mxu1 %v9632_v55  ;;  %v9669_v54 = vcombine.low %v2015_v0, %v2019_v41  ;;  %v9671_v55 = vcombine.low %v2016_v42, %v2020_v43  ;;  %v2035_v60 = vunpack.c.l.s8.bf16 %v1719_v53  ;;  %v2036_v62 = vunpack.c.h.s8.bf16 %v1719_v53 }
 0x1f6   : > { %v9686_v12 = vcombine.high %v2031_v59, %v2035_v60  ;;  %v9688_v15 = vcombine.high %v2032_v61, %v2036_v62  ;;  %v9687_v21 = vcombine.low %v2032_v61, %v2036_v62 }
 0x1f7   : > { %5010 = vmatpush1.bf16.msra.mxu0 %v9629_v1  ;;  %5174 = vmatpush1.bf16.msra.mxu1 %v9631_v3  ;;  %v1721_v1 = vld [vmem:[%s11510_s7 + $0x220] sm:$0xff]  ;;  %v1723_v3 = vld [vmem:[%s11510_s7 + $0x230] sm:$0xff] }
 0x1f8   : > { %5011 = vmatprep.subr.bf16.mxu0 %v9638_v9  ;;  %5175 = vmatprep.subr.bf16.mxu1 %v9640_v10  ;;  %v2039_v8 = vunpack.c.l.s8.bf16 %v1721_v1  ;;  %v2043_v9 = vunpack.c.l.s8.bf16 %v1723_v3  ;;  %v2040_v10 = vunpack.c.h.s8.bf16 %v1721_v1  ;;  %v2044_v11 = vunpack.c.h.s8.bf16 %v1723_v3 }
 0x1fa   : > { %v9696_v23 = vcombine.high %v2040_v10, %v2044_v11  ;;  %v9695_v31 = vcombine.low %v2040_v10, %v2044_v11 }
 0x1fb   : > { %5012 = vmatpush1.bf16.msra.mxu0 %v9637_v18  ;;  %5176 = vmatpush1.bf16.msra.mxu1 %v9639_v19  ;;  %v1727_v18 = vld [vmem:[%s11510_s7 + $0x250] sm:$0xff]  ;;  %v11649_v19 = vrot.slane %v11624_v2, %v11620_v63  ;;  %v9693_v2 = vcombine.low %v2039_v8, %v2043_v9 }
 0x1fc   : > { %5013 = vmatprep.subr.bf16.mxu0 %v9646_v20  ;;  %5177 = vmatprep.subr.bf16.mxu1 %v9648_v22  ;;  %v9685_v20 = vcombine.low %v2031_v59, %v2035_v60  ;;  %v9694_v22 = vcombine.high %v2039_v8, %v2043_v9  ;;  %v2051_v25 = vunpack.c.l.s8.bf16 %v1727_v18  ;;  %v2052_v27 = vunpack.c.h.s8.bf16 %v1727_v18 }
 0x1fe   : > { %v9702_v34 = vcombine.high %v2047_v24, %v2051_v25  ;;  %v9704_v35 = vcombine.high %v2048_v26, %v2052_v27  ;;  %v9703_v0 = vcombine.low %v2048_v26, %v2052_v27 }
 0x1ff   : > { %5014 = vmatpush1.bf16.msra.mxu0 %v9645_v28  ;;  %5178 = vmatpush1.bf16.msra.mxu1 %v9647_v29  ;;  %v1729_v28 = vld [vmem:[%s11510_s7 + $0x260] sm:$0xff]  ;;  %v1731_v29 = vld [vmem:[%s11510_s7 + $0x270] sm:$0xff] }
 0x200   : > { %5015 = vmatprep.subr.bf16.mxu0 %v9654_v32  ;;  %5179 = vmatprep.subr.bf16.mxu1 %v9656_v33  ;;  %v2055_v32 = vunpack.c.l.s8.bf16 %v1729_v28  ;;  %v2059_v33 = vunpack.c.l.s8.bf16 %v1731_v29  ;;  %v2056_v36 = vunpack.c.h.s8.bf16 %v1729_v28  ;;  %v2060_v37 = vunpack.c.h.s8.bf16 %v1731_v29 }
 0x202   : > { %v9712_v42 = vcombine.high %v2056_v36, %v2060_v37  ;;  %v9709_v48 = vcombine.low %v2055_v32, %v2059_v33  ;;  %v9711_v49 = vcombine.low %v2056_v36, %v2060_v37 }
 0x203   : > { %5016 = vmatpush1.bf16.msra.mxu0 %v9653_v38  ;;  %5180 = vmatpush1.bf16.msra.mxu1 %v9655_v39  ;;  %v1733_v38 = vld [vmem:[%s11510_s7 + $0x280] sm:$0xff]  ;;  %v1735_v39 = vld [vmem:[%s11510_s7 + $0x290] sm:$0xff] }
 0x204   : > { %5017 = vmatprep.subr.bf16.mxu0 %v9662_v40  ;;  %5181 = vmatprep.subr.bf16.mxu1 %v9664_v6  ;;  %v9701_v40 = vcombine.low %v2047_v24, %v2051_v25  ;;  %v9710_v6 = vcombine.high %v2055_v32, %v2059_v33  ;;  %v2063_v41 = vunpack.c.l.s8.bf16 %v1733_v38  ;;  %v2067_v43 = vunpack.c.l.s8.bf16 %v1735_v39 }
 0x205   : > { %v2064_v44 = vunpack.c.h.s8.bf16 %v1733_v38  ;;  %v2068_v45 = vunpack.c.h.s8.bf16 %v1735_v39 }
 0x207   : > { %5018 = vmatpush1.bf16.msra.mxu0 %v9661_v46  ;;  %5182 = vmatpush1.bf16.msra.mxu1 %v9663_v47  ;;  %v1737_v46 = vld [vmem:[%s11510_s7 + $0x2a0] sm:$0xff]  ;;  %v1739_v47 = vld [vmem:[%s11510_s7 + $0x2b0] sm:$0xff] }
 0x208   : > { %5019 = vmatprep.subr.bf16.mxu0 %v9670_v52  ;;  %5183 = vmatprep.subr.bf16.mxu1 %v9672_v7  ;;  %v2071_v50 = vunpack.c.l.s8.bf16 %v1737_v46  ;;  %v2075_v51 = vunpack.c.l.s8.bf16 %v1739_v47  ;;  %v9718_v52 = vcombine.high %v2063_v41, %v2067_v43  ;;  %v9720_v7 = vcombine.high %v2064_v44, %v2068_v45 }
 0x209   : > { %v2072_v5 = vunpack.c.h.s8.bf16 %v1737_v46  ;;  %v2076_v53 = vunpack.c.h.s8.bf16 %v1739_v47 }
 0x20a   : > { %v9726_v59 = vcombine.high %v2071_v50, %v2075_v51  ;;  %v9725_v8 = vcombine.low %v2071_v50, %v2075_v51 }
 0x20b   : > { %5020 = vmatpush1.bf16.msra.mxu0 %v9669_v54  ;;  %5184 = vmatpush1.bf16.msra.mxu1 %v9671_v55  ;;  %v1741_v54 = vld [vmem:[%s11510_s7 + $0x2c0] sm:$0xff]  ;;  %v1743_v55 = vld [vmem:[%s11510_s7 + $0x2d0] sm:$0xff]  ;;  %v9728_v61 = vcombine.high %v2072_v5, %v2076_v53  ;;  %v9727_v9 = vcombine.low %v2072_v5, %v2076_v53 }
 0x20c   : > { %5021 = vmatprep.subr.bf16.mxu0 %v9678_v56  ;;  %5185 = vmatprep.subr.bf16.mxu1 %v9680_v58  ;;  %v9717_v56 = vcombine.low %v2063_v41, %v2067_v43  ;;  %v9719_v58 = vcombine.low %v2064_v44, %v2068_v45  ;;  %v2079_v60 = vunpack.c.l.s8.bf16 %v1741_v54  ;;  %v2083_v62 = vunpack.c.l.s8.bf16 %v1743_v55 }
 0x20d   : > { %v2080_v1 = vunpack.c.h.s8.bf16 %v1741_v54  ;;  %v2084_v3 = vunpack.c.h.s8.bf16 %v1743_v55 }
 0x20f   : > { %5022 = vmatpush1.bf16.msra.mxu0 %v9677_v4  ;;  %5186 = vmatpush1.bf16.msra.mxu1 %v9679_v13  ;;  %v1745_v4 = vld [vmem:[%s11510_s7 + $0x2e0] sm:$0xff]  ;;  %v1747_v13 = vld [vmem:[%s11510_s7 + $0x2f0] sm:$0xff] }
 0x210   : > { %5032 = vmatprep.subr.bf16.mxu0 %v9686_v12  ;;  %5196 = vmatprep.subr.bf16.mxu1 %v9688_v15  ;;  %v2087_v10 = vunpack.c.l.s8.bf16 %v1745_v4  ;;  %v2091_v11 = vunpack.c.l.s8.bf16 %v1747_v13  ;;  %v9734_v12 = vcombine.high %v2079_v60, %v2083_v62  ;;  %v9736_v15 = vcombine.high %v2080_v1, %v2084_v3 }
 0x211   : > { %v2088_v16 = vunpack.c.h.s8.bf16 %v1745_v4  ;;  %v2092_v18 = vunpack.c.h.s8.bf16 %v1747_v13 }
 0x212   : > { %5024 = vmatmul.mubr.bf16.vlgmr.msra.gmra.mrb[0].mxu0 %v11649_v19  ;;  %5188 = vmatmul.mubr.bf16.vlgmr.msra.gmra.mrb[0].mxu1 %v11649_v19  ;;  %v9742_v24 = vcombine.high %v2087_v10, %v2091_v11  ;;  %v9741_v32 = vcombine.low %v2087_v10, %v2091_v11 }
 0x213   : > { %5033 = vmatpush1.bf16.msra.mxu0 %v9685_v20  ;;  %5197 = vmatpush1.bf16.msra.mxu1 %v9687_v21  ;;  %v1749_v20 = vld [vmem:[%s11510_s7 + $0x300] sm:$0xff]  ;;  %v1751_v21 = vld [vmem:[%s11510_s7 + $0x310] sm:$0xff]  ;;  %v9744_v26 = vcombine.high %v2088_v16, %v2092_v18  ;;  %v9743_v33 = vcombine.low %v2088_v16, %v2092_v18 }
 0x214   : > { %5034 = vmatprep.subr.bf16.mxu0 %v9694_v22  ;;  %5198 = vmatprep.subr.bf16.mxu1 %v9696_v23  ;;  %v9733_v22 = vcombine.low %v2079_v60, %v2083_v62  ;;  %v9735_v23 = vcombine.low %v2080_v1, %v2084_v3  ;;  %v2095_v25 = vunpack.c.l.s8.bf16 %v1749_v20  ;;  %v2099_v27 = vunpack.c.l.s8.bf16 %v1751_v21 }
 0x215   : > { %5064 = vmatprep.mubr.bf16.mxu0 %v11655_v30  ;;  %5228 = vmatprep.mubr.bf16.mxu1 %v11655_v30  ;;  %v2096_v28 = vunpack.c.h.s8.bf16 %v1749_v20  ;;  %v2100_v29 = vunpack.c.h.s8.bf16 %v1751_v21 }
 0x216   : > { %v9750_v36 = vcombine.high %v2095_v25, %v2099_v27 }
 0x217   : > { %5035 = vmatpush1.bf16.msra.mxu0 %v9693_v2  ;;  %5199 = vmatpush1.bf16.msra.mxu1 %v9695_v31  ;;  %v1753_v2 = vld [vmem:[%s11510_s7 + $0x320] sm:$0xff]  ;;  %v1755_v31 = vld [vmem:[%s11510_s7 + $0x330] sm:$0xff]  ;;  %v9752_v37 = vcombine.high %v2096_v28, %v2100_v29  ;;  %v9751_v41 = vcombine.low %v2096_v28, %v2100_v29 }
 0x218   : > { %5036 = vmatprep.subr.bf16.mxu0 %v9702_v34  ;;  %5200 = vmatprep.subr.bf16.mxu1 %v9704_v35  ;;  %v2103_v34 = vunpack.c.l.s8.bf16 %v1753_v2  ;;  %v2107_v35 = vunpack.c.l.s8.bf16 %v1755_v31  ;;  %v2104_v38 = vunpack.c.h.s8.bf16 %v1753_v2  ;;  %v2108_v39 = vunpack.c.h.s8.bf16 %v1755_v31 }
 0x21a   : > { %v9760_v44 = vcombine.high %v2104_v38, %v2108_v39  ;;  %v9757_v50 = vcombine.low %v2103_v34, %v2107_v35  ;;  %v9759_v51 = vcombine.low %v2104_v38, %v2108_v39 }
 0x21b   : > { %5037 = vmatpush1.bf16.msra.mxu0 %v9701_v40  ;;  %5201 = vmatpush1.bf16.msra.mxu1 %v9703_v0  ;;  %v1757_v40 = vld [vmem:[%s11510_s7 + $0x340] sm:$0xff]  ;;  %v1759_v0 = vld [vmem:[%s11510_s7 + $0x350] sm:$0xff] }
 0x21c   : > { %5038 = vmatprep.subr.bf16.mxu0 %v9710_v6  ;;  %5202 = vmatprep.subr.bf16.mxu1 %v9712_v42  ;;  %v9749_v6 = vcombine.low %v2095_v25, %v2099_v27  ;;  %v9758_v42 = vcombine.high %v2103_v34, %v2107_v35  ;;  %v2111_v43 = vunpack.c.l.s8.bf16 %v1757_v40  ;;  %v2115_v45 = vunpack.c.l.s8.bf16 %v1759_v0 }
 0x21d   : > { %v2112_v46 = vunpack.c.h.s8.bf16 %v1757_v40  ;;  %v2116_v47 = vunpack.c.h.s8.bf16 %v1759_v0 }
 0x21e   : > { %v9766_v5 = vcombine.high %v2111_v43, %v2115_v45 }
 0x21f   : > { %5039 = vmatpush1.bf16.msra.mxu0 %v9709_v48  ;;  %5203 = vmatpush1.bf16.msra.mxu1 %v9711_v49  ;;  %v1761_v48 = vld [vmem:[%s11510_s7 + $0x360] sm:$0xff]  ;;  %v1763_v49 = vld [vmem:[%s11510_s7 + $0x370] sm:$0xff]  ;;  %v9768_v53 = vcombine.high %v2112_v46, %v2116_v47  ;;  %v9767_v60 = vcombine.low %v2112_v46, %v2116_v47 }
 0x220   : > { %5040 = vmatprep.subr.bf16.mxu0 %v9718_v52  ;;  %5204 = vmatprep.subr.bf16.mxu1 %v9720_v7  ;;  %v2119_v52 = vunpack.c.l.s8.bf16 %v1761_v48  ;;  %v2123_v7 = vunpack.c.l.s8.bf16 %v1763_v49  ;;  %v2120_v54 = vunpack.c.h.s8.bf16 %v1761_v48  ;;  %v2124_v55 = vunpack.c.h.s8.bf16 %v1763_v49 }
 0x222   : > { %v9776_v1 = vcombine.high %v2120_v54, %v2124_v55  ;;  %v9773_v10 = vcombine.low %v2119_v52, %v2123_v7  ;;  %v9775_v11 = vcombine.low %v2120_v54, %v2124_v55 }
 0x223   : > { %5041 = vmatpush1.bf16.msra.mxu0 %v9717_v56  ;;  %5205 = vmatpush1.bf16.msra.mxu1 %v9719_v58  ;;  %v1765_v56 = vld [vmem:[%s11510_s7 + $0x380] sm:$0xff]  ;;  %v1767_v58 = vld [vmem:[%s11510_s7 + $0x390] sm:$0xff] }
 0x224   : > { %5042 = vmatprep.subr.bf16.mxu0 %v9726_v59  ;;  %5206 = vmatprep.subr.bf16.mxu1 %v9728_v61  ;;  %v9765_v59 = vcombine.low %v2111_v43, %v2115_v45  ;;  %v9774_v61 = vcombine.high %v2119_v52, %v2123_v7  ;;  %v2127_v62 = vunpack.c.l.s8.bf16 %v1765_v56  ;;  %v2131_v3 = vunpack.c.l.s8.bf16 %v1767_v58  ;;  %v1787_v52 = vld [vmem:[%s11510_s7 + $0x430] sm:$0xff] }
 0x225   : > { %v2128_v4 = vunpack.c.h.s8.bf16 %v1765_v56  ;;  %v2132_v13 = vunpack.c.h.s8.bf16 %v1767_v58  ;;  %v2171_v54 = vunpack.c.l.s8.bf16 %v1787_v52 }
 0x226   : > { %v9782_v16 = vcombine.high %v2127_v62, %v2131_v3 }
 0x227   : > { %5043 = vmatpush1.bf16.msra.mxu0 %v9725_v8  ;;  %5207 = vmatpush1.bf16.msra.mxu1 %v9727_v9  ;;  %v1769_v8 = vld [vmem:[%s11510_s7 + $0x3a0] sm:$0xff]  ;;  %v1771_v9 = vld [vmem:[%s11510_s7 + $0x3b0] sm:$0xff]  ;;  %v9784_v18 = vcombine.high %v2128_v4, %v2132_v13  ;;  %v9783_v25 = vcombine.low %v2128_v4, %v2132_v13 }
 0x228   : > { %5044 = vmatprep.subr.bf16.mxu0 %v9734_v12  ;;  %5208 = vmatprep.subr.bf16.mxu1 %v9736_v15  ;;  %v2135_v12 = vunpack.c.l.s8.bf16 %v1769_v8  ;;  %v2139_v15 = vunpack.c.l.s8.bf16 %v1771_v9  ;;  %v2136_v20 = vunpack.c.h.s8.bf16 %v1769_v8  ;;  %v2140_v21 = vunpack.c.h.s8.bf16 %v1771_v9 }
 0x22a   : > { %v9792_v28 = vcombine.high %v2136_v20, %v2140_v21  ;;  %v9789_v34 = vcombine.low %v2135_v12, %v2139_v15  ;;  %v9791_v35 = vcombine.low %v2136_v20, %v2140_v21 }
 0x22b   : > { %5045 = vmatpush1.bf16.msra.mxu0 %v9733_v22  ;;  %5209 = vmatpush1.bf16.msra.mxu1 %v9735_v23  ;;  %v1773_v22 = vld [vmem:[%s11510_s7 + $0x3c0] sm:$0xff]  ;;  %v1775_v23 = vld [vmem:[%s11510_s7 + $0x3d0] sm:$0xff] }
 0x22c   : > { %5046 = vmatprep.subr.bf16.mxu0 %v9742_v24  ;;  %5210 = vmatprep.subr.bf16.mxu1 %v9744_v26  ;;  %v9781_v24 = vcombine.low %v2127_v62, %v2131_v3  ;;  %v9790_v26 = vcombine.high %v2135_v12, %v2139_v15  ;;  %v2143_v27 = vunpack.c.l.s8.bf16 %v1773_v22  ;;  %v2147_v29 = vunpack.c.l.s8.bf16 %v1775_v23  ;;  %v1793_v15 = vld [vmem:[%s11510_s7 + $0x460] sm:$0xff] }
 0x22d   : > { %v2144_v2 = vunpack.c.h.s8.bf16 %v1773_v22  ;;  %v2148_v31 = vunpack.c.h.s8.bf16 %v1775_v23  ;;  %v2183_v22 = vunpack.c.l.s8.bf16 %v1793_v15 }
 0x22e   : > { %v9798_v38 = vcombine.high %v2143_v27, %v2147_v29  ;;  %v9797_v43 = vcombine.low %v2143_v27, %v2147_v29  ;;  %v1799_v29 = vld [vmem:[%s11510_s7 + $0x490] sm:$0xff] }
 0x22f   : > { %5047 = vmatpush1.bf16.msra.mxu0 %v9741_v32  ;;  %5211 = vmatpush1.bf16.msra.mxu1 %v9743_v33  ;;  %v1777_v32 = vld [vmem:[%s11510_s7 + $0x3e0] sm:$0xff]  ;;  %v1779_v33 = vld [vmem:[%s11510_s7 + $0x3f0] sm:$0xff]  ;;  %v9800_v39 = vcombine.high %v2144_v2, %v2148_v31 }
 0x230   : > { %5048 = vmatprep.subr.bf16.mxu0 %v9750_v36  ;;  %5212 = vmatprep.subr.bf16.mxu1 %v9752_v37  ;;  %v2151_v36 = vunpack.c.l.s8.bf16 %v1777_v32  ;;  %v2155_v37 = vunpack.c.l.s8.bf16 %v1779_v33  ;;  %v2152_v40 = vunpack.c.h.s8.bf16 %v1777_v32  ;;  %v2156_v0 = vunpack.c.h.s8.bf16 %v1779_v33 }
 0x232   : > { %v9806_v45 = vcombine.high %v2151_v36, %v2155_v37  ;;  %v9808_v47 = vcombine.high %v2152_v40, %v2156_v0 }
 0x233   : > { %5049 = vmatpush1.bf16.msra.mxu0 %v9749_v6  ;;  %5213 = vmatpush1.bf16.msra.mxu1 %v9751_v41  ;;  %v1781_v6 = vld [vmem:[%s11510_s7 + $0x400] sm:$0xff]  ;;  %v1783_v41 = vld [vmem:[%s11510_s7 + $0x410] sm:$0xff] }
 0x234   : > { %5050 = vmatprep.subr.bf16.mxu0 %v9758_v42  ;;  %5214 = vmatprep.subr.bf16.mxu1 %v9760_v44  ;;  %v2406_v42 = vcombine.high %v11615_v57, %v11615_v57  ;;  %v9799_v44 = vcombine.low %v2144_v2, %v2148_v31  ;;  %v2159_v46 = vunpack.c.l.s8.bf16 %v1781_v6  ;;  %v2163_v48 = vunpack.c.l.s8.bf16 %v1783_v41 }
 0x235   : > { %v2160_v49 = vunpack.c.h.s8.bf16 %v1781_v6  ;;  %v9805_v57 = vcombine.low %v2151_v36, %v2155_v37  ;;  %v2196_v37 = vunpack.c.h.s8.bf16 %v1799_v29 }
 0x236   : > { %v11692_v7 = vrot.slane %v2406_v42, %v11620_v63  ;;  %v9814_v55 = vcombine.high %v2159_v46, %v2163_v48  ;;  %v9813_v3 = vcombine.low %v2159_v46, %v2163_v48  ;;  %v1805_v46 = vld [vmem:[%s11510_s7 + $0x4c0] sm:$0xff] }
 0x237   : > { %5051 = vmatpush1.bf16.msra.mxu0 %v9757_v50  ;;  %5215 = vmatpush1.bf16.msra.mxu1 %v9759_v51  ;;  %v2164_v50 = vunpack.c.h.s8.bf16 %v1783_v41  ;;  %v1785_v51 = vld [vmem:[%s11510_s7 + $0x420] sm:$0xff] }
 0x238   : > { %5052 = vmatprep.subr.bf16.mxu0 %v9766_v5  ;;  %5216 = vmatprep.subr.bf16.mxu1 %v9768_v53  ;;  %v9807_v5 = vcombine.low %v2152_v40, %v2156_v0  ;;  %v2167_v53 = vunpack.c.l.s8.bf16 %v1785_v51  ;;  %v2168_v58 = vunpack.c.h.s8.bf16 %v1785_v51  ;;  %v2422_v62 = vcombine.high %v11692_v7, %v11692_v7 }
 0x239   : > { %v9816_v56 = vcombine.high %v2160_v49, %v2164_v50  ;;  %v9815_v4 = vcombine.low %v2160_v49, %v2164_v50  ;;  %v2207_v51 = vunpack.c.l.s8.bf16 %v1805_v46 }
 0x23a   : > { %v9822_v13 = vcombine.high %v2167_v53, %v2171_v54  ;;  %v9821_v20 = vcombine.low %v2167_v53, %v2171_v54  ;;  %v1809_v54 = vld [vmem:[%s11510_s7 + $0x4e0] sm:$0xff] }
 0x23b   : > { %5053 = vmatpush1.bf16.msra.mxu0 %v9765_v59  ;;  %5217 = vmatpush1.bf16.msra.mxu1 %v9767_v60  ;;  %v2172_v59 = vunpack.c.h.s8.bf16 %v1787_v52  ;;  %v1789_v60 = vld [vmem:[%s11510_s7 + $0x440] sm:$0xff] }
 0x23c   : > { %5054 = vmatprep.subr.bf16.mxu0 %v9774_v61  ;;  %5218 = vmatprep.subr.bf16.mxu1 %v9776_v1  ;;  %v1791_v61 = vld [vmem:[%s11510_s7 + $0x450] sm:$0xff]  ;;  %v11700_v1 = vcombine.high %v11649_v19, %v11649_v19  ;;  %v2175_v8 = vunpack.c.l.s8.bf16 %v1789_v60 }
 0x23d   : > { %v9824_v9 = vcombine.high %v2168_v58, %v2172_v59  ;;  %v2180_v12 = vunpack.c.h.s8.bf16 %v1791_v61  ;;  %v9823_v21 = vcombine.low %v2168_v58, %v2172_v59  ;;  %v2215_v59 = vunpack.c.l.s8.bf16 %v1809_v54 }
 0x23f   : > { %5055 = vmatpush1.bf16.msra.mxu0 %v9773_v10  ;;  %5219 = vmatpush1.bf16.msra.mxu1 %v9775_v11  ;;  %v2179_v10 = vunpack.c.l.s8.bf16 %v1791_v61  ;;  %v2176_v11 = vunpack.c.h.s8.bf16 %v1789_v60 }
 0x240   : > { %5056 = vmatprep.subr.bf16.mxu0 %v9782_v16  ;;  %5220 = vmatprep.subr.bf16.mxu1 %v9784_v18  ;;  %v1795_v16 = vld [vmem:[%s11510_s7 + $0x470] sm:$0xff]  ;;  %v11705_v18 = vrot.slane %v2422_v62, %v11620_v63 }
 0x241   : > { %v2187_v23 = vunpack.c.l.s8.bf16 %v1795_v16  ;;  %v2188_v27 = vunpack.c.h.s8.bf16 %v1795_v16  ;;  %v9829_v2 = vcombine.low %v2175_v8, %v2179_v10  ;;  %v9831_v31 = vcombine.low %v2176_v11, %v2180_v12 }
 0x243   : > { %5057 = vmatpush1.bf16.msra.mxu0 %v9781_v24  ;;  %5221 = vmatpush1.bf16.msra.mxu1 %v9783_v25  ;;  %v9830_v24 = vcombine.high %v2175_v8, %v2179_v10  ;;  %v9832_v25 = vcombine.high %v2176_v11, %v2180_v12  ;;  %v9838_v32 = vcombine.high %v2183_v22, %v2187_v23  ;;  %v1815_v8 = vld [vmem:[%s11510_s7 + $0x510] sm:$0xff] }
 0x244   : > { %5058 = vmatprep.subr.bf16.mxu0 %v9790_v26  ;;  %5222 = vmatprep.subr.bf16.mxu1 %v9792_v28  ;;  %v2184_v26 = vunpack.c.h.s8.bf16 %v1793_v15  ;;  %v1797_v28 = vld [vmem:[%s11510_s7 + $0x480] sm:$0xff]  ;;  %v9837_v40 = vcombine.low %v2183_v22, %v2187_v23  ;;  %v2227_v16 = vunpack.c.l.s8.bf16 %v1815_v8  ;;  %v1819_v23 = vld [vmem:[%s11510_s7 + $0x530] sm:$0xff] }
 0x245   : > { %v2191_v33 = vunpack.c.l.s8.bf16 %v1797_v28  ;;  %v2192_v36 = vunpack.c.h.s8.bf16 %v1797_v28  ;;  %v1817_v22 = vld [vmem:[%s11510_s7 + $0x520] sm:$0xff] }
 0x246   : > { %v9839_v0 = vcombine.low %v2184_v26, %v2188_v27 }
 0x247   : > { %5059 = vmatpush1.bf16.msra.mxu0 %v9789_v34  ;;  %5223 = vmatpush1.bf16.msra.mxu1 %v9791_v35  ;;  %v9840_v34 = vcombine.high %v2184_v26, %v2188_v27  ;;  %v2195_v35 = vunpack.c.l.s8.bf16 %v1799_v29  ;;  %v9847_v49 = vcombine.low %v2192_v36, %v2196_v37  ;;  %v2231_v26 = vunpack.c.l.s8.bf16 %v1817_v22 }
 0x248   : > { %5060 = vmatprep.subr.bf16.mxu0 %v9798_v38  ;;  %5224 = vmatprep.subr.bf16.mxu1 %v9800_v39  ;;  %v1801_v38 = vld [vmem:[%s11510_s7 + $0x4a0] sm:$0xff]  ;;  %v1803_v39 = vld [vmem:[%s11510_s7 + $0x4b0] sm:$0xff]  ;;  %v2235_v27 = vunpack.c.l.s8.bf16 %v1819_v23 }
 0x249   : > { %v2199_v6 = vunpack.c.l.s8.bf16 %v1801_v38  ;;  %v2203_v41 = vunpack.c.l.s8.bf16 %v1803_v39  ;;  %v9846_v42 = vcombine.high %v2191_v33, %v2195_v35  ;;  %v9845_v48 = vcombine.low %v2191_v33, %v2195_v35  ;;  %v1823_v33 = vld [vmem:[%s11510_s7 + $0x550] sm:$0xff] }
 0x24b   : > { %5061 = vmatpush1.bf16.msra.mxu0 %v9797_v43  ;;  %5225 = vmatpush1.bf16.msra.mxu1 %v9799_v44  ;;  %v9848_v43 = vcombine.high %v2192_v36, %v2196_v37  ;;  %v2200_v44 = vunpack.c.h.s8.bf16 %v1801_v38  ;;  %v9854_v50 = vcombine.high %v2199_v6, %v2203_v41  ;;  %v9886_v36 = vcombine.high %v2231_v26, %v2235_v27 }
 0x24c   : > { %5062 = vmatprep.subr.bf16.mxu0 %v9806_v45  ;;  %5226 = vmatprep.subr.bf16.mxu1 %v9808_v47  ;;  %v2204_v45 = vunpack.c.h.s8.bf16 %v1803_v39  ;;  %v1807_v47 = vld [vmem:[%s11510_s7 + $0x4d0] sm:$0xff]  ;;  %v2243_v39 = vunpack.c.l.s8.bf16 %v1823_v33 }
 0x24d   : > { %v2212_v53 = vunpack.c.h.s8.bf16 %v1807_v47 }
 0x24e   : > { %v9856_v52 = vcombine.high %v2200_v44, %v2204_v45  ;;  %v9855_v58 = vcombine.low %v2200_v44, %v2204_v45 }
 0x24f   : > { %5063 = vmatpush1.bf16.msra.mxu0 %v9805_v57  ;;  %5227 = vmatpush1.bf16.msra.mxu1 %v9807_v5  ;;  %v2211_v57 = vunpack.c.l.s8.bf16 %v1807_v47  ;;  %v2208_v5 = vunpack.c.h.s8.bf16 %v1805_v46 }
 0x250   : > { %5073 = vmatprep.subr.bf16.mxu0 %v9814_v55  ;;  %5237 = vmatprep.subr.bf16.mxu1 %v9816_v56  ;;  %v1811_v55 = vld [vmem:[%s11510_s7 + $0x4f0] sm:$0xff]  ;;  %v9853_v56 = vcombine.low %v2199_v6, %v2203_v41  ;;  %v1825_v6 = vld [vmem:[%s11510_s7 + $0x560] sm:$0xff] }
 0x251   : > { %v2219_v60 = vunpack.c.l.s8.bf16 %v1811_v55  ;;  %v9862_v61 = vcombine.high %v2207_v51, %v2211_v57  ;;  %v9864_v62 = vcombine.high %v2208_v5, %v2212_v53  ;;  %v9863_v10 = vcombine.low %v2208_v5, %v2212_v53  ;;  %v1827_v41 = vld [vmem:[%s11510_s7 + $0x570] sm:$0xff] }
 0x252   : > { %5065 = vmatmul.mubr.bf16.vlgmr.msra.gmra.mrb[0].mxu0 %v11700_v1  ;;  %5229 = vmatmul.mubr.bf16.vlgmr.msra.gmra.mrb[0].mxu1 %v11700_v1  ;;  %v2247_v44 = vunpack.c.l.s8.bf16 %v1825_v6  ;;  %v2251_v45 = vunpack.c.l.s8.bf16 %v1827_v41 }
 0x253   : > { %5074 = vmatpush1.bf16.msra.mxu0 %v9813_v3  ;;  %5238 = vmatpush1.bf16.msra.mxu1 %v9815_v4  ;;  %v2216_v3 = vunpack.c.h.s8.bf16 %v1809_v54  ;;  %v2220_v4 = vunpack.c.h.s8.bf16 %v1811_v55  ;;  %v9870_v11 = vcombine.high %v2215_v59, %v2219_v60 }
 0x254   : > { %5075 = vmatprep.subr.bf16.mxu0 %v9822_v13  ;;  %5239 = vmatprep.subr.bf16.mxu1 %v9824_v9  ;;  %v1813_v13 = vld [vmem:[%s11510_s7 + $0x500] sm:$0xff]  ;;  %v9861_v9 = vcombine.low %v2207_v51, %v2211_v57  ;;  %v1831_v51 = vld [vmem:[%s11510_s7 + $0x590] sm:$0xff]  ;;  %v9902_v5 = vcombine.high %v2247_v44, %v2251_v45 }
 0x255   : > { %5105 = vmatprep.mubr.bf16.mxu0 %v11705_v18  ;;  %5269 = vmatprep.mubr.bf16.mxu1 %v11705_v18  ;;  %v2223_v12 = vunpack.c.l.s8.bf16 %v1813_v13  ;;  %v9872_v15 = vcombine.high %v2216_v3, %v2220_v4  ;;  %v2259_v55 = vunpack.c.l.s8.bf16 %v1831_v51 }
 0x257   : > { %5076 = vmatpush1.bf16.msra.mxu0 %v9821_v20  ;;  %5240 = vmatpush1.bf16.msra.mxu1 %v9823_v21  ;;  %v2224_v20 = vunpack.c.h.s8.bf16 %v1813_v13  ;;  %v2228_v21 = vunpack.c.h.s8.bf16 %v1815_v8  ;;  %v9878_v28 = vcombine.high %v2223_v12, %v2227_v16 }
 0x258   : > { %5077 = vmatprep.subr.bf16.mxu0 %v9830_v24  ;;  %5241 = vmatprep.subr.bf16.mxu1 %v9832_v25  ;;  %v9869_v24 = vcombine.low %v2215_v59, %v2219_v60  ;;  %v9871_v25 = vcombine.low %v2216_v3, %v2220_v4  ;;  %v1833_v59 = vld [vmem:[%s11510_s7 + $0x5a0] sm:$0xff]  ;;  %v1835_v60 = vld [vmem:[%s11510_s7 + $0x5b0] sm:$0xff] }
 0x259   : > { %v9880_v29 = vcombine.high %v2224_v20, %v2228_v21  ;;  %v9879_v35 = vcombine.low %v2224_v20, %v2228_v21  ;;  %v2263_v3 = vunpack.c.l.s8.bf16 %v1833_v59  ;;  %v2267_v4 = vunpack.c.l.s8.bf16 %v1835_v60 }
 0x25b   : > { %5078 = vmatpush1.bf16.msra.mxu0 %v9829_v2  ;;  %5242 = vmatpush1.bf16.msra.mxu1 %v9831_v31  ;;  %v2232_v2 = vunpack.c.h.s8.bf16 %v1817_v22  ;;  %v2236_v31 = vunpack.c.h.s8.bf16 %v1819_v23  ;;  %v9918_v20 = vcombine.high %v2263_v3, %v2267_v4 }
 0x25c   : > { %5079 = vmatprep.subr.bf16.mxu0 %v9838_v32  ;;  %5243 = vmatprep.subr.bf16.mxu1 %v9840_v34  ;;  %v1821_v32 = vld [vmem:[%s11510_s7 + $0x540] sm:$0xff]  ;;  %v9877_v34 = vcombine.low %v2223_v12, %v2227_v16  ;;  %v1839_v12 = vld [vmem:[%s11510_s7 + $0x5d0] sm:$0xff] }
 0x25d   : > { %v2239_v37 = vunpack.c.l.s8.bf16 %v1821_v32  ;;  %v9888_v38 = vcombine.high %v2232_v2, %v2236_v31  ;;  %v2275_v23 = vunpack.c.l.s8.bf16 %v1839_v12 }
 0x25f   : > { %5080 = vmatpush1.bf16.msra.mxu0 %v9837_v40  ;;  %5244 = vmatpush1.bf16.msra.mxu1 %v9839_v0  ;;  %v2240_v40 = vunpack.c.h.s8.bf16 %v1821_v32  ;;  %v2244_v0 = vunpack.c.h.s8.bf16 %v1823_v33  ;;  %v9894_v46 = vcombine.high %v2239_v37, %v2243_v39 }
 0x260   : > { %5081 = vmatprep.subr.bf16.mxu0 %v9846_v42  ;;  %5245 = vmatprep.subr.bf16.mxu1 %v9848_v43  ;;  %v9885_v42 = vcombine.low %v2231_v26, %v2235_v27  ;;  %v9887_v43 = vcombine.low %v2232_v2, %v2236_v31  ;;  %v1841_v26 = vld [vmem:[%s11510_s7 + $0x5e0] sm:$0xff]  ;;  %v1843_v27 = vld [vmem:[%s11510_s7 + $0x5f0] sm:$0xff] }
 0x261   : > { %v9896_v47 = vcombine.high %v2240_v40, %v2244_v0  ;;  %v9895_v57 = vcombine.low %v2240_v40, %v2244_v0  ;;  %v2279_v2 = vunpack.c.l.s8.bf16 %v1841_v26  ;;  %v2283_v31 = vunpack.c.l.s8.bf16 %v1843_v27 }
 0x263   : > { %5082 = vmatpush1.bf16.msra.mxu0 %v9845_v48  ;;  %5246 = vmatpush1.bf16.msra.mxu1 %v9847_v49  ;;  %v2248_v48 = vunpack.c.h.s8.bf16 %v1825_v6  ;;  %v2252_v49 = vunpack.c.h.s8.bf16 %v1827_v41  ;;  %v9934_v6 = vcombine.high %v2279_v2, %v2283_v31 }
 0x264   : > { %5083 = vmatprep.subr.bf16.mxu0 %v9854_v50  ;;  %5247 = vmatprep.subr.bf16.mxu1 %v9856_v52  ;;  %v1829_v50 = vld [vmem:[%s11510_s7 + $0x580] sm:$0xff]  ;;  %v9893_v52 = vcombine.low %v2239_v37, %v2243_v39  ;;  %v1847_v37 = vld [vmem:[%s11510_s7 + $0x610] sm:$0xff] }
 0x265   : > { %v2255_v53 = vunpack.c.l.s8.bf16 %v1829_v50  ;;  %v9904_v54 = vcombine.high %v2248_v48, %v2252_v49  ;;  %v2291_v0 = vunpack.c.l.s8.bf16 %v1847_v37 }
 0x267   : > { %5084 = vmatpush1.bf16.msra.mxu0 %v9853_v56  ;;  %5248 = vmatpush1.bf16.msra.mxu1 %v9855_v58  ;;  %v2256_v56 = vunpack.c.h.s8.bf16 %v1829_v50  ;;  %v2260_v58 = vunpack.c.h.s8.bf16 %v1831_v51  ;;  %v9910_v13 = vcombine.high %v2255_v53, %v2259_v55 }
 0x268   : > { %5085 = vmatprep.subr.bf16.mxu0 %v9862_v61  ;;  %5249 = vmatprep.subr.bf16.mxu1 %v9864_v62  ;;  %v9901_v61 = vcombine.low %v2247_v44, %v2251_v45  ;;  %v9903_v62 = vcombine.low %v2248_v48, %v2252_v49  ;;  %v1849_v44 = vld [vmem:[%s11510_s7 + $0x620] sm:$0xff]  ;;  %v1851_v45 = vld [vmem:[%s11510_s7 + $0x630] sm:$0xff] }
 0x269   : > { %v9912_v8 = vcombine.high %v2256_v56, %v2260_v58  ;;  %v9911_v16 = vcombine.low %v2256_v56, %v2260_v58  ;;  %v2295_v49 = vunpack.c.l.s8.bf16 %v1849_v44  ;;  %v2299_v51 = vunpack.c.l.s8.bf16 %v1851_v45 }
 0x26b   : > { %5086 = vmatpush1.bf16.msra.mxu0 %v9861_v9  ;;  %5250 = vmatpush1.bf16.msra.mxu1 %v9863_v10  ;;  %v2264_v9 = vunpack.c.h.s8.bf16 %v1833_v59  ;;  %v2268_v10 = vunpack.c.h.s8.bf16 %v1835_v60  ;;  %v9950_v60 = vcombine.high %v2295_v49, %v2299_v51 }
 0x26c   : > { %5087 = vmatprep.subr.bf16.mxu0 %v9870_v11  ;;  %5251 = vmatprep.subr.bf16.mxu1 %v9872_v15  ;;  %v1837_v11 = vld [vmem:[%s11510_s7 + $0x5c0] sm:$0xff]  ;;  %v9909_v15 = vcombine.low %v2255_v53, %v2259_v55  ;;  %v1855_v53 = vld [vmem:[%s11510_s7 + $0x650] sm:$0xff] }
 0x26d   : > { %v2271_v21 = vunpack.c.l.s8.bf16 %v1837_v11  ;;  %v9920_v22 = vcombine.high %v2264_v9, %v2268_v10  ;;  %v2307_v59 = vunpack.c.l.s8.bf16 %v1855_v53 }
 0x26f   : > { %5088 = vmatpush1.bf16.msra.mxu0 %v9869_v24  ;;  %5252 = vmatpush1.bf16.msra.mxu1 %v9871_v25  ;;  %v2272_v24 = vunpack.c.h.s8.bf16 %v1837_v11  ;;  %v2276_v25 = vunpack.c.h.s8.bf16 %v1839_v12  ;;  %v9926_v32 = vcombine.high %v2271_v21, %v2275_v23 }
 0x270   : > { %5089 = vmatprep.subr.bf16.mxu0 %v9878_v28  ;;  %5253 = vmatprep.subr.bf16.mxu1 %v9880_v29  ;;  %v9917_v28 = vcombine.low %v2263_v3, %v2267_v4  ;;  %v9919_v29 = vcombine.low %v2264_v9, %v2268_v10  ;;  %v2308_v3 = vunpack.c.h.s8.bf16 %v1855_v53  ;;  %v1857_v4 = vld [vmem:[%s11510_s7 + $0x660] sm:$0xff] }
 0x271   : > { %v9928_v33 = vcombine.high %v2272_v24, %v2276_v25  ;;  %v9927_v39 = vcombine.low %v2272_v24, %v2276_v25  ;;  %v2311_v11 = vunpack.c.l.s8.bf16 %v1857_v4 }
 0x273   : > { %5090 = vmatpush1.bf16.msra.mxu0 %v9877_v34  ;;  %5254 = vmatpush1.bf16.msra.mxu1 %v9879_v35  ;;  %v2280_v34 = vunpack.c.h.s8.bf16 %v1841_v26  ;;  %v2284_v35 = vunpack.c.h.s8.bf16 %v1843_v27 }
 0x274   : > { %5091 = vmatprep.subr.bf16.mxu0 %v9886_v36  ;;  %5255 = vmatprep.subr.bf16.mxu1 %v9888_v38  ;;  %v1845_v36 = vld [vmem:[%s11510_s7 + $0x600] sm:$0xff]  ;;  %v9925_v38 = vcombine.low %v2271_v21, %v2275_v23 }
 0x275   : > { %v2287_v40 = vunpack.c.l.s8.bf16 %v1845_v36  ;;  %v9936_v41 = vcombine.high %v2280_v34, %v2284_v35  ;;  %v1861_v21 = vld [vmem:[%s11510_s7 + $0x680] sm:$0xff] }
 0x276   : > { %v2319_v25 = vunpack.c.l.s8.bf16 %v1861_v21 }
 0x277   : > { %5092 = vmatpush1.bf16.msra.mxu0 %v9885_v42  ;;  %5256 = vmatpush1.bf16.msra.mxu1 %v9887_v43  ;;  %v2288_v42 = vunpack.c.h.s8.bf16 %v1845_v36  ;;  %v2292_v43 = vunpack.c.h.s8.bf16 %v1847_v37  ;;  %v9942_v48 = vcombine.high %v2287_v40, %v2291_v0  ;;  %v9941_v55 = vcombine.low %v2287_v40, %v2291_v0  ;;  %v1869_v0 = vld [vmem:[%s11510_s7 + $0x6c0] sm:$0xff] }
 0x278   : > { %5093 = vmatprep.subr.bf16.mxu0 %v9894_v46  ;;  %5257 = vmatprep.subr.bf16.mxu1 %v9896_v47  ;;  %v9933_v46 = vcombine.low %v2279_v2, %v2283_v31  ;;  %v9935_v47 = vcombine.low %v2280_v34, %v2284_v35  ;;  %v1865_v31 = vld [vmem:[%s11510_s7 + $0x6a0] sm:$0xff] }
 0x279   : > { %v9944_v50 = vcombine.high %v2288_v42, %v2292_v43  ;;  %v9943_v56 = vcombine.low %v2288_v42, %v2292_v43  ;;  %v2327_v36 = vunpack.c.l.s8.bf16 %v1865_v31  ;;  %v2335_v43 = vunpack.c.l.s8.bf16 %v1869_v0 }
 0x27b   : > { %5094 = vmatpush1.bf16.msra.mxu0 %v9893_v52  ;;  %5258 = vmatpush1.bf16.msra.mxu1 %v9895_v57  ;;  %v2296_v52 = vunpack.c.h.s8.bf16 %v1849_v44  ;;  %v2300_v57 = vunpack.c.h.s8.bf16 %v1851_v45 }
 0x27c   : > { %5095 = vmatprep.subr.bf16.mxu0 %v9902_v5  ;;  %5259 = vmatprep.subr.bf16.mxu1 %v9904_v54  ;;  %v1853_v5 = vld [vmem:[%s11510_s7 + $0x640] sm:$0xff]  ;;  %v11743_v54 = vrot.slane %v11692_v7, %v11620_v63  ;;  %v9949_v7 = vcombine.low %v2295_v49, %v2299_v51 }
 0x27d   : > { %v2303_v58 = vunpack.c.l.s8.bf16 %v1853_v5  ;;  %v9951_v9 = vcombine.low %v2296_v52, %v2300_v57  ;;  %v1873_v49 = vld [vmem:[%s11510_s7 + $0x6e0] sm:$0xff] }
 0x27f   : > { %5096 = vmatpush1.bf16.msra.mxu0 %v9901_v61  ;;  %5260 = vmatpush1.bf16.msra.mxu1 %v9903_v62  ;;  %v9952_v61 = vcombine.high %v2296_v52, %v2300_v57  ;;  %v2304_v62 = vunpack.c.h.s8.bf16 %v1853_v5  ;;  %v9958_v10 = vcombine.high %v2303_v58, %v2307_v59  ;;  %v9957_v23 = vcombine.low %v2303_v58, %v2307_v59  ;;  %v1877_v59 = vld [vmem:[%s11510_s7 + $0x700] sm:$0xff] }
 0x280   : > { %5097 = vmatprep.subr.bf16.mxu0 %v9910_v13  ;;  %5261 = vmatprep.subr.bf16.mxu1 %v9912_v8  ;;  %v1859_v13 = vld [vmem:[%s11510_s7 + $0x670] sm:$0xff]  ;;  %v11749_v8 = vcombine.high %v11705_v18, %v11705_v18  ;;  %v2343_v5 = vunpack.c.l.s8.bf16 %v1873_v49 }
 0x281   : > { %v9960_v12 = vcombine.high %v2304_v62, %v2308_v3  ;;  %v9959_v24 = vcombine.low %v2304_v62, %v2308_v3  ;;  %v2351_v3 = vunpack.c.l.s8.bf16 %v1877_v59 }
 0x283   : > { %5098 = vmatpush1.bf16.msra.mxu0 %v9909_v15  ;;  %5262 = vmatpush1.bf16.msra.mxu1 %v9911_v16  ;;  %v2315_v15 = vunpack.c.l.s8.bf16 %v1859_v13  ;;  %v2312_v16 = vunpack.c.h.s8.bf16 %v1857_v4 }
 0x284   : > { %5099 = vmatprep.subr.bf16.mxu0 %v9918_v20  ;;  %5263 = vmatprep.subr.bf16.mxu1 %v9920_v22  ;;  %v2316_v20 = vunpack.c.h.s8.bf16 %v1859_v13  ;;  %v1863_v22 = vld [vmem:[%s11510_s7 + $0x690] sm:$0xff] }
 0x285   : > { %v2323_v26 = vunpack.c.l.s8.bf16 %v1863_v22  ;;  %v9966_v27 = vcombine.high %v2311_v11, %v2315_v15  ;;  %v2324_v2 = vunpack.c.h.s8.bf16 %v1863_v22 }
 0x286   : > { %v9967_v34 = vcombine.low %v2312_v16, %v2316_v20 }
 0x287   : > { %5100 = vmatpush1.bf16.msra.mxu0 %v9917_v28  ;;  %5264 = vmatpush1.bf16.msra.mxu1 %v9919_v29  ;;  %v9968_v28 = vcombine.high %v2312_v16, %v2316_v20  ;;  %v2320_v29 = vunpack.c.h.s8.bf16 %v1861_v21  ;;  %v9974_v35 = vcombine.high %v2319_v25, %v2323_v26 }
 0x288   : > { %5101 = vmatprep.subr.bf16.mxu0 %v9926_v32  ;;  %5265 = vmatprep.subr.bf16.mxu1 %v9928_v33  ;;  %v1867_v32 = vld [vmem:[%s11510_s7 + $0x6b0] sm:$0xff]  ;;  %v9965_v33 = vcombine.low %v2311_v11, %v2315_v15  ;;  %v1881_v11 = vld [vmem:[%s11510_s7 + $0x720] sm:$0xff] }
 0x289   : > { %v9976_v37 = vcombine.high %v2320_v29, %v2324_v2  ;;  %v2332_v40 = vunpack.c.h.s8.bf16 %v1867_v32  ;;  %v9975_v42 = vcombine.low %v2320_v29, %v2324_v2  ;;  %v2359_v21 = vunpack.c.l.s8.bf16 %v1881_v11 }
 0x28b   : > { %5102 = vmatpush1.bf16.msra.mxu0 %v9925_v38  ;;  %5266 = vmatpush1.bf16.msra.mxu1 %v9927_v39  ;;  %v2331_v38 = vunpack.c.l.s8.bf16 %v1867_v32  ;;  %v2328_v39 = vunpack.c.h.s8.bf16 %v1865_v31 }
 0x28c   : > { %5103 = vmatprep.subr.bf16.mxu0 %v9934_v6  ;;  %5267 = vmatprep.subr.bf16.mxu1 %v9936_v41  ;;  %v1871_v6 = vld [vmem:[%s11510_s7 + $0x6d0] sm:$0xff]  ;;  %v9973_v41 = vcombine.low %v2319_v25, %v2323_v26  ;;  %v1885_v26 = vld [vmem:[%s11510_s7 + $0x740] sm:$0xff] }
 0x28d   : > { %v2339_v44 = vunpack.c.l.s8.bf16 %v1871_v6  ;;  %v9982_v45 = vcombine.high %v2327_v36, %v2331_v38  ;;  %v9981_v51 = vcombine.low %v2327_v36, %v2331_v38  ;;  %v9983_v52 = vcombine.low %v2328_v39, %v2332_v40  ;;  %v1889_v36 = vld [vmem:[%s11510_s7 + $0x760] sm:$0xff] }
 0x28e   : > { %v2367_v2 = vunpack.c.l.s8.bf16 %v1885_v26 }
 0x28f   : > { %5104 = vmatpush1.bf16.msra.mxu0 %v9933_v46  ;;  %5268 = vmatpush1.bf16.msra.mxu1 %v9935_v47  ;;  %v9984_v46 = vcombine.high %v2328_v39, %v2332_v40  ;;  %v2336_v47 = vunpack.c.h.s8.bf16 %v1869_v0  ;;  %v9990_v57 = vcombine.high %v2335_v43, %v2339_v44  ;;  %v2375_v0 = vunpack.c.l.s8.bf16 %v1889_v36 }
 0x290   : > { %5114 = vmatprep.subr.bf16.mxu0 %v9942_v48  ;;  %5278 = vmatprep.subr.bf16.mxu1 %v9944_v50  ;;  %v2340_v48 = vunpack.c.h.s8.bf16 %v1871_v6  ;;  %v1875_v50 = vld [vmem:[%s11510_s7 + $0x6f0] sm:$0xff] }
 0x291   : > { %v2348_v58 = vunpack.c.h.s8.bf16 %v1875_v50 }
 0x292   : > { %5106 = vmatmul.mubr.bf16.vlgmr.msra.gmra.mrb[0].mxu0 %v11743_v54  ;;  %5270 = vmatmul.mubr.bf16.vlgmr.msra.gmra.mrb[0].mxu1 %v11743_v54  ;;  %v9992_v53 = vcombine.high %v2336_v47, %v2340_v48  ;;  %v9991_v62 = vcombine.low %v2336_v47, %v2340_v48 }
 0x293   : > { %5115 = vmatpush1.bf16.msra.mxu0 %v9941_v55  ;;  %5279 = vmatpush1.bf16.msra.mxu1 %v9943_v56  ;;  %v2347_v55 = vunpack.c.l.s8.bf16 %v1875_v50  ;;  %v2344_v56 = vunpack.c.h.s8.bf16 %v1873_v49 }
 0x294   : > { %5116 = vmatprep.subr.bf16.mxu0 %v9950_v60  ;;  %5280 = vmatprep.subr.bf16.mxu1 %v9952_v61  ;;  %v1879_v60 = vld [vmem:[%s11510_s7 + $0x710] sm:$0xff]  ;;  %v9989_v61 = vcombine.low %v2335_v43, %v2339_v44  ;;  %v1893_v44 = vld [vmem:[%s11510_s7 + $0x780] sm:$0xff] }
 0x295   : > { %10062 = vmatprep.mubr.msk.bf16.mxu0 %vm4962_vm6, %v11749_v8  ;;  %10064 = vmatprep.mubr.msk.bf16.mxu1 %vm4962_vm6, %v11749_v8  ;;  %v2355_v4 = vunpack.c.l.s8.bf16 %v1879_v60  ;;  %v9998_v13 = vcombine.high %v2343_v5, %v2347_v55  ;;  %v9997_v15 = vcombine.low %v2343_v5, %v2347_v55  ;;  %v9999_v16 = vcombine.low %v2344_v56, %v2348_v58  ;;  %v1897_v5 = vld [vmem:[%s11510_s7 + $0x7a0] sm:$0xff] }
 0x296   : > { %v2383_v48 = vunpack.c.l.s8.bf16 %v1893_v44 }
 0x297   : > { %5117 = vmatpush1.bf16.msra.mxu0 %v9949_v7  ;;  %5281 = vmatpush1.bf16.msra.mxu1 %v9951_v9  ;;  %v10000_v7 = vcombine.high %v2344_v56, %v2348_v58  ;;  %v2352_v9 = vunpack.c.h.s8.bf16 %v1877_v59  ;;  %v10006_v20 = vcombine.high %v2351_v3, %v2355_v4  ;;  %v2391_v59 = vunpack.c.l.s8.bf16 %v1897_v5 }
 0x298   : > { %5118 = vmatprep.subr.bf16.mxu0 %v9958_v10  ;;  %5282 = vmatprep.subr.bf16.mxu1 %v9960_v12  ;;  %v2356_v10 = vunpack.c.h.s8.bf16 %v1879_v60  ;;  %v1883_v12 = vld [vmem:[%s11510_s7 + $0x730] sm:$0xff] }
 0x299   : > { %v2364_v25 = vunpack.c.h.s8.bf16 %v1883_v12 }
 0x29a   : > { %v10008_v22 = vcombine.high %v2352_v9, %v2356_v10  ;;  %v10007_v29 = vcombine.low %v2352_v9, %v2356_v10 }
 0x29b   : > { %5119 = vmatpush1.bf16.msra.mxu0 %v9957_v23  ;;  %5283 = vmatpush1.bf16.msra.mxu1 %v9959_v24  ;;  %v2363_v23 = vunpack.c.l.s8.bf16 %v1883_v12  ;;  %v2360_v24 = vunpack.c.h.s8.bf16 %v1881_v11 }
 0x29c   : > { %5120 = vmatprep.subr.bf16.mxu0 %v9966_v27  ;;  %5284 = vmatprep.subr.bf16.mxu1 %v9968_v28  ;;  %v1887_v27 = vld [vmem:[%s11510_s7 + $0x750] sm:$0xff]  ;;  %v10005_v28 = vcombine.low %v2351_v3, %v2355_v4  ;;  %v1901_v4 = vld [vmem:[%s11510_s7 + $0x7c0] sm:$0xff] }
 0x29d   : > { %v2371_v31 = vunpack.c.l.s8.bf16 %v1887_v27  ;;  %v10014_v32 = vcombine.high %v2359_v21, %v2363_v23  ;;  %v10013_v38 = vcombine.low %v2359_v21, %v2363_v23  ;;  %v10015_v39 = vcombine.low %v2360_v24, %v2364_v25 }
 0x29e   : > { %v2399_v9 = vunpack.c.l.s8.bf16 %v1901_v4  ;;  %v2400_v10 = vunpack.c.h.s8.bf16 %v1901_v4 }
 0x29f   : > { %5121 = vmatpush1.bf16.msra.mxu0 %v9965_v33  ;;  %5285 = vmatpush1.bf16.msra.mxu1 %v9967_v34  ;;  %v10016_v33 = vcombine.high %v2360_v24, %v2364_v25  ;;  %v2368_v34 = vunpack.c.h.s8.bf16 %v1885_v26  ;;  %v10022_v40 = vcombine.high %v2367_v2, %v2371_v31 }
 0x2a0   : > { %5122 = vmatprep.subr.bf16.mxu0 %v9974_v35  ;;  %5286 = vmatprep.subr.bf16.mxu1 %v9976_v37  ;;  %v2372_v35 = vunpack.c.h.s8.bf16 %v1887_v27  ;;  %v1891_v37 = vld [vmem:[%s11510_s7 + $0x770] sm:$0xff]  ;;  %v10055_v23 = vcombine.low %v2400_v10, %v2400_v10  ;;  %v10054_v26 = vcombine.high %v2399_v9, %v2399_v9  ;;  %v10056_v27 = vcombine.high %v2400_v10, %v2400_v10 }
 0x2a1   : > { %v2380_v43 = vunpack.c.h.s8.bf16 %v1891_v37 }
 0x2a2   : > { %v10024_v6 = vcombine.high %v2368_v34, %v2372_v35  ;;  %v10023_v47 = vcombine.low %v2368_v34, %v2372_v35 }
 0x2a3   : > { %5123 = vmatpush1.bf16.msra.mxu0 %v9973_v41  ;;  %5287 = vmatpush1.bf16.msra.mxu1 %v9975_v42  ;;  %v2379_v41 = vunpack.c.l.s8.bf16 %v1891_v37  ;;  %v2376_v42 = vunpack.c.h.s8.bf16 %v1889_v36 }
 0x2a4   : > { %5124 = vmatprep.subr.bf16.mxu0 %v9982_v45  ;;  %5288 = vmatprep.subr.bf16.mxu1 %v9984_v46  ;;  %v1895_v45 = vld [vmem:[%s11510_s7 + $0x790] sm:$0xff]  ;;  %v10021_v46 = vcombine.low %v2367_v2, %v2371_v31  ;;  %v1658_v2 = vld [vmem:[%s11510_s7 + $0x28] sm:$0xff]  ;;  %v1660_v31 = vld [vmem:[%s11510_s7 + $0x38] sm:$0xff] }
 0x2a5   : > { %v2387_v49 = vunpack.c.l.s8.bf16 %v1895_v45  ;;  %v10030_v50 = vcombine.high %v2375_v0, %v2379_v41  ;;  %v10029_v55 = vcombine.low %v2375_v0, %v2379_v41  ;;  %v10031_v56 = vcombine.low %v2376_v42, %v2380_v43  ;;  %v1664_v0 = vld [vmem:[%s11510_s7 + $0x58] sm:$0xff] }
 0x2a6   : > { %v1913_v35 = vunpack.c.l.s8.bf16 %v1658_v2  ;;  %v1917_v37 = vunpack.c.l.s8.bf16 %v1660_v31 }
 0x2a7   : > { %5125 = vmatpush1.bf16.msra.mxu0 %v9981_v51  ;;  %5289 = vmatpush1.bf16.msra.mxu1 %v9983_v52  ;;  %v10032_v51 = vcombine.high %v2376_v42, %v2380_v43  ;;  %v2384_v52 = vunpack.c.h.s8.bf16 %v1893_v44  ;;  %v10038_v58 = vcombine.high %v2383_v48, %v2387_v49  ;;  %v1925_v44 = vunpack.c.l.s8.bf16 %v1664_v0 }
 0x2a8   : > { %5126 = vmatprep.subr.bf16.mxu0 %v9990_v57  ;;  %5290 = vmatprep.subr.bf16.mxu1 %v9992_v53  ;;  %v2388_v57 = vunpack.c.h.s8.bf16 %v1895_v45  ;;  %v1899_v53 = vld [vmem:[%s11510_s7 + $0x7b0] sm:$0xff]  ;;  %v9570_v45 = vcombine.high %v1913_v35, %v1917_v37 }
 0x2a9   : > { %v2396_v3 = vunpack.c.h.s8.bf16 %v1899_v53 }
 0x2aa   : > { %v10040_v60 = vcombine.high %v2384_v52, %v2388_v57 }
 0x2ab   : > { %5127 = vmatpush1.bf16.msra.mxu0 %v9989_v61  ;;  %5291 = vmatpush1.bf16.msra.mxu1 %v9991_v62  ;;  %v2395_v61 = vunpack.c.l.s8.bf16 %v1899_v53  ;;  %v2392_v62 = vunpack.c.h.s8.bf16 %v1897_v5 }
 0x2ac   : > { %5128 = vmatprep.subr.bf16.mxu0 %v9998_v13  ;;  %5292 = vmatprep.subr.bf16.mxu1 %v10000_v7  ;;  %v10037_v13 = vcombine.low %v2383_v48, %v2387_v49  ;;  %v10039_v7 = vcombine.low %v2384_v52, %v2388_v57  ;;  %v1926_v48 = vunpack.c.h.s8.bf16 %v1664_v0  ;;  %v1666_v49 = vld [vmem:[%s11510_s7 + $0x68] sm:$0xff] }
 0x2ad   : > { %v10046_v11 = vcombine.high %v2391_v59, %v2395_v61  ;;  %v10048_v12 = vcombine.high %v2392_v62, %v2396_v3  ;;  %v10047_v21 = vcombine.low %v2392_v62, %v2396_v3  ;;  %v1929_v5 = vunpack.c.l.s8.bf16 %v1666_v49 }
 0x2af   : > { %5129 = vmatpush1.bf16.msra.mxu0 %v9997_v15  ;;  %5293 = vmatpush1.bf16.msra.mxu1 %v9999_v16  ;;  %v1654_v15 = vld [vmem:[%s11510_s7 + $0x8] sm:$0xff]  ;;  %v1656_v16 = vld [vmem:[%s11510_s7 + $0x18] sm:$0xff] }
 0x2b0   : > { %5130 = vmatprep.subr.bf16.mxu0 %v10006_v20  ;;  %5294 = vmatprep.subr.bf16.mxu1 %v10008_v22  ;;  %v10045_v20 = vcombine.low %v2391_v59, %v2395_v61  ;;  %v10053_v22 = vcombine.low %v2399_v9, %v2399_v9  ;;  %v1905_v24 = vunpack.c.l.s8.bf16 %v1654_v15  ;;  %v1909_v25 = vunpack.c.l.s8.bf16 %v1656_v16  ;;  %v1670_v59 = vld [vmem:[%s11510_s7 + $0x88] sm:$0xff] }
 0x2b1   : > { %v1937_v3 = vunpack.c.l.s8.bf16 %v1670_v59 }
 0x2b2   : > { %v9562_v34 = vcombine.high %v1905_v24, %v1909_v25  ;;  %v9561_v41 = vcombine.low %v1905_v24, %v1909_v25  ;;  %v1678_v25 = vld [vmem:[%s11510_s7 + $0xc8] sm:$0xff] }
 0x2b3   : > { %5131 = vmatpush1.bf16.msra.mxu0 %v10005_v28  ;;  %5295 = vmatpush1.bf16.msra.mxu1 %v10007_v29  ;;  %v1906_v28 = vunpack.c.h.s8.bf16 %v1654_v15  ;;  %v1910_v29 = vunpack.c.h.s8.bf16 %v1656_v16 }
 0x2b4   : > { %5132 = vmatprep.subr.bf16.mxu0 %v10014_v32  ;;  %5296 = vmatprep.subr.bf16.mxu1 %v10016_v33  ;;  %v4968_v32 = vsel %vm4966_vm7, %v10053_v22, 0  ;;  %v4974_v33 = vsel %vm4966_vm7, %v10055_v23, 0 }
 0x2b5   : > { %v9564_v36 = vcombine.high %v1906_v28, %v1910_v29  ;;  %v9563_v42 = vcombine.low %v1906_v28, %v1910_v29  ;;  %v1953_v29 = vunpack.c.l.s8.bf16 %v1678_v25 }
 0x2b7   : > { %5133 = vmatpush1.bf16.msra.mxu0 %v10013_v38  ;;  %5297 = vmatpush1.bf16.msra.mxu1 %v10015_v39  ;;  %v1914_v38 = vunpack.c.h.s8.bf16 %v1658_v2  ;;  %v1918_v39 = vunpack.c.h.s8.bf16 %v1660_v31  ;;  %v1954_v31 = vunpack.c.h.s8.bf16 %v1678_v25 }
 0x2b8   : > { %5134 = vmatprep.subr.bf16.mxu0 %v10022_v40  ;;  %5298 = vmatprep.subr.bf16.mxu1 %v10024_v6  ;;  %v1662_v40 = vld [vmem:[%s11510_s7 + $0x48] sm:$0xff]  ;;  %v11790_v6 = vcombine.high %v11743_v54, %v11743_v54 }
 0x2b9   : > { %v1921_v43 = vunpack.c.l.s8.bf16 %v1662_v40  ;;  %v9571_v52 = vcombine.low %v1914_v38, %v1918_v39 }
 0x2bb   : > { %5135 = vmatpush1.bf16.msra.mxu0 %v10021_v46  ;;  %5299 = vmatpush1.bf16.msra.mxu1 %v10023_v47  ;;  %v9572_v46 = vcombine.high %v1914_v38, %v1918_v39  ;;  %v1922_v47 = vunpack.c.h.s8.bf16 %v1662_v40  ;;  %v9578_v57 = vcombine.high %v1921_v43, %v1925_v44  ;;  %v9577_v61 = vcombine.low %v1921_v43, %v1925_v44  ;;  %v1686_v44 = vld [vmem:[%s11510_s7 + $0x108] sm:$0xff] }
 0x2bc   : > { %5136 = vmatprep.subr.bf16.mxu0 %v10030_v50  ;;  %5300 = vmatprep.subr.bf16.mxu1 %v10032_v51  ;;  %v1668_v50 = vld [vmem:[%s11510_s7 + $0x78] sm:$0xff]  ;;  %v9569_v51 = vcombine.low %v1913_v35, %v1917_v37  ;;  %v1682_v35 = vld [vmem:[%s11510_s7 + $0xe8] sm:$0xff] }
 0x2bd   : > { %v9580_v53 = vcombine.high %v1922_v47, %v1926_v48  ;;  %v9579_v62 = vcombine.low %v1922_v47, %v1926_v48  ;;  %v1961_v0 = vunpack.c.l.s8.bf16 %v1682_v35  ;;  %v1969_v48 = vunpack.c.l.s8.bf16 %v1686_v44 }
 0x2bf   : > { %5137 = vmatpush1.bf16.msra.mxu0 %v10029_v55  ;;  %5301 = vmatpush1.bf16.msra.mxu1 %v10031_v56  ;;  %v1933_v55 = vunpack.c.l.s8.bf16 %v1668_v50  ;;  %v1930_v56 = vunpack.c.h.s8.bf16 %v1666_v49 }
 0x2c0   : > { %5138 = vmatprep.subr.bf16.mxu0 %v10038_v58  ;;  %5302 = vmatprep.subr.bf16.mxu1 %v10040_v60  ;;  %v1934_v58 = vunpack.c.h.s8.bf16 %v1668_v50  ;;  %v1672_v60 = vld [vmem:[%s11510_s7 + $0x98] sm:$0xff]  ;;  %v1970_v50 = vunpack.c.h.s8.bf16 %v1686_v44 }
 0x2c1   : > { %v1941_v4 = vunpack.c.l.s8.bf16 %v1672_v60  ;;  %v9586_v9 = vcombine.high %v1929_v5, %v1933_v55  ;;  %v9585_v15 = vcombine.low %v1929_v5, %v1933_v55  ;;  %v1690_v5 = vld [vmem:[%s11510_s7 + $0x128] sm:$0xff] }
 0x2c2   : > { %v9588_v10 = vcombine.high %v1930_v56, %v1934_v58 }
 0x2c3   : > { %5139 = vmatpush1.bf16.msra.mxu0 %v10037_v13  ;;  %5303 = vmatpush1.bf16.msra.mxu1 %v10039_v7  ;;  %v1938_v13 = vunpack.c.h.s8.bf16 %v1670_v59  ;;  %v1942_v7 = vunpack.c.h.s8.bf16 %v1672_v60  ;;  %v9594_v16 = vcombine.high %v1937_v3, %v1941_v4  ;;  %v1977_v60 = vunpack.c.l.s8.bf16 %v1690_v5 }
 0x2c4   : > { %5140 = vmatprep.subr.bf16.mxu0 %v10046_v11  ;;  %5304 = vmatprep.subr.bf16.mxu1 %v10048_v12  ;;  %v1674_v11 = vld [vmem:[%s11510_s7 + $0xa8] sm:$0xff]  ;;  %v1676_v12 = vld [vmem:[%s11510_s7 + $0xb8] sm:$0xff] }
 0x2c5   : > { %v1949_v22 = vunpack.c.l.s8.bf16 %v1676_v12  ;;  %v1946_v23 = vunpack.c.h.s8.bf16 %v1674_v11  ;;  %v1950_v24 = vunpack.c.h.s8.bf16 %v1676_v12  ;;  %v9595_v28 = vcombine.low %v1938_v13, %v1942_v7 }
 0x2c7   : > { %5141 = vmatpush1.bf16.msra.mxu0 %v10045_v20  ;;  %5305 = vmatpush1.bf16.msra.mxu1 %v10047_v21  ;;  %v9596_v20 = vcombine.high %v1938_v13, %v1942_v7  ;;  %v1945_v21 = vunpack.c.l.s8.bf16 %v1674_v11  ;;  %v9603_v38 = vcombine.low %v1946_v23, %v1950_v24  ;;  %v1696_v13 = vld [vmem:[%s11510_s7 + $0x158] sm:$0xff] }
 0x2c8   : > { %10061 = vmatprep.subr.msk.bf16.mxu0 %vm4966_vm7, %v10054_v26  ;;  %10063 = vmatprep.subr.msk.bf16.mxu1 %vm4966_vm7, %v10056_v27  ;;  %v1680_v26 = vld [vmem:[%s11510_s7 + $0xd8] sm:$0xff]  ;;  %v9593_v27 = vcombine.low %v1937_v3, %v1941_v4  ;;  %v1694_v4 = vld [vmem:[%s11510_s7 + $0x148] sm:$0xff]  ;;  %v1989_v11 = vunpack.c.l.s8.bf16 %v1696_v13 }
 0x2c9   : > { %v1957_v2 = vunpack.c.l.s8.bf16 %v1680_v26  ;;  %v9601_v37 = vcombine.low %v1945_v21, %v1949_v22  ;;  %v1986_v12 = vunpack.c.h.s8.bf16 %v1694_v4 }
 0x2cb   : > { %5143 = vmatpush1.bf16.msra.mxu0 %v4968_v32  ;;  %5307 = vmatpush1.bf16.msra.mxu1 %v4974_v33  ;;  %v1958_v32 = vunpack.c.h.s8.bf16 %v1680_v26  ;;  %v9602_v33 = vcombine.high %v1945_v21, %v1949_v22  ;;  %v9610_v39 = vcombine.high %v1953_v29, %v1957_v2  ;;  %v1700_v21 = vld [vmem:[%s11510_s7 + $0x178] sm:$0xff] }
 0x2cc   : > { %5319 = vmatprep.subr.bf16.mxu0 %v9562_v34  ;;  %5483 = vmatprep.subr.bf16.mxu1 %v9564_v36  ;;  %v9604_v34 = vcombine.high %v1946_v23, %v1950_v24  ;;  %v1684_v36 = vld [vmem:[%s11510_s7 + $0xf8] sm:$0xff] }
 0x2cd   : > { %v9612_v40 = vcombine.high %v1954_v31, %v1958_v32  ;;  %v1966_v43 = vunpack.c.h.s8.bf16 %v1684_v36  ;;  %v9611_v47 = vcombine.low %v1954_v31, %v1958_v32  ;;  %v1704_v31 = vld [vmem:[%s11510_s7 + $0x198] sm:$0xff] }
 0x2ce   : > { %5147 = vmatmul.mubr.bf16.vlgmr.msra.gmra.mrb[0].mxu0 %v11790_v6  ;;  %5311 = vmatmul.mubr.bf16.vlgmr.msra.gmra.mrb[0].mxu1 %v11790_v6 }
 0x2cf   : > { %5320 = vmatpush1.bf16.msra.mxu0 %v9561_v41  ;;  %5484 = vmatpush1.bf16.msra.mxu1 %v9563_v42  ;;  %v1965_v41 = vunpack.c.l.s8.bf16 %v1684_v36  ;;  %v1962_v42 = vunpack.c.h.s8.bf16 %v1682_v35  ;;  %v2005_v35 = vunpack.c.l.s8.bf16 %v1704_v31 }
 0x2d0   : > { %5321 = vmatprep.subr.bf16.mxu0 %v9570_v45  ;;  %5485 = vmatprep.subr.bf16.mxu1 %v9572_v46  ;;  %v1688_v45 = vld [vmem:[%s11510_s7 + $0x118] sm:$0xff]  ;;  %v9609_v46 = vcombine.low %v1953_v29, %v1957_v2  ;;  %v1998_v29 = vunpack.c.h.s8.bf16 %v1700_v21  ;;  %v1702_v2 = vld [vmem:[%s11510_s7 + $0x188] sm:$0xff] }
 0x2d1   : > { %5351 = vmatprep.mubr.bf16.mxu0 %v11631_v17  ;;  %5515 = vmatprep.mubr.bf16.mxu1 %v11631_v17  ;;  %v9587_v17 = vcombine.low %v1930_v56, %v1934_v58  ;;  %v1973_v49 = vunpack.c.l.s8.bf16 %v1688_v45  ;;  %v9617_v55 = vcombine.low %v1961_v0, %v1965_v41  ;;  %v9619_v56 = vcombine.low %v1962_v42, %v1966_v43 }
 0x2d2   : > { %v2002_v36 = vunpack.c.h.s8.bf16 %v1702_v2 }
 0x2d3   : > { %5322 = vmatpush1.bf16.msra.mxu0 %v9569_v51  ;;  %5486 = vmatpush1.bf16.msra.mxu1 %v9571_v52  ;;  %v1974_v51 = vunpack.c.h.s8.bf16 %v1688_v45  ;;  %v9618_v52 = vcombine.high %v1961_v0, %v1965_v41  ;;  %v9626_v58 = vcombine.high %v1969_v48, %v1973_v49  ;;  %v9625_v7 = vcombine.low %v1969_v48, %v1973_v49  ;;  %v1708_v0 = vld [vmem:[%s11510_s7 + $0x1b8] sm:$0xff]  ;;  %v1710_v49 = vld [vmem:[%s11510_s7 + $0x1c8] sm:$0xff] }
 0x2d4   : > { %5323 = vmatprep.subr.bf16.mxu0 %v9578_v57  ;;  %5487 = vmatprep.subr.bf16.mxu1 %v9580_v53  ;;  %v9620_v57 = vcombine.high %v1962_v42, %v1966_v43  ;;  %v1692_v53 = vld [vmem:[%s11510_s7 + $0x138] sm:$0xff]  ;;  %v2014_v48 = vunpack.c.h.s8.bf16 %v1708_v0 }
 0x2d5   : > { %v9628_v59 = vcombine.high %v1970_v50, %v1974_v51  ;;  %v1982_v3 = vunpack.c.h.s8.bf16 %v1692_v53 }
 0x2d7   : > { %5324 = vmatpush1.bf16.msra.mxu0 %v9577_v61  ;;  %5488 = vmatpush1.bf16.msra.mxu1 %v9579_v62  ;;  %v1981_v61 = vunpack.c.l.s8.bf16 %v1692_v53  ;;  %v1978_v62 = vunpack.c.h.s8.bf16 %v1690_v5  ;;  %v2018_v53 = vunpack.c.h.s8.bf16 %v1710_v49 }
 0x2d8   : > { %5325 = vmatprep.subr.bf16.mxu0 %v9586_v9  ;;  %5489 = vmatprep.subr.bf16.mxu1 %v9588_v10  ;;  %v9627_v9 = vcombine.low %v1970_v50, %v1974_v51  ;;  %v1985_v10 = vunpack.c.l.s8.bf16 %v1694_v4  ;;  %v1712_v50 = vld [vmem:[%s11510_s7 + $0x1d8] sm:$0xff] }
 0x2d9   : > { %v9633_v22 = vcombine.low %v1977_v60, %v1981_v61  ;;  %v9635_v23 = vcombine.low %v1978_v62, %v1982_v3  ;;  %v2021_v5 = vunpack.c.l.s8.bf16 %v1712_v50 }
 0x2da   : > { %v9642_v24 = vcombine.high %v1985_v10, %v1989_v11  ;;  %v9641_v32 = vcombine.low %v1985_v10, %v1989_v11  ;;  %v1718_v11 = vld [vmem:[%s11510_s7 + $0x208] sm:$0xff] }
 0x2db   : > { %5326 = vmatpush1.bf16.msra.mxu0 %v9585_v15  ;;  %5490 = vmatpush1.bf16.msra.mxu1 %v9587_v17  ;;  %v1990_v15 = vunpack.c.h.s8.bf16 %v1696_v13  ;;  %v9634_v17 = vcombine.high %v1977_v60, %v1981_v61  ;;  %v1716_v60 = vld [vmem:[%s11510_s7 + $0x1f8] sm:$0xff] }
 0x2dc   : > { %5327 = vmatprep.subr.bf16.mxu0 %v9594_v16  ;;  %5491 = vmatprep.subr.bf16.mxu1 %v9596_v20  ;;  %v9636_v16 = vcombine.high %v1978_v62, %v1982_v3  ;;  %v1698_v20 = vld [vmem:[%s11510_s7 + $0x168] sm:$0xff]  ;;  %v2030_v10 = vunpack.c.h.s8.bf16 %v1716_v60 }
 0x2dd   : > { %v9644_v25 = vcombine.high %v1986_v12, %v1990_v15  ;;  %v1993_v26 = vunpack.c.l.s8.bf16 %v1698_v20 }
 0x2df   : > { %5328 = vmatpush1.bf16.msra.mxu0 %v9593_v27  ;;  %5492 = vmatpush1.bf16.msra.mxu1 %v9595_v28  ;;  %v1997_v27 = vunpack.c.l.s8.bf16 %v1700_v21  ;;  %v1994_v28 = vunpack.c.h.s8.bf16 %v1698_v20  ;;  %v2034_v21 = vunpack.c.h.s8.bf16 %v1718_v11 }
 0x2e0   : > { %5329 = vmatprep.subr.bf16.mxu0 %v9602_v33  ;;  %5493 = vmatprep.subr.bf16.mxu1 %v9604_v34  ;;  %v9643_v33 = vcombine.low %v1986_v12, %v1990_v15  ;;  %v2001_v34 = vunpack.c.l.s8.bf16 %v1702_v2  ;;  %v1720_v12 = vld [vmem:[%s11510_s7 + $0x218] sm:$0xff] }
 0x2e1   : > { %v9649_v41 = vcombine.low %v1993_v26, %v1997_v27  ;;  %v9651_v42 = vcombine.low %v1994_v28, %v1998_v29  ;;  %v2037_v20 = vunpack.c.l.s8.bf16 %v1720_v12 }
 0x2e2   : > { %v9658_v43 = vcombine.high %v2001_v34, %v2005_v35  ;;  %v9657_v51 = vcombine.low %v2001_v34, %v2005_v35  ;;  %v1726_v35 = vld [vmem:[%s11510_s7 + $0x248] sm:$0xff] }
 0x2e3   : > { %5330 = vmatpush1.bf16.msra.mxu0 %v9601_v37  ;;  %5494 = vmatpush1.bf16.msra.mxu1 %v9603_v38  ;;  %v2006_v37 = vunpack.c.h.s8.bf16 %v1704_v31  ;;  %v9650_v38 = vcombine.high %v1993_v26, %v1997_v27  ;;  %v1724_v26 = vld [vmem:[%s11510_s7 + $0x238] sm:$0xff] }
 0x2e4   : > { %5331 = vmatprep.subr.bf16.mxu0 %v9610_v39  ;;  %5495 = vmatprep.subr.bf16.mxu1 %v9612_v40  ;;  %v9652_v39 = vcombine.high %v1994_v28, %v1998_v29  ;;  %v1706_v40 = vld [vmem:[%s11510_s7 + $0x1a8] sm:$0xff]  ;;  %v2046_v34 = vunpack.c.h.s8.bf16 %v1724_v26 }
 0x2e5   : > { %v9660_v44 = vcombine.high %v2002_v36, %v2006_v37  ;;  %v2009_v45 = vunpack.c.l.s8.bf16 %v1706_v40 }
 0x2e7   : > { %5332 = vmatpush1.bf16.msra.mxu0 %v9609_v46  ;;  %5496 = vmatpush1.bf16.msra.mxu1 %v9611_v47  ;;  %v2013_v46 = vunpack.c.l.s8.bf16 %v1708_v0  ;;  %v2010_v47 = vunpack.c.h.s8.bf16 %v1706_v40  ;;  %v2050_v0 = vunpack.c.h.s8.bf16 %v1726_v35 }
 0x2e8   : > { %5333 = vmatprep.subr.bf16.mxu0 %v9618_v52  ;;  %5497 = vmatprep.subr.bf16.mxu1 %v9620_v57  ;;  %v9659_v52 = vcombine.low %v2002_v36, %v2006_v37  ;;  %v2017_v57 = vunpack.c.l.s8.bf16 %v1710_v49  ;;  %v1728_v36 = vld [vmem:[%s11510_s7 + $0x258] sm:$0xff] }
 0x2e9   : > { %v9665_v61 = vcombine.low %v2009_v45, %v2013_v46  ;;  %v9667_v62 = vcombine.low %v2010_v47, %v2014_v48  ;;  %v2053_v40 = vunpack.c.l.s8.bf16 %v1728_v36 }
 0x2ea   : > { %v9674_v3 = vcombine.high %v2017_v57, %v2021_v5  ;;  %v9673_v15 = vcombine.low %v2017_v57, %v2021_v5  ;;  %v1734_v5 = vld [vmem:[%s11510_s7 + $0x288] sm:$0xff] }
 0x2eb   : > { %5334 = vmatpush1.bf16.msra.mxu0 %v9617_v55  ;;  %5498 = vmatpush1.bf16.msra.mxu1 %v9619_v56  ;;  %v2022_v55 = vunpack.c.h.s8.bf16 %v1712_v50  ;;  %v9666_v56 = vcombine.high %v2009_v45, %v2013_v46  ;;  %v1732_v45 = vld [vmem:[%s11510_s7 + $0x278] sm:$0xff] }
 0x2ec   : > { %5335 = vmatprep.subr.bf16.mxu0 %v9626_v58  ;;  %5499 = vmatprep.subr.bf16.mxu1 %v9628_v59  ;;  %v9668_v58 = vcombine.high %v2010_v47, %v2014_v48  ;;  %v1714_v59 = vld [vmem:[%s11510_s7 + $0x1e8] sm:$0xff]  ;;  %v2062_v57 = vunpack.c.h.s8.bf16 %v1732_v45 }
 0x2ed   : > { %v9676_v4 = vcombine.high %v2018_v53, %v2022_v55  ;;  %v2025_v13 = vunpack.c.l.s8.bf16 %v1714_v59 }
 0x2ef   : > { %5336 = vmatpush1.bf16.msra.mxu0 %v9625_v7  ;;  %5500 = vmatpush1.bf16.msra.mxu1 %v9627_v9  ;;  %v2029_v7 = vunpack.c.l.s8.bf16 %v1716_v60  ;;  %v2026_v9 = vunpack.c.h.s8.bf16 %v1714_v59  ;;  %v2066_v59 = vunpack.c.h.s8.bf16 %v1734_v5 }
 0x2f0   : > { %5337 = vmatprep.subr.bf16.mxu0 %v9634_v17  ;;  %5501 = vmatprep.subr.bf16.mxu1 %v9636_v16  ;;  %v9675_v17 = vcombine.low %v2018_v53, %v2022_v55  ;;  %v2033_v16 = vunpack.c.l.s8.bf16 %v1718_v11  ;;  %v1736_v53 = vld [vmem:[%s11510_s7 + $0x298] sm:$0xff] }
 0x2f1   : > { %v9681_v27 = vcombine.low %v2025_v13, %v2029_v7  ;;  %v9683_v28 = vcombine.low %v2026_v9, %v2030_v10  ;;  %v2070_v60 = vunpack.c.h.s8.bf16 %v1736_v53 }
 0x2f2   : > { %v9690_v29 = vcombine.high %v2033_v16, %v2037_v20  ;;  %v9689_v37 = vcombine.low %v2033_v16, %v2037_v20  ;;  %v1744_v16 = vld [vmem:[%s11510_s7 + $0x2d8] sm:$0xff] }
 0x2f3   : > { %5338 = vmatpush1.bf16.msra.mxu0 %v9633_v22  ;;  %5502 = vmatpush1.bf16.msra.mxu1 %v9635_v23  ;;  %v2038_v22 = vunpack.c.h.s8.bf16 %v1720_v12  ;;  %v9682_v23 = vcombine.high %v2025_v13, %v2029_v7 }
 0x2f4   : > { %5339 = vmatprep.subr.bf16.mxu0 %v9642_v24  ;;  %5503 = vmatprep.subr.bf16.mxu1 %v9644_v25  ;;  %v9684_v24 = vcombine.high %v2026_v9, %v2030_v10  ;;  %v1722_v25 = vld [vmem:[%s11510_s7 + $0x228] sm:$0xff]  ;;  %v9724_v9 = vcombine.high %v2066_v59, %v2070_v60 }
 0x2f5   : > { %v9692_v2 = vcombine.high %v2034_v21, %v2038_v22  ;;  %v2041_v31 = vunpack.c.l.s8.bf16 %v1722_v25 }
 0x2f7   : > { %5340 = vmatpush1.bf16.msra.mxu0 %v9641_v32  ;;  %5504 = vmatpush1.bf16.msra.mxu1 %v9643_v33  ;;  %v2045_v32 = vunpack.c.l.s8.bf16 %v1724_v26  ;;  %v2042_v33 = vunpack.c.h.s8.bf16 %v1722_v25  ;;  %v2086_v25 = vunpack.c.h.s8.bf16 %v1744_v16 }
 0x2f8   : > { %5341 = vmatprep.subr.bf16.mxu0 %v9650_v38  ;;  %5505 = vmatprep.subr.bf16.mxu1 %v9652_v39  ;;  %v9691_v38 = vcombine.low %v2034_v21, %v2038_v22  ;;  %v2049_v39 = vunpack.c.l.s8.bf16 %v1726_v35  ;;  %v9723_v21 = vcombine.low %v2066_v59, %v2070_v60 }
 0x2f9   : > { %v9697_v46 = vcombine.low %v2041_v31, %v2045_v32  ;;  %v9699_v47 = vcombine.low %v2042_v33, %v2046_v34 }
 0x2fa   : > { %v9706_v48 = vcombine.high %v2049_v39, %v2053_v40 }
 0x2fb   : > { %5342 = vmatpush1.bf16.msra.mxu0 %v9649_v41  ;;  %5506 = vmatpush1.bf16.msra.mxu1 %v9651_v42  ;;  %v2054_v41 = vunpack.c.h.s8.bf16 %v1728_v36  ;;  %v9698_v42 = vcombine.high %v2041_v31, %v2045_v32 }
 0x2fc   : > { %5343 = vmatprep.subr.bf16.mxu0 %v9658_v43  ;;  %5507 = vmatprep.subr.bf16.mxu1 %v9660_v44  ;;  %v9700_v43 = vcombine.high %v2042_v33, %v2046_v34  ;;  %v1730_v44 = vld [vmem:[%s11510_s7 + $0x268] sm:$0xff] }
 0x2fd   : > { %v9708_v49 = vcombine.high %v2050_v0, %v2054_v41  ;;  %v2057_v50 = vunpack.c.l.s8.bf16 %v1730_v44  ;;  %v9707_v55 = vcombine.low %v2050_v0, %v2054_v41 }
 0x2ff   : > { %5344 = vmatpush1.bf16.msra.mxu0 %v9657_v51  ;;  %5508 = vmatpush1.bf16.msra.mxu1 %v9659_v52  ;;  %v2061_v51 = vunpack.c.l.s8.bf16 %v1732_v45  ;;  %v2058_v52 = vunpack.c.h.s8.bf16 %v1730_v44 }
 0x300   : > { %5345 = vmatprep.subr.bf16.mxu0 %v9666_v56  ;;  %5509 = vmatprep.subr.bf16.mxu1 %v9668_v58  ;;  %v2065_v56 = vunpack.c.l.s8.bf16 %v1734_v5  ;;  %v2069_v58 = vunpack.c.l.s8.bf16 %v1736_v53 }
 0x301   : > { %v9713_v13 = vcombine.low %v2057_v50, %v2061_v51 }
 0x302   : > { %v9722_v7 = vcombine.high %v2065_v56, %v2069_v58  ;;  %v9721_v20 = vcombine.low %v2065_v56, %v2069_v58  ;;  %v1760_v56 = vld [vmem:[%s11510_s7 + $0x358] sm:$0xff] }
 0x303   : > { %5346 = vmatpush1.bf16.msra.mxu0 %v9665_v61  ;;  %5510 = vmatpush1.bf16.msra.mxu1 %v9667_v62  ;;  %v9714_v61 = vcombine.high %v2057_v50, %v2061_v51  ;;  %v9716_v62 = vcombine.high %v2058_v52, %v2062_v57 }
 0x304   : > { %5347 = vmatprep.subr.bf16.mxu0 %v9674_v3  ;;  %5511 = vmatprep.subr.bf16.mxu1 %v9676_v4  ;;  %v1738_v3 = vld [vmem:[%s11510_s7 + $0x2a8] sm:$0xff]  ;;  %v1740_v4 = vld [vmem:[%s11510_s7 + $0x2b8] sm:$0xff] }
 0x305   : > { %v2073_v10 = vunpack.c.l.s8.bf16 %v1738_v3  ;;  %v2077_v11 = vunpack.c.l.s8.bf16 %v1740_v4  ;;  %v2074_v12 = vunpack.c.h.s8.bf16 %v1738_v3  ;;  %v2118_v3 = vunpack.c.h.s8.bf16 %v1760_v56 }
 0x307   : > { %5348 = vmatpush1.bf16.msra.mxu0 %v9673_v15  ;;  %5512 = vmatpush1.bf16.msra.mxu1 %v9675_v17  ;;  %v2078_v15 = vunpack.c.h.s8.bf16 %v1740_v4  ;;  %v1742_v17 = vld [vmem:[%s11510_s7 + $0x2c8] sm:$0xff]  ;;  %v9730_v26 = vcombine.high %v2073_v10, %v2077_v11 }
 0x308   : > { %5349 = vmatprep.subr.bf16.mxu0 %v9682_v23  ;;  %5513 = vmatprep.subr.bf16.mxu1 %v9684_v24  ;;  %v2081_v22 = vunpack.c.l.s8.bf16 %v1742_v17  ;;  %v2085_v23 = vunpack.c.l.s8.bf16 %v1744_v16  ;;  %v2082_v24 = vunpack.c.h.s8.bf16 %v1742_v17 }
 0x309   : > { %v9731_v31 = vcombine.low %v2074_v12, %v2078_v15 }
 0x30a   : > { %v9738_v32 = vcombine.high %v2081_v22, %v2085_v23  ;;  %v9740_v33 = vcombine.high %v2082_v24, %v2086_v25  ;;  %v9739_v0 = vcombine.low %v2082_v24, %v2086_v25 }
 0x30b   : > { %5350 = vmatpush1.bf16.msra.mxu0 %v9681_v27  ;;  %5514 = vmatpush1.bf16.msra.mxu1 %v9683_v28  ;;  %v9732_v27 = vcombine.high %v2074_v12, %v2078_v15  ;;  %v1746_v28 = vld [vmem:[%s11510_s7 + $0x2e8] sm:$0xff] }
 0x30c   : > { %5360 = vmatprep.subr.bf16.mxu0 %v9690_v29  ;;  %5524 = vmatprep.subr.bf16.mxu1 %v9692_v2  ;;  %v1748_v29 = vld [vmem:[%s11510_s7 + $0x2f8] sm:$0xff]  ;;  %v9729_v2 = vcombine.low %v2073_v10, %v2077_v11  ;;  %v2089_v34 = vunpack.c.l.s8.bf16 %v1746_v28  ;;  %v2090_v36 = vunpack.c.h.s8.bf16 %v1746_v28 }
 0x30d   : > { %v2093_v35 = vunpack.c.l.s8.bf16 %v1748_v29 }
 0x30e   : > { %5352 = vmatmul.mubr.bf16.vlgmr.msra.gmra.mrb[4].mxu0 %v11649_v19  ;;  %5516 = vmatmul.mubr.bf16.vlgmr.msra.gmra.mrb[4].mxu1 %v11649_v19  ;;  %v9705_v19 = vcombine.low %v2049_v39, %v2053_v40  ;;  %v1752_v39 = vld [vmem:[%s11510_s7 + $0x318] sm:$0xff]  ;;  %v9737_v40 = vcombine.low %v2081_v22, %v2085_v23 }
 0x30f   : > { %5361 = vmatpush1.bf16.msra.mxu0 %v9689_v37  ;;  %5525 = vmatpush1.bf16.msra.mxu1 %v9691_v38  ;;  %v2094_v37 = vunpack.c.h.s8.bf16 %v1748_v29  ;;  %v1750_v38 = vld [vmem:[%s11510_s7 + $0x308] sm:$0xff]  ;;  %v2102_v44 = vunpack.c.h.s8.bf16 %v1752_v39  ;;  %v9746_v45 = vcombine.high %v2089_v34, %v2093_v35  ;;  %v1768_v22 = vld [vmem:[%s11510_s7 + $0x398] sm:$0xff] }
 0x310   : > { %5362 = vmatprep.subr.bf16.mxu0 %v9698_v42  ;;  %5526 = vmatprep.subr.bf16.mxu1 %v9700_v43  ;;  %v2097_v41 = vunpack.c.l.s8.bf16 %v1750_v38  ;;  %v2101_v42 = vunpack.c.l.s8.bf16 %v1752_v39  ;;  %v2098_v43 = vunpack.c.h.s8.bf16 %v1750_v38  ;;  %v2134_v28 = vunpack.c.h.s8.bf16 %v1768_v22 }
 0x311   : > { %5392 = vmatprep.mubr.bf16.mxu0 %v11655_v30  ;;  %5556 = vmatprep.mubr.bf16.mxu1 %v11655_v30  ;;  %v9715_v30 = vcombine.low %v2058_v52, %v2062_v57  ;;  %v9747_v50 = vcombine.low %v2090_v36, %v2094_v37 }
 0x312   : > { %v9754_v51 = vcombine.high %v2097_v41, %v2101_v42  ;;  %v9756_v52 = vcombine.high %v2098_v43, %v2102_v44  ;;  %v9753_v58 = vcombine.low %v2097_v41, %v2101_v42  ;;  %v9755_v59 = vcombine.low %v2098_v43, %v2102_v44  ;;  %v1776_v41 = vld [vmem:[%s11510_s7 + $0x3d8] sm:$0xff] }
 0x313   : > { %5363 = vmatpush1.bf16.msra.mxu0 %v9697_v46  ;;  %5527 = vmatpush1.bf16.msra.mxu1 %v9699_v47  ;;  %v9748_v46 = vcombine.high %v2090_v36, %v2094_v37  ;;  %v1754_v47 = vld [vmem:[%s11510_s7 + $0x328] sm:$0xff] }
 0x314   : > { %5364 = vmatprep.subr.bf16.mxu0 %v9706_v48  ;;  %5528 = vmatprep.subr.bf16.mxu1 %v9708_v49  ;;  %v1756_v48 = vld [vmem:[%s11510_s7 + $0x338] sm:$0xff]  ;;  %v9745_v49 = vcombine.low %v2089_v34, %v2093_v35  ;;  %v2105_v57 = vunpack.c.l.s8.bf16 %v1754_v47  ;;  %v2106_v53 = vunpack.c.h.s8.bf16 %v1754_v47  ;;  %v2150_v47 = vunpack.c.h.s8.bf16 %v1776_v41 }
 0x315   : > { %v2109_v5 = vunpack.c.l.s8.bf16 %v1756_v48 }
 0x317   : > { %5365 = vmatpush1.bf16.msra.mxu0 %v9705_v19  ;;  %5529 = vmatpush1.bf16.msra.mxu1 %v9707_v55  ;;  %v2110_v19 = vunpack.c.h.s8.bf16 %v1756_v48  ;;  %v1758_v55 = vld [vmem:[%s11510_s7 + $0x348] sm:$0xff]  ;;  %v9762_v4 = vcombine.high %v2105_v57, %v2109_v5 }
 0x318   : > { %5366 = vmatprep.subr.bf16.mxu0 %v9714_v61  ;;  %5530 = vmatprep.subr.bf16.mxu1 %v9716_v62  ;;  %v2113_v60 = vunpack.c.l.s8.bf16 %v1758_v55  ;;  %v2117_v61 = vunpack.c.l.s8.bf16 %v1760_v56  ;;  %v2114_v62 = vunpack.c.h.s8.bf16 %v1758_v55 }
 0x319   : > { %v9763_v10 = vcombine.low %v2106_v53, %v2110_v19 }
 0x31a   : > { %v9770_v11 = vcombine.high %v2113_v60, %v2117_v61  ;;  %v9772_v12 = vcombine.high %v2114_v62, %v2118_v3  ;;  %v9769_v23 = vcombine.low %v2113_v60, %v2117_v61  ;;  %v9771_v24 = vcombine.low %v2114_v62, %v2118_v3  ;;  %v1784_v60 = vld [vmem:[%s11510_s7 + $0x418] sm:$0xff] }
 0x31b   : > { %5367 = vmatpush1.bf16.msra.mxu0 %v9713_v13  ;;  %5531 = vmatpush1.bf16.msra.mxu1 %v9715_v30  ;;  %v9764_v13 = vcombine.high %v2106_v53, %v2110_v19  ;;  %v1762_v30 = vld [vmem:[%s11510_s7 + $0x368] sm:$0xff] }
 0x31c   : > { %5368 = vmatprep.subr.bf16.mxu0 %v9722_v7  ;;  %5532 = vmatprep.subr.bf16.mxu1 %v9724_v9  ;;  %v1764_v7 = vld [vmem:[%s11510_s7 + $0x378] sm:$0xff]  ;;  %v9761_v9 = vcombine.low %v2105_v57, %v2109_v5  ;;  %v2121_v15 = vunpack.c.l.s8.bf16 %v1762_v30  ;;  %v2122_v16 = vunpack.c.h.s8.bf16 %v1762_v30  ;;  %v2166_v30 = vunpack.c.h.s8.bf16 %v1784_v60 }
 0x31d   : > { %v2125_v17 = vunpack.c.l.s8.bf16 %v1764_v7 }
 0x31f   : > { %5369 = vmatpush1.bf16.msra.mxu0 %v9721_v20  ;;  %5533 = vmatpush1.bf16.msra.mxu1 %v9723_v21  ;;  %v2126_v20 = vunpack.c.h.s8.bf16 %v1764_v7  ;;  %v1766_v21 = vld [vmem:[%s11510_s7 + $0x388] sm:$0xff]  ;;  %v9778_v29 = vcombine.high %v2121_v15, %v2125_v17 }
 0x320   : > { %5370 = vmatprep.subr.bf16.mxu0 %v9730_v26  ;;  %5534 = vmatprep.subr.bf16.mxu1 %v9732_v27  ;;  %v2129_v25 = vunpack.c.l.s8.bf16 %v1766_v21  ;;  %v2133_v26 = vunpack.c.l.s8.bf16 %v1768_v22  ;;  %v2130_v27 = vunpack.c.h.s8.bf16 %v1766_v21 }
 0x321   : > { %v9779_v34 = vcombine.low %v2122_v16, %v2126_v20 }
 0x322   : > { %v9786_v35 = vcombine.high %v2129_v25, %v2133_v26  ;;  %v9788_v36 = vcombine.high %v2130_v27, %v2134_v28  ;;  %v9785_v42 = vcombine.low %v2129_v25, %v2133_v26  ;;  %v9787_v43 = vcombine.low %v2130_v27, %v2134_v28  ;;  %v1792_v25 = vld [vmem:[%s11510_s7 + $0x458] sm:$0xff] }
 0x323   : > { %5371 = vmatpush1.bf16.msra.mxu0 %v9729_v2  ;;  %5535 = vmatpush1.bf16.msra.mxu1 %v9731_v31  ;;  %v9780_v2 = vcombine.high %v2122_v16, %v2126_v20  ;;  %v1770_v31 = vld [vmem:[%s11510_s7 + $0x3a8] sm:$0xff] }
 0x324   : > { %5372 = vmatprep.subr.bf16.mxu0 %v9738_v32  ;;  %5536 = vmatprep.subr.bf16.mxu1 %v9740_v33  ;;  %v1772_v32 = vld [vmem:[%s11510_s7 + $0x3b8] sm:$0xff]  ;;  %v9777_v33 = vcombine.low %v2121_v15, %v2125_v17  ;;  %v2137_v37 = vunpack.c.l.s8.bf16 %v1770_v31  ;;  %v2138_v39 = vunpack.c.h.s8.bf16 %v1770_v31  ;;  %v2182_v31 = vunpack.c.h.s8.bf16 %v1792_v25 }
 0x325   : > { %v2141_v38 = vunpack.c.l.s8.bf16 %v1772_v32 }
 0x327   : > { %5373 = vmatpush1.bf16.msra.mxu0 %v9737_v40  ;;  %5537 = vmatpush1.bf16.msra.mxu1 %v9739_v0  ;;  %v2142_v40 = vunpack.c.h.s8.bf16 %v1772_v32  ;;  %v1774_v0 = vld [vmem:[%s11510_s7 + $0x3c8] sm:$0xff]  ;;  %v9794_v48 = vcombine.high %v2137_v37, %v2141_v38 }
 0x328   : > { %5374 = vmatprep.subr.bf16.mxu0 %v9746_v45  ;;  %5538 = vmatprep.subr.bf16.mxu1 %v9748_v46  ;;  %v2145_v44 = vunpack.c.l.s8.bf16 %v1774_v0  ;;  %v2149_v45 = vunpack.c.l.s8.bf16 %v1776_v41  ;;  %v2146_v46 = vunpack.c.h.s8.bf16 %v1774_v0 }
 0x329   : > { %v9795_v57 = vcombine.low %v2138_v39, %v2142_v40 }
 0x32a   : > { %v9802_v5 = vcombine.high %v2145_v44, %v2149_v45  ;;  %v9804_v53 = vcombine.high %v2146_v46, %v2150_v47  ;;  %v9801_v61 = vcombine.low %v2145_v44, %v2149_v45  ;;  %v9803_v62 = vcombine.low %v2146_v46, %v2150_v47  ;;  %v1800_v44 = vld [vmem:[%s11510_s7 + $0x498] sm:$0xff] }
 0x32b   : > { %5375 = vmatpush1.bf16.msra.mxu0 %v9745_v49  ;;  %5539 = vmatpush1.bf16.msra.mxu1 %v9747_v50  ;;  %v9796_v49 = vcombine.high %v2138_v39, %v2142_v40  ;;  %v1778_v50 = vld [vmem:[%s11510_s7 + $0x3e8] sm:$0xff]  ;;  %v2197_v47 = vunpack.c.l.s8.bf16 %v1800_v44 }
 0x32c   : > { %5376 = vmatprep.subr.bf16.mxu0 %v9754_v51  ;;  %5540 = vmatprep.subr.bf16.mxu1 %v9756_v52  ;;  %v1780_v51 = vld [vmem:[%s11510_s7 + $0x3f8] sm:$0xff]  ;;  %v9793_v52 = vcombine.low %v2137_v37, %v2141_v38  ;;  %v2153_v19 = vunpack.c.l.s8.bf16 %v1778_v50  ;;  %v2154_v56 = vunpack.c.h.s8.bf16 %v1778_v50 }
 0x32d   : > { %v2157_v55 = vunpack.c.l.s8.bf16 %v1780_v51 }
 0x32f   : > { %5377 = vmatpush1.bf16.msra.mxu0 %v9753_v58  ;;  %5541 = vmatpush1.bf16.msra.mxu1 %v9755_v59  ;;  %v2158_v58 = vunpack.c.h.s8.bf16 %v1780_v51  ;;  %v1782_v59 = vld [vmem:[%s11510_s7 + $0x408] sm:$0xff]  ;;  %v9810_v7 = vcombine.high %v2153_v19, %v2157_v55 }
 0x330   : > { %5378 = vmatprep.subr.bf16.mxu0 %v9762_v4  ;;  %5542 = vmatprep.subr.bf16.mxu1 %v9764_v13  ;;  %v2161_v3 = vunpack.c.l.s8.bf16 %v1782_v59  ;;  %v2165_v4 = vunpack.c.l.s8.bf16 %v1784_v60  ;;  %v2162_v13 = vunpack.c.h.s8.bf16 %v1782_v59  ;;  %v1806_v60 = vld [vmem:[%s11510_s7 + $0x4c8] sm:$0xff] }
 0x331   : > { %v9811_v15 = vcombine.low %v2154_v56, %v2158_v58 }
 0x332   : > { %v9818_v17 = vcombine.high %v2161_v3, %v2165_v4  ;;  %v9820_v16 = vcombine.high %v2162_v13, %v2166_v30  ;;  %v9817_v26 = vcombine.low %v2161_v3, %v2165_v4  ;;  %v9819_v27 = vcombine.low %v2162_v13, %v2166_v30 }
 0x333   : > { %5379 = vmatpush1.bf16.msra.mxu0 %v9761_v9  ;;  %5543 = vmatpush1.bf16.msra.mxu1 %v9763_v10  ;;  %v9812_v9 = vcombine.high %v2154_v56, %v2158_v58  ;;  %v1786_v10 = vld [vmem:[%s11510_s7 + $0x428] sm:$0xff]  ;;  %v2209_v4 = vunpack.c.l.s8.bf16 %v1806_v60  ;;  %v2210_v30 = vunpack.c.h.s8.bf16 %v1806_v60 }
 0x334   : > { %5380 = vmatprep.subr.bf16.mxu0 %v9770_v11  ;;  %5544 = vmatprep.subr.bf16.mxu1 %v9772_v12  ;;  %v1788_v11 = vld [vmem:[%s11510_s7 + $0x438] sm:$0xff]  ;;  %v9809_v12 = vcombine.low %v2153_v19, %v2157_v55  ;;  %v2169_v20 = vunpack.c.l.s8.bf16 %v1786_v10  ;;  %v2170_v22 = vunpack.c.h.s8.bf16 %v1786_v10 }
 0x335   : > { %v2173_v21 = vunpack.c.l.s8.bf16 %v1788_v11 }
 0x337   : > { %5381 = vmatpush1.bf16.msra.mxu0 %v9769_v23  ;;  %5545 = vmatpush1.bf16.msra.mxu1 %v9771_v24  ;;  %v2174_v23 = vunpack.c.h.s8.bf16 %v1788_v11  ;;  %v1790_v24 = vld [vmem:[%s11510_s7 + $0x448] sm:$0xff]  ;;  %v9826_v32 = vcombine.high %v2169_v20, %v2173_v21 }
 0x338   : > { %5382 = vmatprep.subr.bf16.mxu0 %v9778_v29  ;;  %5546 = vmatprep.subr.bf16.mxu1 %v9780_v2  ;;  %v2177_v28 = vunpack.c.l.s8.bf16 %v1790_v24  ;;  %v2181_v29 = vunpack.c.l.s8.bf16 %v1792_v25  ;;  %v2178_v2 = vunpack.c.h.s8.bf16 %v1790_v24  ;;  %v1810_v11 = vld [vmem:[%s11510_s7 + $0x4e8] sm:$0xff] }
 0x339   : > { %v9827_v37 = vcombine.low %v2170_v22, %v2174_v23  ;;  %v1814_v25 = vld [vmem:[%s11510_s7 + $0x508] sm:$0xff] }
 0x33a   : > { %v9834_v38 = vcombine.high %v2177_v28, %v2181_v29  ;;  %v9836_v39 = vcombine.high %v2178_v2, %v2182_v31  ;;  %v9835_v45 = vcombine.low %v2178_v2, %v2182_v31  ;;  %v2226_v31 = vunpack.c.h.s8.bf16 %v1814_v25 }
 0x33b   : > { %5383 = vmatpush1.bf16.msra.mxu0 %v9777_v33  ;;  %5547 = vmatpush1.bf16.msra.mxu1 %v9779_v34  ;;  %v9828_v33 = vcombine.high %v2170_v22, %v2174_v23  ;;  %v1794_v34 = vld [vmem:[%s11510_s7 + $0x468] sm:$0xff]  ;;  %v2218_v23 = vunpack.c.h.s8.bf16 %v1810_v11 }
 0x33c   : > { %5384 = vmatprep.subr.bf16.mxu0 %v9786_v35  ;;  %5548 = vmatprep.subr.bf16.mxu1 %v9788_v36  ;;  %v1796_v35 = vld [vmem:[%s11510_s7 + $0x478] sm:$0xff]  ;;  %v9825_v36 = vcombine.low %v2169_v20, %v2173_v21  ;;  %v2185_v40 = vunpack.c.l.s8.bf16 %v1794_v34  ;;  %v2186_v41 = vunpack.c.h.s8.bf16 %v1794_v34  ;;  %v2217_v21 = vunpack.c.l.s8.bf16 %v1810_v11 }
 0x33d   : > { %v2189_v0 = vunpack.c.l.s8.bf16 %v1796_v35 }
 0x33f   : > { %5385 = vmatpush1.bf16.msra.mxu0 %v9785_v42  ;;  %5549 = vmatpush1.bf16.msra.mxu1 %v9787_v43  ;;  %v2190_v42 = vunpack.c.h.s8.bf16 %v1796_v35  ;;  %v1798_v43 = vld [vmem:[%s11510_s7 + $0x488] sm:$0xff]  ;;  %v9842_v50 = vcombine.high %v2185_v40, %v2189_v0 }
 0x340   : > { %5386 = vmatprep.subr.bf16.mxu0 %v9794_v48  ;;  %5550 = vmatprep.subr.bf16.mxu1 %v9796_v49  ;;  %v2193_v46 = vunpack.c.l.s8.bf16 %v1798_v43  ;;  %v2194_v48 = vunpack.c.h.s8.bf16 %v1798_v43  ;;  %v2198_v49 = vunpack.c.h.s8.bf16 %v1800_v44  ;;  %v1818_v35 = vld [vmem:[%s11510_s7 + $0x528] sm:$0xff] }
 0x341   : > { %v9844_v51 = vcombine.high %v2186_v41, %v2190_v42  ;;  %v1822_v44 = vld [vmem:[%s11510_s7 + $0x548] sm:$0xff] }
 0x342   : > { %v9852_v19 = vcombine.high %v2194_v48, %v2198_v49  ;;  %v9851_v3 = vcombine.low %v2194_v48, %v2198_v49  ;;  %v2242_v49 = vunpack.c.h.s8.bf16 %v1822_v44 }
 0x343   : > { %5387 = vmatpush1.bf16.msra.mxu0 %v9793_v52  ;;  %5551 = vmatpush1.bf16.msra.mxu1 %v9795_v57  ;;  %v1802_v52 = vld [vmem:[%s11510_s7 + $0x4a8] sm:$0xff]  ;;  %v1804_v57 = vld [vmem:[%s11510_s7 + $0x4b8] sm:$0xff] }
 0x344   : > { %5388 = vmatprep.subr.bf16.mxu0 %v9802_v5  ;;  %5552 = vmatprep.subr.bf16.mxu1 %v9804_v53  ;;  %v9841_v5 = vcombine.low %v2185_v40, %v2189_v0  ;;  %v9850_v53 = vcombine.high %v2193_v46, %v2197_v47  ;;  %v2201_v55 = vunpack.c.l.s8.bf16 %v1802_v52  ;;  %v2205_v56 = vunpack.c.l.s8.bf16 %v1804_v57 }
 0x345   : > { %v2202_v58 = vunpack.c.h.s8.bf16 %v1802_v52  ;;  %v2206_v59 = vunpack.c.h.s8.bf16 %v1804_v57  ;;  %v2233_v0 = vunpack.c.l.s8.bf16 %v1818_v35  ;;  %v1826_v57 = vld [vmem:[%s11510_s7 + $0x568] sm:$0xff] }
 0x347   : > { %5389 = vmatpush1.bf16.msra.mxu0 %v9801_v61  ;;  %5553 = vmatpush1.bf16.msra.mxu1 %v9803_v62  ;;  %v1808_v61 = vld [vmem:[%s11510_s7 + $0x4d8] sm:$0xff]  ;;  %v9849_v62 = vcombine.low %v2193_v46, %v2197_v47  ;;  %v9860_v10 = vcombine.high %v2202_v58, %v2206_v59  ;;  %v2241_v47 = vunpack.c.l.s8.bf16 %v1822_v44 }
 0x348   : > { %5390 = vmatprep.subr.bf16.mxu0 %v9810_v7  ;;  %5554 = vmatprep.subr.bf16.mxu1 %v9812_v9  ;;  %v2213_v13 = vunpack.c.l.s8.bf16 %v1808_v61  ;;  %v2214_v7 = vunpack.c.h.s8.bf16 %v1808_v61  ;;  %v9858_v9 = vcombine.high %v2201_v55, %v2205_v56  ;;  %v1830_v61 = vld [vmem:[%s11510_s7 + $0x588] sm:$0xff] }
 0x34a   : > { %v9868_v20 = vcombine.high %v2210_v30, %v2214_v7 }
 0x34b   : > { %5391 = vmatpush1.bf16.msra.mxu0 %v9809_v12  ;;  %5555 = vmatpush1.bf16.msra.mxu1 %v9811_v15  ;;  %v1812_v12 = vld [vmem:[%s11510_s7 + $0x4f8] sm:$0xff]  ;;  %v9857_v15 = vcombine.low %v2201_v55, %v2205_v56  ;;  %v2249_v56 = vunpack.c.l.s8.bf16 %v1826_v57 }
 0x34c   : > { %5401 = vmatprep.subr.bf16.mxu0 %v9818_v17  ;;  %5565 = vmatprep.subr.bf16.mxu1 %v9820_v16  ;;  %v9859_v17 = vcombine.low %v2202_v58, %v2206_v59  ;;  %v9866_v16 = vcombine.high %v2209_v4, %v2213_v13  ;;  %v2221_v22 = vunpack.c.l.s8.bf16 %v1812_v12  ;;  %v2222_v24 = vunpack.c.h.s8.bf16 %v1812_v12  ;;  %v1834_v12 = vld [vmem:[%s11510_s7 + $0x5a8] sm:$0xff] }
 0x34d   : > { %v2250_v59 = vunpack.c.h.s8.bf16 %v1826_v57 }
 0x34e   : > { %5393 = vmatmul.mubr.bf16.vlgmr.msra.gmra.mrb[4].mxu0 %v11700_v1  ;;  %5557 = vmatmul.mubr.bf16.vlgmr.msra.gmra.mrb[4].mxu1 %v11700_v1  ;;  %v9833_v1 = vcombine.low %v2177_v28, %v2181_v29  ;;  %v9867_v28 = vcombine.low %v2210_v30, %v2214_v7  ;;  %v2225_v29 = vunpack.c.l.s8.bf16 %v1814_v25  ;;  %v9876_v34 = vcombine.high %v2218_v23, %v2222_v24 }
 0x34f   : > { %5402 = vmatpush1.bf16.msra.mxu0 %v9817_v26  ;;  %5566 = vmatpush1.bf16.msra.mxu1 %v9819_v27  ;;  %v1816_v26 = vld [vmem:[%s11510_s7 + $0x518] sm:$0xff]  ;;  %v9865_v27 = vcombine.low %v2209_v4, %v2213_v13  ;;  %v2257_v13 = vunpack.c.l.s8.bf16 %v1830_v61  ;;  %v2258_v7 = vunpack.c.h.s8.bf16 %v1830_v61 }
 0x350   : > { %5403 = vmatprep.subr.bf16.mxu0 %v9826_v32  ;;  %5567 = vmatprep.subr.bf16.mxu1 %v9828_v33  ;;  %v2229_v2 = vunpack.c.l.s8.bf16 %v1816_v26  ;;  %v2230_v32 = vunpack.c.h.s8.bf16 %v1816_v26  ;;  %v9874_v33 = vcombine.high %v2217_v21, %v2221_v22  ;;  %v1838_v26 = vld [vmem:[%s11510_s7 + $0x5c8] sm:$0xff] }
 0x351   : > { %5433 = vmatprep.mubr.bf16.mxu0 %v11705_v18  ;;  %5597 = vmatprep.mubr.bf16.mxu1 %v11705_v18  ;;  %v9843_v18 = vcombine.low %v2186_v41, %v2190_v42  ;;  %v2234_v42 = vunpack.c.h.s8.bf16 %v1818_v35 }
 0x352   : > { %v9884_v40 = vcombine.high %v2226_v31, %v2230_v32  ;;  %v9883_v46 = vcombine.low %v2226_v31, %v2230_v32  ;;  %v2274_v32 = vunpack.c.h.s8.bf16 %v1838_v26 }
 0x353   : > { %5404 = vmatpush1.bf16.msra.mxu0 %v9825_v36  ;;  %5568 = vmatpush1.bf16.msra.mxu1 %v9827_v37  ;;  %v1820_v36 = vld [vmem:[%s11510_s7 + $0x538] sm:$0xff]  ;;  %v9873_v37 = vcombine.low %v2217_v21, %v2221_v22  ;;  %v2265_v22 = vunpack.c.l.s8.bf16 %v1834_v12 }
 0x354   : > { %5405 = vmatprep.subr.bf16.mxu0 %v9834_v38  ;;  %5569 = vmatprep.subr.bf16.mxu1 %v9836_v39  ;;  %v9875_v38 = vcombine.low %v2218_v23, %v2222_v24  ;;  %v9882_v39 = vcombine.high %v2225_v29, %v2229_v2  ;;  %v2237_v41 = vunpack.c.l.s8.bf16 %v1820_v36  ;;  %v2238_v43 = vunpack.c.h.s8.bf16 %v1820_v36  ;;  %v1842_v36 = vld [vmem:[%s11510_s7 + $0x5e8] sm:$0xff] }
 0x355   : > { %v2266_v24 = vunpack.c.h.s8.bf16 %v1834_v12 }
 0x356   : > { %v9892_v52 = vcombine.high %v2234_v42, %v2238_v43 }
 0x357   : > { %5406 = vmatpush1.bf16.msra.mxu0 %v9833_v1  ;;  %5570 = vmatpush1.bf16.msra.mxu1 %v9835_v45  ;;  %v1824_v1 = vld [vmem:[%s11510_s7 + $0x558] sm:$0xff]  ;;  %v9881_v45 = vcombine.low %v2225_v29, %v2229_v2  ;;  %v2273_v2 = vunpack.c.l.s8.bf16 %v1838_v26 }
 0x358   : > { %5407 = vmatprep.subr.bf16.mxu0 %v9842_v50  ;;  %5571 = vmatprep.subr.bf16.mxu1 %v9844_v51  ;;  %v2245_v48 = vunpack.c.l.s8.bf16 %v1824_v1  ;;  %v2246_v50 = vunpack.c.h.s8.bf16 %v1824_v1  ;;  %v9890_v51 = vcombine.high %v2233_v0, %v2237_v41  ;;  %v1846_v1 = vld [vmem:[%s11510_s7 + $0x608] sm:$0xff] }
 0x35a   : > { %v9900_v55 = vcombine.high %v2242_v49, %v2246_v50  ;;  %v9899_v4 = vcombine.low %v2242_v49, %v2246_v50  ;;  %v2290_v50 = vunpack.c.h.s8.bf16 %v1846_v1 }
 0x35b   : > { %5408 = vmatpush1.bf16.msra.mxu0 %v9841_v5  ;;  %5572 = vmatpush1.bf16.msra.mxu1 %v9843_v18  ;;  %v1828_v5 = vld [vmem:[%s11510_s7 + $0x578] sm:$0xff]  ;;  %v9889_v18 = vcombine.low %v2233_v0, %v2237_v41  ;;  %v2281_v41 = vunpack.c.l.s8.bf16 %v1842_v36 }
 0x35c   : > { %5409 = vmatprep.subr.bf16.mxu0 %v9850_v53  ;;  %5573 = vmatprep.subr.bf16.mxu1 %v9852_v19  ;;  %v9891_v53 = vcombine.low %v2234_v42, %v2238_v43  ;;  %v9898_v19 = vcombine.high %v2241_v47, %v2245_v48  ;;  %v2253_v58 = vunpack.c.l.s8.bf16 %v1828_v5  ;;  %v2254_v60 = vunpack.c.h.s8.bf16 %v1828_v5  ;;  %v1850_v5 = vld [vmem:[%s11510_s7 + $0x628] sm:$0xff] }
 0x35d   : > { %v2282_v43 = vunpack.c.h.s8.bf16 %v1842_v36  ;;  %v1866_v36 = vld [vmem:[%s11510_s7 + $0x6a8] sm:$0xff] }
 0x35e   : > { %v9908_v11 = vcombine.high %v2250_v59, %v2254_v60 }
 0x35f   : > { %5410 = vmatpush1.bf16.msra.mxu0 %v9849_v62  ;;  %5574 = vmatpush1.bf16.msra.mxu1 %v9851_v3  ;;  %v1832_v62 = vld [vmem:[%s11510_s7 + $0x598] sm:$0xff]  ;;  %v9897_v3 = vcombine.low %v2241_v47, %v2245_v48  ;;  %v2289_v48 = vunpack.c.l.s8.bf16 %v1846_v1 }
 0x360   : > { %5411 = vmatprep.subr.bf16.mxu0 %v9858_v9  ;;  %5575 = vmatprep.subr.bf16.mxu1 %v9860_v10  ;;  %v2261_v30 = vunpack.c.l.s8.bf16 %v1832_v62  ;;  %v2262_v9 = vunpack.c.h.s8.bf16 %v1832_v62  ;;  %v9906_v10 = vcombine.high %v2249_v56, %v2253_v58  ;;  %v1854_v62 = vld [vmem:[%s11510_s7 + $0x648] sm:$0xff]  ;;  %v1872_v1 = vld [vmem:[%s11510_s7 + $0x6d8] sm:$0xff] }
 0x362   : > { %v9916_v21 = vcombine.high %v2258_v7, %v2262_v9  ;;  %v9915_v29 = vcombine.low %v2258_v7, %v2262_v9  ;;  %v2306_v9 = vunpack.c.h.s8.bf16 %v1854_v62 }
 0x363   : > { %5412 = vmatpush1.bf16.msra.mxu0 %v9857_v15  ;;  %5576 = vmatpush1.bf16.msra.mxu1 %v9859_v17  ;;  %v1836_v15 = vld [vmem:[%s11510_s7 + $0x5b8] sm:$0xff]  ;;  %v9905_v17 = vcombine.low %v2249_v56, %v2253_v58  ;;  %v2297_v58 = vunpack.c.l.s8.bf16 %v1850_v5 }
 0x364   : > { %5413 = vmatprep.subr.bf16.mxu0 %v9866_v16  ;;  %5577 = vmatprep.subr.bf16.mxu1 %v9868_v20  ;;  %v9907_v16 = vcombine.low %v2250_v59, %v2254_v60  ;;  %v9914_v20 = vcombine.high %v2257_v13, %v2261_v30  ;;  %v2269_v23 = vunpack.c.l.s8.bf16 %v1836_v15  ;;  %v2270_v25 = vunpack.c.h.s8.bf16 %v1836_v15  ;;  %v1858_v15 = vld [vmem:[%s11510_s7 + $0x668] sm:$0xff] }
 0x365   : > { %v2298_v60 = vunpack.c.h.s8.bf16 %v1850_v5  ;;  %v1876_v5 = vld [vmem:[%s11510_s7 + $0x6f8] sm:$0xff] }
 0x366   : > { %v9924_v35 = vcombine.high %v2266_v24, %v2270_v25 }
 0x367   : > { %5414 = vmatpush1.bf16.msra.mxu0 %v9865_v27  ;;  %5578 = vmatpush1.bf16.msra.mxu1 %v9867_v28  ;;  %v1840_v27 = vld [vmem:[%s11510_s7 + $0x5d8] sm:$0xff]  ;;  %v9913_v28 = vcombine.low %v2257_v13, %v2261_v30  ;;  %v2305_v30 = vunpack.c.l.s8.bf16 %v1854_v62 }
 0x368   : > { %5415 = vmatprep.subr.bf16.mxu0 %v9874_v33  ;;  %5579 = vmatprep.subr.bf16.mxu1 %v9876_v34  ;;  %v2277_v31 = vunpack.c.l.s8.bf16 %v1840_v27  ;;  %v2278_v33 = vunpack.c.h.s8.bf16 %v1840_v27  ;;  %v9922_v34 = vcombine.high %v2265_v22, %v2269_v23  ;;  %v1862_v27 = vld [vmem:[%s11510_s7 + $0x688] sm:$0xff]  ;;  %v1880_v62 = vld [vmem:[%s11510_s7 + $0x718] sm:$0xff] }
 0x36a   : > { %v9932_v0 = vcombine.high %v2274_v32, %v2278_v33  ;;  %v9931_v47 = vcombine.low %v2274_v32, %v2278_v33  ;;  %v2322_v32 = vunpack.c.h.s8.bf16 %v1862_v27 }
 0x36b   : > { %5416 = vmatpush1.bf16.msra.mxu0 %v9873_v37  ;;  %5580 = vmatpush1.bf16.msra.mxu1 %v9875_v38  ;;  %v1844_v37 = vld [vmem:[%s11510_s7 + $0x5f8] sm:$0xff]  ;;  %v9921_v38 = vcombine.low %v2265_v22, %v2269_v23  ;;  %v2313_v23 = vunpack.c.l.s8.bf16 %v1858_v15 }
 0x36c   : > { %5417 = vmatprep.subr.bf16.mxu0 %v9882_v39  ;;  %5581 = vmatprep.subr.bf16.mxu1 %v9884_v40  ;;  %v9923_v39 = vcombine.low %v2266_v24, %v2270_v25  ;;  %v9930_v40 = vcombine.high %v2273_v2, %v2277_v31  ;;  %v2285_v42 = vunpack.c.l.s8.bf16 %v1844_v37  ;;  %v2286_v44 = vunpack.c.h.s8.bf16 %v1844_v37  ;;  %v1868_v37 = vld [vmem:[%s11510_s7 + $0x6b8] sm:$0xff] }
 0x36d   : > { %v2314_v25 = vunpack.c.h.s8.bf16 %v1858_v15  ;;  %v1884_v15 = vld [vmem:[%s11510_s7 + $0x738] sm:$0xff] }
 0x36e   : > { %v9940_v57 = vcombine.high %v2282_v43, %v2286_v44 }
 0x36f   : > { %5418 = vmatpush1.bf16.msra.mxu0 %v9881_v45  ;;  %5582 = vmatpush1.bf16.msra.mxu1 %v9883_v46  ;;  %v1848_v45 = vld [vmem:[%s11510_s7 + $0x618] sm:$0xff]  ;;  %v9929_v46 = vcombine.low %v2273_v2, %v2277_v31  ;;  %v2321_v2 = vunpack.c.l.s8.bf16 %v1862_v27 }
 0x370   : > { %5419 = vmatprep.subr.bf16.mxu0 %v9890_v51  ;;  %5583 = vmatprep.subr.bf16.mxu1 %v9892_v52  ;;  %v2293_v49 = vunpack.c.l.s8.bf16 %v1848_v45  ;;  %v2294_v51 = vunpack.c.h.s8.bf16 %v1848_v45  ;;  %v9938_v52 = vcombine.high %v2281_v41, %v2285_v42  ;;  %v1888_v27 = vld [vmem:[%s11510_s7 + $0x758] sm:$0xff] }
 0x372   : > { %v9948_v56 = vcombine.high %v2290_v50, %v2294_v51  ;;  %v9947_v13 = vcombine.low %v2290_v50, %v2294_v51  ;;  %v2342_v50 = vunpack.c.h.s8.bf16 %v1872_v1 }
 0x373   : > { %5420 = vmatpush1.bf16.msra.mxu0 %v9889_v18  ;;  %5584 = vmatpush1.bf16.msra.mxu1 %v9891_v53  ;;  %v1852_v18 = vld [vmem:[%s11510_s7 + $0x638] sm:$0xff]  ;;  %v9937_v53 = vcombine.low %v2281_v41, %v2285_v42  ;;  %v2333_v41 = vunpack.c.l.s8.bf16 %v1868_v37  ;;  %v2330_v42 = vunpack.c.h.s8.bf16 %v1866_v36 }
 0x374   : > { %5421 = vmatprep.subr.bf16.mxu0 %v9898_v19  ;;  %5585 = vmatprep.subr.bf16.mxu1 %v9900_v55  ;;  %v9939_v19 = vcombine.low %v2282_v43, %v2286_v44  ;;  %v9946_v55 = vcombine.high %v2289_v48, %v2293_v49  ;;  %v2301_v59 = vunpack.c.l.s8.bf16 %v1852_v18  ;;  %v2302_v61 = vunpack.c.h.s8.bf16 %v1852_v18  ;;  %v1870_v44 = vld [vmem:[%s11510_s7 + $0x6c8] sm:$0xff] }
 0x375   : > { %v2334_v43 = vunpack.c.h.s8.bf16 %v1868_v37 }
 0x376   : > { %v9956_v12 = vcombine.high %v2298_v60, %v2302_v61 }
 0x377   : > { %5422 = vmatpush1.bf16.msra.mxu0 %v9897_v3  ;;  %5586 = vmatpush1.bf16.msra.mxu1 %v9899_v4  ;;  %v1856_v3 = vld [vmem:[%s11510_s7 + $0x658] sm:$0xff]  ;;  %v9945_v4 = vcombine.low %v2289_v48, %v2293_v49  ;;  %v2341_v48 = vunpack.c.l.s8.bf16 %v1872_v1  ;;  %v2338_v49 = vunpack.c.h.s8.bf16 %v1870_v44 }
 0x378   : > { %5423 = vmatprep.subr.bf16.mxu0 %v9906_v10  ;;  %5587 = vmatprep.subr.bf16.mxu1 %v9908_v11  ;;  %v2309_v7 = vunpack.c.l.s8.bf16 %v1856_v3  ;;  %v2310_v10 = vunpack.c.h.s8.bf16 %v1856_v3  ;;  %v9954_v11 = vcombine.high %v2297_v58, %v2301_v59 }
 0x37a   : > { %v9964_v22 = vcombine.high %v2306_v9, %v2310_v10 }
 0x37b   : > { %5424 = vmatpush1.bf16.msra.mxu0 %v9905_v17  ;;  %5588 = vmatpush1.bf16.msra.mxu1 %v9907_v16  ;;  %v1860_v17 = vld [vmem:[%s11510_s7 + $0x678] sm:$0xff]  ;;  %v9953_v16 = vcombine.low %v2297_v58, %v2301_v59  ;;  %v2349_v58 = vunpack.c.l.s8.bf16 %v1876_v5 }
 0x37c   : > { %5425 = vmatprep.subr.bf16.mxu0 %v9914_v20  ;;  %5589 = vmatprep.subr.bf16.mxu1 %v9916_v21  ;;  %v9955_v20 = vcombine.low %v2298_v60, %v2302_v61  ;;  %v9962_v21 = vcombine.high %v2305_v30, %v2309_v7  ;;  %v2317_v24 = vunpack.c.l.s8.bf16 %v1860_v17  ;;  %v2318_v26 = vunpack.c.h.s8.bf16 %v1860_v17  ;;  %v1878_v61 = vld [vmem:[%s11510_s7 + $0x708] sm:$0xff] }
 0x37d   : > { %v2350_v60 = vunpack.c.h.s8.bf16 %v1876_v5 }
 0x37f   : > { %5426 = vmatpush1.bf16.msra.mxu0 %v9913_v28  ;;  %5590 = vmatpush1.bf16.msra.mxu1 %v9915_v29  ;;  %v1864_v28 = vld [vmem:[%s11510_s7 + $0x698] sm:$0xff]  ;;  %v9963_v29 = vcombine.low %v2306_v9, %v2310_v10  ;;  %v2358_v9 = vunpack.c.h.s8.bf16 %v1880_v62 }
 0x380   : > { %5427 = vmatprep.subr.bf16.mxu0 %v9922_v34  ;;  %5591 = vmatprep.subr.bf16.mxu1 %v9924_v35  ;;  %v2325_v31 = vunpack.c.l.s8.bf16 %v1864_v28  ;;  %v2326_v33 = vunpack.c.h.s8.bf16 %v1864_v28  ;;  %v9970_v34 = vcombine.high %v2313_v23, %v2317_v24  ;;  %v9972_v35 = vcombine.high %v2314_v25, %v2318_v26 }
 0x382   : > { %v9977_v45 = vcombine.low %v2321_v2, %v2325_v31 }
 0x383   : > { %5428 = vmatpush1.bf16.msra.mxu0 %v9921_v38  ;;  %5592 = vmatpush1.bf16.msra.mxu1 %v9923_v39  ;;  %v9969_v38 = vcombine.low %v2313_v23, %v2317_v24  ;;  %v9978_v39 = vcombine.high %v2321_v2, %v2325_v31  ;;  %v2365_v23 = vunpack.c.l.s8.bf16 %v1884_v15  ;;  %v2373_v2 = vunpack.c.l.s8.bf16 %v1888_v27 }
 0x384   : > { %5429 = vmatprep.subr.bf16.mxu0 %v9930_v40  ;;  %5593 = vmatprep.subr.bf16.mxu1 %v9932_v0  ;;  %v9980_v40 = vcombine.high %v2322_v32, %v2326_v33  ;;  %v2329_v0 = vunpack.c.l.s8.bf16 %v1866_v36  ;;  %v1892_v36 = vld [vmem:[%s11510_s7 + $0x778] sm:$0xff] }
 0x386   : > { %v9986_v51 = vcombine.high %v2329_v0, %v2333_v41  ;;  %v9985_v18 = vcombine.low %v2329_v0, %v2333_v41  ;;  %v2381_v0 = vunpack.c.l.s8.bf16 %v1892_v36 }
 0x387   : > { %5430 = vmatpush1.bf16.msra.mxu0 %v9929_v46  ;;  %5594 = vmatpush1.bf16.msra.mxu1 %v9931_v47  ;;  %v9979_v46 = vcombine.low %v2322_v32, %v2326_v33  ;;  %v2337_v47 = vunpack.c.l.s8.bf16 %v1870_v44  ;;  %v2374_v32 = vunpack.c.h.s8.bf16 %v1888_v27  ;;  %v1896_v44 = vld [vmem:[%s11510_s7 + $0x798] sm:$0xff] }
 0x388   : > { %5431 = vmatprep.subr.bf16.mxu0 %v9938_v52  ;;  %5595 = vmatprep.subr.bf16.mxu1 %v9940_v57  ;;  %v9988_v52 = vcombine.high %v2330_v42, %v2334_v43  ;;  %v1874_v57 = vld [vmem:[%s11510_s7 + $0x6e8] sm:$0xff] }
 0x389   : > { %v2346_v59 = vunpack.c.h.s8.bf16 %v1874_v57  ;;  %v9993_v3 = vcombine.low %v2337_v47, %v2341_v48 }
 0x38b   : > { %5432 = vmatpush1.bf16.msra.mxu0 %v9937_v53  ;;  %5596 = vmatpush1.bf16.msra.mxu1 %v9939_v19  ;;  %v9987_v53 = vcombine.low %v2330_v42, %v2334_v43  ;;  %v9994_v19 = vcombine.high %v2337_v47, %v2341_v48  ;;  %v2382_v42 = vunpack.c.h.s8.bf16 %v1892_v36  ;;  %v1894_v43 = vld [vmem:[%s11510_s7 + $0x788] sm:$0xff]  ;;  %v2389_v47 = vunpack.c.l.s8.bf16 %v1896_v44  ;;  %v913_v36 = vld [vmem:[%s11502_s14 + $0x50] sm:$0xff] }
 0x38c   : > { %5442 = vmatprep.subr.bf16.mxu0 %v9946_v55  ;;  %5606 = vmatprep.subr.bf16.mxu1 %v9948_v56  ;;  %v9996_v55 = vcombine.high %v2338_v49, %v2342_v50  ;;  %v2345_v56 = vunpack.c.l.s8.bf16 %v1874_v57  ;;  %v2386_v48 = vunpack.c.h.s8.bf16 %v1894_v43  ;;  %v1900_v57 = vld [vmem:[%s11510_s7 + $0x7b8] sm:$0xff] }
 0x38e   : > { %5434 = vmatmul.mubr.bf16.vlgmr.msra.gmra.mrb[4].mxu0 %v11743_v54  ;;  %5598 = vmatmul.mubr.bf16.vlgmr.msra.gmra.mrb[4].mxu1 %v11743_v54  ;;  %v9961_v54 = vcombine.low %v2305_v30, %v2309_v7  ;;  %v2357_v30 = vunpack.c.l.s8.bf16 %v1880_v62  ;;  %v2354_v7 = vunpack.c.h.s8.bf16 %v1878_v61  ;;  %v10002_v10 = vcombine.high %v2345_v56, %v2349_v58 }
 0x38f   : > { %5443 = vmatpush1.bf16.msra.mxu0 %v9945_v4  ;;  %5607 = vmatpush1.bf16.msra.mxu1 %v9947_v13  ;;  %v9995_v4 = vcombine.low %v2338_v49, %v2342_v50  ;;  %v2353_v13 = vunpack.c.l.s8.bf16 %v1878_v61  ;;  %v10001_v17 = vcombine.low %v2345_v56, %v2349_v58  ;;  %v2390_v49 = vunpack.c.h.s8.bf16 %v1896_v44  ;;  %v915_v44 = vld [vmem:[%s11502_s14 + $0x60] sm:$0xff] }
 0x390   : > { %5444 = vmatprep.subr.bf16.mxu0 %v9954_v11  ;;  %5608 = vmatprep.subr.bf16.mxu1 %v9956_v12  ;;  %v10004_v11 = vcombine.high %v2346_v59, %v2350_v60  ;;  %v1882_v12 = vld [vmem:[%s11510_s7 + $0x728] sm:$0xff]  ;;  %v2397_v58 = vunpack.c.l.s8.bf16 %v1900_v57 }
 0x391   : > { %10066 = vmatprep.mubr.msk.bf16.mxu0 %vm4962_vm6, %v11749_v8  ;;  %10068 = vmatprep.mubr.msk.bf16.mxu1 %vm4962_vm6, %v11749_v8  ;;  %v9971_v8 = vcombine.low %v2314_v25, %v2318_v26  ;;  %v2362_v24 = vunpack.c.h.s8.bf16 %v1882_v12  ;;  %v2366_v25 = vunpack.c.h.s8.bf16 %v1884_v15  ;;  %v1886_v26 = vld [vmem:[%s11510_s7 + $0x748] sm:$0xff]  ;;  %v10009_v28 = vcombine.low %v2353_v13, %v2357_v30 }
 0x392   : > { %v2370_v31 = vunpack.c.h.s8.bf16 %v1886_v26 }
 0x393   : > { %5445 = vmatpush1.bf16.msra.mxu0 %v9953_v16  ;;  %5609 = vmatpush1.bf16.msra.mxu1 %v9955_v20  ;;  %v10003_v16 = vcombine.low %v2346_v59, %v2350_v60  ;;  %v10010_v20 = vcombine.high %v2353_v13, %v2357_v30  ;;  %v2398_v60 = vunpack.c.h.s8.bf16 %v1900_v57 }
 0x394   : > { %5446 = vmatprep.subr.bf16.mxu0 %v9962_v21  ;;  %5610 = vmatprep.subr.bf16.mxu1 %v9964_v22  ;;  %v10012_v21 = vcombine.high %v2354_v7, %v2358_v9  ;;  %v2361_v22 = vunpack.c.l.s8.bf16 %v1882_v12 }
 0x396   : > { %v10018_v33 = vcombine.high %v2361_v22, %v2365_v23  ;;  %v10017_v37 = vcombine.low %v2361_v22, %v2365_v23 }
 0x397   : > { %5447 = vmatpush1.bf16.msra.mxu0 %v9961_v54  ;;  %5611 = vmatpush1.bf16.msra.mxu1 %v9963_v29  ;;  %v10011_v54 = vcombine.low %v2354_v7, %v2358_v9  ;;  %v2369_v29 = vunpack.c.l.s8.bf16 %v1886_v26  ;;  %v903_v7 = vld [vmem:[%s11502_s14] sm:$0xff]  ;;  %v905_v9 = vld [vmem:[%s11502_s14 + $0x10] sm:$0xff] }
 0x398   : > { %5448 = vmatprep.subr.bf16.mxu0 %v9970_v34  ;;  %5612 = vmatprep.subr.bf16.mxu1 %v9972_v35  ;;  %v10020_v34 = vcombine.high %v2362_v24, %v2366_v25  ;;  %v1890_v35 = vld [vmem:[%s11510_s7 + $0x768] sm:$0xff]  ;;  %v1158_v22 = vunpack.c.h.s8.bf16 %v905_v9  ;;  %v909_v26 = vld [vmem:[%s11502_s14 + $0x30] sm:$0xff] }
 0x399   : > { %v2378_v41 = vunpack.c.h.s8.bf16 %v1890_v35  ;;  %v10025_v1 = vcombine.low %v2369_v29, %v2373_v2 }
 0x39b   : > { %5449 = vmatpush1.bf16.msra.mxu0 %v9969_v38  ;;  %5613 = vmatpush1.bf16.msra.mxu1 %v9971_v8  ;;  %v10019_v38 = vcombine.low %v2362_v24, %v2366_v25  ;;  %v10026_v8 = vcombine.high %v2369_v29, %v2373_v2  ;;  %v907_v25 = vld [vmem:[%s11502_s14 + $0x20] sm:$0xff] }
 0x39c   : > { %5450 = vmatprep.subr.bf16.mxu0 %v9978_v39  ;;  %5614 = vmatprep.subr.bf16.mxu1 %v9980_v40  ;;  %v10028_v39 = vcombine.high %v2370_v31, %v2374_v32  ;;  %v2377_v40 = vunpack.c.l.s8.bf16 %v1890_v35  ;;  %v911_v35 = vld [vmem:[%s11502_s14 + $0x40] sm:$0xff] }
 0x39e   : > { %v10034_v50 = vcombine.high %v2377_v40, %v2381_v0  ;;  %v10033_v5 = vcombine.low %v2377_v40, %v2381_v0  ;;  %v1173_v40 = vunpack.c.l.s8.bf16 %v913_v36  ;;  %v1170_v0 = vunpack.c.h.s8.bf16 %v911_v35 }
 0x39f   : > { %5451 = vmatpush1.bf16.msra.mxu0 %v9977_v45  ;;  %5615 = vmatpush1.bf16.msra.mxu1 %v9979_v46  ;;  %v10027_v45 = vcombine.low %v2370_v31, %v2374_v32  ;;  %v2385_v46 = vunpack.c.l.s8.bf16 %v1894_v43  ;;  %v1161_v31 = vunpack.c.l.s8.bf16 %v907_v25  ;;  %v1165_v32 = vunpack.c.l.s8.bf16 %v909_v26 }
 0x3a0   : > { %5452 = vmatprep.subr.bf16.mxu0 %v9986_v51  ;;  %5616 = vmatprep.subr.bf16.mxu1 %v9988_v52  ;;  %v10036_v51 = vcombine.high %v2378_v41, %v2382_v42  ;;  %v1898_v52 = vld [vmem:[%s11510_s7 + $0x7a8] sm:$0xff] }
 0x3a1   : > { %v2393_v56 = vunpack.c.l.s8.bf16 %v1898_v52  ;;  %v2394_v59 = vunpack.c.h.s8.bf16 %v1898_v52  ;;  %v1178_v52 = vunpack.c.h.s8.bf16 %v915_v44 }
 0x3a3   : > { %5453 = vmatpush1.bf16.msra.mxu0 %v9985_v18  ;;  %5617 = vmatpush1.bf16.msra.mxu1 %v9987_v53  ;;  %v10035_v18 = vcombine.low %v2378_v41, %v2382_v42  ;;  %v10042_v53 = vcombine.high %v2385_v46, %v2389_v47  ;;  %v10050_v13 = vcombine.high %v2393_v56, %v2397_v58  ;;  %v1174_v41 = vunpack.c.h.s8.bf16 %v913_v36 }
 0x3a4   : > { %5454 = vmatprep.subr.bf16.mxu0 %v9994_v19  ;;  %5618 = vmatprep.subr.bf16.mxu1 %v9996_v55  ;;  %v10044_v19 = vcombine.high %v2386_v48, %v2390_v49  ;;  %v1902_v55 = vld [vmem:[%s11510_s7 + $0x7c8] sm:$0xff]  ;;  %v10052_v30 = vcombine.high %v2394_v59, %v2398_v60  ;;  %v10078_v42 = vcombine.high %v1161_v31, %v1165_v32 }
 0x3a5   : > { %v2401_v61 = vunpack.c.l.s8.bf16 %v1902_v55  ;;  %v2402_v62 = vunpack.c.h.s8.bf16 %v1902_v55 }
 0x3a7   : > { %5455 = vmatpush1.bf16.msra.mxu0 %v9993_v3  ;;  %5619 = vmatpush1.bf16.msra.mxu1 %v9995_v4  ;;  %v10041_v3 = vcombine.low %v2385_v46, %v2389_v47  ;;  %v10043_v4 = vcombine.low %v2386_v48, %v2390_v49  ;;  %v10057_v12 = vcombine.low %v2401_v61, %v2401_v61 }
 0x3a8   : > { %5456 = vmatprep.subr.bf16.mxu0 %v10002_v10  ;;  %5620 = vmatprep.subr.bf16.mxu1 %v10004_v11  ;;  %v10049_v10 = vcombine.low %v2393_v56, %v2397_v58  ;;  %v10051_v11 = vcombine.low %v2394_v59, %v2398_v60  ;;  %v10059_v15 = vcombine.low %v2402_v62, %v2402_v62 }
 0x3a9   : > { %v10058_v23 = vcombine.high %v2401_v61, %v2401_v61  ;;  %v10060_v24 = vcombine.high %v2402_v62, %v2402_v62  ;;  %v10077_v46 = vcombine.low %v1161_v31, %v1165_v32  ;;  %v10088_v49 = vcombine.high %v1170_v0, %v1174_v41  ;;  %v923_v61 = vld [vmem:[%s11502_s14 + $0xa0] sm:$0xff]  ;;  %v925_v62 = vld [vmem:[%s11502_s14 + $0xb0] sm:$0xff] }
 0x3ab   : > { %5457 = vmatpush1.bf16.msra.mxu0 %v10001_v17  ;;  %5621 = vmatpush1.bf16.msra.mxu1 %v10003_v16  ;;  %v11931_v17 = vld [vmem:[#allocation2] sm:$0xff]  ;;  %v1153_v16 = vunpack.c.l.s8.bf16 %v903_v7 }
 0x3ac   : > { %5458 = vmatprep.subr.bf16.mxu0 %v10010_v20  ;;  %5622 = vmatprep.subr.bf16.mxu1 %v10012_v21  ;;  %v1157_v20 = vunpack.c.l.s8.bf16 %v905_v9  ;;  %v1154_v21 = vunpack.c.h.s8.bf16 %v903_v7  ;;  %v11937_v27 = vrot.slane %v11931_v17, %v11620_v63  ;;  %v1193_v7 = vunpack.c.l.s8.bf16 %v923_v61 }
 0x3ad   : > { %v1197_v9 = vunpack.c.l.s8.bf16 %v925_v62 }
 0x3ae   : > { %v10070_v29 = vcombine.high %v1153_v16, %v1157_v20  ;;  %v10072_v2 = vcombine.high %v1154_v21, %v1158_v22 }
 0x3af   : > { %5459 = vmatpush1.bf16.msra.mxu0 %v10009_v28  ;;  %5623 = vmatpush1.bf16.msra.mxu1 %v10011_v54  ;;  %v4980_v28 = vsel %vm4966_vm7, %v10057_v12, 0  ;;  %v4986_v54 = vsel %vm4966_vm7, %v10059_v15, 0  ;;  %v927_v12 = vld [vmem:[%s11502_s14 + $0xc0] sm:$0xff]  ;;  %v929_v15 = vld [vmem:[%s11502_s14 + $0xd0] sm:$0xff] }
 0x3b0   : > { %5460 = vmatprep.subr.bf16.mxu0 %v10018_v33  ;;  %5624 = vmatprep.subr.bf16.mxu1 %v10020_v34  ;;  %v1162_v33 = vunpack.c.h.s8.bf16 %v907_v25  ;;  %v1166_v34 = vunpack.c.h.s8.bf16 %v909_v26  ;;  %v10110_v25 = vcombine.high %v1193_v7, %v1197_v9 }
 0x3b2   : > { %v10080_v43 = vcombine.high %v1162_v33, %v1166_v34  ;;  %v10079_v47 = vcombine.low %v1162_v33, %v1166_v34 }
 0x3b3   : > { %5461 = vmatpush1.bf16.msra.mxu0 %v10017_v37  ;;  %5625 = vmatpush1.bf16.msra.mxu1 %v10019_v38  ;;  %v5663_v37 = vcombine.high %v11937_v27, %v11937_v27  ;;  %v10069_v38 = vcombine.low %v1153_v16, %v1157_v20 }
 0x3b4   : > { %5462 = vmatprep.subr.bf16.mxu0 %v10026_v8  ;;  %5626 = vmatprep.subr.bf16.mxu1 %v10028_v39  ;;  %v10071_v8 = vcombine.low %v1154_v21, %v1158_v22  ;;  %v1169_v39 = vunpack.c.l.s8.bf16 %v911_v35  ;;  %v1201_v21 = vunpack.c.l.s8.bf16 %v927_v12  ;;  %v1205_v22 = vunpack.c.l.s8.bf16 %v929_v15 }
 0x3b6   : > { %v10086_v48 = vcombine.high %v1169_v39, %v1173_v40  ;;  %v10118_v31 = vcombine.high %v1201_v21, %v1205_v22 }
 0x3b7   : > { %5463 = vmatpush1.bf16.msra.mxu0 %v10025_v1  ;;  %5627 = vmatpush1.bf16.msra.mxu1 %v10027_v45  ;;  %v917_v1 = vld [vmem:[%s11502_s14 + $0x70] sm:$0xff]  ;;  %v11950_v45 = vrot.slane %v5663_v37, %v11620_v63  ;;  %v935_v37 = vld [vmem:[%s11502_s14 + $0x100] sm:$0xff] }
 0x3b8   : > { %5464 = vmatprep.subr.bf16.mxu0 %v10034_v50  ;;  %5628 = vmatprep.subr.bf16.mxu1 %v10036_v51  ;;  %v1177_v50 = vunpack.c.l.s8.bf16 %v915_v44  ;;  %v1181_v51 = vunpack.c.l.s8.bf16 %v917_v1  ;;  %v1182_v57 = vunpack.c.h.s8.bf16 %v917_v1  ;;  %v939_v1 = vld [vmem:[%s11502_s14 + $0x120] sm:$0xff] }
 0x3ba   : > { %v10094_v59 = vcombine.high %v1177_v50, %v1181_v51  ;;  %v10096_v60 = vcombine.high %v1178_v52, %v1182_v57 }
 0x3bb   : > { %5465 = vmatpush1.bf16.msra.mxu0 %v10033_v5  ;;  %5629 = vmatpush1.bf16.msra.mxu1 %v10035_v18  ;;  %v919_v5 = vld [vmem:[%s11502_s14 + $0x80] sm:$0xff]  ;;  %v921_v18 = vld [vmem:[%s11502_s14 + $0x90] sm:$0xff] }
 0x3bc   : > { %5466 = vmatprep.subr.bf16.mxu0 %v10042_v53  ;;  %5630 = vmatprep.subr.bf16.mxu1 %v10044_v19  ;;  %v10087_v53 = vcombine.low %v1170_v0, %v1174_v41  ;;  %v1185_v19 = vunpack.c.l.s8.bf16 %v919_v5  ;;  %v1189_v55 = vunpack.c.l.s8.bf16 %v921_v18  ;;  %v1186_v56 = vunpack.c.h.s8.bf16 %v919_v5 }
 0x3bd   : > { %v1190_v58 = vunpack.c.h.s8.bf16 %v921_v18  ;;  %v1218_v41 = vunpack.c.h.s8.bf16 %v935_v37  ;;  %v943_v18 = vld [vmem:[%s11502_s14 + $0x140] sm:$0xff] }
 0x3be   : > { %v10101_v16 = vcombine.low %v1185_v19, %v1189_v55 }
 0x3bf   : > { %5467 = vmatpush1.bf16.msra.mxu0 %v10041_v3  ;;  %5631 = vmatpush1.bf16.msra.mxu1 %v10043_v4  ;;  %v10093_v3 = vcombine.low %v1177_v50, %v1181_v51  ;;  %v10095_v4 = vcombine.low %v1178_v52, %v1182_v57  ;;  %v10103_v20 = vcombine.low %v1186_v56, %v1190_v58  ;;  %v1225_v51 = vunpack.c.l.s8.bf16 %v939_v1 }
 0x3c0   : > { %5468 = vmatprep.subr.bf16.mxu0 %v10050_v13  ;;  %5632 = vmatprep.subr.bf16.mxu1 %v10052_v30  ;;  %v10102_v13 = vcombine.high %v1185_v19, %v1189_v55  ;;  %v10104_v30 = vcombine.high %v1186_v56, %v1190_v58  ;;  %v1226_v57 = vunpack.c.h.s8.bf16 %v939_v1  ;;  %v1233_v55 = vunpack.c.l.s8.bf16 %v943_v18 }
 0x3c1   : > { %v1234_v58 = vunpack.c.h.s8.bf16 %v943_v18 }
 0x3c3   : > { %5469 = vmatpush1.bf16.msra.mxu0 %v10049_v10  ;;  %5633 = vmatpush1.bf16.msra.mxu1 %v10051_v11  ;;  %v1194_v10 = vunpack.c.h.s8.bf16 %v923_v61  ;;  %v1198_v11 = vunpack.c.h.s8.bf16 %v925_v62  ;;  %v947_v62 = vld [vmem:[%s11502_s14 + $0x160] sm:$0xff] }
 0x3c4   : > { %10065 = vmatprep.subr.msk.bf16.mxu0 %vm4966_vm7, %v10058_v23  ;;  %10067 = vmatprep.subr.msk.bf16.mxu1 %vm4966_vm7, %v10060_v24  ;;  %v1202_v23 = vunpack.c.h.s8.bf16 %v927_v12  ;;  %v1206_v24 = vunpack.c.h.s8.bf16 %v929_v15  ;;  %v951_v15 = vld [vmem:[%s11502_s14 + $0x180] sm:$0xff] }
 0x3c5   : > { %v10112_v26 = vcombine.high %v1194_v10, %v1198_v11 }
 0x3c6   : > { %v10120_v32 = vcombine.high %v1202_v23, %v1206_v24 }
 0x3c7   : > { %5471 = vmatpush1.bf16.msra.mxu0 %v4980_v28  ;;  %5635 = vmatpush1.bf16.msra.mxu1 %v4986_v54  ;;  %v931_v28 = vld [vmem:[%s11502_s14 + $0xe0] sm:$0xff]  ;;  %v933_v54 = vld [vmem:[%s11502_s14 + $0xf0] sm:$0xff] }
 0x3c8   : > { %8231 = vmatprep.subr.bf16.mxu0 %v10070_v29  ;;  %8395 = vmatprep.subr.bf16.mxu1 %v10072_v2  ;;  %v10109_v29 = vcombine.low %v1193_v7, %v1197_v9  ;;  %v10111_v2 = vcombine.low %v1194_v10, %v1198_v11  ;;  %v1209_v33 = vunpack.c.l.s8.bf16 %v931_v28  ;;  %v1213_v34 = vunpack.c.l.s8.bf16 %v933_v54 }
 0x3c9   : > { %v1210_v35 = vunpack.c.h.s8.bf16 %v931_v28  ;;  %v1214_v36 = vunpack.c.h.s8.bf16 %v933_v54  ;;  %v1241_v9 = vunpack.c.l.s8.bf16 %v947_v62  ;;  %v1242_v11 = vunpack.c.h.s8.bf16 %v947_v62  ;;  %v955_v54 = vld [vmem:[%s11502_s14 + $0x1a0] sm:$0xff] }
 0x3ca   : > { %5475 = vmatmul.mubr.bf16.vlgmr.msra.gmra.mrb[4].mxu0 %v11790_v6  ;;  %5639 = vmatmul.mubr.bf16.vlgmr.msra.gmra.mrb[4].mxu1 %v11790_v6  ;;  %v10085_v6 = vcombine.low %v1169_v39, %v1173_v40  ;;  %v10119_v39 = vcombine.low %v1202_v23, %v1206_v24  ;;  %v1217_v40 = vunpack.c.l.s8.bf16 %v935_v37  ;;  %v1250_v24 = vunpack.c.h.s8.bf16 %v951_v15 }
 0x3cb   : > { %8232 = vmatpush1.bf16.msra.mxu0 %v10069_v38  ;;  %8396 = vmatpush1.bf16.msra.mxu1 %v10071_v8  ;;  %v937_v38 = vld [vmem:[%s11502_s14 + $0x110] sm:$0xff]  ;;  %v10117_v8 = vcombine.low %v1201_v21, %v1205_v22  ;;  %v10128_v44 = vcombine.high %v1210_v35, %v1214_v36  ;;  %v1249_v22 = vunpack.c.l.s8.bf16 %v951_v15 }
 0x3cc   : > { %8233 = vmatprep.subr.bf16.mxu0 %v10078_v42  ;;  %8397 = vmatprep.subr.bf16.mxu1 %v10080_v43  ;;  %v1221_v0 = vunpack.c.l.s8.bf16 %v937_v38  ;;  %v1222_v42 = vunpack.c.h.s8.bf16 %v937_v38  ;;  %v10126_v43 = vcombine.high %v1209_v33, %v1213_v34  ;;  %v959_v38 = vld [vmem:[%s11502_s14 + $0x1c0] sm:$0xff] }
 0x3cd   : > { %8263 = vmatprep.mubr.bf16.mxu0 %v11950_v45  ;;  %8427 = vmatprep.mubr.bf16.mxu1 %v11950_v45 }
 0x3ce   : > { %v10136_v50 = vcombine.high %v1218_v41, %v1222_v42  ;;  %v10135_v19 = vcombine.low %v1218_v41, %v1222_v42  ;;  %v1266_v42 = vunpack.c.h.s8.bf16 %v959_v38 }
 0x3cf   : > { %8234 = vmatpush1.bf16.msra.mxu0 %v10077_v46  ;;  %8398 = vmatpush1.bf16.msra.mxu1 %v10079_v47  ;;  %v941_v46 = vld [vmem:[%s11502_s14 + $0x130] sm:$0xff]  ;;  %v10125_v47 = vcombine.low %v1209_v33, %v1213_v34  ;;  %v1257_v34 = vunpack.c.l.s8.bf16 %v955_v54 }
 0x3d0   : > { %8235 = vmatprep.subr.bf16.mxu0 %v10086_v48  ;;  %8399 = vmatprep.subr.bf16.mxu1 %v10088_v49  ;;  %v10127_v48 = vcombine.low %v1210_v35, %v1214_v36  ;;  %v10134_v49 = vcombine.high %v1217_v40, %v1221_v0  ;;  %v1229_v52 = vunpack.c.l.s8.bf16 %v941_v46  ;;  %v1230_v5 = vunpack.c.h.s8.bf16 %v941_v46  ;;  %v963_v46 = vld [vmem:[%s11502_s14 + $0x1e0] sm:$0xff] }
 0x3d1   : > { %v1258_v36 = vunpack.c.h.s8.bf16 %v955_v54 }
 0x3d2   : > { %v10144_v61 = vcombine.high %v1226_v57, %v1230_v5 }
 0x3d3   : > { %8236 = vmatpush1.bf16.msra.mxu0 %v10085_v6  ;;  %8400 = vmatpush1.bf16.msra.mxu1 %v10087_v53  ;;  %v945_v6 = vld [vmem:[%s11502_s14 + $0x150] sm:$0xff]  ;;  %v10133_v53 = vcombine.low %v1217_v40, %v1221_v0  ;;  %v1265_v0 = vunpack.c.l.s8.bf16 %v959_v38 }
 0x3d4   : > { %8237 = vmatprep.subr.bf16.mxu0 %v10094_v59  ;;  %8401 = vmatprep.subr.bf16.mxu1 %v10096_v60  ;;  %v1237_v56 = vunpack.c.l.s8.bf16 %v945_v6  ;;  %v1238_v59 = vunpack.c.h.s8.bf16 %v945_v6  ;;  %v10142_v60 = vcombine.high %v1225_v51, %v1229_v52  ;;  %v967_v6 = vld [vmem:[%s11502_s14 + $0x200] sm:$0xff] }
 0x3d6   : > { %v10152_v7 = vcombine.high %v1234_v58, %v1238_v59  ;;  %v10151_v21 = vcombine.low %v1234_v58, %v1238_v59  ;;  %v1282_v59 = vunpack.c.h.s8.bf16 %v967_v6 }
 0x3d7   : > { %8238 = vmatpush1.bf16.msra.mxu0 %v10093_v3  ;;  %8402 = vmatpush1.bf16.msra.mxu1 %v10095_v4  ;;  %v949_v3 = vld [vmem:[%s11502_s14 + $0x170] sm:$0xff]  ;;  %v10141_v4 = vcombine.low %v1225_v51, %v1229_v52  ;;  %v1273_v52 = vunpack.c.l.s8.bf16 %v963_v46 }
 0x3d8   : > { %8239 = vmatprep.subr.bf16.mxu0 %v10102_v13  ;;  %8403 = vmatprep.subr.bf16.mxu1 %v10104_v30  ;;  %v10143_v13 = vcombine.low %v1226_v57, %v1230_v5  ;;  %v10150_v30 = vcombine.high %v1233_v55, %v1237_v56  ;;  %v1245_v10 = vunpack.c.l.s8.bf16 %v949_v3  ;;  %v1246_v12 = vunpack.c.h.s8.bf16 %v949_v3  ;;  %v971_v3 = vld [vmem:[%s11502_s14 + $0x220] sm:$0xff] }
 0x3d9   : > { %v1274_v5 = vunpack.c.h.s8.bf16 %v963_v46 }
 0x3da   : > { %v10160_v28 = vcombine.high %v1242_v11, %v1246_v12 }
 0x3db   : > { %8240 = vmatpush1.bf16.msra.mxu0 %v10101_v16  ;;  %8404 = vmatpush1.bf16.msra.mxu1 %v10103_v20  ;;  %v953_v16 = vld [vmem:[%s11502_s14 + $0x190] sm:$0xff]  ;;  %v10149_v20 = vcombine.low %v1233_v55, %v1237_v56  ;;  %v1281_v56 = vunpack.c.l.s8.bf16 %v967_v6 }
 0x3dc   : > { %8241 = vmatprep.subr.bf16.mxu0 %v10110_v25  ;;  %8405 = vmatprep.subr.bf16.mxu1 %v10112_v26  ;;  %v1253_v23 = vunpack.c.l.s8.bf16 %v953_v16  ;;  %v1254_v25 = vunpack.c.h.s8.bf16 %v953_v16  ;;  %v10158_v26 = vcombine.high %v1241_v9, %v1245_v10  ;;  %v975_v16 = vld [vmem:[%s11502_s14 + $0x240] sm:$0xff] }
 0x3de   : > { %v10168_v33 = vcombine.high %v1250_v24, %v1254_v25  ;;  %v10167_v40 = vcombine.low %v1250_v24, %v1254_v25  ;;  %v1297_v24 = vunpack.c.l.s8.bf16 %v975_v16 }
 0x3df   : > { %8242 = vmatpush1.bf16.msra.mxu0 %v10109_v29  ;;  %8406 = vmatpush1.bf16.msra.mxu1 %v10111_v2  ;;  %v957_v29 = vld [vmem:[%s11502_s14 + $0x1b0] sm:$0xff]  ;;  %v10157_v2 = vcombine.low %v1241_v9, %v1245_v10  ;;  %v1289_v10 = vunpack.c.l.s8.bf16 %v971_v3 }
 0x3e0   : > { %8243 = vmatprep.subr.bf16.mxu0 %v10118_v31  ;;  %8407 = vmatprep.subr.bf16.mxu1 %v10120_v32  ;;  %v10159_v31 = vcombine.low %v1242_v11, %v1246_v12  ;;  %v10166_v32 = vcombine.high %v1249_v22, %v1253_v23  ;;  %v1261_v35 = vunpack.c.l.s8.bf16 %v957_v29  ;;  %v1262_v37 = vunpack.c.h.s8.bf16 %v957_v29 }
 0x3e1   : > { %v1290_v12 = vunpack.c.h.s8.bf16 %v971_v3 }
 0x3e2   : > { %v10176_v1 = vcombine.high %v1258_v36, %v1262_v37 }
 0x3e3   : > { %8244 = vmatpush1.bf16.msra.mxu0 %v10117_v8  ;;  %8408 = vmatpush1.bf16.msra.mxu1 %v10119_v39  ;;  %v961_v8 = vld [vmem:[%s11502_s14 + $0x1d0] sm:$0xff]  ;;  %v10165_v39 = vcombine.low %v1249_v22, %v1253_v23 }
 0x3e4   : > { %8245 = vmatprep.subr.bf16.mxu0 %v10126_v43  ;;  %8409 = vmatprep.subr.bf16.mxu1 %v10128_v44  ;;  %v1269_v41 = vunpack.c.l.s8.bf16 %v961_v8  ;;  %v1270_v43 = vunpack.c.h.s8.bf16 %v961_v8  ;;  %v10174_v44 = vcombine.high %v1257_v34, %v1261_v35 }
 0x3e6   : > { %v10184_v51 = vcombine.high %v1266_v42, %v1270_v43  ;;  %v10183_v55 = vcombine.low %v1266_v42, %v1270_v43 }
 0x3e7   : > { %8246 = vmatpush1.bf16.msra.mxu0 %v10125_v47  ;;  %8410 = vmatpush1.bf16.msra.mxu1 %v10127_v48  ;;  %v965_v47 = vld [vmem:[%s11502_s14 + $0x1f0] sm:$0xff]  ;;  %v10173_v48 = vcombine.low %v1257_v34, %v1261_v35 }
 0x3e8   : > { %8247 = vmatprep.subr.bf16.mxu0 %v10134_v49  ;;  %8411 = vmatprep.subr.bf16.mxu1 %v10136_v50  ;;  %v10175_v49 = vcombine.low %v1258_v36, %v1262_v37  ;;  %v10182_v50 = vcombine.high %v1265_v0, %v1269_v41  ;;  %v1277_v57 = vunpack.c.l.s8.bf16 %v965_v47  ;;  %v1278_v18 = vunpack.c.h.s8.bf16 %v965_v47 }
 0x3ea   : > { %v10192_v62 = vcombine.high %v1274_v5, %v1278_v18 }
 0x3eb   : > { %8248 = vmatpush1.bf16.msra.mxu0 %v10133_v53  ;;  %8412 = vmatpush1.bf16.msra.mxu1 %v10135_v19  ;;  %v969_v53 = vld [vmem:[%s11502_s14 + $0x210] sm:$0xff]  ;;  %v10181_v19 = vcombine.low %v1265_v0, %v1269_v41 }
 0x3ec   : > { %8249 = vmatprep.subr.bf16.mxu0 %v10142_v60  ;;  %8413 = vmatprep.subr.bf16.mxu1 %v10144_v61  ;;  %v1285_v58 = vunpack.c.l.s8.bf16 %v969_v53  ;;  %v1286_v60 = vunpack.c.h.s8.bf16 %v969_v53  ;;  %v10190_v61 = vcombine.high %v1273_v52, %v1277_v57 }
 0x3ee   : > { %v10200_v9 = vcombine.high %v1282_v59, %v1286_v60  ;;  %v10197_v22 = vcombine.low %v1281_v56, %v1285_v58  ;;  %v10199_v23 = vcombine.low %v1282_v59, %v1286_v60 }
 0x3ef   : > { %8250 = vmatpush1.bf16.msra.mxu0 %v10141_v4  ;;  %8414 = vmatpush1.bf16.msra.mxu1 %v10143_v13  ;;  %v973_v4 = vld [vmem:[%s11502_s14 + $0x230] sm:$0xff]  ;;  %v10189_v13 = vcombine.low %v1273_v52, %v1277_v57 }
 0x3f0   : > { %8251 = vmatprep.subr.bf16.mxu0 %v10150_v30  ;;  %8415 = vmatprep.subr.bf16.mxu1 %v10152_v7  ;;  %v10191_v30 = vcombine.low %v1274_v5, %v1278_v18  ;;  %v10198_v7 = vcombine.high %v1281_v56, %v1285_v58  ;;  %v1293_v11 = vunpack.c.l.s8.bf16 %v973_v4  ;;  %v1294_v15 = vunpack.c.h.s8.bf16 %v973_v4 }
 0x3f2   : > { %v10206_v54 = vcombine.high %v1289_v10, %v1293_v11  ;;  %v10208_v29 = vcombine.high %v1290_v12, %v1294_v15 }
 0x3f3   : > { %8252 = vmatpush1.bf16.msra.mxu0 %v10149_v20  ;;  %8416 = vmatpush1.bf16.msra.mxu1 %v10151_v21  ;;  %v977_v20 = vld [vmem:[%s11502_s14 + $0x250] sm:$0xff]  ;;  %v11988_v21 = vrot.slane %v11937_v27, %v11620_v63  ;;  %v10205_v27 = vcombine.low %v1289_v10, %v1293_v11 }
 0x3f4   : > { %8253 = vmatprep.subr.bf16.mxu0 %v10158_v26  ;;  %8417 = vmatprep.subr.bf16.mxu1 %v10160_v28  ;;  %v1301_v25 = vunpack.c.l.s8.bf16 %v977_v20  ;;  %v1298_v26 = vunpack.c.h.s8.bf16 %v975_v16  ;;  %v1302_v28 = vunpack.c.h.s8.bf16 %v977_v20 }
 0x3f6   : > { %v10214_v34 = vcombine.high %v1297_v24, %v1301_v25  ;;  %v10216_v35 = vcombine.high %v1298_v26, %v1302_v28  ;;  %v10213_v0 = vcombine.low %v1297_v24, %v1301_v25  ;;  %v10215_v41 = vcombine.low %v1298_v26, %v1302_v28 }
 0x3f7   : > { %8254 = vmatpush1.bf16.msra.mxu0 %v10157_v2  ;;  %8418 = vmatpush1.bf16.msra.mxu1 %v10159_v31  ;;  %v979_v2 = vld [vmem:[%s11502_s14 + $0x260] sm:$0xff]  ;;  %v981_v31 = vld [vmem:[%s11502_s14 + $0x270] sm:$0xff] }
 0x3f8   : > { %8255 = vmatprep.subr.bf16.mxu0 %v10166_v32  ;;  %8419 = vmatprep.subr.bf16.mxu1 %v10168_v33  ;;  %v11994_v32 = vcombine.high %v11950_v45, %v11950_v45  ;;  %v10207_v33 = vcombine.low %v1290_v12, %v1294_v15  ;;  %v1305_v36 = vunpack.c.l.s8.bf16 %v979_v2  ;;  %v1309_v37 = vunpack.c.l.s8.bf16 %v981_v31 }
 0x3f9   : > { %v1306_v38 = vunpack.c.h.s8.bf16 %v979_v2  ;;  %v1310_v8 = vunpack.c.h.s8.bf16 %v981_v31 }
 0x3fa   : > { %v10222_v46 = vcombine.high %v1305_v36, %v1309_v37 }
 0x3fb   : > { %8256 = vmatpush1.bf16.msra.mxu0 %v10165_v39  ;;  %8420 = vmatpush1.bf16.msra.mxu1 %v10167_v40  ;;  %v983_v39 = vld [vmem:[%s11502_s14 + $0x280] sm:$0xff]  ;;  %v985_v40 = vld [vmem:[%s11502_s14 + $0x290] sm:$0xff]  ;;  %v10224_v47 = vcombine.high %v1306_v38, %v1310_v8 }
 0x3fc   : > { %8257 = vmatprep.subr.bf16.mxu0 %v10174_v44  ;;  %8421 = vmatprep.subr.bf16.mxu1 %v10176_v1  ;;  %v1313_v42 = vunpack.c.l.s8.bf16 %v983_v39  ;;  %v1317_v43 = vunpack.c.l.s8.bf16 %v985_v40  ;;  %v1314_v44 = vunpack.c.h.s8.bf16 %v983_v39  ;;  %v1318_v1 = vunpack.c.h.s8.bf16 %v985_v40 }
 0x3fe   : > { %v10230_v52 = vcombine.high %v1313_v42, %v1317_v43  ;;  %v10232_v57 = vcombine.high %v1314_v44, %v1318_v1  ;;  %v10229_v56 = vcombine.low %v1313_v42, %v1317_v43  ;;  %v10231_v58 = vcombine.low %v1314_v44, %v1318_v1 }
 0x3ff   : > { %8258 = vmatpush1.bf16.msra.mxu0 %v10173_v48  ;;  %8422 = vmatpush1.bf16.msra.mxu1 %v10175_v49  ;;  %v987_v48 = vld [vmem:[%s11502_s14 + $0x2a0] sm:$0xff]  ;;  %v989_v49 = vld [vmem:[%s11502_s14 + $0x2b0] sm:$0xff] }
 0x400   : > { %8259 = vmatprep.subr.bf16.mxu0 %v10182_v50  ;;  %8423 = vmatprep.subr.bf16.mxu1 %v10184_v51  ;;  %v10221_v50 = vcombine.low %v1305_v36, %v1309_v37  ;;  %v10223_v51 = vcombine.low %v1306_v38, %v1310_v8  ;;  %v1321_v5 = vunpack.c.l.s8.bf16 %v987_v48  ;;  %v1325_v18 = vunpack.c.l.s8.bf16 %v989_v49 }
 0x401   : > { %v1322_v6 = vunpack.c.h.s8.bf16 %v987_v48  ;;  %v1326_v53 = vunpack.c.h.s8.bf16 %v989_v49 }
 0x402   : > { %v10238_v3 = vcombine.high %v1321_v5, %v1325_v18 }
 0x403   : > { %8260 = vmatpush1.bf16.msra.mxu0 %v10181_v19  ;;  %8424 = vmatpush1.bf16.msra.mxu1 %v10183_v55  ;;  %v991_v19 = vld [vmem:[%s11502_s14 + $0x2c0] sm:$0xff]  ;;  %v993_v55 = vld [vmem:[%s11502_s14 + $0x2d0] sm:$0xff]  ;;  %v10240_v4 = vcombine.high %v1322_v6, %v1326_v53 }
 0x404   : > { %8261 = vmatprep.subr.bf16.mxu0 %v10190_v61  ;;  %8425 = vmatprep.subr.bf16.mxu1 %v10192_v62  ;;  %v1329_v59 = vunpack.c.l.s8.bf16 %v991_v19  ;;  %v1333_v60 = vunpack.c.l.s8.bf16 %v993_v55  ;;  %v1330_v61 = vunpack.c.h.s8.bf16 %v991_v19  ;;  %v1334_v62 = vunpack.c.h.s8.bf16 %v993_v55 }
 0x406   : > { %v10246_v10 = vcombine.high %v1329_v59, %v1333_v60  ;;  %v10248_v11 = vcombine.high %v1330_v61, %v1334_v62  ;;  %v10245_v24 = vcombine.low %v1329_v59, %v1333_v60  ;;  %v10247_v25 = vcombine.low %v1330_v61, %v1334_v62 }
 0x407   : > { %8262 = vmatpush1.bf16.msra.mxu0 %v10189_v13  ;;  %8426 = vmatpush1.bf16.msra.mxu1 %v10191_v30  ;;  %v995_v13 = vld [vmem:[%s11502_s14 + $0x2e0] sm:$0xff]  ;;  %v997_v30 = vld [vmem:[%s11502_s14 + $0x2f0] sm:$0xff] }
 0x408   : > { %8272 = vmatprep.subr.bf16.mxu0 %v10198_v7  ;;  %8436 = vmatprep.subr.bf16.mxu1 %v10200_v9  ;;  %v10237_v7 = vcombine.low %v1321_v5, %v1325_v18  ;;  %v10239_v9 = vcombine.low %v1322_v6, %v1326_v53  ;;  %v1337_v12 = vunpack.c.l.s8.bf16 %v995_v13  ;;  %v1341_v15 = vunpack.c.l.s8.bf16 %v997_v30 }
 0x409   : > { %v1338_v16 = vunpack.c.h.s8.bf16 %v995_v13  ;;  %v1342_v20 = vunpack.c.h.s8.bf16 %v997_v30 }
 0x40a   : > { %8264 = vmatmul.mubr.bf16.vlgmr.msra.gmra.mrb[0].mxu0 %v11988_v21  ;;  %8428 = vmatmul.mubr.bf16.vlgmr.msra.gmra.mrb[0].mxu1 %v11988_v21  ;;  %v10254_v2 = vcombine.high %v1337_v12, %v1341_v15 }
 0x40b   : > { %8273 = vmatpush1.bf16.msra.mxu0 %v10197_v22  ;;  %8437 = vmatpush1.bf16.msra.mxu1 %v10199_v23  ;;  %v999_v22 = vld [vmem:[%s11502_s14 + $0x300] sm:$0xff]  ;;  %v1001_v23 = vld [vmem:[%s11502_s14 + $0x310] sm:$0xff]  ;;  %v10256_v31 = vcombine.high %v1338_v16, %v1342_v20 }
 0x40c   : > { %8274 = vmatprep.subr.bf16.mxu0 %v10206_v54  ;;  %8438 = vmatprep.subr.bf16.mxu1 %v10208_v29  ;;  %v1345_v26 = vunpack.c.l.s8.bf16 %v999_v22  ;;  %v1349_v28 = vunpack.c.l.s8.bf16 %v1001_v23  ;;  %v1346_v54 = vunpack.c.h.s8.bf16 %v999_v22  ;;  %v1350_v29 = vunpack.c.h.s8.bf16 %v1001_v23 }
 0x40d   : > { %8304 = vmatprep.mubr.bf16.mxu0 %v11994_v32  ;;  %8468 = vmatprep.mubr.bf16.mxu1 %v11994_v32 }
 0x40e   : > { %v10262_v36 = vcombine.high %v1345_v26, %v1349_v28  ;;  %v10264_v37 = vcombine.high %v1346_v54, %v1350_v29  ;;  %v10261_v42 = vcombine.low %v1345_v26, %v1349_v28  ;;  %v10263_v43 = vcombine.low %v1346_v54, %v1350_v29 }
 0x40f   : > { %8275 = vmatpush1.bf16.msra.mxu0 %v10205_v27  ;;  %8439 = vmatpush1.bf16.msra.mxu1 %v10207_v33  ;;  %v1003_v27 = vld [vmem:[%s11502_s14 + $0x320] sm:$0xff]  ;;  %v1005_v33 = vld [vmem:[%s11502_s14 + $0x330] sm:$0xff] }
 0x410   : > { %8276 = vmatprep.subr.bf16.mxu0 %v10214_v34  ;;  %8440 = vmatprep.subr.bf16.mxu1 %v10216_v35  ;;  %v10253_v34 = vcombine.low %v1337_v12, %v1341_v15  ;;  %v10255_v35 = vcombine.low %v1338_v16, %v1342_v20  ;;  %v1353_v38 = vunpack.c.l.s8.bf16 %v1003_v27  ;;  %v1357_v8 = vunpack.c.l.s8.bf16 %v1005_v33 }
 0x411   : > { %v1354_v39 = vunpack.c.h.s8.bf16 %v1003_v27  ;;  %v1358_v40 = vunpack.c.h.s8.bf16 %v1005_v33 }
 0x412   : > { %v10270_v48 = vcombine.high %v1353_v38, %v1357_v8 }
 0x413   : > { %8277 = vmatpush1.bf16.msra.mxu0 %v10213_v0  ;;  %8441 = vmatpush1.bf16.msra.mxu1 %v10215_v41  ;;  %v1007_v0 = vld [vmem:[%s11502_s14 + $0x340] sm:$0xff]  ;;  %v1009_v41 = vld [vmem:[%s11502_s14 + $0x350] sm:$0xff]  ;;  %v10272_v49 = vcombine.high %v1354_v39, %v1358_v40 }
 0x414   : > { %8278 = vmatprep.subr.bf16.mxu0 %v10222_v46  ;;  %8442 = vmatprep.subr.bf16.mxu1 %v10224_v47  ;;  %v1361_v44 = vunpack.c.l.s8.bf16 %v1007_v0  ;;  %v1365_v1 = vunpack.c.l.s8.bf16 %v1009_v41  ;;  %v1362_v46 = vunpack.c.h.s8.bf16 %v1007_v0  ;;  %v1366_v47 = vunpack.c.h.s8.bf16 %v1009_v41 }
 0x416   : > { %v10278_v5 = vcombine.high %v1361_v44, %v1365_v1  ;;  %v10280_v18 = vcombine.high %v1362_v46, %v1366_v47  ;;  %v10277_v59 = vcombine.low %v1361_v44, %v1365_v1  ;;  %v10279_v60 = vcombine.low %v1362_v46, %v1366_v47 }
 0x417   : > { %8279 = vmatpush1.bf16.msra.mxu0 %v10221_v50  ;;  %8443 = vmatpush1.bf16.msra.mxu1 %v10223_v51  ;;  %v1011_v50 = vld [vmem:[%s11502_s14 + $0x360] sm:$0xff]  ;;  %v1013_v51 = vld [vmem:[%s11502_s14 + $0x370] sm:$0xff]  ;;  %v5648_v44 = vcombine.high %v11931_v17, %v11931_v17 }
 0x418   : > { %8280 = vmatprep.subr.bf16.mxu0 %v10230_v52  ;;  %8444 = vmatprep.subr.bf16.mxu1 %v10232_v57  ;;  %v10269_v52 = vcombine.low %v1353_v38, %v1357_v8  ;;  %v10271_v57 = vcombine.low %v1354_v39, %v1358_v40  ;;  %v1369_v6 = vunpack.c.l.s8.bf16 %v1011_v50  ;;  %v1373_v53 = vunpack.c.l.s8.bf16 %v1013_v51 }
 0x419   : > { %v1370_v19 = vunpack.c.h.s8.bf16 %v1011_v50  ;;  %v1374_v55 = vunpack.c.h.s8.bf16 %v1013_v51 }
 0x41a   : > { %v10286_v13 = vcombine.high %v1369_v6, %v1373_v53 }
 0x41b   : > { %8281 = vmatpush1.bf16.msra.mxu0 %v10229_v56  ;;  %8445 = vmatpush1.bf16.msra.mxu1 %v10231_v58  ;;  %v1015_v56 = vld [vmem:[%s11502_s14 + $0x380] sm:$0xff]  ;;  %v1017_v58 = vld [vmem:[%s11502_s14 + $0x390] sm:$0xff]  ;;  %v10288_v30 = vcombine.high %v1370_v19, %v1374_v55 }
 0x41c   : > { %8282 = vmatprep.subr.bf16.mxu0 %v10238_v3  ;;  %8446 = vmatprep.subr.bf16.mxu1 %v10240_v4  ;;  %v1377_v61 = vunpack.c.l.s8.bf16 %v1015_v56  ;;  %v1381_v62 = vunpack.c.l.s8.bf16 %v1017_v58  ;;  %v1378_v3 = vunpack.c.h.s8.bf16 %v1015_v56  ;;  %v1382_v4 = vunpack.c.h.s8.bf16 %v1017_v58 }
 0x41e   : > { %v10294_v12 = vcombine.high %v1377_v61, %v1381_v62  ;;  %v10296_v15 = vcombine.high %v1378_v3, %v1382_v4  ;;  %v10293_v26 = vcombine.low %v1377_v61, %v1381_v62  ;;  %v10295_v28 = vcombine.low %v1378_v3, %v1382_v4  ;;  %v1041_v61 = vld [vmem:[%s11502_s14 + $0x450] sm:$0xff] }
 0x41f   : > { %8283 = vmatpush1.bf16.msra.mxu0 %v10237_v7  ;;  %8447 = vmatpush1.bf16.msra.mxu1 %v10239_v9  ;;  %v1019_v7 = vld [vmem:[%s11502_s14 + $0x3a0] sm:$0xff]  ;;  %v1021_v9 = vld [vmem:[%s11502_s14 + $0x3b0] sm:$0xff]  ;;  %v12039_v3 = vcombine.high %v11988_v21, %v11988_v21 }
 0x420   : > { %8284 = vmatprep.subr.bf16.mxu0 %v10246_v10  ;;  %8448 = vmatprep.subr.bf16.mxu1 %v10248_v11  ;;  %v10285_v10 = vcombine.low %v1369_v6, %v1373_v53  ;;  %v10287_v11 = vcombine.low %v1370_v19, %v1374_v55  ;;  %v1385_v16 = vunpack.c.l.s8.bf16 %v1019_v7  ;;  %v1389_v20 = vunpack.c.l.s8.bf16 %v1021_v9 }
 0x421   : > { %v1386_v22 = vunpack.c.h.s8.bf16 %v1019_v7  ;;  %v1390_v23 = vunpack.c.h.s8.bf16 %v1021_v9  ;;  %v1429_v7 = vunpack.c.l.s8.bf16 %v1041_v61 }
 0x422   : > { %v10302_v27 = vcombine.high %v1385_v16, %v1389_v20 }
 0x423   : > { %8285 = vmatpush1.bf16.msra.mxu0 %v10245_v24  ;;  %8449 = vmatpush1.bf16.msra.mxu1 %v10247_v25  ;;  %v1023_v24 = vld [vmem:[%s11502_s14 + $0x3c0] sm:$0xff]  ;;  %v1025_v25 = vld [vmem:[%s11502_s14 + $0x3d0] sm:$0xff]  ;;  %v10304_v33 = vcombine.high %v1386_v22, %v1390_v23 }
 0x424   : > { %8286 = vmatprep.subr.bf16.mxu0 %v10254_v2  ;;  %8450 = vmatprep.subr.bf16.mxu1 %v10256_v31  ;;  %v1393_v54 = vunpack.c.l.s8.bf16 %v1023_v24  ;;  %v1397_v29 = vunpack.c.l.s8.bf16 %v1025_v25  ;;  %v1394_v2 = vunpack.c.h.s8.bf16 %v1023_v24  ;;  %v1398_v31 = vunpack.c.h.s8.bf16 %v1025_v25 }
 0x426   : > { %v10310_v38 = vcombine.high %v1393_v54, %v1397_v29  ;;  %v10312_v8 = vcombine.high %v1394_v2, %v1398_v31  ;;  %v10309_v1 = vcombine.low %v1393_v54, %v1397_v29  ;;  %v10311_v46 = vcombine.low %v1394_v2, %v1398_v31  ;;  %v1047_v2 = vld [vmem:[%s11502_s14 + $0x480] sm:$0xff]  ;;  %v1049_v31 = vld [vmem:[%s11502_s14 + $0x490] sm:$0xff] }
 0x427   : > { %8287 = vmatpush1.bf16.msra.mxu0 %v10253_v34  ;;  %8451 = vmatpush1.bf16.msra.mxu1 %v10255_v35  ;;  %v1027_v34 = vld [vmem:[%s11502_s14 + $0x3e0] sm:$0xff]  ;;  %v1029_v35 = vld [vmem:[%s11502_s14 + $0x3f0] sm:$0xff] }
 0x428   : > { %8288 = vmatprep.subr.bf16.mxu0 %v10262_v36  ;;  %8452 = vmatprep.subr.bf16.mxu1 %v10264_v37  ;;  %v10301_v36 = vcombine.low %v1385_v16, %v1389_v20  ;;  %v10303_v37 = vcombine.low %v1386_v22, %v1390_v23  ;;  %v1401_v39 = vunpack.c.l.s8.bf16 %v1027_v34  ;;  %v1405_v40 = vunpack.c.l.s8.bf16 %v1029_v35  ;;  %v1045_v16 = vld [vmem:[%s11502_s14 + $0x470] sm:$0xff] }
 0x429   : > { %v1402_v0 = vunpack.c.h.s8.bf16 %v1027_v34  ;;  %v1406_v41 = vunpack.c.h.s8.bf16 %v1029_v35  ;;  %v1438_v29 = vunpack.c.h.s8.bf16 %v1045_v16  ;;  %v1441_v34 = vunpack.c.l.s8.bf16 %v1047_v2 }
 0x42a   : > { %v10318_v51 = vcombine.high %v1401_v39, %v1405_v40  ;;  %v10317_v17 = vcombine.low %v1401_v39, %v1405_v40  ;;  %v1445_v35 = vunpack.c.l.s8.bf16 %v1049_v31  ;;  %v1051_v39 = vld [vmem:[%s11502_s14 + $0x4a0] sm:$0xff]  ;;  %v1053_v40 = vld [vmem:[%s11502_s14 + $0x4b0] sm:$0xff] }
 0x42b   : > { %8289 = vmatpush1.bf16.msra.mxu0 %v10261_v42  ;;  %8453 = vmatpush1.bf16.msra.mxu1 %v10263_v43  ;;  %v1031_v42 = vld [vmem:[%s11502_s14 + $0x400] sm:$0xff]  ;;  %v1033_v43 = vld [vmem:[%s11502_s14 + $0x410] sm:$0xff]  ;;  %v10319_v6 = vcombine.low %v1402_v0, %v1406_v41 }
 0x42c   : > { %8290 = vmatprep.subr.bf16.mxu0 %v10270_v48  ;;  %8454 = vmatprep.subr.bf16.mxu1 %v10272_v49  ;;  %v1409_v47 = vunpack.c.l.s8.bf16 %v1031_v42  ;;  %v1413_v48 = vunpack.c.l.s8.bf16 %v1033_v43  ;;  %v1410_v49 = vunpack.c.h.s8.bf16 %v1031_v42  ;;  %v1414_v50 = vunpack.c.h.s8.bf16 %v1033_v43 }
 0x42d   : > { %v10358_v42 = vcombine.high %v1441_v34, %v1445_v35 }
 0x42e   : > { %v10326_v53 = vcombine.high %v1409_v47, %v1413_v48  ;;  %v10328_v19 = vcombine.high %v1410_v49, %v1414_v50  ;;  %v10325_v4 = vcombine.low %v1409_v47, %v1413_v48  ;;  %v1454_v47 = vunpack.c.h.s8.bf16 %v1053_v40  ;;  %v1055_v48 = vld [vmem:[%s11502_s14 + $0x4c0] sm:$0xff] }
 0x42f   : > { %8291 = vmatpush1.bf16.msra.mxu0 %v10269_v52  ;;  %8455 = vmatpush1.bf16.msra.mxu1 %v10271_v57  ;;  %v10320_v52 = vcombine.high %v1402_v0, %v1406_v41  ;;  %v1035_v57 = vld [vmem:[%s11502_s14 + $0x420] sm:$0xff] }
 0x430   : > { %8292 = vmatprep.subr.bf16.mxu0 %v10278_v5  ;;  %8456 = vmatprep.subr.bf16.mxu1 %v10280_v18  ;;  %v1037_v5 = vld [vmem:[%s11502_s14 + $0x430] sm:$0xff]  ;;  %v12031_v18 = vrot.slane %v5648_v44, %v11620_v63  ;;  %v1417_v55 = vunpack.c.l.s8.bf16 %v1035_v57  ;;  %v1418_v58 = vunpack.c.h.s8.bf16 %v1035_v57  ;;  %v1449_v44 = vunpack.c.l.s8.bf16 %v1051_v39 }
 0x431   : > { %v1421_v56 = vunpack.c.l.s8.bf16 %v1037_v5 }
 0x432   : > { %v5664_v62 = vcombine.high %v12031_v18, %v12031_v18 }
 0x433   : > { %8293 = vmatpush1.bf16.msra.mxu0 %v10277_v59  ;;  %8457 = vmatpush1.bf16.msra.mxu1 %v10279_v60  ;;  %v1422_v59 = vunpack.c.h.s8.bf16 %v1037_v5  ;;  %v1039_v60 = vld [vmem:[%s11502_s14 + $0x440] sm:$0xff]  ;;  %v10333_v22 = vcombine.low %v1417_v55, %v1421_v56  ;;  %v1458_v5 = vunpack.c.h.s8.bf16 %v1055_v48 }
 0x434   : > { %8294 = vmatprep.subr.bf16.mxu0 %v10286_v13  ;;  %8458 = vmatprep.subr.bf16.mxu1 %v10288_v30  ;;  %v10327_v13 = vcombine.low %v1410_v49, %v1414_v50  ;;  %v1425_v30 = vunpack.c.l.s8.bf16 %v1039_v60  ;;  %v1426_v9 = vunpack.c.h.s8.bf16 %v1039_v60  ;;  %v12044_v20 = vrot.slane %v5664_v62, %v11620_v63  ;;  %v1057_v49 = vld [vmem:[%s11502_s14 + $0x4d0] sm:$0xff] }
 0x435   : > { %v10335_v23 = vcombine.low %v1418_v58, %v1422_v59  ;;  %v10357_v50 = vcombine.low %v1441_v34, %v1445_v35  ;;  %v1461_v57 = vunpack.c.l.s8.bf16 %v1057_v49  ;;  %v1071_v34 = vld [vmem:[%s11502_s14 + $0x540] sm:$0xff]  ;;  %v1073_v35 = vld [vmem:[%s11502_s14 + $0x550] sm:$0xff] }
 0x436   : > { %v10342_v24 = vcombine.high %v1425_v30, %v1429_v7 }
 0x437   : > { %8295 = vmatpush1.bf16.msra.mxu0 %v10285_v10  ;;  %8459 = vmatpush1.bf16.msra.mxu1 %v10287_v11  ;;  %v1430_v10 = vunpack.c.h.s8.bf16 %v1041_v61  ;;  %v10334_v11 = vcombine.high %v1417_v55, %v1421_v56  ;;  %v1061_v55 = vld [vmem:[%s11502_s14 + $0x4f0] sm:$0xff] }
 0x438   : > { %8296 = vmatprep.subr.bf16.mxu0 %v10294_v12  ;;  %8460 = vmatprep.subr.bf16.mxu1 %v10296_v15  ;;  %v10336_v12 = vcombine.high %v1418_v58, %v1422_v59  ;;  %v1043_v15 = vld [vmem:[%s11502_s14 + $0x460] sm:$0xff]  ;;  %v1469_v62 = vunpack.c.l.s8.bf16 %v1061_v55 }
 0x439   : > { %v10344_v25 = vcombine.high %v1426_v9, %v1430_v10  ;;  %v1434_v54 = vunpack.c.h.s8.bf16 %v1043_v15 }
 0x43b   : > { %8297 = vmatpush1.bf16.msra.mxu0 %v10293_v26  ;;  %8461 = vmatpush1.bf16.msra.mxu1 %v10295_v28  ;;  %v1433_v26 = vunpack.c.l.s8.bf16 %v1043_v15  ;;  %v1437_v28 = vunpack.c.l.s8.bf16 %v1045_v16  ;;  %v10351_v41 = vcombine.low %v1434_v54, %v1438_v29 }
 0x43c   : > { %8298 = vmatprep.subr.bf16.mxu0 %v10302_v27  ;;  %8462 = vmatprep.subr.bf16.mxu1 %v10304_v33  ;;  %v10341_v27 = vcombine.low %v1425_v30, %v1429_v7  ;;  %v10343_v33 = vcombine.low %v1426_v9, %v1430_v10  ;;  %v1063_v30 = vld [vmem:[%s11502_s14 + $0x500] sm:$0xff]  ;;  %v1065_v7 = vld [vmem:[%s11502_s14 + $0x510] sm:$0xff] }
 0x43d   : > { %v10349_v0 = vcombine.low %v1433_v26, %v1437_v28  ;;  %v1474_v15 = vunpack.c.h.s8.bf16 %v1063_v30  ;;  %v1478_v16 = vunpack.c.h.s8.bf16 %v1065_v7 }
 0x43f   : > { %8299 = vmatpush1.bf16.msra.mxu0 %v10301_v36  ;;  %8463 = vmatpush1.bf16.msra.mxu1 %v10303_v37  ;;  %v1442_v36 = vunpack.c.h.s8.bf16 %v1047_v2  ;;  %v1446_v37 = vunpack.c.h.s8.bf16 %v1049_v31 }
 0x440   : > { %8300 = vmatprep.subr.bf16.mxu0 %v10310_v38  ;;  %8464 = vmatprep.subr.bf16.mxu1 %v10312_v8  ;;  %v10350_v38 = vcombine.high %v1433_v26, %v1437_v28  ;;  %v10352_v8 = vcombine.high %v1434_v54, %v1438_v29  ;;  %v10392_v29 = vcombine.high %v1474_v15, %v1478_v16 }
 0x441   : > { %v10360_v43 = vcombine.high %v1442_v36, %v1446_v37 }
 0x443   : > { %8301 = vmatpush1.bf16.msra.mxu0 %v10309_v1  ;;  %8465 = vmatpush1.bf16.msra.mxu1 %v10311_v46  ;;  %v1453_v1 = vunpack.c.l.s8.bf16 %v1053_v40  ;;  %v1450_v46 = vunpack.c.h.s8.bf16 %v1051_v39  ;;  %v1490_v39 = vunpack.c.h.s8.bf16 %v1071_v34  ;;  %v1494_v40 = vunpack.c.h.s8.bf16 %v1073_v35 }
 0x444   : > { %8302 = vmatprep.subr.bf16.mxu0 %v10318_v51  ;;  %8466 = vmatprep.subr.bf16.mxu1 %v10320_v52  ;;  %v10359_v51 = vcombine.low %v1442_v36, %v1446_v37  ;;  %v1457_v52 = vunpack.c.l.s8.bf16 %v1055_v48  ;;  %v10391_v37 = vcombine.low %v1474_v15, %v1478_v16 }
 0x445   : > { %v10365_v56 = vcombine.low %v1449_v44, %v1453_v1  ;;  %v10367_v58 = vcombine.low %v1450_v46, %v1454_v47 }
 0x446   : > { %v10374_v59 = vcombine.high %v1457_v52, %v1461_v57  ;;  %v10373_v9 = vcombine.low %v1457_v52, %v1461_v57  ;;  %v1079_v52 = vld [vmem:[%s11502_s14 + $0x580] sm:$0xff]  ;;  %v1081_v57 = vld [vmem:[%s11502_s14 + $0x590] sm:$0xff] }
 0x447   : > { %8303 = vmatpush1.bf16.msra.mxu0 %v10317_v17  ;;  %8467 = vmatpush1.bf16.msra.mxu1 %v10319_v6  ;;  %v1462_v17 = vunpack.c.h.s8.bf16 %v1057_v49  ;;  %v10366_v6 = vcombine.high %v1449_v44, %v1453_v1 }
 0x448   : > { %8313 = vmatprep.subr.bf16.mxu0 %v10326_v53  ;;  %8477 = vmatprep.subr.bf16.mxu1 %v10328_v19  ;;  %v10368_v53 = vcombine.high %v1450_v46, %v1454_v47  ;;  %v1059_v19 = vld [vmem:[%s11502_s14 + $0x4e0] sm:$0xff]  ;;  %v10408_v47 = vcombine.high %v1490_v39, %v1494_v40 }
 0x449   : > { %v10376_v60 = vcombine.high %v1458_v5, %v1462_v17  ;;  %v1465_v61 = vunpack.c.l.s8.bf16 %v1059_v19  ;;  %v10375_v10 = vcombine.low %v1458_v5, %v1462_v17  ;;  %v10407_v17 = vcombine.low %v1490_v39, %v1494_v40 }
 0x44a   : > { %8305 = vmatmul.mubr.bf16.vlgmr.msra.gmra.mrb[0].mxu0 %v12039_v3  ;;  %8469 = vmatmul.mubr.bf16.vlgmr.msra.gmra.mrb[0].mxu1 %v12039_v3 }
 0x44b   : > { %8314 = vmatpush1.bf16.msra.mxu0 %v10325_v4  ;;  %8478 = vmatpush1.bf16.msra.mxu1 %v10327_v13  ;;  %v1466_v4 = vunpack.c.h.s8.bf16 %v1059_v19  ;;  %v1470_v13 = vunpack.c.h.s8.bf16 %v1061_v55  ;;  %v10381_v26 = vcombine.low %v1465_v61, %v1469_v62  ;;  %v1506_v19 = vunpack.c.h.s8.bf16 %v1079_v52 }
 0x44c   : > { %8315 = vmatprep.subr.bf16.mxu0 %v10334_v11  ;;  %8479 = vmatprep.subr.bf16.mxu1 %v10336_v12  ;;  %v1473_v11 = vunpack.c.l.s8.bf16 %v1063_v30  ;;  %v1477_v12 = vunpack.c.l.s8.bf16 %v1065_v7  ;;  %v1510_v55 = vunpack.c.h.s8.bf16 %v1081_v57 }
 0x44d   : > { %8345 = vmatprep.mubr.bf16.mxu0 %v12044_v20  ;;  %8509 = vmatprep.mubr.bf16.mxu1 %v12044_v20  ;;  %v10383_v28 = vcombine.low %v1466_v4, %v1470_v13 }
 0x44e   : > { %v10390_v54 = vcombine.high %v1473_v11, %v1477_v12  ;;  %v10389_v36 = vcombine.low %v1473_v11, %v1477_v12  ;;  %v1087_v11 = vld [vmem:[%s11502_s14 + $0x5c0] sm:$0xff]  ;;  %v1089_v12 = vld [vmem:[%s11502_s14 + $0x5d0] sm:$0xff]  ;;  %v10423_v16 = vcombine.low %v1506_v19, %v1510_v55 }
 0x44f   : > { %8316 = vmatpush1.bf16.msra.mxu0 %v10333_v22  ;;  %8480 = vmatpush1.bf16.msra.mxu1 %v10335_v23  ;;  %v10382_v22 = vcombine.high %v1465_v61, %v1469_v62  ;;  %v10384_v23 = vcombine.high %v1466_v4, %v1470_v13  ;;  %v10424_v13 = vcombine.high %v1506_v19, %v1510_v55 }
 0x450   : > { %8317 = vmatprep.subr.bf16.mxu0 %v10342_v24  ;;  %8481 = vmatprep.subr.bf16.mxu1 %v10344_v25  ;;  %v1067_v24 = vld [vmem:[%s11502_s14 + $0x520] sm:$0xff]  ;;  %v1069_v25 = vld [vmem:[%s11502_s14 + $0x530] sm:$0xff]  ;;  %v12082_v19 = vrot.slane %v12031_v18, %v11620_v63 }
 0x451   : > { %v1481_v2 = vunpack.c.l.s8.bf16 %v1067_v24  ;;  %v1485_v31 = vunpack.c.l.s8.bf16 %v1069_v25 }
 0x453   : > { %8318 = vmatpush1.bf16.msra.mxu0 %v10341_v27  ;;  %8482 = vmatpush1.bf16.msra.mxu1 %v10343_v33  ;;  %v1482_v27 = vunpack.c.h.s8.bf16 %v1067_v24  ;;  %v1486_v33 = vunpack.c.h.s8.bf16 %v1069_v25  ;;  %v10397_v44 = vcombine.low %v1481_v2, %v1485_v31  ;;  %v1522_v24 = vunpack.c.h.s8.bf16 %v1087_v11 }
 0x454   : > { %8319 = vmatprep.subr.bf16.mxu0 %v10350_v38  ;;  %8483 = vmatprep.subr.bf16.mxu1 %v10352_v8  ;;  %v1489_v38 = vunpack.c.l.s8.bf16 %v1071_v34  ;;  %v1493_v8 = vunpack.c.l.s8.bf16 %v1073_v35  ;;  %v1526_v25 = vunpack.c.h.s8.bf16 %v1089_v12 }
 0x455   : > { %v10399_v1 = vcombine.low %v1482_v27, %v1486_v33 }
 0x456   : > { %v10406_v46 = vcombine.high %v1489_v38, %v1493_v8  ;;  %v10405_v5 = vcombine.low %v1489_v38, %v1493_v8  ;;  %v1095_v38 = vld [vmem:[%s11502_s14 + $0x600] sm:$0xff]  ;;  %v1097_v8 = vld [vmem:[%s11502_s14 + $0x610] sm:$0xff]  ;;  %v10439_v40 = vcombine.low %v1522_v24, %v1526_v25 }
 0x457   : > { %8320 = vmatpush1.bf16.msra.mxu0 %v10349_v0  ;;  %8484 = vmatpush1.bf16.msra.mxu1 %v10351_v41  ;;  %v10398_v0 = vcombine.high %v1481_v2, %v1485_v31  ;;  %v10400_v41 = vcombine.high %v1482_v27, %v1486_v33  ;;  %v10440_v33 = vcombine.high %v1522_v24, %v1526_v25 }
 0x458   : > { %8321 = vmatprep.subr.bf16.mxu0 %v10358_v42  ;;  %8485 = vmatprep.subr.bf16.mxu1 %v10360_v43  ;;  %v1075_v42 = vld [vmem:[%s11502_s14 + $0x560] sm:$0xff]  ;;  %v1077_v43 = vld [vmem:[%s11502_s14 + $0x570] sm:$0xff] }
 0x459   : > { %v1497_v48 = vunpack.c.l.s8.bf16 %v1075_v42  ;;  %v1501_v49 = vunpack.c.l.s8.bf16 %v1077_v43 }
 0x45b   : > { %8322 = vmatpush1.bf16.msra.mxu0 %v10357_v50  ;;  %8486 = vmatpush1.bf16.msra.mxu1 %v10359_v51  ;;  %v1498_v50 = vunpack.c.h.s8.bf16 %v1075_v42  ;;  %v1502_v51 = vunpack.c.h.s8.bf16 %v1077_v43  ;;  %v10413_v61 = vcombine.low %v1497_v48, %v1501_v49  ;;  %v1538_v42 = vunpack.c.h.s8.bf16 %v1095_v38 }
 0x45c   : > { %8323 = vmatprep.subr.bf16.mxu0 %v10366_v6  ;;  %8487 = vmatprep.subr.bf16.mxu1 %v10368_v53  ;;  %v1505_v6 = vunpack.c.l.s8.bf16 %v1079_v52  ;;  %v1509_v53 = vunpack.c.l.s8.bf16 %v1081_v57  ;;  %v1542_v43 = vunpack.c.h.s8.bf16 %v1097_v8 }
 0x45d   : > { %v10415_v62 = vcombine.low %v1498_v50, %v1502_v51 }
 0x45e   : > { %v10422_v4 = vcombine.high %v1505_v6, %v1509_v53  ;;  %v10421_v15 = vcombine.low %v1505_v6, %v1509_v53  ;;  %v1103_v6 = vld [vmem:[%s11502_s14 + $0x640] sm:$0xff]  ;;  %v1105_v53 = vld [vmem:[%s11502_s14 + $0x650] sm:$0xff] }
 0x45f   : > { %8324 = vmatpush1.bf16.msra.mxu0 %v10365_v56  ;;  %8488 = vmatpush1.bf16.msra.mxu1 %v10367_v58  ;;  %v10414_v56 = vcombine.high %v1497_v48, %v1501_v49  ;;  %v10416_v58 = vcombine.high %v1498_v50, %v1502_v51  ;;  %v10456_v51 = vcombine.high %v1538_v42, %v1542_v43 }
 0x460   : > { %8325 = vmatprep.subr.bf16.mxu0 %v10374_v59  ;;  %8489 = vmatprep.subr.bf16.mxu1 %v10376_v60  ;;  %v1083_v59 = vld [vmem:[%s11502_s14 + $0x5a0] sm:$0xff]  ;;  %v1085_v60 = vld [vmem:[%s11502_s14 + $0x5b0] sm:$0xff] }
 0x461   : > { %v1513_v30 = vunpack.c.l.s8.bf16 %v1083_v59  ;;  %v1517_v7 = vunpack.c.l.s8.bf16 %v1085_v60 }
 0x463   : > { %8326 = vmatpush1.bf16.msra.mxu0 %v10373_v9  ;;  %8490 = vmatpush1.bf16.msra.mxu1 %v10375_v10  ;;  %v1514_v9 = vunpack.c.h.s8.bf16 %v1083_v59  ;;  %v1518_v10 = vunpack.c.h.s8.bf16 %v1085_v60  ;;  %v10429_v2 = vcombine.low %v1513_v30, %v1517_v7  ;;  %v1557_v59 = vunpack.c.l.s8.bf16 %v1105_v53 }
 0x464   : > { %8327 = vmatprep.subr.bf16.mxu0 %v10382_v22  ;;  %8491 = vmatprep.subr.bf16.mxu1 %v10384_v23  ;;  %v1521_v22 = vunpack.c.l.s8.bf16 %v1087_v11  ;;  %v1525_v23 = vunpack.c.l.s8.bf16 %v1089_v12  ;;  %v1554_v60 = vunpack.c.h.s8.bf16 %v1103_v6 }
 0x465   : > { %v10431_v31 = vcombine.low %v1514_v9, %v1518_v10 }
 0x466   : > { %v10438_v27 = vcombine.high %v1521_v22, %v1525_v23  ;;  %v10437_v39 = vcombine.low %v1521_v22, %v1525_v23  ;;  %v1111_v22 = vld [vmem:[%s11502_s14 + $0x680] sm:$0xff]  ;;  %v1113_v23 = vld [vmem:[%s11502_s14 + $0x690] sm:$0xff] }
 0x467   : > { %8328 = vmatpush1.bf16.msra.mxu0 %v10381_v26  ;;  %8492 = vmatpush1.bf16.msra.mxu1 %v10383_v28  ;;  %v10430_v26 = vcombine.high %v1513_v30, %v1517_v7  ;;  %v10432_v28 = vcombine.high %v1514_v9, %v1518_v10  ;;  %v1109_v30 = vld [vmem:[%s11502_s14 + $0x670] sm:$0xff]  ;;  %v12088_v7 = vcombine.high %v12044_v20, %v12044_v20 }
 0x468   : > { %8329 = vmatprep.subr.bf16.mxu0 %v10390_v54  ;;  %8493 = vmatprep.subr.bf16.mxu1 %v10392_v29  ;;  %v1091_v54 = vld [vmem:[%s11502_s14 + $0x5e0] sm:$0xff]  ;;  %v1093_v29 = vld [vmem:[%s11502_s14 + $0x5f0] sm:$0xff]  ;;  %v1565_v12 = vunpack.c.l.s8.bf16 %v1109_v30 }
 0x469   : > { %v1529_v34 = vunpack.c.l.s8.bf16 %v1091_v54  ;;  %v1533_v35 = vunpack.c.l.s8.bf16 %v1093_v29 }
 0x46b   : > { %8330 = vmatpush1.bf16.msra.mxu0 %v10389_v36  ;;  %8494 = vmatpush1.bf16.msra.mxu1 %v10391_v37  ;;  %v1530_v36 = vunpack.c.h.s8.bf16 %v1091_v54  ;;  %v1534_v37 = vunpack.c.h.s8.bf16 %v1093_v29  ;;  %v10445_v48 = vcombine.low %v1529_v34, %v1533_v35  ;;  %v1570_v54 = vunpack.c.h.s8.bf16 %v1111_v22 }
 0x46c   : > { %8331 = vmatprep.subr.bf16.mxu0 %v10398_v0  ;;  %8495 = vmatprep.subr.bf16.mxu1 %v10400_v41  ;;  %v1537_v0 = vunpack.c.l.s8.bf16 %v1095_v38  ;;  %v1541_v41 = vunpack.c.l.s8.bf16 %v1097_v8  ;;  %v1574_v29 = vunpack.c.h.s8.bf16 %v1113_v23 }
 0x46d   : > { %v10447_v49 = vcombine.low %v1530_v36, %v1534_v37 }
 0x46e   : > { %v10454_v50 = vcombine.high %v1537_v0, %v1541_v41  ;;  %v10453_v55 = vcombine.low %v1537_v0, %v1541_v41  ;;  %v1119_v0 = vld [vmem:[%s11502_s14 + $0x6c0] sm:$0xff]  ;;  %v1121_v41 = vld [vmem:[%s11502_s14 + $0x6d0] sm:$0xff] }
 0x46f   : > { %8332 = vmatpush1.bf16.msra.mxu0 %v10397_v44  ;;  %8496 = vmatpush1.bf16.msra.mxu1 %v10399_v1  ;;  %v10446_v44 = vcombine.high %v1529_v34, %v1533_v35  ;;  %v10448_v1 = vcombine.high %v1530_v36, %v1534_v37  ;;  %v10488_v37 = vcombine.high %v1570_v54, %v1574_v29 }
 0x470   : > { %8333 = vmatprep.subr.bf16.mxu0 %v10406_v46  ;;  %8497 = vmatprep.subr.bf16.mxu1 %v10408_v47  ;;  %v1099_v46 = vld [vmem:[%s11502_s14 + $0x620] sm:$0xff]  ;;  %v1101_v47 = vld [vmem:[%s11502_s14 + $0x630] sm:$0xff] }
 0x471   : > { %v1545_v52 = vunpack.c.l.s8.bf16 %v1099_v46  ;;  %v1549_v57 = vunpack.c.l.s8.bf16 %v1101_v47 }
 0x473   : > { %8334 = vmatpush1.bf16.msra.mxu0 %v10405_v5  ;;  %8498 = vmatpush1.bf16.msra.mxu1 %v10407_v17  ;;  %v1546_v5 = vunpack.c.h.s8.bf16 %v1099_v46  ;;  %v1550_v17 = vunpack.c.h.s8.bf16 %v1101_v47  ;;  %v10461_v63 = vcombine.low %v1545_v52, %v1549_v57  ;;  %v1586_v46 = vunpack.c.h.s8.bf16 %v1119_v0 }
 0x474   : > { %8335 = vmatprep.subr.bf16.mxu0 %v10414_v56  ;;  %8499 = vmatprep.subr.bf16.mxu1 %v10416_v58  ;;  %v10455_v56 = vcombine.low %v1538_v42, %v1542_v43  ;;  %v1553_v58 = vunpack.c.l.s8.bf16 %v1103_v6  ;;  %v10487_v43 = vcombine.low %v1570_v54, %v1574_v29  ;;  %v1590_v47 = vunpack.c.h.s8.bf16 %v1121_v41 }
 0x475   : > { %v10463_v18 = vcombine.low %v1546_v5, %v1550_v17 }
 0x476   : > { %v10470_v9 = vcombine.high %v1553_v58, %v1557_v59  ;;  %v10469_v24 = vcombine.low %v1553_v58, %v1557_v59  ;;  %v1127_v58 = vld [vmem:[%s11502_s14 + $0x700] sm:$0xff]  ;;  %v1129_v59 = vld [vmem:[%s11502_s14 + $0x710] sm:$0xff] }
 0x477   : > { %8336 = vmatpush1.bf16.msra.mxu0 %v10413_v61  ;;  %8500 = vmatpush1.bf16.msra.mxu1 %v10415_v62  ;;  %v1558_v61 = vunpack.c.h.s8.bf16 %v1105_v53  ;;  %v10462_v62 = vcombine.high %v1545_v52, %v1549_v57 }
 0x478   : > { %8337 = vmatprep.subr.bf16.mxu0 %v10422_v4  ;;  %8501 = vmatprep.subr.bf16.mxu1 %v10424_v13  ;;  %v10464_v4 = vcombine.high %v1546_v5, %v1550_v17  ;;  %v1107_v13 = vld [vmem:[%s11502_s14 + $0x660] sm:$0xff]  ;;  %v10504_v17 = vcombine.high %v1586_v46, %v1590_v47 }
 0x479   : > { %v10472_v10 = vcombine.high %v1554_v60, %v1558_v61  ;;  %v1561_v11 = vunpack.c.l.s8.bf16 %v1107_v13  ;;  %v10471_v25 = vcombine.low %v1554_v60, %v1558_v61  ;;  %v10503_v61 = vcombine.low %v1586_v46, %v1590_v47 }
 0x47b   : > { %8338 = vmatpush1.bf16.msra.mxu0 %v10421_v15  ;;  %8502 = vmatpush1.bf16.msra.mxu1 %v10423_v16  ;;  %v1562_v15 = vunpack.c.h.s8.bf16 %v1107_v13  ;;  %v1566_v16 = vunpack.c.h.s8.bf16 %v1109_v30  ;;  %v10477_v34 = vcombine.low %v1561_v11, %v1565_v12  ;;  %v1602_v13 = vunpack.c.h.s8.bf16 %v1127_v58 }
 0x47c   : > { %8339 = vmatprep.subr.bf16.mxu0 %v10430_v26  ;;  %8503 = vmatprep.subr.bf16.mxu1 %v10432_v28  ;;  %v1569_v26 = vunpack.c.l.s8.bf16 %v1111_v22  ;;  %v1573_v28 = vunpack.c.l.s8.bf16 %v1113_v23  ;;  %v1606_v30 = vunpack.c.h.s8.bf16 %v1129_v59 }
 0x47d   : > { %v10479_v35 = vcombine.low %v1562_v15, %v1566_v16 }
 0x47e   : > { %v10486_v36 = vcombine.high %v1569_v26, %v1573_v28  ;;  %v10485_v42 = vcombine.low %v1569_v26, %v1573_v28  ;;  %v1135_v26 = vld [vmem:[%s11502_s14 + $0x740] sm:$0xff]  ;;  %v1137_v28 = vld [vmem:[%s11502_s14 + $0x750] sm:$0xff]  ;;  %v10519_v29 = vcombine.low %v1602_v13, %v1606_v30 }
 0x47f   : > { %8340 = vmatpush1.bf16.msra.mxu0 %v10429_v2  ;;  %8504 = vmatpush1.bf16.msra.mxu1 %v10431_v31  ;;  %v10478_v2 = vcombine.high %v1561_v11, %v1565_v12  ;;  %v10480_v31 = vcombine.high %v1562_v15, %v1566_v16  ;;  %v10520_v16 = vcombine.high %v1602_v13, %v1606_v30 }
 0x480   : > { %8341 = vmatprep.subr.bf16.mxu0 %v10438_v27  ;;  %8505 = vmatprep.subr.bf16.mxu1 %v10440_v33  ;;  %v1115_v27 = vld [vmem:[%s11502_s14 + $0x6a0] sm:$0xff]  ;;  %v1117_v33 = vld [vmem:[%s11502_s14 + $0x6b0] sm:$0xff] }
 0x481   : > { %v1577_v38 = vunpack.c.l.s8.bf16 %v1115_v27  ;;  %v1581_v8 = vunpack.c.l.s8.bf16 %v1117_v33 }
 0x483   : > { %8342 = vmatpush1.bf16.msra.mxu0 %v10437_v39  ;;  %8506 = vmatpush1.bf16.msra.mxu1 %v10439_v40  ;;  %v1578_v39 = vunpack.c.h.s8.bf16 %v1115_v27  ;;  %v1582_v40 = vunpack.c.h.s8.bf16 %v1117_v33  ;;  %v10493_v52 = vcombine.low %v1577_v38, %v1581_v8  ;;  %v1618_v27 = vunpack.c.h.s8.bf16 %v1135_v26 }
 0x484   : > { %8343 = vmatprep.subr.bf16.mxu0 %v10446_v44  ;;  %8507 = vmatprep.subr.bf16.mxu1 %v10448_v1  ;;  %v1585_v44 = vunpack.c.l.s8.bf16 %v1119_v0  ;;  %v1589_v1 = vunpack.c.l.s8.bf16 %v1121_v41  ;;  %v1622_v33 = vunpack.c.h.s8.bf16 %v1137_v28 }
 0x485   : > { %v10495_v57 = vcombine.low %v1578_v39, %v1582_v40 }
 0x486   : > { %v10502_v5 = vcombine.high %v1585_v44, %v1589_v1  ;;  %v10501_v60 = vcombine.low %v1585_v44, %v1589_v1  ;;  %v1143_v44 = vld [vmem:[%s11502_s14 + $0x780] sm:$0xff]  ;;  %v1145_v1 = vld [vmem:[%s11502_s14 + $0x790] sm:$0xff]  ;;  %v10535_v47 = vcombine.low %v1618_v27, %v1622_v33 }
 0x487   : > { %8344 = vmatpush1.bf16.msra.mxu0 %v10445_v48  ;;  %8508 = vmatpush1.bf16.msra.mxu1 %v10447_v49  ;;  %v10494_v48 = vcombine.high %v1577_v38, %v1581_v8  ;;  %v10496_v49 = vcombine.high %v1578_v39, %v1582_v40  ;;  %v10536_v40 = vcombine.high %v1618_v27, %v1622_v33 }
 0x488   : > { %8354 = vmatprep.subr.bf16.mxu0 %v10454_v50  ;;  %8518 = vmatprep.subr.bf16.mxu1 %v10456_v51  ;;  %v1123_v50 = vld [vmem:[%s11502_s14 + $0x6e0] sm:$0xff]  ;;  %v1125_v51 = vld [vmem:[%s11502_s14 + $0x6f0] sm:$0xff] }
 0x489   : > { %v1593_v6 = vunpack.c.l.s8.bf16 %v1123_v50  ;;  %v1597_v53 = vunpack.c.l.s8.bf16 %v1125_v51 }
 0x48a   : > { %8346 = vmatmul.mubr.bf16.vlgmr.msra.gmra.mrb[0].mxu0 %v12082_v19  ;;  %8510 = vmatmul.mubr.bf16.vlgmr.msra.gmra.mrb[0].mxu1 %v12082_v19 }
 0x48b   : > { %8355 = vmatpush1.bf16.msra.mxu0 %v10453_v55  ;;  %8519 = vmatpush1.bf16.msra.mxu1 %v10455_v56  ;;  %v1594_v55 = vunpack.c.h.s8.bf16 %v1123_v50  ;;  %v1598_v56 = vunpack.c.h.s8.bf16 %v1125_v51  ;;  %v10509_v11 = vcombine.low %v1593_v6, %v1597_v53  ;;  %v1634_v50 = vunpack.c.h.s8.bf16 %v1143_v44 }
 0x48c   : > { %8356 = vmatprep.subr.bf16.mxu0 %v10462_v62  ;;  %8520 = vmatprep.subr.bf16.mxu1 %v10464_v4  ;;  %v1601_v62 = vunpack.c.l.s8.bf16 %v1127_v58  ;;  %v1605_v4 = vunpack.c.l.s8.bf16 %v1129_v59  ;;  %v1638_v51 = vunpack.c.h.s8.bf16 %v1145_v1  ;;  %v1151_v58 = vld [vmem:[%s11502_s14 + $0x7c0] sm:$0xff] }
 0x48d   : > { %10574 = vmatprep.mubr.msk.bf16.mxu0 %vm4962_vm6, %v12088_v7  ;;  %10576 = vmatprep.mubr.msk.bf16.mxu1 %vm4962_vm6, %v12088_v7  ;;  %v10511_v12 = vcombine.low %v1594_v55, %v1598_v56 }
 0x48e   : > { %v10518_v15 = vcombine.high %v1601_v62, %v1605_v4  ;;  %v10517_v54 = vcombine.low %v1601_v62, %v1605_v4  ;;  %v1649_v4 = vunpack.c.l.s8.bf16 %v1151_v58  ;;  %v10551_v30 = vcombine.low %v1634_v50, %v1638_v51 }
 0x48f   : > { %8357 = vmatpush1.bf16.msra.mxu0 %v10461_v63  ;;  %8521 = vmatpush1.bf16.msra.mxu1 %v10463_v18  ;;  %v10510_v63 = vcombine.high %v1593_v6, %v1597_v53  ;;  %v10512_v18 = vcombine.high %v1594_v55, %v1598_v56  ;;  %v10552_v56 = vcombine.high %v1634_v50, %v1638_v51 }
 0x490   : > { %8358 = vmatprep.subr.bf16.mxu0 %v10470_v9  ;;  %8522 = vmatprep.subr.bf16.mxu1 %v10472_v10  ;;  %v1131_v9 = vld [vmem:[%s11502_s14 + $0x720] sm:$0xff]  ;;  %v1133_v10 = vld [vmem:[%s11502_s14 + $0x730] sm:$0xff] }
 0x491   : > { %v1609_v22 = vunpack.c.l.s8.bf16 %v1131_v9  ;;  %v1613_v23 = vunpack.c.l.s8.bf16 %v1133_v10 }
 0x493   : > { %8359 = vmatpush1.bf16.msra.mxu0 %v10469_v24  ;;  %8523 = vmatpush1.bf16.msra.mxu1 %v10471_v25  ;;  %v1610_v24 = vunpack.c.h.s8.bf16 %v1131_v9  ;;  %v1614_v25 = vunpack.c.h.s8.bf16 %v1133_v10  ;;  %v10525_v38 = vcombine.low %v1609_v22, %v1613_v23  ;;  %v904_v10 = vld [vmem:[%s11502_s14 + $0x8] sm:$0xff] }
 0x494   : > { %8360 = vmatprep.subr.bf16.mxu0 %v10478_v2  ;;  %8524 = vmatprep.subr.bf16.mxu1 %v10480_v31  ;;  %v1617_v2 = vunpack.c.l.s8.bf16 %v1135_v26  ;;  %v1621_v31 = vunpack.c.l.s8.bf16 %v1137_v28  ;;  %v1156_v28 = vunpack.c.h.s8.bf16 %v904_v10 }
 0x495   : > { %v10527_v8 = vcombine.low %v1610_v24, %v1614_v25 }
 0x496   : > { %v10534_v39 = vcombine.high %v1617_v2, %v1621_v31  ;;  %v10533_v46 = vcombine.low %v1617_v2, %v1621_v31  ;;  %v910_v2 = vld [vmem:[%s11502_s14 + $0x38] sm:$0xff] }
 0x497   : > { %8361 = vmatpush1.bf16.msra.mxu0 %v10477_v34  ;;  %8525 = vmatpush1.bf16.msra.mxu1 %v10479_v35  ;;  %v10526_v34 = vcombine.high %v1609_v22, %v1613_v23  ;;  %v10528_v35 = vcombine.high %v1610_v24, %v1614_v25  ;;  %v10565_v23 = vcombine.low %v1649_v4, %v1649_v4  ;;  %v1155_v25 = vunpack.c.l.s8.bf16 %v904_v10 }
 0x498   : > { %8362 = vmatprep.subr.bf16.mxu0 %v10486_v36  ;;  %8526 = vmatprep.subr.bf16.mxu1 %v10488_v37  ;;  %v1139_v36 = vld [vmem:[%s11502_s14 + $0x760] sm:$0xff]  ;;  %v1141_v37 = vld [vmem:[%s11502_s14 + $0x770] sm:$0xff]  ;;  %v1167_v27 = vunpack.c.l.s8.bf16 %v910_v2 }
 0x499   : > { %v1625_v0 = vunpack.c.l.s8.bf16 %v1139_v36  ;;  %v1629_v41 = vunpack.c.l.s8.bf16 %v1141_v37 }
 0x49b   : > { %8363 = vmatpush1.bf16.msra.mxu0 %v10485_v42  ;;  %8527 = vmatpush1.bf16.msra.mxu1 %v10487_v43  ;;  %v1626_v42 = vunpack.c.h.s8.bf16 %v1139_v36  ;;  %v1630_v43 = vunpack.c.h.s8.bf16 %v1141_v37  ;;  %v10541_v6 = vcombine.low %v1625_v0, %v1629_v41 }
 0x49c   : > { %8364 = vmatprep.subr.bf16.mxu0 %v10494_v48  ;;  %8528 = vmatprep.subr.bf16.mxu1 %v10496_v49  ;;  %v1633_v48 = vunpack.c.l.s8.bf16 %v1143_v44  ;;  %v1637_v49 = vunpack.c.l.s8.bf16 %v1145_v1 }
 0x49d   : > { %v10543_v53 = vcombine.low %v1626_v42, %v1630_v43 }
 0x49e   : > { %v10550_v55 = vcombine.high %v1633_v48, %v1637_v49  ;;  %v10549_v13 = vcombine.low %v1633_v48, %v1637_v49  ;;  %v916_v48 = vld [vmem:[%s11502_s14 + $0x68] sm:$0xff]  ;;  %v918_v49 = vld [vmem:[%s11502_s14 + $0x78] sm:$0xff] }
 0x49f   : > { %8365 = vmatpush1.bf16.msra.mxu0 %v10493_v52  ;;  %8529 = vmatpush1.bf16.msra.mxu1 %v10495_v57  ;;  %v10542_v52 = vcombine.high %v1625_v0, %v1629_v41  ;;  %v10544_v57 = vcombine.high %v1626_v42, %v1630_v43 }
 0x4a0   : > { %8366 = vmatprep.subr.bf16.mxu0 %v10502_v5  ;;  %8530 = vmatprep.subr.bf16.mxu1 %v10504_v17  ;;  %v1147_v5 = vld [vmem:[%s11502_s14 + $0x7a0] sm:$0xff]  ;;  %v1149_v17 = vld [vmem:[%s11502_s14 + $0x7b0] sm:$0xff] }
 0x4a1   : > { %v1641_v59 = vunpack.c.l.s8.bf16 %v1147_v5  ;;  %v1646_v62 = vunpack.c.h.s8.bf16 %v1149_v17 }
 0x4a3   : > { %8367 = vmatpush1.bf16.msra.mxu0 %v10501_v60  ;;  %8531 = vmatpush1.bf16.msra.mxu1 %v10503_v61  ;;  %v1645_v60 = vunpack.c.l.s8.bf16 %v1149_v17  ;;  %v1642_v61 = vunpack.c.h.s8.bf16 %v1147_v5  ;;  %v1180_v5 = vunpack.c.h.s8.bf16 %v916_v48  ;;  %v1184_v17 = vunpack.c.h.s8.bf16 %v918_v49 }
 0x4a4   : > { %8368 = vmatprep.subr.bf16.mxu0 %v10510_v63  ;;  %8532 = vmatprep.subr.bf16.mxu1 %v10512_v18  ;;  %v1650_v63 = vunpack.c.h.s8.bf16 %v1151_v58 }
 0x4a5   : > { %v10558_v18 = vcombine.high %v1641_v59, %v1645_v60  ;;  %v10560_v9 = vcombine.high %v1642_v61, %v1646_v62  ;;  %v10099_v10 = vcombine.low %v1180_v5, %v1184_v17 }
 0x4a6   : > { %v10568_v22 = vcombine.high %v1650_v63, %v1650_v63  ;;  %v10567_v24 = vcombine.low %v1650_v63, %v1650_v63  ;;  %v924_v63 = vld [vmem:[%s11502_s14 + $0xa8] sm:$0xff] }
 0x4a7   : > { %8369 = vmatpush1.bf16.msra.mxu0 %v10509_v11  ;;  %8533 = vmatpush1.bf16.msra.mxu1 %v10511_v12  ;;  %v906_v11 = vld [vmem:[%s11502_s14 + $0x18] sm:$0xff]  ;;  %v10557_v12 = vcombine.low %v1641_v59, %v1645_v60 }
 0x4a8   : > { %8370 = vmatprep.subr.bf16.mxu0 %v10518_v15  ;;  %8534 = vmatprep.subr.bf16.mxu1 %v10520_v16  ;;  %v10559_v15 = vcombine.low %v1642_v61, %v1646_v62  ;;  %v10566_v16 = vcombine.high %v1649_v4, %v1649_v4  ;;  %v1159_v26 = vunpack.c.l.s8.bf16 %v906_v11  ;;  %v8214_v36 = vsel %vm4966_vm7, %v10567_v24, 0  ;;  %v930_v24 = vld [vmem:[%s11502_s14 + $0xd8] sm:$0xff] }
 0x4a9   : > { %v10100_v61 = vcombine.high %v1180_v5, %v1184_v17 }
 0x4aa   : > { %v10074_v37 = vcombine.high %v1155_v25, %v1159_v26  ;;  %v10073_v0 = vcombine.low %v1155_v25, %v1159_v26 }
 0x4ab   : > { %8371 = vmatpush1.bf16.msra.mxu0 %v10517_v54  ;;  %8535 = vmatpush1.bf16.msra.mxu1 %v10519_v29  ;;  %v1160_v54 = vunpack.c.h.s8.bf16 %v906_v11  ;;  %v908_v29 = vld [vmem:[%s11502_s14 + $0x28] sm:$0xff] }
 0x4ac   : > { %8372 = vmatprep.subr.bf16.mxu0 %v10526_v34  ;;  %8536 = vmatprep.subr.bf16.mxu1 %v10528_v35  ;;  %v1163_v31 = vunpack.c.l.s8.bf16 %v908_v29  ;;  %v1164_v33 = vunpack.c.h.s8.bf16 %v908_v29  ;;  %v1168_v34 = vunpack.c.h.s8.bf16 %v910_v2  ;;  %v8208_v35 = vsel %vm4966_vm7, %v10565_v23, 0  ;;  %v928_v23 = vld [vmem:[%s11502_s14 + $0xc8] sm:$0xff] }
 0x4ad   : > { %v10075_v41 = vcombine.low %v1156_v28, %v1160_v54  ;;  %v1203_v29 = vunpack.c.l.s8.bf16 %v928_v23  ;;  %v1207_v2 = vunpack.c.l.s8.bf16 %v930_v24 }
 0x4ae   : > { %v10082_v42 = vcombine.high %v1163_v31, %v1167_v27  ;;  %v10084_v43 = vcombine.high %v1164_v33, %v1168_v34  ;;  %v10081_v50 = vcombine.low %v1163_v31, %v1167_v27  ;;  %v10083_v51 = vcombine.low %v1164_v33, %v1168_v34  ;;  %v932_v33 = vld [vmem:[%s11502_s14 + $0xe8] sm:$0xff]  ;;  %v934_v34 = vld [vmem:[%s11502_s14 + $0xf8] sm:$0xff] }
 0x4af   : > { %8373 = vmatpush1.bf16.msra.mxu0 %v10525_v38  ;;  %8537 = vmatpush1.bf16.msra.mxu1 %v10527_v8  ;;  %v10076_v38 = vcombine.high %v1156_v28, %v1160_v54  ;;  %v912_v8 = vld [vmem:[%s11502_s14 + $0x48] sm:$0xff]  ;;  %v1204_v31 = vunpack.c.h.s8.bf16 %v928_v23  ;;  %v1208_v27 = vunpack.c.h.s8.bf16 %v930_v24 }
 0x4b0   : > { %8374 = vmatprep.subr.bf16.mxu0 %v10534_v39  ;;  %8538 = vmatprep.subr.bf16.mxu1 %v10536_v40  ;;  %v914_v39 = vld [vmem:[%s11502_s14 + $0x58] sm:$0xff]  ;;  %v12129_v40 = vcombine.high %v12082_v19, %v12082_v19  ;;  %v1171_v44 = vunpack.c.l.s8.bf16 %v912_v8 }
 0x4b1   : > { %v1175_v1 = vunpack.c.l.s8.bf16 %v914_v39 }
 0x4b3   : > { %8375 = vmatpush1.bf16.msra.mxu0 %v10533_v46  ;;  %8539 = vmatpush1.bf16.msra.mxu1 %v10535_v47  ;;  %v1172_v46 = vunpack.c.h.s8.bf16 %v912_v8  ;;  %v1176_v47 = vunpack.c.h.s8.bf16 %v914_v39  ;;  %v10089_v58 = vcombine.low %v1171_v44, %v1175_v1  ;;  %v1212_v8 = vunpack.c.h.s8.bf16 %v932_v33 }
 0x4b4   : > { %8376 = vmatprep.subr.bf16.mxu0 %v10542_v52  ;;  %8540 = vmatprep.subr.bf16.mxu1 %v10544_v57  ;;  %v1179_v52 = vunpack.c.l.s8.bf16 %v916_v48  ;;  %v1183_v57 = vunpack.c.l.s8.bf16 %v918_v49  ;;  %v1216_v39 = vunpack.c.h.s8.bf16 %v934_v34 }
 0x4b5   : > { %v10091_v59 = vcombine.low %v1172_v46, %v1176_v47 }
 0x4b6   : > { %v10098_v60 = vcombine.high %v1179_v52, %v1183_v57  ;;  %v10131_v17 = vcombine.low %v1212_v8, %v1216_v39 }
 0x4b7   : > { %8377 = vmatpush1.bf16.msra.mxu0 %v10541_v6  ;;  %8541 = vmatpush1.bf16.msra.mxu1 %v10543_v53  ;;  %v10090_v6 = vcombine.high %v1171_v44, %v1175_v1  ;;  %v10092_v53 = vcombine.high %v1172_v46, %v1176_v47  ;;  %v10121_v44 = vcombine.low %v1203_v29, %v1207_v2 }
 0x4b8   : > { %8378 = vmatprep.subr.bf16.mxu0 %v10550_v55  ;;  %8542 = vmatprep.subr.bf16.mxu1 %v10552_v56  ;;  %v920_v55 = vld [vmem:[%s11502_s14 + $0x88] sm:$0xff]  ;;  %v922_v56 = vld [vmem:[%s11502_s14 + $0x98] sm:$0xff]  ;;  %v10123_v1 = vcombine.low %v1204_v31, %v1208_v27  ;;  %v10132_v47 = vcombine.high %v1212_v8, %v1216_v39 }
 0x4b9   : > { %v1187_v62 = vunpack.c.l.s8.bf16 %v920_v55  ;;  %v1191_v4 = vunpack.c.l.s8.bf16 %v922_v56 }
 0x4bb   : > { %8379 = vmatpush1.bf16.msra.mxu0 %v10549_v13  ;;  %8543 = vmatpush1.bf16.msra.mxu1 %v10551_v30  ;;  %v1188_v13 = vunpack.c.h.s8.bf16 %v920_v55  ;;  %v1192_v30 = vunpack.c.h.s8.bf16 %v922_v56  ;;  %v10105_v25 = vcombine.low %v1187_v62, %v1191_v4 }
 0x4bc   : > { %8380 = vmatprep.subr.bf16.mxu0 %v10558_v18  ;;  %8544 = vmatprep.subr.bf16.mxu1 %v10560_v9  ;;  %v926_v18 = vld [vmem:[%s11502_s14 + $0xb8] sm:$0xff]  ;;  %v10097_v9 = vcombine.low %v1179_v52, %v1183_v57  ;;  %v940_v52 = vld [vmem:[%s11502_s14 + $0x128] sm:$0xff] }
 0x4bd   : > { %v1199_v11 = vunpack.c.l.s8.bf16 %v926_v18  ;;  %v10107_v26 = vcombine.low %v1188_v13, %v1192_v30  ;;  %v942_v57 = vld [vmem:[%s11502_s14 + $0x138] sm:$0xff]  ;;  %v1228_v55 = vunpack.c.h.s8.bf16 %v940_v52 }
 0x4be   : > { %v1232_v56 = vunpack.c.h.s8.bf16 %v942_v57 }
 0x4bf   : > { %8381 = vmatpush1.bf16.msra.mxu0 %v10557_v12  ;;  %8545 = vmatpush1.bf16.msra.mxu1 %v10559_v15  ;;  %v1196_v12 = vunpack.c.h.s8.bf16 %v924_v63  ;;  %v1200_v15 = vunpack.c.h.s8.bf16 %v926_v18 }
 0x4c0   : > { %10573 = vmatprep.subr.msk.bf16.mxu0 %vm4966_vm7, %v10566_v16  ;;  %10575 = vmatprep.subr.msk.bf16.mxu1 %vm4966_vm7, %v10568_v22  ;;  %v10106_v16 = vcombine.high %v1187_v62, %v1191_v4  ;;  %v10108_v22 = vcombine.high %v1188_v13, %v1192_v30  ;;  %v10148_v30 = vcombine.high %v1228_v55, %v1232_v56 }
 0x4c1   : > { %v10116_v54 = vcombine.high %v1196_v12, %v1200_v15 }
 0x4c3   : > { %8383 = vmatpush1.bf16.msra.mxu0 %v8208_v35  ;;  %8547 = vmatpush1.bf16.msra.mxu1 %v8214_v36  ;;  %v10115_v36 = vcombine.low %v1196_v12, %v1200_v15  ;;  %v10147_v15 = vcombine.low %v1228_v55, %v1232_v56 }
 0x4c4   : > { %8559 = vmatprep.subr.bf16.mxu0 %v10074_v37  ;;  %8723 = vmatprep.subr.bf16.mxu1 %v10076_v38  ;;  %v1211_v37 = vunpack.c.l.s8.bf16 %v932_v33  ;;  %v1215_v38 = vunpack.c.l.s8.bf16 %v934_v34 }
 0x4c6   : > { %8387 = vmatmul.mubr.bf16.vlgmr.msra.gmra.mrb[0].mxu0 %v12129_v40  ;;  %8551 = vmatmul.mubr.bf16.vlgmr.msra.gmra.mrb[0].mxu1 %v12129_v40  ;;  %v10130_v46 = vcombine.high %v1211_v37, %v1215_v38  ;;  %v10129_v5 = vcombine.low %v1211_v37, %v1215_v38  ;;  %v956_v37 = vld [vmem:[%s11502_s14 + $0x1a8] sm:$0xff]  ;;  %v958_v38 = vld [vmem:[%s11502_s14 + $0x1b8] sm:$0xff] }
 0x4c7   : > { %8560 = vmatpush1.bf16.msra.mxu0 %v10073_v0  ;;  %8724 = vmatpush1.bf16.msra.mxu1 %v10075_v41  ;;  %v10122_v0 = vcombine.high %v1203_v29, %v1207_v2  ;;  %v10124_v41 = vcombine.high %v1204_v31, %v1208_v27 }
 0x4c8   : > { %8561 = vmatprep.subr.bf16.mxu0 %v10082_v42  ;;  %8725 = vmatprep.subr.bf16.mxu1 %v10084_v43  ;;  %v936_v42 = vld [vmem:[%s11502_s14 + $0x108] sm:$0xff]  ;;  %v938_v43 = vld [vmem:[%s11502_s14 + $0x118] sm:$0xff] }
 0x4c9   : > { %8591 = vmatprep.mubr.bf16.mxu0 %v11950_v45  ;;  %8755 = vmatprep.mubr.bf16.mxu1 %v11950_v45  ;;  %v1195_v45 = vunpack.c.l.s8.bf16 %v924_v63  ;;  %v1219_v48 = vunpack.c.l.s8.bf16 %v936_v42  ;;  %v1223_v49 = vunpack.c.l.s8.bf16 %v938_v43 }
 0x4cb   : > { %8562 = vmatpush1.bf16.msra.mxu0 %v10081_v50  ;;  %8726 = vmatpush1.bf16.msra.mxu1 %v10083_v51  ;;  %v10114_v28 = vcombine.high %v1195_v45, %v1199_v11  ;;  %v10113_v35 = vcombine.low %v1195_v45, %v1199_v11  ;;  %v1220_v50 = vunpack.c.h.s8.bf16 %v936_v42  ;;  %v1224_v51 = vunpack.c.h.s8.bf16 %v938_v43  ;;  %v948_v45 = vld [vmem:[%s11502_s14 + $0x168] sm:$0xff]  ;;  %v950_v11 = vld [vmem:[%s11502_s14 + $0x178] sm:$0xff] }
 0x4cc   : > { %8563 = vmatprep.subr.bf16.mxu0 %v10090_v6  ;;  %8727 = vmatprep.subr.bf16.mxu1 %v10092_v53  ;;  %v1227_v6 = vunpack.c.l.s8.bf16 %v940_v52  ;;  %v1231_v53 = vunpack.c.l.s8.bf16 %v942_v57  ;;  %v10137_v62 = vcombine.low %v1219_v48, %v1223_v49  ;;  %v1244_v23 = vunpack.c.h.s8.bf16 %v948_v45 }
 0x4cd   : > { %v10139_v4 = vcombine.low %v1220_v50, %v1224_v51  ;;  %v1248_v24 = vunpack.c.h.s8.bf16 %v950_v11  ;;  %v1260_v42 = vunpack.c.h.s8.bf16 %v956_v37  ;;  %v1264_v43 = vunpack.c.h.s8.bf16 %v958_v38 }
 0x4ce   : > { %v10146_v13 = vcombine.high %v1227_v6, %v1231_v53  ;;  %v10145_v12 = vcombine.low %v1227_v6, %v1231_v53  ;;  %v964_v6 = vld [vmem:[%s11502_s14 + $0x1e8] sm:$0xff]  ;;  %v966_v53 = vld [vmem:[%s11502_s14 + $0x1f8] sm:$0xff] }
 0x4cf   : > { %8564 = vmatpush1.bf16.msra.mxu0 %v10089_v58  ;;  %8728 = vmatpush1.bf16.msra.mxu1 %v10091_v59  ;;  %v10138_v58 = vcombine.high %v1219_v48, %v1223_v49  ;;  %v10140_v59 = vcombine.high %v1220_v50, %v1224_v51  ;;  %v10164_v27 = vcombine.high %v1244_v23, %v1248_v24 }
 0x4d0   : > { %8565 = vmatprep.subr.bf16.mxu0 %v10098_v60  ;;  %8729 = vmatprep.subr.bf16.mxu1 %v10100_v61  ;;  %v944_v60 = vld [vmem:[%s11502_s14 + $0x148] sm:$0xff]  ;;  %v946_v61 = vld [vmem:[%s11502_s14 + $0x158] sm:$0xff]  ;;  %v10163_v39 = vcombine.low %v1244_v23, %v1248_v24  ;;  %v10180_v51 = vcombine.high %v1260_v42, %v1264_v43  ;;  %v10179_v56 = vcombine.low %v1260_v42, %v1264_v43 }
 0x4d1   : > { %v1235_v63 = vunpack.c.l.s8.bf16 %v944_v60  ;;  %v1239_v18 = vunpack.c.l.s8.bf16 %v946_v61 }
 0x4d3   : > { %8566 = vmatpush1.bf16.msra.mxu0 %v10097_v9  ;;  %8730 = vmatpush1.bf16.msra.mxu1 %v10099_v10  ;;  %v1236_v9 = vunpack.c.h.s8.bf16 %v944_v60  ;;  %v1240_v10 = vunpack.c.h.s8.bf16 %v946_v61  ;;  %v10153_v29 = vcombine.low %v1235_v63, %v1239_v18  ;;  %v1276_v60 = vunpack.c.h.s8.bf16 %v964_v6 }
 0x4d4   : > { %8567 = vmatprep.subr.bf16.mxu0 %v10106_v16  ;;  %8731 = vmatprep.subr.bf16.mxu1 %v10108_v22  ;;  %v1243_v16 = vunpack.c.l.s8.bf16 %v948_v45  ;;  %v1247_v22 = vunpack.c.l.s8.bf16 %v950_v11  ;;  %v1280_v61 = vunpack.c.h.s8.bf16 %v966_v53 }
 0x4d5   : > { %v10155_v2 = vcombine.low %v1236_v9, %v1240_v10 }
 0x4d6   : > { %v10162_v31 = vcombine.high %v1243_v16, %v1247_v22  ;;  %v10161_v8 = vcombine.low %v1243_v16, %v1247_v22  ;;  %v972_v16 = vld [vmem:[%s11502_s14 + $0x228] sm:$0xff]  ;;  %v974_v22 = vld [vmem:[%s11502_s14 + $0x238] sm:$0xff]  ;;  %v10195_v24 = vcombine.low %v1276_v60, %v1280_v61 }
 0x4d7   : > { %8568 = vmatpush1.bf16.msra.mxu0 %v10105_v25  ;;  %8732 = vmatpush1.bf16.msra.mxu1 %v10107_v26  ;;  %v10154_v25 = vcombine.high %v1235_v63, %v1239_v18  ;;  %v10156_v26 = vcombine.high %v1236_v9, %v1240_v10  ;;  %v10196_v10 = vcombine.high %v1276_v60, %v1280_v61 }
 0x4d8   : > { %8569 = vmatprep.subr.bf16.mxu0 %v10114_v28  ;;  %8733 = vmatprep.subr.bf16.mxu1 %v10116_v54  ;;  %v952_v28 = vld [vmem:[%s11502_s14 + $0x188] sm:$0xff]  ;;  %v954_v54 = vld [vmem:[%s11502_s14 + $0x198] sm:$0xff] }
 0x4d9   : > { %v1251_v33 = vunpack.c.l.s8.bf16 %v952_v28  ;;  %v1255_v34 = vunpack.c.l.s8.bf16 %v954_v54 }
 0x4db   : > { %8570 = vmatpush1.bf16.msra.mxu0 %v10113_v35  ;;  %8734 = vmatpush1.bf16.msra.mxu1 %v10115_v36  ;;  %v1252_v35 = vunpack.c.h.s8.bf16 %v952_v28  ;;  %v1256_v36 = vunpack.c.h.s8.bf16 %v954_v54  ;;  %v10169_v48 = vcombine.low %v1251_v33, %v1255_v34  ;;  %v1292_v28 = vunpack.c.h.s8.bf16 %v972_v16 }
 0x4dc   : > { %8571 = vmatprep.subr.bf16.mxu0 %v10122_v0  ;;  %8735 = vmatprep.subr.bf16.mxu1 %v10124_v41  ;;  %v1259_v0 = vunpack.c.l.s8.bf16 %v956_v37  ;;  %v1263_v41 = vunpack.c.l.s8.bf16 %v958_v38  ;;  %v1296_v54 = vunpack.c.h.s8.bf16 %v974_v22 }
 0x4dd   : > { %v10171_v49 = vcombine.low %v1252_v35, %v1256_v36 }
 0x4de   : > { %v10178_v50 = vcombine.high %v1259_v0, %v1263_v41  ;;  %v10177_v55 = vcombine.low %v1259_v0, %v1263_v41  ;;  %v980_v0 = vld [vmem:[%s11502_s14 + $0x268] sm:$0xff]  ;;  %v982_v41 = vld [vmem:[%s11502_s14 + $0x278] sm:$0xff]  ;;  %v10211_v43 = vcombine.low %v1292_v28, %v1296_v54 }
 0x4df   : > { %8572 = vmatpush1.bf16.msra.mxu0 %v10121_v44  ;;  %8736 = vmatpush1.bf16.msra.mxu1 %v10123_v1  ;;  %v10170_v44 = vcombine.high %v1251_v33, %v1255_v34  ;;  %v10172_v1 = vcombine.high %v1252_v35, %v1256_v36  ;;  %v10212_v36 = vcombine.high %v1292_v28, %v1296_v54 }
 0x4e0   : > { %8573 = vmatprep.subr.bf16.mxu0 %v10130_v46  ;;  %8737 = vmatprep.subr.bf16.mxu1 %v10132_v47  ;;  %v960_v46 = vld [vmem:[%s11502_s14 + $0x1c8] sm:$0xff]  ;;  %v962_v47 = vld [vmem:[%s11502_s14 + $0x1d8] sm:$0xff] }
 0x4e1   : > { %v1267_v52 = vunpack.c.l.s8.bf16 %v960_v46  ;;  %v1271_v57 = vunpack.c.l.s8.bf16 %v962_v47 }
 0x4e3   : > { %8574 = vmatpush1.bf16.msra.mxu0 %v10129_v5  ;;  %8738 = vmatpush1.bf16.msra.mxu1 %v10131_v17  ;;  %v1268_v5 = vunpack.c.h.s8.bf16 %v960_v46  ;;  %v1272_v17 = vunpack.c.h.s8.bf16 %v962_v47  ;;  %v10185_v63 = vcombine.low %v1267_v52, %v1271_v57  ;;  %v1308_v46 = vunpack.c.h.s8.bf16 %v980_v0 }
 0x4e4   : > { %8575 = vmatprep.subr.bf16.mxu0 %v10138_v58  ;;  %8739 = vmatprep.subr.bf16.mxu1 %v10140_v59  ;;  %v1275_v58 = vunpack.c.l.s8.bf16 %v964_v6  ;;  %v1279_v59 = vunpack.c.l.s8.bf16 %v966_v53  ;;  %v1312_v47 = vunpack.c.h.s8.bf16 %v982_v41 }
 0x4e5   : > { %v10187_v18 = vcombine.low %v1268_v5, %v1272_v17 }
 0x4e6   : > { %v10194_v9 = vcombine.high %v1275_v58, %v1279_v59  ;;  %v10193_v23 = vcombine.low %v1275_v58, %v1279_v59  ;;  %v990_v58 = vld [vmem:[%s11502_s14 + $0x2b8] sm:$0xff]  ;;  %v10227_v60 = vcombine.low %v1308_v46, %v1312_v47 }
 0x4e7   : > { %8576 = vmatpush1.bf16.msra.mxu0 %v10137_v62  ;;  %8740 = vmatpush1.bf16.msra.mxu1 %v10139_v4  ;;  %v10186_v62 = vcombine.high %v1267_v52, %v1271_v57  ;;  %v10188_v4 = vcombine.high %v1268_v5, %v1272_v17  ;;  %v10228_v5 = vcombine.high %v1308_v46, %v1312_v47  ;;  %v1327_v61 = vunpack.c.l.s8.bf16 %v990_v58 }
 0x4e8   : > { %8577 = vmatprep.subr.bf16.mxu0 %v10146_v13  ;;  %8741 = vmatprep.subr.bf16.mxu1 %v10148_v30  ;;  %v968_v13 = vld [vmem:[%s11502_s14 + $0x208] sm:$0xff]  ;;  %v970_v30 = vld [vmem:[%s11502_s14 + $0x218] sm:$0xff] }
 0x4e9   : > { %v1283_v45 = vunpack.c.l.s8.bf16 %v968_v13  ;;  %v1287_v11 = vunpack.c.l.s8.bf16 %v970_v30 }
 0x4eb   : > { %8578 = vmatpush1.bf16.msra.mxu0 %v10145_v12  ;;  %8742 = vmatpush1.bf16.msra.mxu1 %v10147_v15  ;;  %v1284_v12 = vunpack.c.h.s8.bf16 %v968_v13  ;;  %v1288_v15 = vunpack.c.h.s8.bf16 %v970_v30  ;;  %v10201_v33 = vcombine.low %v1283_v45, %v1287_v11 }
 0x4ec   : > { %8579 = vmatprep.subr.bf16.mxu0 %v10154_v25  ;;  %8743 = vmatprep.subr.bf16.mxu1 %v10156_v26  ;;  %v1291_v25 = vunpack.c.l.s8.bf16 %v972_v16  ;;  %v1295_v26 = vunpack.c.l.s8.bf16 %v974_v22 }
 0x4ed   : > { %v10203_v34 = vcombine.low %v1284_v12, %v1288_v15 }
 0x4ee   : > { %v10210_v35 = vcombine.high %v1291_v25, %v1295_v26  ;;  %v10209_v42 = vcombine.low %v1291_v25, %v1295_v26 }
 0x4ef   : > { %8580 = vmatpush1.bf16.msra.mxu0 %v10153_v29  ;;  %8744 = vmatpush1.bf16.msra.mxu1 %v10155_v2  ;;  %v10202_v29 = vcombine.high %v1283_v45, %v1287_v11  ;;  %v10204_v2 = vcombine.high %v1284_v12, %v1288_v15 }
 0x4f0   : > { %8581 = vmatprep.subr.bf16.mxu0 %v10162_v31  ;;  %8745 = vmatprep.subr.bf16.mxu1 %v10164_v27  ;;  %v976_v31 = vld [vmem:[%s11502_s14 + $0x248] sm:$0xff]  ;;  %v978_v27 = vld [vmem:[%s11502_s14 + $0x258] sm:$0xff] }
 0x4f1   : > { %v1299_v37 = vunpack.c.l.s8.bf16 %v976_v31  ;;  %v1303_v38 = vunpack.c.l.s8.bf16 %v978_v27 }
 0x4f3   : > { %8582 = vmatpush1.bf16.msra.mxu0 %v10161_v8  ;;  %8746 = vmatpush1.bf16.msra.mxu1 %v10163_v39  ;;  %v1300_v8 = vunpack.c.h.s8.bf16 %v976_v31  ;;  %v1304_v39 = vunpack.c.h.s8.bf16 %v978_v27 }
 0x4f4   : > { %8583 = vmatprep.subr.bf16.mxu0 %v10170_v44  ;;  %8747 = vmatprep.subr.bf16.mxu1 %v10172_v1  ;;  %v1307_v44 = vunpack.c.l.s8.bf16 %v980_v0  ;;  %v1311_v1 = vunpack.c.l.s8.bf16 %v982_v41 }
 0x4f5   : > { %v10219_v52 = vcombine.low %v1300_v8, %v1304_v39 }
 0x4f6   : > { %v10226_v57 = vcombine.high %v1307_v44, %v1311_v1  ;;  %v10225_v59 = vcombine.low %v1307_v44, %v1311_v1 }
 0x4f7   : > { %8584 = vmatpush1.bf16.msra.mxu0 %v10169_v48  ;;  %8748 = vmatpush1.bf16.msra.mxu1 %v10171_v49  ;;  %v10218_v48 = vcombine.high %v1299_v37, %v1303_v38  ;;  %v10220_v49 = vcombine.high %v1300_v8, %v1304_v39 }
 0x4f8   : > { %8585 = vmatprep.subr.bf16.mxu0 %v10178_v50  ;;  %8749 = vmatprep.subr.bf16.mxu1 %v10180_v51  ;;  %v984_v50 = vld [vmem:[%s11502_s14 + $0x288] sm:$0xff]  ;;  %v986_v51 = vld [vmem:[%s11502_s14 + $0x298] sm:$0xff] }
 0x4f9   : > { %v1315_v17 = vunpack.c.l.s8.bf16 %v984_v50  ;;  %v1319_v6 = vunpack.c.l.s8.bf16 %v986_v51  ;;  %v1316_v53 = vunpack.c.h.s8.bf16 %v984_v50 }
 0x4fb   : > { %8586 = vmatpush1.bf16.msra.mxu0 %v10177_v55  ;;  %8750 = vmatpush1.bf16.msra.mxu1 %v10179_v56  ;;  %v1320_v55 = vunpack.c.h.s8.bf16 %v986_v51  ;;  %v988_v56 = vld [vmem:[%s11502_s14 + $0x2a8] sm:$0xff]  ;;  %v10234_v13 = vcombine.high %v1315_v17, %v1319_v6 }
 0x4fc   : > { %8587 = vmatprep.subr.bf16.mxu0 %v10186_v62  ;;  %8751 = vmatprep.subr.bf16.mxu1 %v10188_v4  ;;  %v1324_v62 = vunpack.c.h.s8.bf16 %v988_v56  ;;  %v1328_v4 = vunpack.c.h.s8.bf16 %v990_v58 }
 0x4fd   : > { %v10236_v30 = vcombine.high %v1316_v53, %v1320_v55 }
 0x4fe   : > { %v10244_v11 = vcombine.high %v1324_v62, %v1328_v4  ;;  %v10243_v26 = vcombine.low %v1324_v62, %v1328_v4 }
 0x4ff   : > { %8588 = vmatpush1.bf16.msra.mxu0 %v10185_v63  ;;  %8752 = vmatpush1.bf16.msra.mxu1 %v10187_v18  ;;  %v992_v63 = vld [vmem:[%s11502_s14 + $0x2c8] sm:$0xff]  ;;  %v994_v18 = vld [vmem:[%s11502_s14 + $0x2d8] sm:$0xff] }
 0x500   : > { %8589 = vmatprep.subr.bf16.mxu0 %v10194_v9  ;;  %8753 = vmatprep.subr.bf16.mxu1 %v10196_v10  ;;  %v10233_v9 = vcombine.low %v1315_v17, %v1319_v6  ;;  %v10235_v10 = vcombine.low %v1316_v53, %v1320_v55  ;;  %v1331_v12 = vunpack.c.l.s8.bf16 %v992_v63  ;;  %v1335_v15 = vunpack.c.l.s8.bf16 %v994_v18 }
 0x501   : > { %v1332_v16 = vunpack.c.h.s8.bf16 %v992_v63  ;;  %v1336_v22 = vunpack.c.h.s8.bf16 %v994_v18 }
 0x502   : > { %v10250_v31 = vcombine.high %v1331_v12, %v1335_v15 }
 0x503   : > { %8590 = vmatpush1.bf16.msra.mxu0 %v10193_v23  ;;  %8754 = vmatpush1.bf16.msra.mxu1 %v10195_v24  ;;  %v996_v23 = vld [vmem:[%s11502_s14 + $0x2e8] sm:$0xff]  ;;  %v998_v24 = vld [vmem:[%s11502_s14 + $0x2f8] sm:$0xff]  ;;  %v10252_v27 = vcombine.high %v1332_v16, %v1336_v22 }
 0x504   : > { %8600 = vmatprep.subr.bf16.mxu0 %v10202_v29  ;;  %8764 = vmatprep.subr.bf16.mxu1 %v10204_v2  ;;  %v1339_v28 = vunpack.c.l.s8.bf16 %v996_v23  ;;  %v1343_v54 = vunpack.c.l.s8.bf16 %v998_v24  ;;  %v1340_v29 = vunpack.c.h.s8.bf16 %v996_v23  ;;  %v1344_v2 = vunpack.c.h.s8.bf16 %v998_v24 }
 0x506   : > { %8592 = vmatmul.mubr.bf16.vlgmr.msra.gmra.mrb[4].mxu0 %v11988_v21  ;;  %8756 = vmatmul.mubr.bf16.vlgmr.msra.gmra.mrb[4].mxu1 %v11988_v21  ;;  %v10217_v21 = vcombine.low %v1299_v37, %v1303_v38  ;;  %v10258_v37 = vcombine.high %v1339_v28, %v1343_v54  ;;  %v10260_v38 = vcombine.high %v1340_v29, %v1344_v2 }
 0x507   : > { %8601 = vmatpush1.bf16.msra.mxu0 %v10201_v33  ;;  %8765 = vmatpush1.bf16.msra.mxu1 %v10203_v34  ;;  %v1000_v33 = vld [vmem:[%s11502_s14 + $0x308] sm:$0xff]  ;;  %v1002_v34 = vld [vmem:[%s11502_s14 + $0x318] sm:$0xff]  ;;  %v10257_v44 = vcombine.low %v1339_v28, %v1343_v54  ;;  %v10259_v1 = vcombine.low %v1340_v29, %v1344_v2 }
 0x508   : > { %8602 = vmatprep.subr.bf16.mxu0 %v10210_v35  ;;  %8766 = vmatprep.subr.bf16.mxu1 %v10212_v36  ;;  %v10249_v35 = vcombine.low %v1331_v12, %v1335_v15  ;;  %v10251_v36 = vcombine.low %v1332_v16, %v1336_v22  ;;  %v1347_v8 = vunpack.c.l.s8.bf16 %v1000_v33  ;;  %v1351_v39 = vunpack.c.l.s8.bf16 %v1002_v34 }
 0x509   : > { %8632 = vmatprep.mubr.bf16.mxu0 %v11994_v32  ;;  %8796 = vmatprep.mubr.bf16.mxu1 %v11994_v32  ;;  %v1323_v32 = vunpack.c.l.s8.bf16 %v988_v56  ;;  %v1348_v0 = vunpack.c.h.s8.bf16 %v1000_v33  ;;  %v1352_v41 = vunpack.c.h.s8.bf16 %v1002_v34 }
 0x50a   : > { %v10266_v50 = vcombine.high %v1347_v8, %v1351_v39 }
 0x50b   : > { %8603 = vmatpush1.bf16.msra.mxu0 %v10209_v42  ;;  %8767 = vmatpush1.bf16.msra.mxu1 %v10211_v43  ;;  %v10242_v45 = vcombine.high %v1323_v32, %v1327_v61  ;;  %v10241_v25 = vcombine.low %v1323_v32, %v1327_v61  ;;  %v1004_v42 = vld [vmem:[%s11502_s14 + $0x328] sm:$0xff]  ;;  %v1006_v43 = vld [vmem:[%s11502_s14 + $0x338] sm:$0xff]  ;;  %v10268_v51 = vcombine.high %v1348_v0, %v1352_v41 }
 0x50c   : > { %8604 = vmatprep.subr.bf16.mxu0 %v10218_v48  ;;  %8768 = vmatprep.subr.bf16.mxu1 %v10220_v49  ;;  %v1355_v46 = vunpack.c.l.s8.bf16 %v1004_v42  ;;  %v1359_v47 = vunpack.c.l.s8.bf16 %v1006_v43  ;;  %v1356_v48 = vunpack.c.h.s8.bf16 %v1004_v42  ;;  %v1360_v49 = vunpack.c.h.s8.bf16 %v1006_v43 }
 0x50e   : > { %v10274_v17 = vcombine.high %v1355_v46, %v1359_v47  ;;  %v10276_v6 = vcombine.high %v1356_v48, %v1360_v49  ;;  %v10273_v32 = vcombine.low %v1355_v46, %v1359_v47  ;;  %v10275_v61 = vcombine.low %v1356_v48, %v1360_v49 }
 0x50f   : > { %8605 = vmatpush1.bf16.msra.mxu0 %v10217_v21  ;;  %8769 = vmatpush1.bf16.msra.mxu1 %v10219_v52  ;;  %v1008_v21 = vld [vmem:[%s11502_s14 + $0x348] sm:$0xff]  ;;  %v1010_v52 = vld [vmem:[%s11502_s14 + $0x358] sm:$0xff] }
 0x510   : > { %8606 = vmatprep.subr.bf16.mxu0 %v10226_v57  ;;  %8770 = vmatprep.subr.bf16.mxu1 %v10228_v5  ;;  %v10265_v57 = vcombine.low %v1347_v8, %v1351_v39  ;;  %v10267_v5 = vcombine.low %v1348_v0, %v1352_v41  ;;  %v1363_v53 = vunpack.c.l.s8.bf16 %v1008_v21  ;;  %v1367_v55 = vunpack.c.l.s8.bf16 %v1010_v52 }
 0x511   : > { %v1364_v56 = vunpack.c.h.s8.bf16 %v1008_v21  ;;  %v1368_v58 = vunpack.c.h.s8.bf16 %v1010_v52 }
 0x512   : > { %v10282_v63 = vcombine.high %v1363_v53, %v1367_v55 }
 0x513   : > { %8607 = vmatpush1.bf16.msra.mxu0 %v10225_v59  ;;  %8771 = vmatpush1.bf16.msra.mxu1 %v10227_v60  ;;  %v1012_v59 = vld [vmem:[%s11502_s14 + $0x368] sm:$0xff]  ;;  %v1014_v60 = vld [vmem:[%s11502_s14 + $0x378] sm:$0xff]  ;;  %v10284_v18 = vcombine.high %v1364_v56, %v1368_v58 }
 0x514   : > { %8608 = vmatprep.subr.bf16.mxu0 %v10234_v13  ;;  %8772 = vmatprep.subr.bf16.mxu1 %v10236_v30  ;;  %v1371_v62 = vunpack.c.l.s8.bf16 %v1012_v59  ;;  %v1375_v4 = vunpack.c.l.s8.bf16 %v1014_v60  ;;  %v1372_v13 = vunpack.c.h.s8.bf16 %v1012_v59  ;;  %v1376_v30 = vunpack.c.h.s8.bf16 %v1014_v60 }
 0x516   : > { %v10290_v12 = vcombine.high %v1371_v62, %v1375_v4  ;;  %v10292_v15 = vcombine.high %v1372_v13, %v1376_v30  ;;  %v10289_v28 = vcombine.low %v1371_v62, %v1375_v4  ;;  %v10291_v54 = vcombine.low %v1372_v13, %v1376_v30 }
 0x517   : > { %8609 = vmatpush1.bf16.msra.mxu0 %v10233_v9  ;;  %8773 = vmatpush1.bf16.msra.mxu1 %v10235_v10  ;;  %v1016_v9 = vld [vmem:[%s11502_s14 + $0x388] sm:$0xff]  ;;  %v1018_v10 = vld [vmem:[%s11502_s14 + $0x398] sm:$0xff] }
 0x518   : > { %8610 = vmatprep.subr.bf16.mxu0 %v10242_v45  ;;  %8774 = vmatprep.subr.bf16.mxu1 %v10244_v11  ;;  %v10281_v45 = vcombine.low %v1363_v53, %v1367_v55  ;;  %v10283_v11 = vcombine.low %v1364_v56, %v1368_v58  ;;  %v1379_v16 = vunpack.c.l.s8.bf16 %v1016_v9  ;;  %v1383_v22 = vunpack.c.l.s8.bf16 %v1018_v10 }
 0x519   : > { %v1380_v23 = vunpack.c.h.s8.bf16 %v1016_v9  ;;  %v1384_v24 = vunpack.c.h.s8.bf16 %v1018_v10 }
 0x51a   : > { %v10298_v33 = vcombine.high %v1379_v16, %v1383_v22 }
 0x51b   : > { %8611 = vmatpush1.bf16.msra.mxu0 %v10241_v25  ;;  %8775 = vmatpush1.bf16.msra.mxu1 %v10243_v26  ;;  %v1020_v25 = vld [vmem:[%s11502_s14 + $0x3a8] sm:$0xff]  ;;  %v1022_v26 = vld [vmem:[%s11502_s14 + $0x3b8] sm:$0xff]  ;;  %v10300_v34 = vcombine.high %v1380_v23, %v1384_v24 }
 0x51c   : > { %8612 = vmatprep.subr.bf16.mxu0 %v10250_v31  ;;  %8776 = vmatprep.subr.bf16.mxu1 %v10252_v27  ;;  %v1387_v29 = vunpack.c.l.s8.bf16 %v1020_v25  ;;  %v1391_v2 = vunpack.c.l.s8.bf16 %v1022_v26  ;;  %v1388_v31 = vunpack.c.h.s8.bf16 %v1020_v25  ;;  %v1392_v27 = vunpack.c.h.s8.bf16 %v1022_v26 }
 0x51e   : > { %v10306_v8 = vcombine.high %v1387_v29, %v1391_v2  ;;  %v10308_v39 = vcombine.high %v1388_v31, %v1392_v27  ;;  %v10305_v46 = vcombine.low %v1387_v29, %v1391_v2  ;;  %v10307_v47 = vcombine.low %v1388_v31, %v1392_v27 }
 0x51f   : > { %8613 = vmatpush1.bf16.msra.mxu0 %v10249_v35  ;;  %8777 = vmatpush1.bf16.msra.mxu1 %v10251_v36  ;;  %v1024_v35 = vld [vmem:[%s11502_s14 + $0x3c8] sm:$0xff]  ;;  %v1026_v36 = vld [vmem:[%s11502_s14 + $0x3d8] sm:$0xff] }
 0x520   : > { %8614 = vmatprep.subr.bf16.mxu0 %v10258_v37  ;;  %8778 = vmatprep.subr.bf16.mxu1 %v10260_v38  ;;  %v10297_v37 = vcombine.low %v1379_v16, %v1383_v22  ;;  %v10299_v38 = vcombine.low %v1380_v23, %v1384_v24  ;;  %v1395_v0 = vunpack.c.l.s8.bf16 %v1024_v35  ;;  %v1399_v41 = vunpack.c.l.s8.bf16 %v1026_v36 }
 0x521   : > { %v1396_v42 = vunpack.c.h.s8.bf16 %v1024_v35  ;;  %v1400_v43 = vunpack.c.h.s8.bf16 %v1026_v36 }
 0x522   : > { %v10314_v21 = vcombine.high %v1395_v0, %v1399_v41 }
 0x523   : > { %8615 = vmatpush1.bf16.msra.mxu0 %v10257_v44  ;;  %8779 = vmatpush1.bf16.msra.mxu1 %v10259_v1  ;;  %v1028_v44 = vld [vmem:[%s11502_s14 + $0x3e8] sm:$0xff]  ;;  %v1030_v1 = vld [vmem:[%s11502_s14 + $0x3f8] sm:$0xff]  ;;  %v10316_v52 = vcombine.high %v1396_v42, %v1400_v43 }
 0x524   : > { %8616 = vmatprep.subr.bf16.mxu0 %v10266_v50  ;;  %8780 = vmatprep.subr.bf16.mxu1 %v10268_v51  ;;  %v1403_v48 = vunpack.c.l.s8.bf16 %v1028_v44  ;;  %v1407_v49 = vunpack.c.l.s8.bf16 %v1030_v1  ;;  %v1404_v50 = vunpack.c.h.s8.bf16 %v1028_v44  ;;  %v1408_v51 = vunpack.c.h.s8.bf16 %v1030_v1  ;;  %v1052_v1 = vld [vmem:[%s11502_s14 + $0x4a8] sm:$0xff] }
 0x526   : > { %v10322_v53 = vcombine.high %v1403_v48, %v1407_v49  ;;  %v10324_v55 = vcombine.high %v1404_v50, %v1408_v51  ;;  %v10321_v62 = vcombine.low %v1403_v48, %v1407_v49  ;;  %v10323_v4 = vcombine.low %v1404_v50, %v1408_v51 }
 0x527   : > { %8617 = vmatpush1.bf16.msra.mxu0 %v10265_v57  ;;  %8781 = vmatpush1.bf16.msra.mxu1 %v10267_v5  ;;  %v1032_v57 = vld [vmem:[%s11502_s14 + $0x408] sm:$0xff]  ;;  %v1034_v5 = vld [vmem:[%s11502_s14 + $0x418] sm:$0xff]  ;;  %v1452_v50 = vunpack.c.h.s8.bf16 %v1052_v1 }
 0x528   : > { %8618 = vmatprep.subr.bf16.mxu0 %v10274_v17  ;;  %8782 = vmatprep.subr.bf16.mxu1 %v10276_v6  ;;  %v10313_v17 = vcombine.low %v1395_v0, %v1399_v41  ;;  %v10315_v6 = vcombine.low %v1396_v42, %v1400_v43  ;;  %v1411_v56 = vunpack.c.l.s8.bf16 %v1032_v57  ;;  %v1415_v58 = vunpack.c.l.s8.bf16 %v1034_v5 }
 0x529   : > { %v1412_v59 = vunpack.c.h.s8.bf16 %v1032_v57  ;;  %v1416_v60 = vunpack.c.h.s8.bf16 %v1034_v5  ;;  %v1056_v57 = vld [vmem:[%s11502_s14 + $0x4c8] sm:$0xff]  ;;  %v1058_v5 = vld [vmem:[%s11502_s14 + $0x4d8] sm:$0xff] }
 0x52a   : > { %v10330_v9 = vcombine.high %v1411_v56, %v1415_v58 }
 0x52b   : > { %8619 = vmatpush1.bf16.msra.mxu0 %v10273_v32  ;;  %8783 = vmatpush1.bf16.msra.mxu1 %v10275_v61  ;;  %v1036_v32 = vld [vmem:[%s11502_s14 + $0x428] sm:$0xff]  ;;  %v1038_v61 = vld [vmem:[%s11502_s14 + $0x438] sm:$0xff]  ;;  %v10332_v10 = vcombine.high %v1412_v59, %v1416_v60 }
 0x52c   : > { %8620 = vmatprep.subr.bf16.mxu0 %v10282_v63  ;;  %8784 = vmatprep.subr.bf16.mxu1 %v10284_v18  ;;  %v1419_v13 = vunpack.c.l.s8.bf16 %v1036_v32  ;;  %v1423_v30 = vunpack.c.l.s8.bf16 %v1038_v61  ;;  %v1420_v63 = vunpack.c.h.s8.bf16 %v1036_v32  ;;  %v1424_v18 = vunpack.c.h.s8.bf16 %v1038_v61  ;;  %v1060_v32 = vld [vmem:[%s11502_s14 + $0x4e8] sm:$0xff]  ;;  %v1062_v61 = vld [vmem:[%s11502_s14 + $0x4f8] sm:$0xff] }
 0x52e   : > { %v10338_v16 = vcombine.high %v1419_v13, %v1423_v30  ;;  %v10340_v22 = vcombine.high %v1420_v63, %v1424_v18  ;;  %v10337_v29 = vcombine.low %v1419_v13, %v1423_v30  ;;  %v10339_v2 = vcombine.low %v1420_v63, %v1424_v18 }
 0x52f   : > { %8621 = vmatpush1.bf16.msra.mxu0 %v10281_v45  ;;  %8785 = vmatpush1.bf16.msra.mxu1 %v10283_v11  ;;  %v1040_v45 = vld [vmem:[%s11502_s14 + $0x448] sm:$0xff]  ;;  %v1042_v11 = vld [vmem:[%s11502_s14 + $0x458] sm:$0xff]  ;;  %v1467_v13 = vunpack.c.l.s8.bf16 %v1060_v32  ;;  %v1471_v30 = vunpack.c.l.s8.bf16 %v1062_v61  ;;  %v1468_v63 = vunpack.c.h.s8.bf16 %v1060_v32  ;;  %v1472_v18 = vunpack.c.h.s8.bf16 %v1062_v61 }
 0x530   : > { %8622 = vmatprep.subr.bf16.mxu0 %v10290_v12  ;;  %8786 = vmatprep.subr.bf16.mxu1 %v10292_v15  ;;  %v10329_v12 = vcombine.low %v1411_v56, %v1415_v58  ;;  %v10331_v15 = vcombine.low %v1412_v59, %v1416_v60  ;;  %v1427_v23 = vunpack.c.l.s8.bf16 %v1040_v45  ;;  %v1431_v24 = vunpack.c.l.s8.bf16 %v1042_v11  ;;  %v1084_v32 = vld [vmem:[%s11502_s14 + $0x5a8] sm:$0xff]  ;;  %v1086_v61 = vld [vmem:[%s11502_s14 + $0x5b8] sm:$0xff] }
 0x531   : > { %v1428_v25 = vunpack.c.h.s8.bf16 %v1040_v45  ;;  %v1432_v26 = vunpack.c.h.s8.bf16 %v1042_v11  ;;  %v1459_v56 = vunpack.c.l.s8.bf16 %v1056_v57  ;;  %v1463_v58 = vunpack.c.l.s8.bf16 %v1058_v5  ;;  %v1064_v45 = vld [vmem:[%s11502_s14 + $0x508] sm:$0xff]  ;;  %v1066_v11 = vld [vmem:[%s11502_s14 + $0x518] sm:$0xff] }
 0x532   : > { %v10346_v35 = vcombine.high %v1427_v23, %v1431_v24  ;;  %v1460_v59 = vunpack.c.h.s8.bf16 %v1056_v57  ;;  %v1464_v60 = vunpack.c.h.s8.bf16 %v1058_v5  ;;  %v1080_v57 = vld [vmem:[%s11502_s14 + $0x588] sm:$0xff]  ;;  %v1082_v5 = vld [vmem:[%s11502_s14 + $0x598] sm:$0xff] }
 0x533   : > { %8623 = vmatpush1.bf16.msra.mxu0 %v10289_v28  ;;  %8787 = vmatpush1.bf16.msra.mxu1 %v10291_v54  ;;  %v1044_v28 = vld [vmem:[%s11502_s14 + $0x468] sm:$0xff]  ;;  %v1046_v54 = vld [vmem:[%s11502_s14 + $0x478] sm:$0xff]  ;;  %v10348_v36 = vcombine.high %v1428_v25, %v1432_v26 }
 0x534   : > { %8624 = vmatprep.subr.bf16.mxu0 %v10298_v33  ;;  %8788 = vmatprep.subr.bf16.mxu1 %v10300_v34  ;;  %v1435_v31 = vunpack.c.l.s8.bf16 %v1044_v28  ;;  %v1439_v27 = vunpack.c.l.s8.bf16 %v1046_v54  ;;  %v1436_v33 = vunpack.c.h.s8.bf16 %v1044_v28  ;;  %v1440_v34 = vunpack.c.h.s8.bf16 %v1046_v54  ;;  %v1068_v28 = vld [vmem:[%s11502_s14 + $0x528] sm:$0xff]  ;;  %v1070_v54 = vld [vmem:[%s11502_s14 + $0x538] sm:$0xff] }
 0x536   : > { %v10356_v0 = vcombine.high %v1436_v33, %v1440_v34  ;;  %v10355_v48 = vcombine.low %v1436_v33, %v1440_v34  ;;  %v1484_v33 = vunpack.c.h.s8.bf16 %v1068_v28  ;;  %v1488_v34 = vunpack.c.h.s8.bf16 %v1070_v54 }
 0x537   : > { %8625 = vmatpush1.bf16.msra.mxu0 %v10297_v37  ;;  %8789 = vmatpush1.bf16.msra.mxu1 %v10299_v38  ;;  %v1048_v37 = vld [vmem:[%s11502_s14 + $0x488] sm:$0xff]  ;;  %v1050_v38 = vld [vmem:[%s11502_s14 + $0x498] sm:$0xff] }
 0x538   : > { %8626 = vmatprep.subr.bf16.mxu0 %v10306_v8  ;;  %8790 = vmatprep.subr.bf16.mxu1 %v10308_v39  ;;  %v10347_v8 = vcombine.low %v1428_v25, %v1432_v26  ;;  %v10354_v39 = vcombine.high %v1435_v31, %v1439_v27  ;;  %v1443_v41 = vunpack.c.l.s8.bf16 %v1048_v37  ;;  %v1447_v42 = vunpack.c.l.s8.bf16 %v1050_v38 }
 0x539   : > { %v1444_v43 = vunpack.c.h.s8.bf16 %v1048_v37  ;;  %v1448_v44 = vunpack.c.h.s8.bf16 %v1050_v38  ;;  %v1476_v25 = vunpack.c.h.s8.bf16 %v1064_v45  ;;  %v1480_v26 = vunpack.c.h.s8.bf16 %v1066_v11  ;;  %v1072_v37 = vld [vmem:[%s11502_s14 + $0x548] sm:$0xff]  ;;  %v1074_v38 = vld [vmem:[%s11502_s14 + $0x558] sm:$0xff] }
 0x53b   : > { %8627 = vmatpush1.bf16.msra.mxu0 %v10305_v46  ;;  %8791 = vmatpush1.bf16.msra.mxu1 %v10307_v47  ;;  %v1054_v46 = vld [vmem:[%s11502_s14 + $0x4b8] sm:$0xff]  ;;  %v10353_v47 = vcombine.low %v1435_v31, %v1439_v27  ;;  %v1483_v31 = vunpack.c.l.s8.bf16 %v1068_v28  ;;  %v1487_v27 = vunpack.c.l.s8.bf16 %v1070_v54  ;;  %v1092_v28 = vld [vmem:[%s11502_s14 + $0x5e8] sm:$0xff] }
 0x53c   : > { %8628 = vmatprep.subr.bf16.mxu0 %v10314_v21  ;;  %8792 = vmatprep.subr.bf16.mxu1 %v10316_v52  ;;  %v1455_v49 = vunpack.c.l.s8.bf16 %v1054_v46  ;;  %v1456_v51 = vunpack.c.h.s8.bf16 %v1054_v46  ;;  %v10362_v21 = vcombine.high %v1443_v41, %v1447_v42  ;;  %v10364_v52 = vcombine.high %v1444_v43, %v1448_v44  ;;  %v1078_v46 = vld [vmem:[%s11502_s14 + $0x578] sm:$0xff] }
 0x53d   : > { %v1094_v54 = vld [vmem:[%s11502_s14 + $0x5f8] sm:$0xff] }
 0x53f   : > { %8629 = vmatpush1.bf16.msra.mxu0 %v10313_v17  ;;  %8793 = vmatpush1.bf16.msra.mxu1 %v10315_v6  ;;  %v10361_v17 = vcombine.low %v1443_v41, %v1447_v42  ;;  %v10363_v6 = vcombine.low %v1444_v43, %v1448_v44  ;;  %v1491_v41 = vunpack.c.l.s8.bf16 %v1072_v37  ;;  %v1495_v42 = vunpack.c.l.s8.bf16 %v1074_v38 }
 0x540   : > { %8630 = vmatprep.subr.bf16.mxu0 %v10322_v53  ;;  %8794 = vmatprep.subr.bf16.mxu1 %v10324_v55  ;;  %v10372_v55 = vcombine.high %v1452_v50, %v1456_v51  ;;  %v1492_v43 = vunpack.c.h.s8.bf16 %v1072_v37  ;;  %v1496_v44 = vunpack.c.h.s8.bf16 %v1074_v38  ;;  %v1096_v37 = vld [vmem:[%s11502_s14 + $0x608] sm:$0xff]  ;;  %v1098_v38 = vld [vmem:[%s11502_s14 + $0x618] sm:$0xff] }
 0x543   : > { %8631 = vmatpush1.bf16.msra.mxu0 %v10321_v62  ;;  %8795 = vmatpush1.bf16.msra.mxu1 %v10323_v4  ;;  %v10371_v4 = vcombine.low %v1452_v50, %v1456_v51  ;;  %v1504_v51 = vunpack.c.h.s8.bf16 %v1078_v46 }
 0x544   : > { %8641 = vmatprep.subr.bf16.mxu0 %v10330_v9  ;;  %8805 = vmatprep.subr.bf16.mxu1 %v10332_v10  ;;  %v10378_v9 = vcombine.high %v1459_v56, %v1463_v58  ;;  %v10380_v10 = vcombine.high %v1460_v59, %v1464_v60 }
 0x546   : > { %8633 = vmatmul.mubr.bf16.vlgmr.msra.gmra.mrb[4].mxu0 %v12039_v3  ;;  %8797 = vmatmul.mubr.bf16.vlgmr.msra.gmra.mrb[4].mxu1 %v12039_v3  ;;  %v10345_v3 = vcombine.low %v1427_v23, %v1431_v24  ;;  %v1475_v23 = vunpack.c.l.s8.bf16 %v1064_v45  ;;  %v1479_v24 = vunpack.c.l.s8.bf16 %v1066_v11  ;;  %v1088_v45 = vld [vmem:[%s11502_s14 + $0x5c8] sm:$0xff]  ;;  %v1090_v11 = vld [vmem:[%s11502_s14 + $0x5d8] sm:$0xff] }
 0x547   : > { %8642 = vmatpush1.bf16.msra.mxu0 %v10329_v12  ;;  %8806 = vmatpush1.bf16.msra.mxu1 %v10331_v15  ;;  %v10377_v12 = vcombine.low %v1459_v56, %v1463_v58  ;;  %v10379_v15 = vcombine.low %v1460_v59, %v1464_v60  ;;  %v1507_v56 = vunpack.c.l.s8.bf16 %v1080_v57  ;;  %v1511_v58 = vunpack.c.l.s8.bf16 %v1082_v5 }
 0x548   : > { %8643 = vmatprep.subr.bf16.mxu0 %v10338_v16  ;;  %8807 = vmatprep.subr.bf16.mxu1 %v10340_v22  ;;  %v10386_v16 = vcombine.high %v1467_v13, %v1471_v30  ;;  %v10388_v22 = vcombine.high %v1468_v63, %v1472_v18  ;;  %v1508_v59 = vunpack.c.h.s8.bf16 %v1080_v57  ;;  %v1512_v60 = vunpack.c.h.s8.bf16 %v1082_v5  ;;  %v1104_v57 = vld [vmem:[%s11502_s14 + $0x648] sm:$0xff]  ;;  %v1106_v5 = vld [vmem:[%s11502_s14 + $0x658] sm:$0xff] }
 0x549   : > { %8673 = vmatprep.mubr.bf16.mxu0 %v12044_v20  ;;  %8837 = vmatprep.mubr.bf16.mxu1 %v12044_v20  ;;  %v1451_v20 = vunpack.c.l.s8.bf16 %v1052_v1  ;;  %v1076_v1 = vld [vmem:[%s11502_s14 + $0x568] sm:$0xff] }
 0x54a   : > { %v1500_v50 = vunpack.c.h.s8.bf16 %v1076_v1 }
 0x54b   : > { %8644 = vmatpush1.bf16.msra.mxu0 %v10337_v29  ;;  %8808 = vmatpush1.bf16.msra.mxu1 %v10339_v2  ;;  %v10370_v53 = vcombine.high %v1451_v20, %v1455_v49  ;;  %v10369_v62 = vcombine.low %v1451_v20, %v1455_v49  ;;  %v10385_v29 = vcombine.low %v1467_v13, %v1471_v30  ;;  %v1499_v20 = vunpack.c.l.s8.bf16 %v1076_v1  ;;  %v1100_v1 = vld [vmem:[%s11502_s14 + $0x628] sm:$0xff] }
 0x54c   : > { %8645 = vmatprep.subr.bf16.mxu0 %v10346_v35  ;;  %8809 = vmatprep.subr.bf16.mxu1 %v10348_v36  ;;  %v10387_v2 = vcombine.low %v1468_v63, %v1472_v18  ;;  %v10394_v35 = vcombine.high %v1475_v23, %v1479_v24  ;;  %v10396_v36 = vcombine.high %v1476_v25, %v1480_v26  ;;  %v1503_v49 = vunpack.c.l.s8.bf16 %v1078_v46  ;;  %v1102_v46 = vld [vmem:[%s11502_s14 + $0x638] sm:$0xff] }
 0x54d   : > { %v1515_v13 = vunpack.c.l.s8.bf16 %v1084_v32  ;;  %v1519_v30 = vunpack.c.l.s8.bf16 %v1086_v61  ;;  %v1516_v63 = vunpack.c.h.s8.bf16 %v1084_v32  ;;  %v1520_v18 = vunpack.c.h.s8.bf16 %v1086_v61  ;;  %v1108_v32 = vld [vmem:[%s11502_s14 + $0x668] sm:$0xff]  ;;  %v1110_v61 = vld [vmem:[%s11502_s14 + $0x678] sm:$0xff] }
 0x54f   : > { %8646 = vmatpush1.bf16.msra.mxu0 %v10345_v3  ;;  %8810 = vmatpush1.bf16.msra.mxu1 %v10347_v8  ;;  %v10393_v3 = vcombine.low %v1475_v23, %v1479_v24  ;;  %v10395_v8 = vcombine.low %v1476_v25, %v1480_v26  ;;  %v1523_v23 = vunpack.c.l.s8.bf16 %v1088_v45  ;;  %v1527_v24 = vunpack.c.l.s8.bf16 %v1090_v11 }
 0x550   : > { %8647 = vmatprep.subr.bf16.mxu0 %v10354_v39  ;;  %8811 = vmatprep.subr.bf16.mxu1 %v10356_v0  ;;  %v10402_v39 = vcombine.high %v1483_v31, %v1487_v27  ;;  %v10404_v0 = vcombine.high %v1484_v33, %v1488_v34  ;;  %v1524_v25 = vunpack.c.h.s8.bf16 %v1088_v45  ;;  %v1528_v26 = vunpack.c.h.s8.bf16 %v1090_v11  ;;  %v1112_v45 = vld [vmem:[%s11502_s14 + $0x688] sm:$0xff]  ;;  %v1114_v11 = vld [vmem:[%s11502_s14 + $0x698] sm:$0xff] }
 0x553   : > { %8648 = vmatpush1.bf16.msra.mxu0 %v10353_v47  ;;  %8812 = vmatpush1.bf16.msra.mxu1 %v10355_v48  ;;  %v10401_v47 = vcombine.low %v1483_v31, %v1487_v27  ;;  %v10403_v48 = vcombine.low %v1484_v33, %v1488_v34  ;;  %v1531_v31 = vunpack.c.l.s8.bf16 %v1092_v28  ;;  %v1535_v27 = vunpack.c.l.s8.bf16 %v1094_v54 }
 0x554   : > { %8649 = vmatprep.subr.bf16.mxu0 %v10362_v21  ;;  %8813 = vmatprep.subr.bf16.mxu1 %v10364_v52  ;;  %v10410_v21 = vcombine.high %v1491_v41, %v1495_v42  ;;  %v10412_v52 = vcombine.high %v1492_v43, %v1496_v44  ;;  %v1532_v33 = vunpack.c.h.s8.bf16 %v1092_v28  ;;  %v1536_v34 = vunpack.c.h.s8.bf16 %v1094_v54  ;;  %v1118_v28 = vld [vmem:[%s11502_s14 + $0x6b8] sm:$0xff] }
 0x557   : > { %8650 = vmatpush1.bf16.msra.mxu0 %v10361_v17  ;;  %8814 = vmatpush1.bf16.msra.mxu1 %v10363_v6  ;;  %v10409_v17 = vcombine.low %v1491_v41, %v1495_v42  ;;  %v10411_v6 = vcombine.low %v1492_v43, %v1496_v44  ;;  %v1539_v41 = vunpack.c.l.s8.bf16 %v1096_v37  ;;  %v1543_v42 = vunpack.c.l.s8.bf16 %v1098_v38 }
 0x558   : > { %8651 = vmatprep.subr.bf16.mxu0 %v10370_v53  ;;  %8815 = vmatprep.subr.bf16.mxu1 %v10372_v55  ;;  %v10418_v53 = vcombine.high %v1499_v20, %v1503_v49  ;;  %v10420_v55 = vcombine.high %v1500_v50, %v1504_v51  ;;  %v1540_v43 = vunpack.c.h.s8.bf16 %v1096_v37  ;;  %v1544_v44 = vunpack.c.h.s8.bf16 %v1098_v38 }
 0x55b   : > { %8652 = vmatpush1.bf16.msra.mxu0 %v10369_v62  ;;  %8816 = vmatpush1.bf16.msra.mxu1 %v10371_v4  ;;  %v10417_v62 = vcombine.low %v1499_v20, %v1503_v49  ;;  %v10419_v4 = vcombine.low %v1500_v50, %v1504_v51  ;;  %v1547_v20 = vunpack.c.l.s8.bf16 %v1100_v1  ;;  %v1551_v49 = vunpack.c.l.s8.bf16 %v1102_v46 }
 0x55c   : > { %8653 = vmatprep.subr.bf16.mxu0 %v10378_v9  ;;  %8817 = vmatprep.subr.bf16.mxu1 %v10380_v10  ;;  %v10426_v9 = vcombine.high %v1507_v56, %v1511_v58  ;;  %v10428_v10 = vcombine.high %v1508_v59, %v1512_v60  ;;  %v1548_v50 = vunpack.c.h.s8.bf16 %v1100_v1  ;;  %v1552_v51 = vunpack.c.h.s8.bf16 %v1102_v46 }
 0x55f   : > { %8654 = vmatpush1.bf16.msra.mxu0 %v10377_v12  ;;  %8818 = vmatpush1.bf16.msra.mxu1 %v10379_v15  ;;  %v10425_v12 = vcombine.low %v1507_v56, %v1511_v58  ;;  %v10427_v15 = vcombine.low %v1508_v59, %v1512_v60  ;;  %v1555_v56 = vunpack.c.l.s8.bf16 %v1104_v57  ;;  %v1559_v58 = vunpack.c.l.s8.bf16 %v1106_v5 }
 0x560   : > { %8655 = vmatprep.subr.bf16.mxu0 %v10386_v16  ;;  %8819 = vmatprep.subr.bf16.mxu1 %v10388_v22  ;;  %v10434_v16 = vcombine.high %v1515_v13, %v1519_v30  ;;  %v10436_v22 = vcombine.high %v1516_v63, %v1520_v18  ;;  %v1556_v59 = vunpack.c.h.s8.bf16 %v1104_v57  ;;  %v1560_v60 = vunpack.c.h.s8.bf16 %v1106_v5  ;;  %v1128_v57 = vld [vmem:[%s11502_s14 + $0x708] sm:$0xff]  ;;  %v1130_v5 = vld [vmem:[%s11502_s14 + $0x718] sm:$0xff] }
 0x563   : > { %8656 = vmatpush1.bf16.msra.mxu0 %v10385_v29  ;;  %8820 = vmatpush1.bf16.msra.mxu1 %v10387_v2  ;;  %v10433_v29 = vcombine.low %v1515_v13, %v1519_v30  ;;  %v10435_v2 = vcombine.low %v1516_v63, %v1520_v18  ;;  %v1563_v13 = vunpack.c.l.s8.bf16 %v1108_v32  ;;  %v1567_v30 = vunpack.c.l.s8.bf16 %v1110_v61 }
 0x564   : > { %8657 = vmatprep.subr.bf16.mxu0 %v10394_v35  ;;  %8821 = vmatprep.subr.bf16.mxu1 %v10396_v36  ;;  %v10442_v35 = vcombine.high %v1523_v23, %v1527_v24  ;;  %v10444_v36 = vcombine.high %v1524_v25, %v1528_v26  ;;  %v1564_v63 = vunpack.c.h.s8.bf16 %v1108_v32  ;;  %v1568_v18 = vunpack.c.h.s8.bf16 %v1110_v61 }
 0x565   : > { %v10481_v54 = vcombine.low %v1563_v13, %v1567_v30 }
 0x567   : > { %8658 = vmatpush1.bf16.msra.mxu0 %v10393_v3  ;;  %8822 = vmatpush1.bf16.msra.mxu1 %v10395_v8  ;;  %v10441_v3 = vcombine.low %v1523_v23, %v1527_v24  ;;  %v10443_v8 = vcombine.low %v1524_v25, %v1528_v26  ;;  %v1575_v23 = vunpack.c.l.s8.bf16 %v1114_v11  ;;  %v1572_v24 = vunpack.c.h.s8.bf16 %v1112_v45  ;;  %v1116_v26 = vld [vmem:[%s11502_s14 + $0x6a8] sm:$0xff] }
 0x568   : > { %8659 = vmatprep.subr.bf16.mxu0 %v10402_v39  ;;  %8823 = vmatprep.subr.bf16.mxu1 %v10404_v0  ;;  %v10450_v39 = vcombine.high %v1531_v31, %v1535_v27  ;;  %v10452_v0 = vcombine.high %v1532_v33, %v1536_v34  ;;  %v1576_v25 = vunpack.c.h.s8.bf16 %v1114_v11 }
 0x56a   : > { %v10491_v38 = vcombine.low %v1572_v24, %v1576_v25 }
 0x56b   : > { %8660 = vmatpush1.bf16.msra.mxu0 %v10401_v47  ;;  %8824 = vmatpush1.bf16.msra.mxu1 %v10403_v48  ;;  %v10449_v47 = vcombine.low %v1531_v31, %v1535_v27  ;;  %v10451_v48 = vcombine.low %v1532_v33, %v1536_v34  ;;  %v1580_v31 = vunpack.c.h.s8.bf16 %v1116_v26  ;;  %v1584_v27 = vunpack.c.h.s8.bf16 %v1118_v28 }
 0x56c   : > { %8661 = vmatprep.subr.bf16.mxu0 %v10410_v21  ;;  %8825 = vmatprep.subr.bf16.mxu1 %v10412_v52  ;;  %v10458_v21 = vcombine.high %v1539_v41, %v1543_v42  ;;  %v10460_v52 = vcombine.high %v1540_v43, %v1544_v44  ;;  %v10492_v34 = vcombine.high %v1572_v24, %v1576_v25 }
 0x56d   : > { %v10499_v46 = vcombine.low %v1580_v31, %v1584_v27 }
 0x56f   : > { %8662 = vmatpush1.bf16.msra.mxu0 %v10409_v17  ;;  %8826 = vmatpush1.bf16.msra.mxu1 %v10411_v6  ;;  %v10457_v17 = vcombine.low %v1539_v41, %v1543_v42  ;;  %v10459_v6 = vcombine.low %v1540_v43, %v1544_v44  ;;  %v1124_v43 = vld [vmem:[%s11502_s14 + $0x6e8] sm:$0xff]  ;;  %v1126_v44 = vld [vmem:[%s11502_s14 + $0x6f8] sm:$0xff] }
 0x570   : > { %8663 = vmatprep.subr.bf16.mxu0 %v10418_v53  ;;  %8827 = vmatprep.subr.bf16.mxu1 %v10420_v55  ;;  %v10466_v53 = vcombine.high %v1547_v20, %v1551_v49  ;;  %v10468_v55 = vcombine.high %v1548_v50, %v1552_v51 }
 0x573   : > { %8664 = vmatpush1.bf16.msra.mxu0 %v10417_v62  ;;  %8828 = vmatpush1.bf16.msra.mxu1 %v10419_v4  ;;  %v10465_v62 = vcombine.low %v1547_v20, %v1551_v49  ;;  %v10467_v4 = vcombine.low %v1548_v50, %v1552_v51  ;;  %v1596_v20 = vunpack.c.h.s8.bf16 %v1124_v43  ;;  %v1600_v49 = vunpack.c.h.s8.bf16 %v1126_v44 }
 0x574   : > { %8665 = vmatprep.subr.bf16.mxu0 %v10426_v9  ;;  %8829 = vmatprep.subr.bf16.mxu1 %v10428_v10  ;;  %v10474_v9 = vcombine.high %v1555_v56, %v1559_v58  ;;  %v10476_v10 = vcombine.high %v1556_v59, %v1560_v60 }
 0x577   : > { %8666 = vmatpush1.bf16.msra.mxu0 %v10425_v12  ;;  %8830 = vmatpush1.bf16.msra.mxu1 %v10427_v15  ;;  %v10475_v12 = vcombine.low %v1556_v59, %v1560_v60  ;;  %v10482_v15 = vcombine.high %v1563_v13, %v1567_v30  ;;  %v10516_v60 = vcombine.high %v1596_v20, %v1600_v49  ;;  %v1604_v13 = vunpack.c.h.s8.bf16 %v1128_v57 }
 0x578   : > { %8667 = vmatprep.subr.bf16.mxu0 %v10434_v16  ;;  %8831 = vmatprep.subr.bf16.mxu1 %v10436_v22  ;;  %v10484_v16 = vcombine.high %v1564_v63, %v1568_v18  ;;  %v1571_v22 = vunpack.c.l.s8.bf16 %v1112_v45  ;;  %v1608_v30 = vunpack.c.h.s8.bf16 %v1130_v5 }
 0x57a   : > { %v10490_v33 = vcombine.high %v1571_v22, %v1575_v23  ;;  %v10489_v37 = vcombine.low %v1571_v22, %v1575_v23  ;;  %v1136_v22 = vld [vmem:[%s11502_s14 + $0x748] sm:$0xff]  ;;  %v1138_v23 = vld [vmem:[%s11502_s14 + $0x758] sm:$0xff]  ;;  %v10523_v25 = vcombine.low %v1604_v13, %v1608_v30 }
 0x57b   : > { %8668 = vmatpush1.bf16.msra.mxu0 %v10433_v29  ;;  %8832 = vmatpush1.bf16.msra.mxu1 %v10435_v2  ;;  %v10483_v29 = vcombine.low %v1564_v63, %v1568_v18  ;;  %v1583_v2 = vunpack.c.l.s8.bf16 %v1118_v28  ;;  %v1132_v63 = vld [vmem:[%s11502_s14 + $0x728] sm:$0xff]  ;;  %v1134_v18 = vld [vmem:[%s11502_s14 + $0x738] sm:$0xff] }
 0x57c   : > { %8669 = vmatprep.subr.bf16.mxu0 %v10442_v35  ;;  %8833 = vmatprep.subr.bf16.mxu1 %v10444_v36  ;;  %v1120_v35 = vld [vmem:[%s11502_s14 + $0x6c8] sm:$0xff]  ;;  %v1122_v36 = vld [vmem:[%s11502_s14 + $0x6d8] sm:$0xff]  ;;  %v1611_v45 = vunpack.c.l.s8.bf16 %v1132_v63  ;;  %v1615_v11 = vunpack.c.l.s8.bf16 %v1134_v18 }
 0x57d   : > { %v1588_v41 = vunpack.c.h.s8.bf16 %v1120_v35  ;;  %v1592_v42 = vunpack.c.h.s8.bf16 %v1122_v36 }
 0x57f   : > { %8670 = vmatpush1.bf16.msra.mxu0 %v10441_v3  ;;  %8834 = vmatpush1.bf16.msra.mxu1 %v10443_v8  ;;  %v10500_v8 = vcombine.high %v1580_v31, %v1584_v27  ;;  %v10508_v51 = vcombine.high %v1588_v41, %v1592_v42  ;;  %v1140_v31 = vld [vmem:[%s11502_s14 + $0x768] sm:$0xff]  ;;  %v1142_v27 = vld [vmem:[%s11502_s14 + $0x778] sm:$0xff] }
 0x580   : > { %8671 = vmatprep.subr.bf16.mxu0 %v10450_v39  ;;  %8835 = vmatprep.subr.bf16.mxu1 %v10452_v0  ;;  %v1587_v39 = vunpack.c.l.s8.bf16 %v1120_v35  ;;  %v1591_v0 = vunpack.c.l.s8.bf16 %v1122_v36  ;;  %v1627_v35 = vunpack.c.l.s8.bf16 %v1140_v31  ;;  %v1631_v36 = vunpack.c.l.s8.bf16 %v1142_v27 }
 0x582   : > { %v10506_v50 = vcombine.high %v1587_v39, %v1591_v0 }
 0x583   : > { %8672 = vmatpush1.bf16.msra.mxu0 %v10449_v47  ;;  %8836 = vmatpush1.bf16.msra.mxu1 %v10451_v48  ;;  %v1595_v47 = vunpack.c.l.s8.bf16 %v1124_v43  ;;  %v1599_v48 = vunpack.c.l.s8.bf16 %v1126_v44  ;;  %v10546_v43 = vcombine.high %v1627_v35, %v1631_v36 }
 0x584   : > { %8682 = vmatprep.subr.bf16.mxu0 %v10458_v21  ;;  %8846 = vmatprep.subr.bf16.mxu1 %v10460_v52 }
 0x585   : > { %v10514_v59 = vcombine.high %v1595_v47, %v1599_v48 }
 0x586   : > { %8674 = vmatmul.mubr.bf16.vlgmr.msra.gmra.mrb[4].mxu0 %v12082_v19  ;;  %8838 = vmatmul.mubr.bf16.vlgmr.msra.gmra.mrb[4].mxu1 %v12082_v19  ;;  %v10473_v19 = vcombine.low %v1555_v56, %v1559_v58  ;;  %v10507_v58 = vcombine.low %v1588_v41, %v1592_v42 }
 0x587   : > { %8683 = vmatpush1.bf16.msra.mxu0 %v10457_v17  ;;  %8847 = vmatpush1.bf16.msra.mxu1 %v10459_v6 }
 0x588   : > { %8684 = vmatprep.subr.bf16.mxu0 %v10466_v53  ;;  %8848 = vmatprep.subr.bf16.mxu1 %v10468_v55  ;;  %v10505_v53 = vcombine.low %v1587_v39, %v1591_v0  ;;  %v1144_v39 = vld [vmem:[%s11502_s14 + $0x788] sm:$0xff]  ;;  %v1146_v0 = vld [vmem:[%s11502_s14 + $0x798] sm:$0xff] }
 0x589   : > { %10578 = vmatprep.mubr.msk.bf16.mxu0 %vm4962_vm6, %v12088_v7  ;;  %10580 = vmatprep.mubr.msk.bf16.mxu1 %vm4962_vm6, %v12088_v7  ;;  %v1579_v7 = vunpack.c.l.s8.bf16 %v1116_v26  ;;  %v10530_v26 = vcombine.high %v1611_v45, %v1615_v11  ;;  %v1635_v44 = vunpack.c.l.s8.bf16 %v1144_v39 }
 0x58b   : > { %8685 = vmatpush1.bf16.msra.mxu0 %v10465_v62  ;;  %8849 = vmatpush1.bf16.msra.mxu1 %v10467_v4  ;;  %v10498_v3 = vcombine.high %v1579_v7, %v1583_v2  ;;  %v10497_v1 = vcombine.low %v1579_v7, %v1583_v2  ;;  %v1603_v62 = vunpack.c.l.s8.bf16 %v1128_v57  ;;  %v1607_v4 = vunpack.c.l.s8.bf16 %v1130_v5 }
 0x58c   : > { %8686 = vmatprep.subr.bf16.mxu0 %v10474_v9  ;;  %8850 = vmatprep.subr.bf16.mxu1 %v10476_v10  ;;  %v10513_v9 = vcombine.low %v1595_v47, %v1599_v48  ;;  %v10515_v10 = vcombine.low %v1596_v20, %v1600_v49  ;;  %v1620_v7 = vunpack.c.h.s8.bf16 %v1136_v22  ;;  %v1624_v2 = vunpack.c.h.s8.bf16 %v1138_v23  ;;  %v1148_v20 = vld [vmem:[%s11502_s14 + $0x7a8] sm:$0xff]  ;;  %v1150_v49 = vld [vmem:[%s11502_s14 + $0x7b8] sm:$0xff] }
 0x58d   : > { %v10521_v24 = vcombine.low %v1603_v62, %v1607_v4  ;;  %v1636_v47 = vunpack.c.h.s8.bf16 %v1144_v39  ;;  %v1640_v48 = vunpack.c.h.s8.bf16 %v1146_v0  ;;  %v10545_v57 = vcombine.low %v1627_v35, %v1631_v36 }
 0x58e   : > { %v10539_v42 = vcombine.low %v1620_v7, %v1624_v2 }
 0x58f   : > { %8687 = vmatpush1.bf16.msra.mxu0 %v10473_v19  ;;  %8851 = vmatpush1.bf16.msra.mxu1 %v10475_v12  ;;  %v1612_v19 = vunpack.c.h.s8.bf16 %v1132_v63  ;;  %v1616_v12 = vunpack.c.h.s8.bf16 %v1134_v18  ;;  %v10555_v18 = vcombine.low %v1636_v47, %v1640_v48 }
 0x590   : > { %8688 = vmatprep.subr.bf16.mxu0 %v10482_v15  ;;  %8852 = vmatprep.subr.bf16.mxu1 %v10484_v16  ;;  %v10522_v15 = vcombine.high %v1603_v62, %v1607_v4  ;;  %v10524_v16 = vcombine.high %v1604_v13, %v1608_v30  ;;  %v8895_v62 = vsub.s32 1, %v11613_v14  ;;  %v8903_v4 = vsub.s32 3, %v11613_v14  ;;  %v9002_v13 = vld [vmem:[%s12286_s28] sm:$0xff] }
 0x591   : > { %v10532_v28 = vcombine.high %v1612_v19, %v1616_v12  ;;  %v12291_v30 = vld [vmem:[%s413_s23] sm:$0xff] }
 0x593   : > { %8689 = vmatpush1.bf16.msra.mxu0 %v10481_v54  ;;  %8853 = vmatpush1.bf16.msra.mxu1 %v10483_v29  ;;  %v1619_v54 = vunpack.c.l.s8.bf16 %v1136_v22  ;;  %v1623_v29 = vunpack.c.l.s8.bf16 %v1138_v23  ;;  %v12298_v22 = vld [vmem:[%s422_s30] sm:$0xff] }
 0x594   : > { %8690 = vmatprep.subr.bf16.mxu0 %v10490_v33  ;;  %8854 = vmatprep.subr.bf16.mxu1 %v10492_v34  ;;  %v10529_v33 = vcombine.low %v1611_v45, %v1615_v11  ;;  %v10531_v34 = vcombine.low %v1612_v19, %v1616_v12  ;;  %v9007_v12 = vcombine.high %v9002_v13, %v9002_v13 }
 0x595   : > { %v10537_v41 = vcombine.low %v1619_v54, %v1623_v29  ;;  %v8954_v35 = vrot.slane %v12298_v22, %v8903_v4 }
 0x597   : > { %8691 = vmatpush1.bf16.msra.mxu0 %v10489_v37  ;;  %8855 = vmatpush1.bf16.msra.mxu1 %v10491_v38  ;;  %v10538_v37 = vcombine.high %v1619_v54, %v1623_v29  ;;  %v10540_v38 = vcombine.high %v1620_v7, %v1624_v2  ;;  %v8899_v29 = vsub.s32 2, %v11613_v14 }
 0x598   : > { %8692 = vmatprep.subr.bf16.mxu0 %v10498_v3  ;;  %8856 = vmatprep.subr.bf16.mxu1 %v10500_v8  ;;  %v1628_v3 = vunpack.c.h.s8.bf16 %v1140_v31  ;;  %v1632_v8 = vunpack.c.h.s8.bf16 %v1142_v27 }
 0x599   : > { %v12255_v21 = vpop.f32.mrb[0].mxu0  ;;  %v12257_v52 = vpop.f32.mrb[0].mxu1 }
 0x59a   : > { %v12261_v17 = vpop.f32.mrb[1].mxu0  ;;  %v12263_v6 = vpop.f32.mrb[1].mxu1  ;;  %v10547_v5 = vcombine.low %v1628_v3, %v1632_v8 }
 0x59b   : > { %v8392_v55 = vpop.f32.mrb[2].mxu0  ;;  %v8556_v56 = vpop.f32.mrb[2].mxu1  ;;  %8693 = vmatpush1.bf16.msra.mxu0 %v10497_v1  ;;  %8857 = vmatpush1.bf16.msra.mxu1 %v10499_v46  ;;  %v1639_v1 = vunpack.c.l.s8.bf16 %v1146_v0  ;;  %v10548_v46 = vcombine.high %v1628_v3, %v1632_v8  ;;  %v8900_v8 = vrot.slane %v12291_v30, %v8899_v29 }
 0x59c   : > { %v8393_v32 = vpop.f32.mrb[3].mxu0  ;;  %v8557_v61 = vpop.f32.mrb[3].mxu1  ;;  %8694 = vmatprep.subr.bf16.mxu0 %v10506_v50  ;;  %8858 = vmatprep.subr.bf16.mxu1 %v10508_v51  ;;  %v11143_v50 = vmov 1983009808   ;;  %v1643_v55 = vunpack.c.l.s8.bf16 %v1148_v20  ;;  %v1647_v56 = vunpack.c.l.s8.bf16 %v1150_v49 }
 0x59d   : > { %v9009_v51 = vunpack.c.l.s4 %v11143_v50  ;;  %v1152_v32 = vld [vmem:[%s11502_s14 + $0x7c8] sm:$0xff]  ;;  %v10553_v63 = vcombine.low %v1635_v44, %v1639_v1 }
 0x59e   : > { %v1652_v45 = vunpack.c.h.s8.bf16 %v1152_v32  ;;  %v10561_v23 = vcombine.low %v1643_v55, %v1647_v56 }
 0x59f   : > { %8695 = vmatpush1.bf16.msra.mxu0 %v10505_v53  ;;  %8859 = vmatpush1.bf16.msra.mxu1 %v10507_v58  ;;  %v10554_v53 = vcombine.high %v1635_v44, %v1639_v1  ;;  %v10556_v58 = vcombine.high %v1636_v47, %v1640_v48  ;;  %v9010_v61 = vunpack.c.0.s8 %v9009_v51 }
 0x5a0   : > { %8696 = vmatprep.subr.bf16.mxu0 %v10514_v59  ;;  %8860 = vmatprep.subr.bf16.mxu1 %v10516_v60  ;;  %v1644_v59 = vunpack.c.h.s8.bf16 %v1148_v20  ;;  %v1648_v60 = vunpack.c.h.s8.bf16 %v1150_v49  ;;  %v10571_v7 = vcombine.low %v1652_v45, %v1652_v45 }
 0x5a1   : > { %v9013_v19 = vsub.s32 %v9010_v61, %v11613_v14 }
 0x5a2   : > { %v10564_v11 = vcombine.high %v1644_v59, %v1648_v60 }
 0x5a3   : > { %8697 = vmatpush1.bf16.msra.mxu0 %v10513_v9  ;;  %8861 = vmatpush1.bf16.msra.mxu1 %v10515_v10  ;;  %v10562_v9 = vcombine.high %v1643_v55, %v1647_v56  ;;  %v1651_v10 = vunpack.c.l.s8.bf16 %v1152_v32  ;;  %v9014_v2 = vrot.slane %v9002_v13, %v9013_v19  ;;  %v9021_v31 = vrot.slane %v9007_v12, %v9013_v19 }
 0x5a4   : > { %8698 = vmatprep.subr.bf16.mxu0 %v10522_v15  ;;  %8862 = vmatprep.subr.bf16.mxu1 %v10524_v16  ;;  %v8896_v15 = vrot.slane %v12291_v30, %v8895_v62  ;;  %v8904_v16 = vrot.slane %v12291_v30, %v8903_v4  ;;  %v8919_v55 = vsub.s32 7, %v11613_v14 }
 0x5a5   : > { %v10569_v54 = vcombine.low %v1651_v10, %v1651_v10  ;;  %v9023_v3 = vcombine.high %v9021_v31, %v9021_v31 }
 0x5a6   : > { %v8930_v27 = vmul.f32 %v8896_v15, %v12261_v17 }
 0x5a7   : > { %8699 = vmatpush1.bf16.msra.mxu0 %v10521_v24  ;;  %8863 = vmatpush1.bf16.msra.mxu1 %v10523_v25  ;;  %v10563_v24 = vcombine.low %v1644_v59, %v1648_v60  ;;  %v8891_v25 = vsub.s32 0, %v11613_v14  ;;  %v8220_v36 = vsel %vm4966_vm7, %v10569_v54, 0  ;;  %v8920_v60 = vrot.slane %v12291_v30, %v8919_v55 }
 0x5a8   : > { %8700 = vmatprep.subr.bf16.mxu0 %v10530_v26  ;;  %8864 = vmatprep.subr.bf16.mxu1 %v10532_v28  ;;  %v10570_v26 = vcombine.high %v1651_v10, %v1651_v10  ;;  %v10572_v28 = vcombine.high %v1652_v45, %v1652_v45 }
 0x5a9   : > { %v8892_v17 = vrot.slane %v12291_v30, %v8891_v25  ;;  %v8942_v0 = vrot.slane %v12298_v22, %v8891_v25 }
 0x5ab   : > { %8701 = vmatpush1.bf16.msra.mxu0 %v10529_v33  ;;  %8865 = vmatpush1.bf16.msra.mxu1 %v10531_v34  ;;  %v8946_v33 = vrot.slane %v12298_v22, %v8895_v62  ;;  %v8932_v34 = vmul.f32 %v8904_v16, %v12263_v6 }
 0x5ac   : > { %8702 = vmatprep.subr.bf16.mxu0 %v10538_v37  ;;  %8866 = vmatprep.subr.bf16.mxu1 %v10540_v38  ;;  %v8226_v37 = vsel %vm4966_vm7, %v10571_v7, 0  ;;  %v9022_v38 = vcombine.high %v9014_v2, %v9014_v2 }
 0x5ad   : > { %v8980_v39 = vadd.f32 %v8946_v33, %v8930_v27  ;;  %v8982_v6 = vadd.f32 %v8954_v35, %v8932_v34 }
 0x5af   : > { %8703 = vmatpush1.bf16.msra.mxu0 %v10537_v41  ;;  %8867 = vmatpush1.bf16.msra.mxu1 %v10539_v42  ;;  %v8950_v41 = vrot.slane %v12298_v22, %v8899_v29  ;;  %v8929_v42 = vmul.f32 %v8892_v17, %v12255_v21  ;;  %v8988_v44 = vmax.f32 %v8980_v39, 0.0  ;;  %v8990_v1 = vmax.f32 %v8982_v6, 0.0  ;;  %v9003_v21 = vld [vmem:[%s12286_s28 + $0x8] sm:$0xff] }
 0x5b0   : > { %8704 = vmatprep.subr.bf16.mxu0 %v10546_v43  ;;  %8868 = vmatprep.subr.bf16.mxu1 %v10548_v46  ;;  %v8931_v43 = vmul.f32 %v8900_v8, %v12257_v52  ;;  %v9024_v49 = vcombine.high %v9003_v21, %v9003_v21  ;;  %v9031_v50 = vrot.slane %v9003_v21, %v9013_v19 }
 0x5b1   : > { %v8979_v46 = vadd.f32 %v8942_v0, %v8929_v42 }
 0x5b2   : > { %v8981_v47 = vadd.f32 %v8950_v41, %v8931_v43  ;;  %v9038_v52 = vrot.slane %v9024_v49, %v9013_v19  ;;  %v9039_v51 = vcombine.high %v9031_v50, %v9031_v50 }
 0x5b3   : > { %8705 = vmatpush1.bf16.msra.mxu0 %v10545_v57  ;;  %8869 = vmatpush1.bf16.msra.mxu1 %v10547_v5  ;;  %v8987_v48 = vmax.f32 %v8979_v46, 0.0  ;;  %v8915_v5 = vsub.s32 6, %v11613_v14 }
 0x5b4   : > { %8706 = vmatprep.subr.bf16.mxu0 %v10554_v53  ;;  %8870 = vmatprep.subr.bf16.mxu1 %v10556_v58  ;;  %v8989_v20 = vmax.f32 %v8981_v47, 0.0  ;;  %v9040_v57 = vcombine.high %v9038_v52, %v9038_v52  ;;  %v8911_v53 = vsub.s32 5, %v11613_v14 }
 0x5b5   : > { %v8916_v58 = vrot.slane %v12291_v30, %v8915_v5  ;;  %v8966_v61 = vrot.slane %v12298_v22, %v8915_v5 }
 0x5b6   : > { %v8912_v59 = vrot.slane %v12291_v30, %v8911_v53  ;;  %v8962_v13 = vrot.slane %v12298_v22, %v8911_v53 }
 0x5b7   : > { %8707 = vmatpush1.bf16.msra.mxu0 %v10553_v63  ;;  %8871 = vmatpush1.bf16.msra.mxu1 %v10555_v18  ;;  %v8970_v63 = vrot.slane %v12298_v22, %v8919_v55 }
 0x5b8   : > { %8708 = vmatprep.subr.bf16.mxu0 %v10562_v9  ;;  %8872 = vmatprep.subr.bf16.mxu1 %v10564_v11 }
 0x5bb   : > { %8709 = vmatpush1.bf16.msra.mxu0 %v10561_v23  ;;  %8873 = vmatpush1.bf16.msra.mxu1 %v10563_v24 }
 0x5bc   : > { %10577 = vmatprep.subr.msk.bf16.mxu0 %vm4966_vm7, %v10570_v26  ;;  %10579 = vmatprep.subr.msk.bf16.mxu1 %vm4966_vm7, %v10572_v28 }
 0x5bf   : > { %8711 = vmatpush1.bf16.msra.mxu0 %v8220_v36  ;;  %8875 = vmatpush1.bf16.msra.mxu1 %v8226_v37 }
 0x5c0   : > { %9049 = vmatprep.subr.mxu0 %v9022_v38  ;;  %9119 = vmatprep.subr.mxu1 %v9023_v3  ;;  %v9004_v38 = vld [vmem:[#allocation4] sm:$0x3] }
 0x5c2   : > { %8715 = vmatmul.mubr.bf16.vlgmr.msra.gmra.mrb[4].mxu0 %v12129_v40  ;;  %8879 = vmatmul.mubr.bf16.vlgmr.msra.gmra.mrb[4].mxu1 %v12129_v40  ;;  %v8907_v40 = vsub.s32 4, %v11613_v14 }
 0x5c3   : > { %9113 = vmatprep.mubr.f32.mxu0 %v8988_v44  ;;  %9183 = vmatprep.mubr.f32.mxu1 %v8990_v1 }
 0x5c4   : > { %v8908_v56 = vrot.slane %v12291_v30, %v8907_v40  ;;  %v8958_v32 = vrot.slane %v12298_v22, %v8907_v40 }
 0x5c8   : > { %9050 = vmatpush1.xpose.msra.mxu0 %v9014_v2  ;;  %9120 = vmatpush1.xpose.msra.mxu1 %v9021_v31 }
 0x5c9   : > { %9189 = vmatprep.subr.mxu0 %v9039_v51  ;;  %9259 = vmatprep.subr.mxu1 %v9040_v57 }
 0x5cb   : > { %9114 = vmatmul.mubr.f32.vlgmr.msra.gmra.mrb[8].mxu0 %v8987_v48  ;;  %9184 = vmatmul.mubr.f32.vlgmr.msra.gmra.mrb[8].mxu1 %v8989_v20 }
 0x5cc   : > { %9190 = vmatpush1.xpose.msra.mxu0 %v9031_v50  ;;  %9260 = vmatpush1.xpose.msra.mxu1 %v9038_v52 }
 0x695   : > { %v8716_v62 = vpop.f32.mrb[4].mxu0  ;;  %v8880_v4 = vpop.f32.mrb[4].mxu1 }
 0x696   : > { %v8933_v18 = vmul.f32 %v8908_v56, %v8716_v62  ;;  %v8935_v14 = vmul.f32 %v8916_v58, %v8880_v4  ;;  %v8718_v9 = vpop.f32.mrb[5].mxu0  ;;  %v8882_v10 = vpop.f32.mrb[5].mxu1 }
 0x697   : > { %v8934_v45 = vmul.f32 %v8912_v59, %v8718_v9  ;;  %v8936_v11 = vmul.f32 %v8920_v60, %v8882_v10  ;;  %v8720_v19 = vpop.f32.mrb[6].mxu0  ;;  %v8884_v12 = vpop.f32.mrb[6].mxu1 }
 0x698   : > { %v8983_v15 = vadd.f32 %v8958_v32, %v8933_v18  ;;  %v8985_v30 = vadd.f32 %v8966_v61, %v8935_v14  ;;  %v8721_v16 = vpop.f32.mrb[7].mxu0  ;;  %v8885_v23 = vpop.f32.mrb[7].mxu1 }
 0x699   : > { %v8984_v24 = vadd.f32 %v8962_v13, %v8934_v45  ;;  %v8986_v25 = vadd.f32 %v8970_v63, %v8936_v11 }
 0x69a   : > { %v8991_v54 = vmax.f32 %v8983_v15, 0.0  ;;  %v8993_v29 = vmax.f32 %v8985_v30, 0.0 }
 0x69b   : > { %v8992_v26 = vmax.f32 %v8984_v24, 0.0  ;;  %v8994_v28 = vmax.f32 %v8986_v25, 0.0 }
 0x69d   : > { %9253 = vmatprep.mubr.f32.mxu0 %v8992_v26  ;;  %9323 = vmatprep.mubr.f32.mxu1 %v8994_v28 }
 0x69e   : > { %v9115_v22 = vpop.f32.mrb[8].mxu0  ;;  %v9185_v7 = vpop.f32.mrb[8].mxu1  ;;  %9254 = vmatmul.mubr.f32.vlgmr.msra.gmra.mrb[10].mxu0 %v8991_v54  ;;  %9324 = vmatmul.mubr.f32.vlgmr.msra.gmra.mrb[10].mxu1 %v8993_v29 }
 0x69f   : > { %v9186_v2 = vadd.f32 %v9185_v7, %v9115_v22  ;;  %v9117_v31 = vpop.f32.mrb[9].mxu0  ;;  %v9187_v27 = vpop.f32.mrb[9].mxu1 }
 0x771   : > { %v9255_v33 = vpop.f32.mrb[10].mxu0  ;;  %v9325_v34 = vpop.f32.mrb[10].mxu1 }
 0x772   : > { %v9256_v35 = vadd.f32 %v9255_v33, %v9186_v2  ;;  %v9257_v36 = vpop.f32.mrb[11].mxu0  ;;  %v9327_v37 = vpop.f32.mrb[11].mxu1  ;;  %9335 = sbr.rel (%p10584_p10) target bundleno = 1921 (0x781), region = 84 }
 0x774   : > { %v9326_v3 = vadd.f32 %v9325_v34, %v9256_v35 }
 0x776   : > { %v9329_v17 = vadd.f32 %v9326_v3, %v9004_v38 }
 0x778   : > { %9331 = vst.msk [vmem:[#allocation4] sm:$0x3] %vm9330_vm8, %v9329_v17 }
 0x77f   : > { %v9336_v8 = vld [vmem:[#allocation4] sm:$0x3] }
 0x780   : > { %9337 = vst.msk [vmem:[%s11523_s22] sm:$0x3] %vm9330_vm8, %v9336_v8 }
 0x781 PF: > { %s19_s8 = sadd.s32 1, %s11126_s8   ;;  %s12433_s24 = sld [smem:[#allocation18_spill]] }
 0x782   : > { %p16_p12 = scmp.ge.s32.totalorder %s19_s8, 6   ;;  %s12434_s27 = sld [smem:[#allocation21_spill]] }
 0x783   : > { %s12435_s28 = sld [smem:[#allocation22_spill]]  ;;  %s12436_s29 = sld [smem:[#allocation24_spill]] }
 0x784   : > { %s12437_s30 = sld [smem:[#allocation25_spill]]  ;;  %s12438_s25 = smov %s11106_s26 }
 0x785   : > { %s12439_s26 = smov %s11356_s0  ;;  %18 = sbr.rel (!%p16_p12) target bundleno = 9 (0x9), region = 141 }
 0x78c   :  { %9357 = vsyncpa [#allocation6], 1 }
 0x78d   :  { %9359 = vsyncpa [#allocation6 + $0x1], 1 }
 0x78e   :  { %9360 = vsyncpa [#allocation8], 1 }

</bundles_post_ra>
